<compile_context>
chip_gen: v7x
topology: tpu7x:2x2x1
jax: 0.10.0
libtpu: 0.0.40
codegen_flags: <defaults>
</compile_context>

<pallas_src>
import functools

import jax
import jax.numpy as jnp
import numpy as np
from jax.experimental import pallas as pl
from jax.experimental.pallas import tpu as pltpu


# ----------------------------------------------------------------------------
# helpers
# ----------------------------------------------------------------------------
def _pow2_tile(n, cap):
    """Largest power-of-two divisor of n that is <= cap."""
    t = 1
    while t * 2 <= cap and n % (t * 2) == 0:
        t *= 2
    return t


# ----------------------------------------------------------------------------
# Pallas kernels
# ----------------------------------------------------------------------------
def _stats_kernel(x_ref, o_ref, acc_ref, *, n_elems):
    """Per-batch mean / unbiased std, accumulated tile-by-tile in SMEM."""
    i = pl.program_id(1)

    @pl.when(i == 0)
    def _init():
        acc_ref[0] = jnp.float32(0.0)
        acc_ref[1] = jnp.float32(0.0)

    x = x_ref[...]                                  # (rows, W) f32, lane-dense
    acc_ref[0] += jnp.sum(x)
    acc_ref[1] += jnp.sum(x * x)

    @pl.when(i == pl.num_programs(1) - 1)
    def _finalize():
        s = acc_ref[0]
        ss = acc_ref[1]
        mean = s / n_elems
        var = (ss - s * mean) / (n_elems - 1.0)     # unbiased, matches torch.std
        std = jnp.sqrt(jnp.maximum(var, 0.0))
        lane = jax.lax.broadcasted_iota(jnp.int32, (1, 1, 2), 2)
        o_ref[...] = jnp.where(lane == 0, mean, std)


def _separator_kernel(stats_ref, hlo_ref, x_ref, hhi_ref,
                      w1_ref, w2_ref, w3_ref, w4_ref,
                      b1_ref, b2_ref, b3_ref, b4_ref,
                      out_ref, *, q_total, r_tile):
    """Fused normalize -> enc1 -> enc2 -> dec1 -> dec2 -> de-normalize.

    One "row" = 16 audio samples.  Every layer is ONE wide-K matmul:
        lhs = concat([in[q-1], in[q], in[q+1]], lanes)   (bf16, single cast)
        out = lhs @ W_cat (+ bias, GELU)                 (f32 accumulation)
    The tile carries 8 halo rows per side; pltpu.roll (non-negative shifts)
    builds the +-1 row shifted operands; a validity mask restores exact
    zero-padding semantics at the sequence boundaries.
    """
    b = pl.program_id(0)
    n = r_tile + 16

    # per-batch normalization statistics: scalars straight from SMEM
    mean = stats_ref[b, 0]
    std = stats_ref[b, 1]
    inv = 1.0 / (1e-5 + std)

    # rows whose global index is outside [0, Q) must act as zeros (conv padding)
    row = jax.lax.broadcasted_iota(jnp.int32, (n, 1), 0)
    gq = row + (pl.program_id(1) * r_tile - 8)
    valid = jnp.logical_and(gq >= 0, gq < q_total)

    # assemble the tile with its 8-row halos, normalize, zero the padding rows
    x_full = jnp.concatenate([hlo_ref[...], x_ref[...], hhi_ref[...]], axis=0)
    xn = jnp.where(valid, (x_full - mean) * inv, 0.0)   # (n, 16*C) f32

    def conv3(v, w_ref, b_ref, use_gelu, use_mask):
        # shifted operands via sublane rolls on the f32 tensor (clean layout);
        # wrap-around rows are absorbed by the 8-row halo (<=4 rows corrupted).
        prev = pltpu.roll(v, shift=1, axis=0)           # v[q-1]
        nxt = pltpu.roll(v, shift=n - 1, axis=0)        # v[q+1]  (== shift -1)
        lhs = jnp.concatenate([prev, v, nxt], axis=-1).astype(jnp.bfloat16)
        acc = jnp.dot(lhs, w_ref[...], preferred_element_type=jnp.float32)
        acc = acc + b_ref[...]                          # (1, Fout) f32 bias
        if use_gelu:
            acc = jax.nn.gelu(acc, approximate=True)    # tanh GELU -> EUP
        if use_mask:
            acc = jnp.where(valid, acc, 0.0)            # zero padding for next layer
        return acc

    h1 = conv3(xn, w1_ref, b1_ref, True, True)          # (n, 4H)     encoder 1
    h2 = conv3(h1, w2_ref, b2_ref, True, True)          # (n, 2H)     encoder 2
    d1 = conv3(h2, w3_ref, b3_ref, True, True)          # (n, 4H)     decoder 1 (tconv)
    z = conv3(d1, w4_ref, b4_ref, False, False)         # (n, 16*S*C) decoder 2 (tconv)

    z = z * std + mean                                  # HDemucs de-normalization
    out_ref[...] = z[8:8 + r_tile, :]                   # drop halo rows (8-aligned)


# ----------------------------------------------------------------------------
# SourceSeparator
# ----------------------------------------------------------------------------
class SourceSeparatorPallas:
    sources = ("drums", "bass", "other", "vocals")

    def __init__(self, key, channels=2, hidden=32, kernel=8, stride=4):
        assert kernel == 8 and stride == 4, "blocked formulation assumes K=8, stride=4"
        assert channels == 2, "stereo input expected"
        assert hidden % 8 == 0
        self.C = channels
        self.S = len(self.sources)
        self.H = hidden
        self.K = kernel
        self.stride = stride

        C, H, K, S = channels, hidden, kernel, self.S
        SC = S * C
        sc = 0.1
        ks = jax.random.split(key, 8)
        # base conv weights (PyTorch layouts), synthetic deterministic init
        W1 = np.asarray(sc * jax.random.normal(ks[0], (C, K, H), jnp.float32))
        b1 = np.asarray(sc * jax.random.normal(ks[1], (H,), jnp.float32))
        W2 = np.asarray(sc * jax.random.normal(ks[2], (H, K, 2 * H), jnp.float32))
        b2 = np.asarray(sc * jax.random.normal(ks[3], (2 * H,), jnp.float32))
        Wd1 = np.asarray(sc * jax.random.normal(ks[4], (2 * H, H, K), jnp.float32))
        bd1 = np.asarray(sc * jax.random.normal(ks[5], (H,), jnp.float32))
        Wd2 = np.asarray(sc * jax.random.normal(ks[6], (H, SC, K), jnp.float32))
        bd2 = np.asarray(sc * jax.random.normal(ks[7], (SC,), jnp.float32))

        # --- enc1: Conv1d(C->H, K, s=4, pad=2) over rows of 16 samples -------
        # xb[q, j*C+c] = x[c, 16q+j]; h1[q, u*H+h] = y1[h, 4q+u]
        A1p = np.zeros((16 * C, 4 * H), np.float32)
        A1m = np.zeros_like(A1p)
        A1n = np.zeros_like(A1p)
        for u in range(4):
            for k in range(K):
                d = 4 * u + k - 2
                if d < 0:
                    tgt, j = A1p, d + 16
                elif d < 16:
                    tgt, j = A1m, d
                else:
                    tgt, j = A1n, d - 16
                tgt[j * C:(j + 1) * C, u * H:(u + 1) * H] = W1[:, k, :]

        # --- enc2: Conv1d(H->2H, K, s=4, pad=2);  h2[q, f] = y2[f, q] --------
        A2p = np.zeros((4 * H, 2 * H), np.float32)
        A2m = np.zeros_like(A2p)
        A2n = np.zeros_like(A2p)
        for k in range(K):
            d = k - 2
            if d < 0:
                tgt, u = A2p, d + 4
            elif d < 4:
                tgt, u = A2m, d
            else:
                tgt, u = A2n, d - 4
            tgt[u * H:(u + 1) * H, :] = W2[:, k, :]

        # --- dec1: ConvTranspose1d(2H->H, K, s=4) + crop (overlap-add folded) -
        # d1[q, u*H+h] = d1_time[h, 4q+u]
        A3p = np.zeros((2 * H, 4 * H), np.float32)
        A3m = np.zeros_like(A3p)
        A3n = np.zeros_like(A3p)
        for u in range(4):
            for k in ((u + 2) % 4, (u + 2) % 4 + 4):
                m = (u + 2 - k) // 4
                tgt = A3p if m == -1 else (A3m if m == 0 else A3n)
                tgt[:, u * H:(u + 1) * H] = Wd1[:, :, k]

        # --- dec2: ConvTranspose1d(H->S*C, K, s=4) + crop ---------------------
        # z[q, j*SC+o] = z_time[o, 16q+j]
        A4p = np.zeros((4 * H, 16 * SC), np.float32)
        A4m = np.zeros_like(A4p)
        A4n = np.zeros_like(A4p)
        for j in range(16):
            for k in ((j + 2) % 4, (j + 2) % 4 + 4):
                m = (j + 2 - k) // 4
                if m == -1:
                    tgt, u = A4p, 3
                elif m == 4:
                    tgt, u = A4n, 0
                else:
                    tgt, u = A4m, m
                tgt[u * H:(u + 1) * H, j * SC:(j + 1) * SC] = Wd2[:, :, k]

        def cat3(Ap, Am, An):
            # fused wide-K weights: lhs = [prev | mid | nxt]  ->  (3*Fin, Fout)
            return jnp.asarray(np.concatenate([Ap, Am, An], axis=0), jnp.bfloat16)

        # bf16 weights for the MXU, f32 biases for the VPU epilogue
        self.W1c = cat3(A1p, A1m, A1n)                                   # (96, 4H)
        self.W2c = cat3(A2p, A2m, A2n)                                   # (12H, 2H)
        self.W3c = cat3(A3p, A3m, A3n)                                   # (6H, 4H)
        self.W4c = cat3(A4p, A4m, A4n)                                   # (12H, 16*SC)
        self.B1 = jnp.asarray(np.tile(b1, 4)[None, :], jnp.float32)      # (1, 4H)
        self.B2 = jnp.asarray(b2[None, :], jnp.float32)                  # (1, 2H)
        self.B3 = jnp.asarray(np.tile(bd1, 4)[None, :], jnp.float32)     # (1, 4H)
        self.B4 = jnp.asarray(np.tile(bd2, 16)[None, :], jnp.float32)    # (1, 16*SC)

    def __call__(self, signal):
        return self.forward(signal)

    # ------------------------------------------------------------------------
    def _batch_stats(self, xb):
        """xb: (B, Q, 16*C) -> (B, 2) holding [mean, std] per batch."""
        B, Q, F = xb.shape
        if Q % 32 == 0:
            xs = xb.reshape(B, (Q * F) // 128, 128)     # lane-dense view (free reshape)
        else:
            xs = xb
        R, W = xs.shape[1], xs.shape[2]
        rows = _pow2_tile(R, 4096)                      # big streaming blocks
        stats = pl.pallas_call(
            functools.partial(_stats_kernel, n_elems=float(Q * F)),
            out_shape=jax.ShapeDtypeStruct((B, 1, 2), jnp.float32),
            grid=(B, R // rows),
            in_specs=[pl.BlockSpec((None, rows, W), lambda b, i: (b, i, 0))],
            out_specs=pl.BlockSpec((1, 1, 2), lambda b, i: (b, 0, 0)),
            scratch_shapes=[pltpu.SMEM((2,), jnp.float32)],
            compiler_params=pltpu.CompilerParams(
                dimension_semantics=("parallel", "arbitrary")),
        )(xs)
        return stats.reshape(B, 2)

    def forward(self, signal):
        """signal: (B, C, T) float32 -> (B, S, C, T) float32."""
        B, C, T = signal.shape
        assert C == self.C
        assert T % 128 == 0 and T >= 128, "T must be a multiple of 128"
        SC = self.S * C
        Q = T // 16                        # rows of 16 samples
        # big row tiles (review: 1024-2048); for B==1 keep >=2 grid cells so
        # both v7x TensorCores get work.
        cap = 2048 if B > 1 else max(8, min(1024, Q // 2))
        r_tile = _pow2_tile(Q, cap)
        nQ = Q // r_tile

        x = signal.astype(jnp.float32)
        # time-major blocked layout: xb[b, q, j*C + c] = x[b, c, 16q + j]
        xb = jnp.transpose(x, (0, 2, 1)).reshape(B, Q, 16 * C)

        # per-batch normalization stats (tiled, lane-dense Pallas reduction)
        stats = self._batch_stats(xb)                               # (B, 2)

        # tiny 8-row halo arrays (true neighbor rows; zeros at sequence ends)
        xc = xb.reshape(B, nQ, r_tile, 16 * C)
        zeros8 = jnp.zeros((B, 1, 8, 16 * C), jnp.float32)
        halo_lo = jnp.concatenate([zeros8, xc[:, :-1, -8:, :]], axis=1)
        halo_hi = jnp.concatenate([xc[:, 1:, :8, :], zeros8], axis=1)
        halo_lo = halo_lo.reshape(B, nQ * 8, 16 * C)
        halo_hi = halo_hi.reshape(B, nQ * 8, 16 * C)

        def resident(shape):
            nd = len(shape)
            return pl.BlockSpec(shape, lambda b, i, _n=nd: (0,) * _n)

        z = pl.pallas_call(
            functools.partial(_separator_kernel, q_total=Q, r_tile=r_tile),
            out_shape=jax.ShapeDtypeStruct((B, Q, 16 * SC), jnp.float32),
            grid=(B, nQ),
            in_specs=[
                pl.BlockSpec(memory_space=pltpu.MemorySpace.SMEM),        # stats (B,2)
                pl.BlockSpec((None, 8, 16 * C), lambda b, i: (b, i, 0)),  # halo lo
                pl.BlockSpec((None, r_tile, 16 * C), lambda b, i: (b, i, 0)),
                pl.BlockSpec((None, 8, 16 * C), lambda b, i: (b, i, 0)),  # halo hi
                resident(self.W1c.shape),
                resident(self.W2c.shape),
                resident(self.W3c.shape),
                resident(self.W4c.shape),
                resident(self.B1.shape),
                resident(self.B2.shape),
                resident(self.B3.shape),
                resident(self.B4.shape),
            ],
            out_specs=pl.BlockSpec((None, r_tile, 16 * SC), lambda b, i: (b, i, 0)),
            compiler_params=pltpu.CompilerParams(
                dimension_semantics=("parallel", "parallel"),
                vmem_limit_bytes=48 * 1024 * 1024),
        )(stats, halo_lo, xb, halo_hi,
          self.W1c, self.W2c, self.W3c, self.W4c,
          self.B1, self.B2, self.B3, self.B4)                       # (B, Q, 16*SC)

        # (B, Q, 16*SC) == (B, T, S*C) row-major -> one XLA transpose to NCW
        out = jnp.transpose(z.reshape(B, T, SC), (0, 2, 1))
        return out.reshape(B, self.S, C, T)

    def decompose_signal(self, signal, normalise=True):
        """signal: (C, T) -> dict of per-source (C, T) tensors."""
        # TODO(synk): torchaudio.transforms.Resample is not implemented.
        if signal.shape[0] > signal.shape[1]:
            signal = signal.T
        if normalise:
            ref = signal.mean(0)
            signal = (signal - ref.mean()) / ref.std()
        separated = self.forward(signal[None])[0]
        return dict(zip(self.sources, [separated[i] for i in range(len(self.sources))]))


# ----------------------------------------------------------------------------
if __name__ == "__main__":
    key = jax.random.PRNGKey(0)
    k_in, k_model = jax.random.split(key)

    B, C, T = 2, 2, 8192
    signal = jax.random.normal(k_in, (B, C, T), jnp.float32)

    model = SourceSeparatorPallas(k_model, channels=C, hidden=32, kernel=8, stride=4)
    fwd = jax.jit(model.forward)
    out = jax.block_until_ready(fwd(signal))

    assert out.shape == (B, len(model.sources), C, T), out.shape
    assert bool(jnp.all(jnp.isfinite(out)))
    print("KERNEL_OK")
</pallas_src>

<mosaic_0001>
module attributes {stable_mosaic.version = 11 : i64} {
  func.func @_stats_kernel(%arg0: i32, %arg1: i32, %arg2: memref<1x128x128xf32, #tpu.memory_space<vmem>>, %arg3: memref<1x1x2xf32, #tpu.memory_space<vmem>>, %arg4: memref<2xf32, #tpu.memory_space<smem>>) attributes {dimension_semantics = [#tpu.dimension_semantics<parallel>, #tpu.dimension_semantics<arbitrary>], iteration_bounds = array<i64: 2, 1>, scalar_prefetch = 0 : i64, scratch_operands = 1 : i64, tpu.core_type = #tpu.core_type<tc>, window_params = [{transform_indices = @transform_0, window_bounds = array<i64: 1, 128, 128>}, {transform_indices = @transform_1, window_bounds = array<i64: 1, 1, 2>}]} {
    %c0_i32 = arith.constant 0 : i32
    %0 = arith.cmpi eq, %arg1, %c0_i32 : i32
    %1 = arith.extui %0 : i1 to i32
    %c0_i32_0 = arith.constant 0 : i32
    %2 = arith.cmpi ne, %1, %c0_i32_0 : i32
    scf.if %2 {
      %cst_9 = arith.constant 0.000000e+00 : f32
      %c0_10 = arith.constant 0 : index
      %23 = memref.load %arg4[%c0_10] : memref<2xf32, #tpu.memory_space<smem>>
      memref.store %cst_9, %arg4[%c0_10] : memref<2xf32, #tpu.memory_space<smem>>
      %cst_11 = arith.constant 0.000000e+00 : f32
      %c1_12 = arith.constant 1 : index
      %24 = memref.load %arg4[%c1_12] : memref<2xf32, #tpu.memory_space<smem>>
      memref.store %cst_11, %arg4[%c1_12] : memref<2xf32, #tpu.memory_space<smem>>
    } else {
    }
    %c0 = arith.constant 0 : index
    %c0_1 = arith.constant 0 : index
    %c0_2 = arith.constant 0 : index
    %3 = vector.load %arg2[%c0, %c0_1, %c0_2] : memref<1x128x128xf32, #tpu.memory_space<vmem>>, vector<1x128x128xf32>
    %4 = vector.shape_cast %3 : vector<1x128x128xf32> to vector<128x128xf32>
    %c0_3 = arith.constant 0 : index
    %5 = memref.load %arg4[%c0_3] : memref<2xf32, #tpu.memory_space<smem>>
    %6 = vector.shape_cast %4 : vector<128x128xf32> to vector<1x128x128xf32>
    %cst = arith.constant dense<0.000000e+00> : vector<1xf32>
    %7 = vector.multi_reduction <add>, %6, %cst [1, 2] : vector<1x128x128xf32> to vector<1xf32>
    %8 = vector.shape_cast %7 : vector<1xf32> to vector<1x1x1xf32>
    %9 = vector.extract %8[0, 0, 0] : f32 from vector<1x1x1xf32>
    %10 = arith.addf %5, %9 : f32
    %c0_4 = arith.constant 0 : index
    %11 = memref.load %arg4[%c0_4] : memref<2xf32, #tpu.memory_space<smem>>
    memref.store %10, %arg4[%c0_4] : memref<2xf32, #tpu.memory_space<smem>>
    %c1 = arith.constant 1 : index
    %12 = memref.load %arg4[%c1] : memref<2xf32, #tpu.memory_space<smem>>
    %13 = arith.mulf %4, %4 : vector<128x128xf32>
    %14 = vector.shape_cast %13 : vector<128x128xf32> to vector<1x128x128xf32>
    %cst_5 = arith.constant dense<0.000000e+00> : vector<1xf32>
    %15 = vector.multi_reduction <add>, %14, %cst_5 [1, 2] : vector<1x128x128xf32> to vector<1xf32>
    %16 = vector.shape_cast %15 : vector<1xf32> to vector<1x1x1xf32>
    %17 = vector.extract %16[0, 0, 0] : f32 from vector<1x1x1xf32>
    %18 = arith.addf %12, %17 : f32
    %c1_6 = arith.constant 1 : index
    %19 = memref.load %arg4[%c1_6] : memref<2xf32, #tpu.memory_space<smem>>
    memref.store %18, %arg4[%c1_6] : memref<2xf32, #tpu.memory_space<smem>>
    %c0_i32_7 = arith.constant 0 : i32
    %20 = arith.cmpi eq, %arg1, %c0_i32_7 : i32
    %21 = arith.extui %20 : i1 to i32
    %c0_i32_8 = arith.constant 0 : i32
    %22 = arith.cmpi ne, %21, %c0_i32_8 : i32
    scf.if %22 {
      %c0_9 = arith.constant 0 : index
      %23 = memref.load %arg4[%c0_9] : memref<2xf32, #tpu.memory_space<smem>>
      %c1_10 = arith.constant 1 : index
      %24 = memref.load %arg4[%c1_10] : memref<2xf32, #tpu.memory_space<smem>>
      %cst_11 = arith.constant 1.638400e+04 : f32
      %25 = arith.divf %23, %cst_11 : f32
      %26 = arith.mulf %23, %25 : f32
      %27 = arith.subf %24, %26 : f32
      %cst_12 = arith.constant 1.638300e+04 : f32
      %28 = arith.divf %27, %cst_12 : f32
      %cst_13 = arith.constant 0.000000e+00 : f32
      %29 = arith.maximumf %28, %cst_13 : f32
      %30 = math.sqrt %29 : f32
      %31 = tpu.iota {dimensions = array<i32: 2>} : vector<1x1x2xi32>
      %c0_i32_14 = arith.constant 0 : i32
      %32 = vector.broadcast %c0_i32_14 : i32 to vector<1x1x2xi32>
      %33 = arith.cmpi eq, %31, %32 : vector<1x1x2xi32>
      %34 = vector.broadcast %25 : f32 to vector<1x1x2xf32>
      %35 = vector.broadcast %30 : f32 to vector<1x1x2xf32>
      %36 = arith.select %33, %34, %35 : vector<1x1x2xi1>, vector<1x1x2xf32>
      %c0_15 = arith.constant 0 : index
      %c0_16 = arith.constant 0 : index
      %c0_17 = arith.constant 0 : index
      %37 = vector.load %arg3[%c0_15, %c0_16, %c0_17] : memref<1x1x2xf32, #tpu.memory_space<vmem>>, vector<1x1x2xf32>
      tpu.vector_store %arg3[%c0_15, %c0_16, %c0_17], %36 {strides = array<i32>} : memref<1x1x2xf32, #tpu.memory_space<vmem>>, vector<1x1x2xf32>,
    } else {
    }
    return
  }
  func.func @transform_0(%arg0: i32, %arg1: i32) -> (i32, i32, i32) {
    %c0_i32 = arith.constant 0 : i32
    %c0_i32_0 = arith.constant 0 : i32
    return %arg0, %arg1, %c0_i32 : i32, i32, i32
  }
  func.func @transform_1(%arg0: i32, %arg1: i32) -> (i32, i32, i32) {
    %c0_i32 = arith.constant 0 : i32
    %c0_i32_0 = arith.constant 0 : i32
    %c0_i32_1 = arith.constant 0 : i32
    return %arg0, %c0_i32, %c0_i32_0 : i32, i32, i32
  }
}

module attributes {stable_mosaic.version = 11 : i64} {
  func.func @_separator_kernel(%arg0: i32, %arg1: i32, %arg2: memref<2x2xf32, #tpu.memory_space<smem>>, %arg3: memref<1x8x32xf32, #tpu.memory_space<vmem>>, %arg4: memref<1x512x32xf32, #tpu.memory_space<vmem>>, %arg5: memref<1x8x32xf32, #tpu.memory_space<vmem>>, %arg6: memref<96x128xbf16, #tpu.memory_space<vmem>>, %arg7: memref<384x64xbf16, #tpu.memory_space<vmem>>, %arg8: memref<192x128xbf16, #tpu.memory_space<vmem>>, %arg9: memref<384x128xbf16, #tpu.memory_space<vmem>>, %arg10: memref<1x128xf32, #tpu.memory_space<vmem>>, %arg11: memref<1x64xf32, #tpu.memory_space<vmem>>, %arg12: memref<1x128xf32, #tpu.memory_space<vmem>>, %arg13: memref<1x128xf32, #tpu.memory_space<vmem>>, %arg14: memref<1x512x128xf32, #tpu.memory_space<vmem>>) attributes {dimension_semantics = [#tpu.dimension_semantics<parallel>, #tpu.dimension_semantics<parallel>], iteration_bounds = array<i64: 2, 1>, scalar_prefetch = 0 : i64, scratch_operands = 0 : i64, tpu.core_type = #tpu.core_type<tc>, window_params = [{transform_indices = @transform_0, window_bounds = array<i64: 2, 2>}, {transform_indices = @transform_1, window_bounds = array<i64: 1, 8, 32>}, {transform_indices = @transform_2, window_bounds = array<i64: 1, 512, 32>}, {transform_indices = @transform_3, window_bounds = array<i64: 1, 8, 32>}, {pipeline_mode = #tpu.pipeline_mode<synchronous>, transform_indices = @transform_4, window_bounds = array<i64: 96, 128>}, {pipeline_mode = #tpu.pipeline_mode<synchronous>, transform_indices = @transform_5, window_bounds = array<i64: 384, 64>}, {pipeline_mode = #tpu.pipeline_mode<synchronous>, transform_indices = @transform_6, window_bounds = array<i64: 192, 128>}, {pipeline_mode = #tpu.pipeline_mode<synchronous>, transform_indices = @transform_7, window_bounds = array<i64: 384, 128>}, {pipeline_mode = #tpu.pipeline_mode<synchronous>, transform_indices = @transform_8, window_bounds = array<i64: 1, 128>}, {pipeline_mode = #tpu.pipeline_mode<synchronous>, transform_indices = @transform_9, window_bounds = array<i64: 1, 64>}, {pipeline_mode = #tpu.pipeline_mode<synchronous>, transform_indices = @transform_10, window_bounds = array<i64: 1, 128>}, {pipeline_mode = #tpu.pipeline_mode<synchronous>, transform_indices = @transform_11, window_bounds = array<i64: 1, 128>}, {transform_indices = @transform_12, window_bounds = array<i64: 1, 512, 128>}]} {
    %0 = arith.index_cast %arg0 : i32 to index
    %c0 = arith.constant 0 : index
    %1 = memref.load %arg2[%0, %c0] : memref<2x2xf32, #tpu.memory_space<smem>>
    %2 = arith.index_cast %arg0 : i32 to index
    %c1 = arith.constant 1 : index
    %3 = memref.load %arg2[%2, %c1] : memref<2x2xf32, #tpu.memory_space<smem>>
    %cst = arith.constant 9.99999974E-6 : f32
    %4 = arith.addf %cst, %3 : f32
    %cst_0 = arith.constant 1.000000e+00 : f32
    %5 = arith.divf %cst_0, %4 : f32
    %6 = tpu.iota {dimensions = array<i32: 0>} : vector<528x1xi32>
    %c512_i32 = arith.constant 512 : i32
    %7 = arith.muli %arg1, %c512_i32 : i32
    %c8_i32 = arith.constant 8 : i32
    %8 = arith.subi %7, %c8_i32 : i32
    %9 = vector.broadcast %8 : i32 to vector<528x1xi32>
    %10 = arith.addi %6, %9 : vector<528x1xi32>
    %c0_i32 = arith.constant 0 : i32
    %11 = vector.broadcast %c0_i32 : i32 to vector<528x1xi32>
    %12 = arith.cmpi sge, %10, %11 : vector<528x1xi32>
    %c512_i32_1 = arith.constant 512 : i32
    %13 = vector.broadcast %c512_i32_1 : i32 to vector<528x1xi32>
    %14 = arith.cmpi slt, %10, %13 : vector<528x1xi32>
    %15 = arith.andi %12, %14 : vector<528x1xi1>
    %c0_2 = arith.constant 0 : index
    %c0_3 = arith.constant 0 : index
    %c0_4 = arith.constant 0 : index
    %16 = vector.load %arg3[%c0_2, %c0_3, %c0_4] : memref<1x8x32xf32, #tpu.memory_space<vmem>>, vector<1x8x32xf32>
    %17 = vector.shape_cast %16 : vector<1x8x32xf32> to vector<8x32xf32>
    %c0_5 = arith.constant 0 : index
    %c0_6 = arith.constant 0 : index
    %c0_7 = arith.constant 0 : index
    %18 = vector.load %arg4[%c0_5, %c0_6, %c0_7] : memref<1x512x32xf32, #tpu.memory_space<vmem>>, vector<1x512x32xf32>
    %19 = vector.shape_cast %18 : vector<1x512x32xf32> to vector<512x32xf32>
    %c0_8 = arith.constant 0 : index
    %c0_9 = arith.constant 0 : index
    %c0_10 = arith.constant 0 : index
    %20 = vector.load %arg5[%c0_8, %c0_9, %c0_10] : memref<1x8x32xf32, #tpu.memory_space<vmem>>, vector<1x8x32xf32>
    %21 = vector.shape_cast %20 : vector<1x8x32xf32> to vector<8x32xf32>
    %22 = tpu.concatenate %17, %19, %21 in 0 : vector<8x32xf32>, vector<512x32xf32>, vector<8x32xf32> -> vector<528x32xf32>
    %23 = vector.broadcast %1 : f32 to vector<528x32xf32>
    %24 = arith.subf %22, %23 : vector<528x32xf32>
    %25 = vector.broadcast %5 : f32 to vector<528x32xf32>
    %26 = arith.mulf %24, %25 : vector<528x32xf32>
    %cst_11 = arith.constant 0.000000e+00 : f32
    %27 = vector.shape_cast %15 : vector<528x1xi1> to vector<528x1xi1>
    %28 = vector.broadcast %27 : vector<528x1xi1> to vector<528x32xi1>
    %29 = vector.broadcast %cst_11 : f32 to vector<528x32xf32>
    %30 = arith.select %28, %26, %29 : vector<528x32xi1>, vector<528x32xf32>
    %c1_i32 = arith.constant 1 : i32
    %31 = tpu.dynamic_rotate %30 by %c1_i32 dim 0 : vector<528x32xf32>, i32 -> vector<528x32xf32>
    %c527_i32 = arith.constant 527 : i32
    %32 = tpu.dynamic_rotate %30 by %c527_i32 dim 0 : vector<528x32xf32>, i32 -> vector<528x32xf32>
    %33 = tpu.concatenate %31, %30, %32 in 1 : vector<528x32xf32>, vector<528x32xf32>, vector<528x32xf32> -> vector<528x96xf32>
    %34 = arith.truncf %33 : vector<528x96xf32> to vector<528x96xbf16>
    %c0_12 = arith.constant 0 : index
    %c0_13 = arith.constant 0 : index
    %35 = vector.load %arg6[%c0_12, %c0_13] : memref<96x128xbf16, #tpu.memory_space<vmem>>, vector<96x128xbf16>
    %cst_14 = arith.constant dense<0.000000e+00> : vector<528x128xf32>
    %36 = tpu.matmul %34, %35, %cst_14 {dimension_numbers = #tpu.dot_dimension_numbers<[1], [0], [0], [1], [0, 0, 1, 1], [], []>} : vector<528x96xbf16>, vector<96x128xbf16>, vector<528x128xf32> -> vector<528x128xf32>
    %c0_15 = arith.constant 0 : index
    %c0_16 = arith.constant 0 : index
    %37 = vector.load %arg10[%c0_15, %c0_16] : memref<1x128xf32, #tpu.memory_space<vmem>>, vector<1x128xf32>
    %38 = vector.broadcast %37 : vector<1x128xf32> to vector<528x128xf32>
    %39 = arith.addf %36, %38 : vector<528x128xf32>
    %40 = arith.mulf %39, %39 : vector<528x128xf32>
    %41 = arith.mulf %39, %40 : vector<528x128xf32>
    %cst_17 = arith.constant 4.471500e-02 : f32
    %42 = vector.broadcast %cst_17 : f32 to vector<528x128xf32>
    %43 = arith.mulf %42, %41 : vector<528x128xf32>
    %44 = arith.addf %39, %43 : vector<528x128xf32>
    %cst_18 = arith.constant 0.797884583 : f32
    %45 = vector.broadcast %cst_18 : f32 to vector<528x128xf32>
    %46 = arith.mulf %45, %44 : vector<528x128xf32>
    %47 = math.tanh %46 : vector<528x128xf32>
    %cst_19 = arith.constant 1.000000e+00 : f32
    %48 = vector.broadcast %cst_19 : f32 to vector<528x128xf32>
    %49 = arith.addf %48, %47 : vector<528x128xf32>
    %cst_20 = arith.constant 5.000000e-01 : f32
    %50 = vector.broadcast %cst_20 : f32 to vector<528x128xf32>
    %51 = arith.mulf %50, %49 : vector<528x128xf32>
    %52 = arith.mulf %39, %51 : vector<528x128xf32>
    %cst_21 = arith.constant 0.000000e+00 : f32
    %53 = vector.shape_cast %15 : vector<528x1xi1> to vector<528x1xi1>
    %54 = vector.broadcast %53 : vector<528x1xi1> to vector<528x128xi1>
    %55 = vector.broadcast %cst_21 : f32 to vector<528x128xf32>
    %56 = arith.select %54, %52, %55 : vector<528x128xi1>, vector<528x128xf32>
    %c1_i32_22 = arith.constant 1 : i32
    %57 = tpu.dynamic_rotate %56 by %c1_i32_22 dim 0 : vector<528x128xf32>, i32 -> vector<528x128xf32>
    %c527_i32_23 = arith.constant 527 : i32
    %58 = tpu.dynamic_rotate %56 by %c527_i32_23 dim 0 : vector<528x128xf32>, i32 -> vector<528x128xf32>
    %59 = tpu.concatenate %57, %56, %58 in 1 : vector<528x128xf32>, vector<528x128xf32>, vector<528x128xf32> -> vector<528x384xf32>
    %60 = arith.truncf %59 : vector<528x384xf32> to vector<528x384xbf16>
    %c0_24 = arith.constant 0 : index
    %c0_25 = arith.constant 0 : index
    %61 = vector.load %arg7[%c0_24, %c0_25] : memref<384x64xbf16, #tpu.memory_space<vmem>>, vector<384x64xbf16>
    %cst_26 = arith.constant dense<0.000000e+00> : vector<528x64xf32>
    %62 = tpu.matmul %60, %61, %cst_26 {dimension_numbers = #tpu.dot_dimension_numbers<[1], [0], [0], [1], [0, 0, 1, 1], [], []>} : vector<528x384xbf16>, vector<384x64xbf16>, vector<528x64xf32> -> vector<528x64xf32>
    %c0_27 = arith.constant 0 : index
    %c0_28 = arith.constant 0 : index
    %63 = vector.load %arg11[%c0_27, %c0_28] : memref<1x64xf32, #tpu.memory_space<vmem>>, vector<1x64xf32>
    %64 = vector.broadcast %63 : vector<1x64xf32> to vector<528x64xf32>
    %65 = arith.addf %62, %64 : vector<528x64xf32>
    %66 = arith.mulf %65, %65 : vector<528x64xf32>
    %67 = arith.mulf %65, %66 : vector<528x64xf32>
    %cst_29 = arith.constant 4.471500e-02 : f32
    %68 = vector.broadcast %cst_29 : f32 to vector<528x64xf32>
    %69 = arith.mulf %68, %67 : vector<528x64xf32>
    %70 = arith.addf %65, %69 : vector<528x64xf32>
    %cst_30 = arith.constant 0.797884583 : f32
    %71 = vector.broadcast %cst_30 : f32 to vector<528x64xf32>
    %72 = arith.mulf %71, %70 : vector<528x64xf32>
    %73 = math.tanh %72 : vector<528x64xf32>
    %cst_31 = arith.constant 1.000000e+00 : f32
    %74 = vector.broadcast %cst_31 : f32 to vector<528x64xf32>
    %75 = arith.addf %74, %73 : vector<528x64xf32>
    %cst_32 = arith.constant 5.000000e-01 : f32
    %76 = vector.broadcast %cst_32 : f32 to vector<528x64xf32>
    %77 = arith.mulf %76, %75 : vector<528x64xf32>
    %78 = arith.mulf %65, %77 : vector<528x64xf32>
    %cst_33 = arith.constant 0.000000e+00 : f32
    %79 = vector.shape_cast %15 : vector<528x1xi1> to vector<528x1xi1>
    %80 = vector.broadcast %79 : vector<528x1xi1> to vector<528x64xi1>
    %81 = vector.broadcast %cst_33 : f32 to vector<528x64xf32>
    %82 = arith.select %80, %78, %81 : vector<528x64xi1>, vector<528x64xf32>
    %c1_i32_34 = arith.constant 1 : i32
    %83 = tpu.dynamic_rotate %82 by %c1_i32_34 dim 0 : vector<528x64xf32>, i32 -> vector<528x64xf32>
    %c527_i32_35 = arith.constant 527 : i32
    %84 = tpu.dynamic_rotate %82 by %c527_i32_35 dim 0 : vector<528x64xf32>, i32 -> vector<528x64xf32>
    %85 = tpu.concatenate %83, %82, %84 in 1 : vector<528x64xf32>, vector<528x64xf32>, vector<528x64xf32> -> vector<528x192xf32>
    %86 = arith.truncf %85 : vector<528x192xf32> to vector<528x192xbf16>
    %c0_36 = arith.constant 0 : index
    %c0_37 = arith.constant 0 : index
    %87 = vector.load %arg8[%c0_36, %c0_37] : memref<192x128xbf16, #tpu.memory_space<vmem>>, vector<192x128xbf16>
    %cst_38 = arith.constant dense<0.000000e+00> : vector<528x128xf32>
    %88 = tpu.matmul %86, %87, %cst_38 {dimension_numbers = #tpu.dot_dimension_numbers<[1], [0], [0], [1], [0, 0, 1, 1], [], []>} : vector<528x192xbf16>, vector<192x128xbf16>, vector<528x128xf32> -> vector<528x128xf32>
    %c0_39 = arith.constant 0 : index
    %c0_40 = arith.constant 0 : index
    %89 = vector.load %arg12[%c0_39, %c0_40] : memref<1x128xf32, #tpu.memory_space<vmem>>, vector<1x128xf32>
    %90 = vector.broadcast %89 : vector<1x128xf32> to vector<528x128xf32>
    %91 = arith.addf %88, %90 : vector<528x128xf32>
    %92 = arith.mulf %91, %91 : vector<528x128xf32>
    %93 = arith.mulf %91, %92 : vector<528x128xf32>
    %cst_41 = arith.constant 4.471500e-02 : f32
    %94 = vector.broadcast %cst_41 : f32 to vector<528x128xf32>
    %95 = arith.mulf %94, %93 : vector<528x128xf32>
    %96 = arith.addf %91, %95 : vector<528x128xf32>
    %cst_42 = arith.constant 0.797884583 : f32
    %97 = vector.broadcast %cst_42 : f32 to vector<528x128xf32>
    %98 = arith.mulf %97, %96 : vector<528x128xf32>
    %99 = math.tanh %98 : vector<528x128xf32>
    %cst_43 = arith.constant 1.000000e+00 : f32
    %100 = vector.broadcast %cst_43 : f32 to vector<528x128xf32>
    %101 = arith.addf %100, %99 : vector<528x128xf32>
    %cst_44 = arith.constant 5.000000e-01 : f32
    %102 = vector.broadcast %cst_44 : f32 to vector<528x128xf32>
    %103 = arith.mulf %102, %101 : vector<528x128xf32>
    %104 = arith.mulf %91, %103 : vector<528x128xf32>
    %cst_45 = arith.constant 0.000000e+00 : f32
    %105 = vector.shape_cast %15 : vector<528x1xi1> to vector<528x1xi1>
    %106 = vector.broadcast %105 : vector<528x1xi1> to vector<528x128xi1>
    %107 = vector.broadcast %cst_45 : f32 to vector<528x128xf32>
    %108 = arith.select %106, %104, %107 : vector<528x128xi1>, vector<528x128xf32>
    %c1_i32_46 = arith.constant 1 : i32
    %109 = tpu.dynamic_rotate %108 by %c1_i32_46 dim 0 : vector<528x128xf32>, i32 -> vector<528x128xf32>
    %c527_i32_47 = arith.constant 527 : i32
    %110 = tpu.dynamic_rotate %108 by %c527_i32_47 dim 0 : vector<528x128xf32>, i32 -> vector<528x128xf32>
    %111 = tpu.concatenate %109, %108, %110 in 1 : vector<528x128xf32>, vector<528x128xf32>, vector<528x128xf32> -> vector<528x384xf32>
    %112 = arith.truncf %111 : vector<528x384xf32> to vector<528x384xbf16>
    %c0_48 = arith.constant 0 : index
    %c0_49 = arith.constant 0 : index
    %113 = vector.load %arg9[%c0_48, %c0_49] : memref<384x128xbf16, #tpu.memory_space<vmem>>, vector<384x128xbf16>
    %cst_50 = arith.constant dense<0.000000e+00> : vector<528x128xf32>
    %114 = tpu.matmul %112, %113, %cst_50 {dimension_numbers = #tpu.dot_dimension_numbers<[1], [0], [0], [1], [0, 0, 1, 1], [], []>} : vector<528x384xbf16>, vector<384x128xbf16>, vector<528x128xf32> -> vector<528x128xf32>
    %c0_51 = arith.constant 0 : index
    %c0_52 = arith.constant 0 : index
    %115 = vector.load %arg13[%c0_51, %c0_52] : memref<1x128xf32, #tpu.memory_space<vmem>>, vector<1x128xf32>
    %116 = vector.broadcast %115 : vector<1x128xf32> to vector<528x128xf32>
    %117 = arith.addf %114, %116 : vector<528x128xf32>
    %118 = vector.broadcast %3 : f32 to vector<528x128xf32>
    %119 = arith.mulf %117, %118 : vector<528x128xf32>
    %120 = vector.broadcast %1 : f32 to vector<528x128xf32>
    %121 = arith.addf %119, %120 : vector<528x128xf32>
    %122 = vector.extract_strided_slice %121 {offsets = [8, 0], sizes = [512, 128], strides = [1, 1]} : vector<528x128xf32> to vector<512x128xf32>
    %c0_53 = arith.constant 0 : index
    %c0_54 = arith.constant 0 : index
    %c0_55 = arith.constant 0 : index
    %123 = vector.load %arg14[%c0_53, %c0_54, %c0_55] : memref<1x512x128xf32, #tpu.memory_space<vmem>>, vector<1x512x128xf32>
    %124 = vector.shape_cast %123 : vector<1x512x128xf32> to vector<512x128xf32>
    %125 = vector.shape_cast %122 : vector<512x128xf32> to vector<1x512x128xf32>
    tpu.vector_store %arg14[%c0_53, %c0_54, %c0_55], %125 {strides = array<i32>} : memref<1x512x128xf32, #tpu.memory_space<vmem>>, vector<1x512x128xf32>,
    return
  }
  func.func @transform_0(%arg0: i32, %arg1: i32) -> (i32, i32) {
    %c0_i32 = arith.constant 0 : i32
    %c0_i32_0 = arith.constant 0 : i32
    %c0_i32_1 = arith.constant 0 : i32
    return %c0_i32, %c0_i32_0 : i32, i32
  }
  func.func @transform_1(%arg0: i32, %arg1: i32) -> (i32, i32, i32) {
    %c0_i32 = arith.constant 0 : i32
    %c0_i32_0 = arith.constant 0 : i32
    return %arg0, %arg1, %c0_i32 : i32, i32, i32
  }
  func.func @transform_2(%arg0: i32, %arg1: i32) -> (i32, i32, i32) {
    %c0_i32 = arith.constant 0 : i32
    %c0_i32_0 = arith.constant 0 : i32
    return %arg0, %arg1, %c0_i32 : i32, i32, i32
  }
  func.func @transform_3(%arg0: i32, %arg1: i32) -> (i32, i32, i32) {
    %c0_i32 = arith.constant 0 : i32
    %c0_i32_0 = arith.constant 0 : i32
    return %arg0, %arg1, %c0_i32 : i32, i32, i32
  }
  func.func @transform_4(%arg0: i32, %arg1: i32) -> (i32, i32) {
    %c0_i32 = arith.constant 0 : i32
    %c0_i32_0 = arith.constant 0 : i32
    %c0_i32_1 = arith.constant 0 : i32
    return %c0_i32, %c0_i32_0 : i32, i32
  }
  func.func @transform_5(%arg0: i32, %arg1: i32) -> (i32, i32) {
    %c0_i32 = arith.constant 0 : i32
    %c0_i32_0 = arith.constant 0 : i32
    %c0_i32_1 = arith.constant 0 : i32
    return %c0_i32, %c0_i32_0 : i32, i32
  }
  func.func @transform_6(%arg0: i32, %arg1: i32) -> (i32, i32) {
    %c0_i32 = arith.constant 0 : i32
    %c0_i32_0 = arith.constant 0 : i32
    %c0_i32_1 = arith.constant 0 : i32
    return %c0_i32, %c0_i32_0 : i32, i32
  }
  func.func @transform_7(%arg0: i32, %arg1: i32) -> (i32, i32) {
    %c0_i32 = arith.constant 0 : i32
    %c0_i32_0 = arith.constant 0 : i32
    %c0_i32_1 = arith.constant 0 : i32
    return %c0_i32, %c0_i32_0 : i32, i32
  }
  func.func @transform_8(%arg0: i32, %arg1: i32) -> (i32, i32) {
    %c0_i32 = arith.constant 0 : i32
    %c0_i32_0 = arith.constant 0 : i32
    %c0_i32_1 = arith.constant 0 : i32
    return %c0_i32, %c0_i32_0 : i32, i32
  }
  func.func @transform_9(%arg0: i32, %arg1: i32) -> (i32, i32) {
    %c0_i32 = arith.constant 0 : i32
    %c0_i32_0 = arith.constant 0 : i32
    %c0_i32_1 = arith.constant 0 : i32
    return %c0_i32, %c0_i32_0 : i32, i32
  }
  func.func @transform_10(%arg0: i32, %arg1: i32) -> (i32, i32) {
    %c0_i32 = arith.constant 0 : i32
    %c0_i32_0 = arith.constant 0 : i32
    %c0_i32_1 = arith.constant 0 : i32
    return %c0_i32, %c0_i32_0 : i32, i32
  }
  func.func @transform_11(%arg0: i32, %arg1: i32) -> (i32, i32) {
    %c0_i32 = arith.constant 0 : i32
    %c0_i32_0 = arith.constant 0 : i32
    %c0_i32_1 = arith.constant 0 : i32
    return %c0_i32, %c0_i32_0 : i32, i32
  }
  func.func @transform_12(%arg0: i32, %arg1: i32) -> (i32, i32, i32) {
    %c0_i32 = arith.constant 0 : i32
    %c0_i32_0 = arith.constant 0 : i32
    return %arg0, %arg1, %c0_i32 : i32, i32, i32
  }
}

</mosaic_0001>

<bundles_post_ra>
// kernel: forward.2
= control target key start
LH: loop header
LB: loop body
LE: loop exit
PB: predicated region body
PF: predicated region fallthrough
CT: control target
= control target key end

     0   :  { %s409_s6 = smov 0   ;;  %s411_s7 = smov 0   ;;  %s464_s0 = inlined_call_operand.vmem [shape: f32[2,128,128], index: 0, kind: input, shape index: {}]   ;;  %s465_s1 = inlined_call_operand.vmem [shape: f32[2,1,2], index: 1, kind: output, shape index: {}]  }
   0x1   :  { %s413_s8 = smov 0  }
   0x2 LB: > { %s23_s9 = sadd.s32 1, %s392_s7  ;;  %p333_p0 = scmp.ge.s32.totalorder %s396_s8, 1  ;;  %s396_s8 = sphi %s413_s8, %s11_s8   ;;  %s392_s7 = sphi %s411_s7, %s467_s7   ;;  %s388_s6 = sphi %s409_s6, %s466_s6  }
   0x3   : > { %p25_p1 = scmp.ge.s32.totalorder %s23_s9, 2  ;;  %p106_p2 = scmp.lt.s32.totalorder %s396_s8, 3 }
   0x5   : > { %s469_s9 = smov (%p25_p1, %s23_s9), 0  ;;  %p107_p3 = pnand %p333_p0, %p106_p2 }
   0x6   : > { %p129_p4 = scmp.lt.s32.totalorder (!%p107_p3), %s388_s6, 1  ;;  %s398_s20 = smov (!%p107_p3), 0.0   ;;  %vm266_vm3 = vcmask (!%p107_p3), 8192  }
   0x7   : > { %110 = sbr.rel (%p107_p3) target bundleno = 330 (0x14a), region = 24 }
   0xe   : > { %s471_s6 = smov (!%p129_p4, %s388_s6), 1 }
   0xf   : > { %s340_s10 = sshll.u32 %s471_s6, 7  ;;  %s140_s24 = scalar_lea.vmem %s465_s1, %s471_s6 }
  0x10   : > { %s433_s13 = scalar_lea.vmem %s464_s0, %s340_s10 }
  0x11   : > { %v149_v0 = vld [vmem:[%s433_s13] sm:$0xff]  ;;  %v150_v1 = vld [vmem:[%s433_s13 + $0x8] sm:$0xff]  ;;  %v151_v2 = vld [vmem:[%s433_s13 + $0x10] sm:$0xff] }
  0x12   : > { %v166_v3 = vadd.f32 %v150_v1, %v149_v0  ;;  %v194_v4 = vmul.f32 %v149_v0, %v149_v0  ;;  %v195_v5 = vmul.f32 %v150_v1, %v150_v1  ;;  %v152_v6 = vld [vmem:[%s433_s13 + $0x18] sm:$0xff]  ;;  %v196_v7 = vmul.f32 %v151_v2, %v151_v2  ;;  %v153_v9 = vld [vmem:[%s433_s13 + $0x20] sm:$0xff]  ;;  %v154_v13 = vld [vmem:[%s433_s13 + $0x28] sm:$0xff] }
  0x13   : > { %v197_v10 = vmul.f32 %v152_v6, %v152_v6  ;;  %v198_v14 = vmul.f32 %v153_v9, %v153_v9  ;;  %v155_v17 = vld [vmem:[%s433_s13 + $0x30] sm:$0xff]  ;;  %v199_v18 = vmul.f32 %v154_v13, %v154_v13  ;;  %v156_v21 = vld [vmem:[%s433_s13 + $0x38] sm:$0xff]  ;;  %v157_v25 = vld [vmem:[%s433_s13 + $0x40] sm:$0xff] }
  0x14   : > { %v167_v8 = vadd.f32 %v166_v3, %v151_v2  ;;  %v210_v11 = vadd.f32 %v195_v5, %v194_v4  ;;  %v200_v22 = vmul.f32 %v155_v17, %v155_v17  ;;  %v201_v26 = vmul.f32 %v156_v21, %v156_v21  ;;  %v158_v29 = vld [vmem:[%s433_s13 + $0x48] sm:$0xff]  ;;  %v159_v33 = vld [vmem:[%s433_s13 + $0x50] sm:$0xff]  ;;  %v160_v37 = vld [vmem:[%s433_s13 + $0x58] sm:$0xff] }
  0x15   : > { %v202_v30 = vmul.f32 %v157_v25, %v157_v25  ;;  %v203_v34 = vmul.f32 %v158_v29, %v158_v29  ;;  %v204_v38 = vmul.f32 %v159_v33, %v159_v33  ;;  %v161_v41 = vld [vmem:[%s433_s13 + $0x60] sm:$0xff]  ;;  %v205_v42 = vmul.f32 %v160_v37, %v160_v37  ;;  %v162_v45 = vld [vmem:[%s433_s13 + $0x68] sm:$0xff]  ;;  %v163_v49 = vld [vmem:[%s433_s13 + $0x70] sm:$0xff] }
  0x16   : > { %v168_v12 = vadd.f32 %v167_v8, %v152_v6  ;;  %v211_v15 = vadd.f32 %v210_v11, %v196_v7  ;;  %v206_v46 = vmul.f32 %v161_v41, %v161_v41  ;;  %v207_v50 = vmul.f32 %v162_v45, %v162_v45  ;;  %v164_v53 = vld [vmem:[%s433_s13 + $0x78] sm:$0xff] }
  0x17   : > { %v208_v54 = vmul.f32 %v163_v49, %v163_v49  ;;  %v209_v57 = vmul.f32 %v164_v53, %v164_v53 }
  0x18   : > { %v169_v16 = vadd.f32 %v168_v12, %v153_v9  ;;  %v212_v19 = vadd.f32 %v211_v15, %v197_v10 }
  0x1a   : > { %v170_v20 = vadd.f32 %v169_v16, %v154_v13  ;;  %v213_v23 = vadd.f32 %v212_v19, %v198_v14 }
  0x1c   : > { %v171_v24 = vadd.f32 %v170_v20, %v155_v17  ;;  %v214_v27 = vadd.f32 %v213_v23, %v199_v18  ;;  %v260_v18 = vlaneseq }
  0x1e   : > { %v172_v28 = vadd.f32 %v171_v24, %v156_v21  ;;  %v215_v31 = vadd.f32 %v214_v27, %v200_v22  ;;  %v261_v19 = vand.u32 127, %v260_v18 }
  0x20   : > { %v173_v32 = vadd.f32 %v172_v28, %v157_v25  ;;  %v216_v35 = vadd.f32 %v215_v31, %v201_v26  ;;  %vm262_vm2 = vcmp.eq.s32.totalorder %v261_v19, 0 }
  0x22   : > { %v174_v36 = vadd.f32 %v173_v32, %v158_v29  ;;  %v217_v39 = vadd.f32 %v216_v35, %v202_v30 }
  0x24   : > { %v175_v40 = vadd.f32 %v174_v36, %v159_v33  ;;  %v218_v43 = vadd.f32 %v217_v39, %v203_v34 }
  0x26   : > { %v176_v44 = vadd.f32 %v175_v40, %v160_v37  ;;  %v219_v47 = vadd.f32 %v218_v43, %v204_v38 }
  0x28   : > { %v177_v48 = vadd.f32 %v176_v44, %v161_v41  ;;  %v220_v51 = vadd.f32 %v219_v47, %v205_v42 }
  0x2a   : > { %v178_v52 = vadd.f32 %v177_v48, %v162_v45  ;;  %v221_v55 = vadd.f32 %v220_v51, %v206_v46 }
  0x2c   : > { %v179_v56 = vadd.f32 %v178_v52, %v163_v49  ;;  %v222_v58 = vadd.f32 %v221_v55, %v207_v50 }
  0x2e   : > { %v180_v59 = vadd.f32 %v179_v56, %v164_v53  ;;  %v223_v60 = vadd.f32 %v222_v58, %v208_v54 }
  0x30   : > { %181 = vadd.xlane.f32.xlu0 %v180_v59  ;;  %v224_v61 = vadd.f32 %v223_v60, %v209_v57 }
  0x34   : > { %225 = vadd.xlane.f32.xlu0 %v224_v61 }
  0xbd   : > { %v182_v62 = vpop.xlane.xlu0 %181 }
  0xbe   : > { %v183_v63 = vrot.slane %v182_v62, 4 }
  0xc0   : > { %v184_v0 = vadd.f32 %v183_v63, %v182_v62 }
  0xc1   : > { %v226_v1 = vpop.xlane.xlu0 %225 }
  0xc2   : > { %v185_v2 = vrot.slane %v184_v0, 2  ;;  %v227_v3 = vrot.slane %v226_v1, 4 }
  0xc4   : > { %v228_v4 = vadd.f32 %v227_v3, %v226_v1  ;;  %v186_v5 = vadd.f32 %v185_v2, %v184_v0 }
  0xc6   : > { %v229_v6 = vrot.slane %v228_v4, 2  ;;  %v187_v7 = vrot.slane %v186_v5, 1 }
  0xc8   : > { %v230_v8 = vadd.f32 %v229_v6, %v228_v4  ;;  %v188_v9 = vadd.f32 %v187_v7, %v186_v5 }
  0xca   : > { %341 = vpush %v188_v9  ;;  %v231_v10 = vrot.slane %v230_v8, 1 }
  0xcc   : > { %v232_v11 = vadd.f32 %v231_v10, %v230_v8 }
  0xce   : > { %343 = vpush %v232_v11 }
  0xfb   : > { %s342_s14 = spop %341 }
  0xfc   : > { %s244_s15 = smul.f32 6.1035156e-05, %s342_s14 }
  0xfe   : > { %s245_s16 = smul.f32 %s342_s14, %s244_s15  ;;  %v263_v20 = vstv %s244_s15 }
  0xff   : > { %s344_s17 = spop %343 }
 0x100   : > { %s246_s18 = ssub.f32 %s344_s17, %s245_s16 }
 0x102   : > { %s249_s19 = smul.f32 6.103888e-05, %s246_s18 }
 0x104   : > { %s250_s21 = smax.f32 %s398_s20, %s249_s19 }
 0x105   : > { %v251_v12 = vstv %s250_s21 }
 0x106   : > { %372 = vrsqrt.f32 %v251_v12  ;;  %vm254_vm0 = vcmp.eq.f32.partialorder %v251_v12, inf  ;;  %v257_v15 = vand.u32 2147483648, %v251_v12  ;;  %vm256_vm1 = vcmp.eq.f32.partialorder %v251_v12, 0.0 }
 0x110   : > { %v373_v13 = vpop.eup %372 }
 0x111   : > { %v253_v14 = vmul.f32 %v373_v13, %v251_v12 }
 0x113   : > { %v255_v16 = vsel %vm254_vm0, %v251_v12, %v253_v14 }
 0x114   : > { %v258_v17 = vsel %vm256_vm1, %v257_v15, %v255_v16 }
 0x115   : > { %345 = vpush %v258_v17 }
 0x146   : > { %s346_s25 = spop %345 }
 0x147   : > { %v264_v21 = vstv %s346_s25 }
 0x148   : > { %v265_v22 = vsel %vm262_vm2, %v263_v20, %v264_v21 }
 0x149   : > { %267 = vst.msk [vmem:[%s140_s24] sm:$0x1] %vm266_vm3, %v265_v22 }
 0x14a PF: > { %s11_s8 = sadd.s32 1, %s396_s8   ;;  %s466_s6 = smov %s392_s7 }
 0x14b   : > { %p8_p5 = scmp.ge.s32.totalorder %s11_s8, 4   ;;  %s467_s7 = smov %s469_s9 }
 0x14d   :  { %10 = sbr.rel (!%p8_p5) target bundleno = 2 (0x2), region = 66 }

// kernel: forward.3
= control target key start
LH: loop header
LB: loop body
LE: loop exit
PB: predicated region body
PF: predicated region fallthrough
CT: control target
= control target key end

     0   :  { %17 = vsyncpa [#allocation3], 0  ;;  %s10686_s19 = smov 0   ;;  %s10688_s20 = smov 0   ;;  %s18337_s0 = inlined_call_operand.vmem [shape: f32[2,2], index: 0, kind: input, shape index: {}]   ;;  %s18338_s1 = inlined_call_operand.vmem [shape: f32[2,8,32], index: 1, kind: input, shape index: {}, may-alias: {1,3}]   ;;  %s18339_s2 = inlined_call_operand.vmem [shape: f32[2,512,32], index: 2, kind: input, shape index: {}]   ;;  %s18340_s3 = inlined_call_operand.vmem [shape: f32[2,8,32], index: 3, kind: input, shape index: {}, may-alias: {1,3}]   ;;  %s18341_s4 = inlined_call_operand.vmem [shape: bf16[96,128], index: 4, kind: input, shape index: {}]   ;;  %s18342_s5 = inlined_call_operand.vmem [shape: bf16[384,64], index: 5, kind: input, shape index: {}]   ;;  %s18343_s6 = inlined_call_operand.vmem [shape: bf16[192,128], index: 6, kind: input, shape index: {}]   ;;  %s18344_s7 = inlined_call_operand.vmem [shape: bf16[384,128], index: 7, kind: input, shape index: {}]   ;;  %s18345_s8 = inlined_call_operand.vmem [shape: f32[1,128], index: 8, kind: input, shape index: {}]   ;;  %s18346_s9 = inlined_call_operand.vmem [shape: f32[1,64], index: 9, kind: input, shape index: {}]   ;;  %s18347_s10 = inlined_call_operand.vmem [shape: f32[1,128], index: 10, kind: input, shape index: {}]   ;;  %s18348_s11 = inlined_call_operand.vmem [shape: f32[1,128], index: 11, kind: input, shape index: {}]   ;;  %s18349_s12 = inlined_call_operand.vmem [shape: f32[2,512,128], index: 12, kind: output, shape index: {}]  }
   0x1   :  { %s10690_s21 = smov 0  }
   0x2 LB: > { %s8446_s22 = sadd.s32 4294967295, %s10613_s21   ;;  %s35_s23 = sadd.s32 1, %s10609_s20  ;;  %s10613_s21 = sphi %s10690_s21, %s23_s21   ;;  %s10609_s20 = sphi %s10688_s20, %s19054_s20   ;;  %s10605_s19 = sphi %s10686_s19, %s19053_s19  }
   0x3   : > { %p37_p0 = scmp.ge.s32.totalorder %s35_s23, 2  ;;  %p8448_p1 = scmp.ge.s32.totalorder %s10613_s21, 1 }
   0x4   : > { %p341_p2 = scmp.lt.s32.totalorder %s10613_s21, 3  ;;  %p10711_p4 = scmp.eq.s32.totalorder %s8446_s22, 0 }
   0x5   : > { %s19056_s23 = smov (%p37_p0, %s35_s23), 0  ;;  %s354_s28 = sshll.u32 %s18337_s0, 4  ;;  %s355_s28 = int_to_ptr.vmem [resolvable:$true] %s354_s28 }
   0x6   : > { %p10707_p3 = pnand %p8448_p1, %p341_p2  ;;  %s10572_s29 = scalar_lea.vmem %s355_s28, 32 }
   0x7   : > { %p10573_p7 = scmp.ne.s32.totalorder %s355_s28, %s10572_s29  ;;  %p10580_p11 = scmp.lt.s32.totalorder %s355_s28, %s355_s28 }
   0x8   : > { %p9583_p5 = pneg %p10707_p3  ;;  %p10581_p12 = scmp.lt.s32.totalorder %s10572_s29, %s10572_s29 }
   0xa   : > { %p9584_p6 = pnand %p10711_p4, %p9583_p5  ;;  %p10582_p13 = por %p10581_p12, %p10580_p11 }
   0xc   : > { %p10574_p8 = pneg %p9584_p6 }
   0xe   : > { %p10575_p9 = pnand %p10574_p8, %p10573_p7 }
  0x10   : > { %p10576_p10 = pneg %p10575_p9 }
  0x12   : > { %p10583_p0 = pnand %p10582_p13, %p10576_p10 }
  0x14   : > { %10586 = shalt.err (!%p10583_p0)
}
  0x15   : > { %s10615_s1 = smov [#allocation2]   ;;  %424 = sbr.rel (%p10707_p3) target bundleno = 2131 (0x853), region = 68 }
  0x16   : > { %9586 = dma.vmem_to_smem (!%p9584_p6), %s355_s28, 32, %s10615_s1, [#allocation3]  }
  0x1c   : > { %10600 = dma.done.wait (%p10711_p4), [#allocation3], 32  }
  0x1d   : > { %10602 = vsyncadd (%p10711_p4), [#allocation3], 4294967264 }
  0x1e   : > { %430 = sfence }
  0x1f   : > { %s8459_s30 = sshll.u32 %s10605_s19, 7  ;;  %v18350_v0 = vmov 0.0   ;;  %p497_p1 = scmp.lt.s32.totalorder %s10605_s19, 1  ;;  %v10114_v3 = vld [vmem:[%s18341_s4] sm:$0xff]   ;;  %v10115_v4 = vld [vmem:[%s18341_s4 + $0x8] sm:$0xff]   ;;  %v10116_v5 = vld [vmem:[%s18341_s4 + $0x10] sm:$0xff]   ;;  %v532_v6 = vlaneseq }
  0x20   : > { %s526_s13 = sadd.s32 1, %s8459_s30  ;;  %8721 = vmatprep.subr.bf16.mxu1 %v18350_v0  ;;  %s525_s15 = sld [smem:[#allocation2 + %s8459_s30]]  ;;  %v10117_v7 = vld [vmem:[%s18341_s4 + $0x18] sm:$0xff]   ;;  %v10780_v20 = vrot.slane %v18350_v0, 1  ;;  %v10118_v25 = vld [vmem:[%s18341_s4 + $0x20] sm:$0xff]   ;;  %v10119_v49 = vld [vmem:[%s18341_s4 + $0x28] sm:$0xff]  }
  0x21   : > { %s10730_s14 = sld [smem:[#allocation2 + %s526_s13]]  ;;  %8722 = vmatpush3.bf16.msra.mxu1 %v10114_v3  ;;  %s19058_s19 = smov (!%p497_p1, %s10605_s19), 1  ;;  %v10761_v8 = vshrl.u32 %v532_v6, 7  ;;  %vm10619_vm2 = vmmov 0   ;;  %vm2058_vm3 = vcmask 261120   ;;  %vm2125_vm4 = vcmask 523264  }
  0x22   : > { %8723 = vmatprep.subr.bf16.mxu1 %v18350_v0  ;;  %s8598_s24 = sshll.u32 %s19058_s19, 9  ;;  %18494 = vst [vmem:[#allocation6_spill] sm:$0xff] %v10780_v20  ;;  %s10617_s18 = smov 32   ;;  %vm2280_vm5 = vcmask 785408  }
  0x23   : > { %s10758_s30 = scalar_lea.vmem %s18339_s2, %s8598_s24  ;;  %vm1463_vm0 = vcmp.lt.s32.totalorder %v10761_v8, 7  ;;  %s10618_s22 = smov 64   ;;  %vm1330_vm1 = vcmp.lt.s32.totalorder %v10761_v8, 1 }
  0x24   : > { %v868_v9 = vld [vmem:[%s10758_s30 + $0x8] sm:$0xff]  ;;  %v869_v10 = vld [vmem:[%s10758_s30 + $0x10] sm:$0xff]  ;;  %v867_v11 = vld [vmem:[%s10758_s30] sm:$0xff]  ;;  %s18044_s16 = scalar_lea.vmem %s18349_s12, %s8598_s24 }
  0x25   : > { %8724 = vmatpush3.bf16.msra.mxu1 %v10115_v4  ;;  %v870_v12 = vld [vmem:[%s10758_s30 + $0x18] sm:$0xff]  ;;  %v871_v13 = vld [vmem:[%s10758_s30 + $0x20] sm:$0xff]  ;;  %v872_v14 = vld [vmem:[%s10758_s30 + $0x28] sm:$0xff] }
  0x26   : > { %8725 = vmatprep.subr.bf16.mxu1 %v18350_v0  ;;  %v10769_v15 = vstv %s525_s15  ;;  %v873_v16 = vld [vmem:[%s10758_s30 + $0x30] sm:$0xff]  ;;  %v874_v17 = vld [vmem:[%s10758_s30 + $0x38] sm:$0xff]  ;;  %v10774_v18 = vld [vmem:[%s10758_s30 + $0x40] sm:$0xff] }
  0x27   : > { %s528_s3 = sadd.f32 1e-05, %s10730_s14  ;;  %18493 = vst [vmem:[#allocation5_spill] sm:$0xff] %v10769_v15  ;;  %v10777_v19 = vld [vmem:[%s10758_s30 + $0x48] sm:$0xff]  ;;  %v10783_v21 = vld [vmem:[%s10758_s30 + $0x50] sm:$0xff]  ;;  %v10786_v22 = vld [vmem:[%s10758_s30 + $0x58] sm:$0xff]  ;;  %v935_v29 = vsub.f32 %v868_v9, %v10769_v15  ;;  %v936_v30 = vsub.f32 %v869_v10, %v10769_v15  ;;  %v934_v31 = vsub.f32 %v867_v11, %v10769_v15  ;;  %v937_v32 = vsub.f32 %v870_v12, %v10769_v15 }
  0x28   : > { %v10789_v23 = vld [vmem:[%s10758_s30 + $0x60] sm:$0xff]  ;;  %v10792_v24 = vld [vmem:[%s10758_s30 + $0x68] sm:$0xff]  ;;  %v10799_v26 = vld [vmem:[%s10758_s30 + $0x70] sm:$0xff]  ;;  %v938_v33 = vsub.f32 %v871_v13, %v10769_v15  ;;  %v939_v34 = vsub.f32 %v872_v14, %v10769_v15  ;;  %v940_v35 = vsub.f32 %v873_v16, %v10769_v15  ;;  %v941_v36 = vsub.f32 %v874_v17, %v10769_v15 }
  0x29   : > { %v529_v1 = vstv %s528_s3  ;;  %8726 = vmatpush3.bf16.msra.mxu1 %v10116_v5  ;;  %v10802_v27 = vld [vmem:[%s10758_s30 + $0x78] sm:$0xff]  ;;  %v10805_v28 = vld [vmem:[%s10758_s30 + $0x80] sm:$0xff]  ;;  %v942_v37 = vsub.f32 %v10774_v18, %v10769_v15  ;;  %v943_v38 = vsub.f32 %v10777_v19, %v10769_v15  ;;  %v944_v39 = vsub.f32 %v10783_v21, %v10769_v15  ;;  %v10829_v43 = vld [vmem:[%s10758_s30 + $0x88] sm:$0xff] }
  0x2a   : > { %10180 = vrcp.f32 %v529_v1  ;;  %8727 = vmatprep.subr.bf16.mxu1 %v18350_v0  ;;  %v945_v40 = vsub.f32 %v10786_v22, %v10769_v15  ;;  %v946_v41 = vsub.f32 %v10789_v23, %v10769_v15  ;;  %v947_v42 = vsub.f32 %v10792_v24, %v10769_v15  ;;  %v10840_v48 = vld [vmem:[%s10758_s30 + $0x90] sm:$0xff]  ;;  %v10858_v54 = vld [vmem:[%s10758_s30 + $0x98] sm:$0xff]  ;;  %v10872_v59 = vld [vmem:[%s10758_s30 + $0xa0] sm:$0xff] }
  0x2b   : > { %v10884_v1 = vld [vmem:[%s10758_s30 + $0xa8] sm:$0xff]  ;;  %v10899_v11 = vld [vmem:[%s10758_s30 + $0xb0] sm:$0xff]  ;;  %v10909_v17 = vld [vmem:[%s10758_s30 + $0xb8] sm:$0xff]  ;;  %v18509_v58 = vsub.f32 %v10802_v27, %v10769_v15 }
  0x2c   : > { %v10912_v18 = vld [vmem:[%s10758_s30 + $0xc0] sm:$0xff]  ;;  %v11015_v22 = vld [vmem:[%s10758_s30 + $0x128] sm:$0xff]  ;;  %v11080_v47 = vld [vmem:[%s10758_s30 + $0x170] sm:$0xff] }
  0x2d   : > { %8728 = vmatpush3.bf16.msra.mxu1 %v10117_v7  ;;  %v11033_v16 = vld [vmem:[%s10758_s30 + $0x140] sm:$0xff]  ;;  %v11036_v10 = vld [vmem:[%s10758_s30 + $0x148] sm:$0xff] }
  0x2e   : > { %8729 = vmatprep.subr.bf16.mxu1 %v18350_v0  ;;  %v11095_v46 = vld [vmem:[%s10758_s30 + $0x180] sm:$0xff]  ;;  %v11098_v45 = vld [vmem:[%s10758_s30 + $0x188] sm:$0xff] }
  0x2f   : > { %18506 = vst [vmem:[#allocation18_spill] sm:$0xff] %v11098_v45  ;;  %v18519_v45 = vsub.f32 %v10840_v48, %v10769_v15 }
  0x31   : > { %8730 = vmatpush3.bf16.msra.mxu1 %v10118_v25  ;;  %v10915_v25 = vld [vmem:[%s10758_s30 + $0xc8] sm:$0xff] }
  0x32   : > { %8731 = vmatprep.subr.bf16.mxu1 %v18350_v0 }
  0x34   : > { %v10181_v2 = vpop.eup %10180 }
  0x35   : > { %9577 = vpush %v10181_v2  ;;  %8732 = vmatpush3.bf16.msra.mxu1 %v10119_v49 }
  0x66   : > { %s9578_s15 = spop %9577 }
  0x67   : > { %v10831_v44 = vstv %s9578_s15 }
  0x68   : > { %v10846_v50 = vmul.f32 %v10831_v44, %v935_v29  ;;  %v10849_v51 = vmul.f32 %v10831_v44, %v936_v30  ;;  %v10852_v52 = vmul.f32 %v10831_v44, %v934_v31  ;;  %v10855_v53 = vmul.f32 %v10831_v44, %v937_v32 }
  0x69   : > { %v10861_v55 = vmul.f32 %v10831_v44, %v938_v33  ;;  %v10864_v56 = vmul.f32 %v10831_v44, %v939_v34  ;;  %v10867_v57 = vmul.f32 %v10831_v44, %v940_v35  ;;  %v10879_v62 = vmul.f32 %v10831_v44, %v941_v36  ;;  %v10924_v33 = vld [vmem:[%s10758_s30 + $0xd0] sm:$0xff]  ;;  %v10927_v34 = vld [vmem:[%s10758_s30 + $0xd8] sm:$0xff]  ;;  %v10930_v35 = vld [vmem:[%s10758_s30 + $0xe0] sm:$0xff] }
  0x6a   : > { %18495 = vst [vmem:[#allocation7_spill] sm:$0xff] %v10852_v52  ;;  %18496 = vst [vmem:[#allocation8_spill] sm:$0xff] %v10855_v53  ;;  %v9629_v60 = vpack.i.bf16 %v10849_v51, %v10846_v50  ;;  %v9619_v61 = vpack.i.bf16 %v10852_v52, %v18350_v0  ;;  %v1399_v2 = vrot.slane %v10846_v50, 1  ;;  %v1400_v3 = vrot.slane %v10849_v51, 1  ;;  %v10971_v0 = vld [vmem:[%s10758_s30 + $0x100] sm:$0xff] }
  0x6b   : > { %18497 = vst [vmem:[#allocation9_spill] sm:$0xff] %v10861_v55  ;;  %18498 = vst [vmem:[#allocation10_spill] sm:$0xff] %v10864_v56  ;;  %v1401_v4 = vrot.slane %v10855_v53, 1  ;;  %v1398_v6 = vrot.slane %v10852_v52, 1  ;;  %v1402_v7 = vrot.slane %v10861_v55, 1  ;;  %v1403_v9 = vrot.slane %v10864_v56, 1 }
  0x6c   : > { %18499 = vst [vmem:[#allocation11_spill] sm:$0xff] %v10867_v57  ;;  %18500 = vst [vmem:[#allocation12_spill] sm:$0xff] %v10879_v62  ;;  %9630 = vrot.lane.b32.xlu1 %v9629_v60, %s10617_s18  ;;  %9620 = vrot.lane.b32.xlu0 %v9619_v61, %s10617_s18  ;;  %v1526_v13 = vsel %vm1463_vm0, %v1399_v2, %v1400_v3  ;;  %v1404_v14 = vrot.slane %v10867_v57, 1  ;;  %v1405_v32 = vrot.slane %v10879_v62, 1  ;;  %v11053_v61 = vld [vmem:[%s10758_s30 + $0x150] sm:$0xff] }
  0x6d   : > { %v1525_v12 = vsel %vm1463_vm0, %v1400_v3, %v1401_v4  ;;  %v1527_v30 = vsel %vm1463_vm0, %v1398_v6, %v1399_v2  ;;  %v1528_v31 = vsel %vm1463_vm0, %v10780_v20, %v1398_v6  ;;  %v1523_v49 = vsel %vm1463_vm0, %v1402_v7, %v1403_v9  ;;  %v10989_v6 = vld [vmem:[%s10758_s30 + $0x120] sm:$0xff] }
  0x6e   : > { %v9634_v29 = vpack.i.bf16 %v1525_v12, %v1526_v13  ;;  %v9624_v36 = vpack.i.bf16 %v1527_v30, %v1528_v31  ;;  %v1524_v60 = vsel %vm1463_vm0, %v1401_v4, %v1402_v7  ;;  %v10940_v2 = vmul.f32 %v10831_v44, %v942_v37  ;;  %v10949_v7 = vld [vmem:[%s10758_s30 + $0xe8] sm:$0xff]  ;;  %v10952_v12 = vld [vmem:[%s10758_s30 + $0xf0] sm:$0xff]  ;;  %v10968_v31 = vld [vmem:[%s10758_s30 + $0xf8] sm:$0xff] }
  0x6f   : > { %v10959_v37 = vmul.f32 %v10831_v44, %v943_v38  ;;  %v9644_v4 = vpack.i.bf16 %v1523_v49, %v1524_v60  ;;  %v9639_v19 = vpack.i.bf16 %v10861_v55, %v10855_v53  ;;  %v1521_v38 = vsel %vm1463_vm0, %v1404_v14, %v1405_v32  ;;  %v10983_v13 = vld [vmem:[%s10758_s30 + $0x110] sm:$0xff]  ;;  %v10986_v30 = vld [vmem:[%s10758_s30 + $0x118] sm:$0xff] }
  0x70   : > { %9635 = vrot.lane.b32.xlu1 %v9634_v29, %s10618_s22  ;;  %18501 = vst [vmem:[#allocation13_spill] sm:$0xff] %v10940_v2  ;;  %9625 = vrot.lane.b32.xlu0 %v9624_v36, %s10618_s22  ;;  %v10974_v36 = vld [vmem:[%s10758_s30 + $0x108] sm:$0xff]  ;;  %v1522_v29 = vsel %vm1463_vm0, %v1403_v9, %v1404_v14  ;;  %v1406_v3 = vrot.slane %v10940_v2, 1  ;;  %v10997_v60 = vmul.f32 %v10831_v44, %v944_v39  ;;  %v11030_v14 = vld [vmem:[%s10758_s30 + $0x138] sm:$0xff] }
  0x71   : > { %18502 = vst [vmem:[#allocation14_spill] sm:$0xff] %v10959_v37  ;;  %v1407_v49 = vrot.slane %v10959_v37, 1  ;;  %v11003_v9 = vmul.f32 %v10831_v44, %v945_v40  ;;  %v11018_v40 = vld [vmem:[%s10758_s30 + $0x130] sm:$0xff]  ;;  %v9654_v5 = vpack.i.bf16 %v1521_v38, %v1522_v29  ;;  %v11044_v21 = vmul.f32 %v10831_v44, %v946_v41  ;;  %v11056_v29 = vld [vmem:[%s10758_s30 + $0x158] sm:$0xff]  ;;  %v11059_v38 = vld [vmem:[%s10758_s30 + $0x160] sm:$0xff] }
  0x72   : > { %18503 = vst [vmem:[#allocation15_spill] sm:$0xff] %v10997_v60  ;;  %v11050_v39 = vmul.f32 %v10831_v44, %v947_v42  ;;  %v1520_v23 = vsel %vm1463_vm0, %v1405_v32, %v1406_v3  ;;  %v1408_v41 = vrot.slane %v10997_v60, 1  ;;  %v11092_v42 = vld [vmem:[%s10758_s30 + $0x178] sm:$0xff]  ;;  %v11112_v32 = vmul.f32 %v10831_v44, %v18509_v58  ;;  %v11151_v55 = vld [vmem:[%s10758_s30 + $0x1b0] sm:$0xff] }
  0x73   : > { %18504 = vst [vmem:[#allocation16_spill] sm:$0xff] %v11003_v9  ;;  %18505 = vst [vmem:[#allocation17_spill] sm:$0xff] %v11044_v21  ;;  %v1409_v24 = vrot.slane %v11003_v9, 1  ;;  %v1410_v27 = vrot.slane %v11044_v21, 1  ;;  %v11154_v53 = vld [vmem:[%s10758_s30 + $0x1b8] sm:$0xff] }
  0x74   : > { %9645 = vrot.lane.b32.xlu1 %v9644_v4, %s10618_s22  ;;  %9640 = vrot.lane.b32.xlu0 %v9639_v19, %s10617_s18  ;;  %v9649_v19 = vpack.i.bf16 %v10867_v57, %v10864_v56  ;;  %v1519_v4 = vsel %vm1463_vm0, %v1406_v3, %v1407_v49  ;;  %v11077_v3 = vld [vmem:[%s10758_s30 + $0x168] sm:$0xff]  ;;  %v11115_v57 = vld [vmem:[%s10758_s30 + $0x190] sm:$0xff]  ;;  %v1411_v58 = vrot.slane %v11050_v39, 1 }
  0x75   : > { %v9664_v20 = vpack.i.bf16 %v1519_v4, %v1520_v23  ;;  %18510 = vst [vmem:[#allocation20_spill] sm:$0xff] %v11115_v57  ;;  %v11118_v56 = vld [vmem:[%s10758_s30 + $0x198] sm:$0xff]  ;;  %v11121_v4 = vld [vmem:[%s10758_s30 + $0x1a0] sm:$0xff]  ;;  %v1518_v23 = vsel %vm1463_vm0, %v1407_v49, %v1408_v41 }
  0x76   : > { %18511 = vst [vmem:[#allocation21_spill] sm:$0xff] %v11118_v56  ;;  %18512 = vst [vmem:[#allocation22_spill] sm:$0xff] %v11121_v4  ;;  %v11161_v57 = vld [vmem:[%s10758_s30 + $0x1c0] sm:$0xff]  ;;  %v11167_v56 = vld [vmem:[%s10758_s30 + $0x1d0] sm:$0xff] }
  0x77   : > { %18513 = vst [vmem:[#allocation23_spill] sm:$0xff] %v11161_v57  ;;  %18515 = vst [vmem:[#allocation25_spill] sm:$0xff] %v11167_v56 }
  0x78   : > { %9655 = vrot.lane.b32.xlu1 %v9654_v5, %s10618_s22  ;;  %9650 = vrot.lane.b32.xlu0 %v9649_v19, %s10617_s18  ;;  %v9659_v19 = vpack.i.bf16 %v10940_v2, %v10879_v62  ;;  %v18507_v5 = vsub.f32 %v10799_v26, %v10769_v15  ;;  %v1517_v26 = vsel %vm1463_vm0, %v1408_v41, %v1409_v24  ;;  %v11146_v2 = vld [vmem:[%s10758_s30 + $0x1a8] sm:$0xff]  ;;  %v1413_v41 = vrot.slane %v11112_v32, 1 }
  0x79   : > { %v9674_v49 = vpack.i.bf16 %v1517_v26, %v1518_v23  ;;  %v1515_v62 = vsel %vm1463_vm0, %v1410_v27, %v1411_v58  ;;  %v1516_v26 = vsel %vm1463_vm0, %v1409_v24, %v1410_v27  ;;  %v18516_v23 = vsub.f32 %v10805_v28, %v10769_v15 }
  0x7a   : > { %v11106_v63 = vmul.f32 %v10831_v44, %v18507_v5  ;;  %v11164_v5 = vld [vmem:[%s10758_s30 + $0x1c8] sm:$0xff]  ;;  %v11190_v24 = vmul.f32 %v10831_v44, %v18519_v45  ;;  %v18521_v28 = vsub.f32 %v10858_v54, %v10769_v15  ;;  %v11227_v54 = vld [vmem:[%s10758_s30 + $0x1f0] sm:$0xff] }
  0x7b   : > { %18514 = vst [vmem:[#allocation24_spill] sm:$0xff] %v11164_v5 }
  0x7c   : > { %18508 = vst [vmem:[#allocation19_spill] sm:$0xff] %v11106_v63  ;;  %9665 = vrot.lane.b32.xlu1 %v9664_v20, %s10618_s22  ;;  %9660 = vrot.lane.b32.xlu0 %v9659_v19, %s10617_s18  ;;  %v9669_v19 = vpack.i.bf16 %v10997_v60, %v10959_v37  ;;  %v1412_v20 = vrot.slane %v11106_v63, 1  ;;  %v11177_v60 = vmul.f32 %v10831_v44, %v18516_v23  ;;  %18520 = vst [vmem:[#allocation27_spill] sm:$0xff] %v11190_v24 }
  0x7d   : > { %v18517_v37 = vsub.f32 %v10829_v43, %v10769_v15  ;;  %v11196_v27 = vmul.f32 %v10831_v44, %v18521_v28  ;;  %v11215_v28 = vld [vmem:[%s10758_s30 + $0x1e0] sm:$0xff]  ;;  %v11224_v43 = vld [vmem:[%s10758_s30 + $0x1e8] sm:$0xff] }
  0x7e   : > { %18522 = vst [vmem:[#allocation28_spill] sm:$0xff] %v11215_v28  ;;  %v1513_v48 = vsel %vm1463_vm0, %v1412_v20, %v1413_v41  ;;  %v1514_v45 = vsel %vm1463_vm0, %v1411_v58, %v1412_v20  ;;  %18523 = vst [vmem:[#allocation29_spill] sm:$0xff] %v11224_v43  ;;  %v1414_v5 = vrot.slane %v11177_v60, 1  ;;  %v11244_v58 = vld [vmem:[%s10758_s30 + $0x1f8] sm:$0xff]  ;;  %v1416_v20 = vrot.slane %v11190_v24, 1 }
  0x7f   : > { %v11183_v4 = vmul.f32 %v10831_v44, %v18517_v37  ;;  %v9684_v37 = vpack.i.bf16 %v1515_v62, %v1516_v26  ;;  %v18524_v62 = vsub.f32 %v10872_v59, %v10769_v15  ;;  %v1417_v56 = vrot.slane %v11196_v27, 1 }
  0x80   : > { %9675 = vrot.lane.b32.xlu1 %v9674_v49, %s10618_s22  ;;  %9670 = vrot.lane.b32.xlu0 %v9669_v19, %s10617_s18  ;;  %v11210_v49 = vld [vmem:[%s10758_s30 + $0x1d8] sm:$0xff]  ;;  %v9679_v19 = vpack.i.bf16 %v11044_v21, %v11003_v9  ;;  %v18525_v21 = vsub.f32 %v10884_v1, %v10769_v15  ;;  %v18527_v1 = vsub.f32 %v10899_v11, %v10769_v15 }
  0x81   : > { %18518 = vst [vmem:[#allocation26_spill] sm:$0xff] %v11183_v4  ;;  %v1415_v23 = vrot.slane %v11183_v4, 1  ;;  %v11235_v26 = vmul.f32 %v10831_v44, %v18524_v62  ;;  %v9694_v28 = vpack.i.bf16 %v1513_v48, %v1514_v45  ;;  %v9689_v11 = vpack.i.bf16 %v11106_v63, %v11050_v39 }
  0x82   : > { %v11241_v9 = vmul.f32 %v10831_v44, %v18525_v21  ;;  %v11258_v21 = vmul.f32 %v10831_v44, %v18527_v1  ;;  %v1509_v48 = vsel %vm1463_vm0, %v1416_v20, %v1417_v56  ;;  %v18531_v1 = vsub.f32 %v10912_v18, %v10769_v15 }
  0x83   : > { %v1418_v59 = vrot.slane %v11235_v26, 1  ;;  %v1510_v45 = vsel %vm1463_vm0, %v1415_v23, %v1416_v20  ;;  %v18535_v20 = vsub.f32 %v10927_v34, %v10769_v15  ;;  %v9699_v63 = vpack.i.bf16 %v11177_v60, %v11112_v32 }
  0x84   : > { %18526 = vst [vmem:[#allocation30_spill] sm:$0xff] %v11241_v9  ;;  %9685 = vrot.lane.b32.xlu1 %v9684_v37, %s10618_s22  ;;  %9680 = vrot.lane.b32.xlu0 %v9679_v19, %s10617_s18  ;;  %18528 = vst [vmem:[#allocation31_spill] sm:$0xff] %v11258_v21  ;;  %v18529_v37 = vsub.f32 %v10909_v17, %v10769_v15  ;;  %v1511_v17 = vsel %vm1463_vm0, %v1414_v5, %v1415_v23  ;;  %v1419_v43 = vrot.slane %v11241_v9, 1 }
  0x85   : > { %v11290_v62 = vmul.f32 %v10831_v44, %v18531_v1  ;;  %v18534_v23 = vsub.f32 %v10924_v33, %v10769_v15  ;;  %v9709_v33 = vpack.i.bf16 %v11190_v24, %v11183_v4  ;;  %v18536_v34 = vsub.f32 %v10930_v35, %v10769_v15 }
  0x86   : > { %v11264_v57 = vmul.f32 %v10831_v44, %v18529_v37  ;;  %v1512_v37 = vsel %vm1463_vm0, %v1413_v41, %v1414_v5  ;;  %v18533_v5 = vsub.f32 %v10915_v25, %v10769_v15  ;;  %v11311_v25 = vmul.f32 %v10831_v44, %v18535_v20 }
  0x87   : > { %18532 = vst [vmem:[#allocation33_spill] sm:$0xff] %v11290_v62  ;;  %v11305_v18 = vmul.f32 %v10831_v44, %v18534_v23  ;;  %v1508_v23 = vsel %vm1463_vm0, %v1417_v56, %v1418_v59  ;;  %v11325_v20 = vmul.f32 %v10831_v44, %v18536_v34  ;;  %v18537_v1 = vsub.f32 %v10949_v7, %v10769_v15 }
  0x88   : > { %18530 = vst [vmem:[#allocation32_spill] sm:$0xff] %v11264_v57  ;;  %9695 = vrot.lane.b32.xlu1 %v9694_v28, %s10618_s22  ;;  %v11296_v41 = vmul.f32 %v10831_v44, %v18533_v5  ;;  %9690 = vrot.lane.b32.xlu0 %v9689_v11, %s10617_s18  ;;  %v1420_v28 = vrot.slane %v11258_v21, 1  ;;  %v1421_v19 = vrot.slane %v11264_v57, 1  ;;  %v9704_v5 = vpack.i.bf16 %v1511_v17, %v1512_v37 }
  0x89   : > { %v11331_v17 = vmul.f32 %v10831_v44, %v18537_v1  ;;  %v9714_v37 = vpack.i.bf16 %v1509_v48, %v1510_v45  ;;  %v1507_v11 = vsel %vm1463_vm0, %v1418_v59, %v1419_v43  ;;  %v1422_v56 = vrot.slane %v11290_v62, 1 }
  0x8a   : > { %v1423_v24 = vrot.slane %v11296_v41, 1  ;;  %v1505_v35 = vsel %vm1463_vm0, %v1420_v28, %v1421_v19  ;;  %v1506_v7 = vsel %vm1463_vm0, %v1419_v43, %v1420_v28  ;;  %v1424_v1 = vrot.slane %v11305_v18, 1 }
  0x8b   : > { %v18538_v48 = vsub.f32 %v10952_v12, %v10769_v15  ;;  %v18539_v45 = vsub.f32 %v10968_v31, %v10769_v15  ;;  %v18540_v34 = vsub.f32 %v10971_v0, %v10769_v15  ;;  %v18541_v28 = vsub.f32 %v10974_v36, %v10769_v15 }
  0x8c   : > { %9705 = vrot.lane.b32.xlu1 %v9704_v5, %s10618_s22  ;;  %9700 = vrot.lane.b32.xlu0 %v9699_v63, %s10617_s18  ;;  %v1425_v5 = vrot.slane %v11311_v25, 1  ;;  %v9719_v4 = vpack.i.bf16 %v11235_v26, %v11196_v27  ;;  %v1426_v31 = vrot.slane %v11325_v20, 1  ;;  %v9734_v0 = vpack.i.bf16 %v1505_v35, %v1506_v7 }
  0x8d   : > { %v11349_v59 = vmul.f32 %v10831_v44, %v18538_v48  ;;  %v11355_v63 = vmul.f32 %v10831_v44, %v18539_v45  ;;  %v11361_v43 = vmul.f32 %v10831_v44, %v18540_v34  ;;  %v11367_v12 = vmul.f32 %v10831_v44, %v18541_v28 }
  0x8e   : > { %v9724_v48 = vpack.i.bf16 %v1507_v11, %v1508_v23  ;;  %v1427_v45 = vrot.slane %v11331_v17, 1  ;;  %v9729_v34 = vpack.i.bf16 %v11258_v21, %v11241_v9  ;;  %v9739_v36 = vpack.i.bf16 %v11290_v62, %v11264_v57 }
  0x8f   : > { %v1503_v11 = vsel %vm1463_vm0, %v1422_v56, %v1423_v24  ;;  %v1504_v23 = vsel %vm1463_vm0, %v1421_v19, %v1422_v56  ;;  %v11391_v35 = vsel %vm1463_vm0, %v1423_v24, %v1424_v1  ;;  %v1428_v7 = vrot.slane %v11349_v59, 1 }
  0x90   : > { %9715 = vrot.lane.b32.xlu1 %v9714_v37, %s10618_s22  ;;  %9710 = vrot.lane.b32.xlu0 %v9709_v33, %s10617_s18  ;;  %v11387_v37 = vsel %vm1463_vm0, %v1424_v1, %v1425_v5  ;;  %v1429_v28 = vrot.slane %v11355_v63, 1  ;;  %v1430_v33 = vrot.slane %v11361_v43, 1  ;;  %v1431_v62 = vrot.slane %v11367_v12, 1 }
  0x91   : > { %v11399_v57 = vsel %vm1463_vm0, %v1426_v31, %v1427_v45  ;;  %v11403_v19 = vsel %vm1463_vm0, %v1425_v5, %v1426_v31  ;;  %v18542_v24 = vsub.f32 %v10983_v13, %v10769_v15  ;;  %v18543_v1 = vsub.f32 %v10986_v30, %v10769_v15 }
  0x92   : > { %v18544_v9 = vsub.f32 %v10989_v6, %v10769_v15  ;;  %v18545_v13 = vsub.f32 %v11015_v22, %v10769_v15  ;;  %v18547_v30 = vsub.f32 %v11018_v40, %v10769_v15  ;;  %v9754_v22 = vpack.i.bf16 %v11387_v37, %v11391_v35 }
  0x93   : > { %v11409_v56 = vmul.f32 %v10831_v44, %v18542_v24  ;;  %v11415_v21 = vmul.f32 %v10831_v44, %v18543_v1  ;;  %v18553_v37 = vsub.f32 %v11036_v10, %v10769_v15 }
  0x94   : > { %9725 = vrot.lane.b32.xlu1 %v9724_v48, %s10618_s22  ;;  %v11422_v5 = vmul.f32 %v10831_v44, %v18544_v9  ;;  %v11428_v31 = vmul.f32 %v10831_v44, %v18545_v13  ;;  %v11434_v24 = vmul.f32 %v10831_v44, %v18547_v30  ;;  %v18549_v48 = vsub.f32 %v11030_v14, %v10769_v15 }
  0x95   : > { %9720 = vrot.lane.b32.xlu0 %v9719_v4, %s10617_s18  ;;  %v9744_v9 = vpack.i.bf16 %v1503_v11, %v1504_v23  ;;  %v11451_v13 = vsel %vm1463_vm0, %v1428_v7, %v1429_v28  ;;  %v11455_v14 = vsel %vm1463_vm0, %v1427_v45, %v1428_v7  ;;  %v11459_v4 = vsel %vm1463_vm0, %v1430_v33, %v1431_v62 }
  0x96   : > { %18546 = vst [vmem:[#allocation34_spill] sm:$0xff] %v11428_v31  ;;  %18548 = vst [vmem:[#allocation35_spill] sm:$0xff] %v11434_v24  ;;  %v11440_v6 = vmul.f32 %v10831_v44, %v18549_v48  ;;  %v11463_v11 = vsel %vm1463_vm0, %v1429_v28, %v1430_v33  ;;  %v9764_v23 = vpack.i.bf16 %v11399_v57, %v11403_v19  ;;  %v1432_v35 = vrot.slane %v11409_v56, 1 }
  0x97   : > { %v1433_v30 = vrot.slane %v11415_v21, 1  ;;  %v1434_v45 = vrot.slane %v11422_v5, 1  ;;  %v1435_v7 = vrot.slane %v11428_v31, 1  ;;  %v1436_v28 = vrot.slane %v11434_v24, 1  ;;  %v18565_v24 = vld [vmem:[#allocation18_spill] sm:$0xff] }
  0x98   : > { %18550 = vst [vmem:[#allocation36_spill] sm:$0xff] %v11440_v6  ;;  %9735 = vrot.lane.b32.xlu1 %v9734_v0, %s10618_s22  ;;  %v1437_v33 = vrot.slane %v11440_v6, 1  ;;  %v18551_v48 = vsub.f32 %v11033_v16, %v10769_v15  ;;  %v11492_v40 = vmul.f32 %v10831_v44, %v18553_v37  ;;  %v18555_v19 = vsub.f32 %v11053_v61, %v10769_v15 }
  0x99   : > { %9730 = vrot.lane.b32.xlu0 %v9729_v34, %s10617_s18  ;;  %v11512_v37 = vsel %vm1463_vm0, %v1432_v35, %v1433_v30  ;;  %v11516_v34 = vsel %vm1463_vm0, %v1431_v62, %v1432_v35  ;;  %v18558_v61 = vsub.f32 %v11059_v38, %v10769_v15  ;;  %v11533_v57 = vsel %vm1463_vm0, %v1434_v45, %v1435_v7 }
  0x9a   : > { %v11486_v0 = vmul.f32 %v10831_v44, %v18551_v48  ;;  %18554 = vst [vmem:[#allocation38_spill] sm:$0xff] %v11492_v40  ;;  %v11502_v16 = vmul.f32 %v10831_v44, %v18555_v19  ;;  %v18557_v48 = vsub.f32 %v11056_v29, %v10769_v15  ;;  %v18559_v29 = vsub.f32 %v11077_v3, %v10769_v15 }
  0x9b   : > { %v11522_v19 = vmul.f32 %v10831_v44, %v18558_v61  ;;  %v11537_v62 = vsel %vm1463_vm0, %v1433_v30, %v1434_v45  ;;  %v11541_v38 = vsel %vm1463_vm0, %v1436_v28, %v1437_v33  ;;  %v11545_v3 = vsel %vm1463_vm0, %v1435_v7, %v1436_v28 }
  0x9c   : > { %18552 = vst [vmem:[#allocation37_spill] sm:$0xff] %v11486_v0  ;;  %18556 = vst [vmem:[#allocation39_spill] sm:$0xff] %v11502_v16  ;;  %v11508_v10 = vmul.f32 %v10831_v44, %v18557_v48  ;;  %v11528_v48 = vmul.f32 %v10831_v44, %v18559_v29  ;;  %9745 = vrot.lane.b32.xlu1 %v9744_v9, %s10618_s22  ;;  %v1438_v9 = vrot.slane %v11486_v0, 1  ;;  %v1439_v35 = vrot.slane %v11492_v40, 1  ;;  %v18574_v0 = vld [vmem:[#allocation20_spill] sm:$0xff] }
  0x9d   : > { %18560 = vst [vmem:[#allocation40_spill] sm:$0xff] %v11545_v3  ;;  %9740 = vrot.lane.b32.xlu0 %v9739_v36, %s10617_s18  ;;  %v18561_v61 = vsub.f32 %v11080_v47, %v10769_v15  ;;  %v18562_v45 = vsub.f32 %v11092_v42, %v10769_v15  ;;  %v1440_v28 = vrot.slane %v11502_v16, 1  ;;  %v1442_v42 = vrot.slane %v11522_v19, 1 }
  0x9e   : > { %v1441_v1 = vrot.slane %v11508_v10, 1  ;;  %v18564_v31 = vsub.f32 %v11095_v46, %v10769_v15  ;;  %v11597_v36 = vsel %vm1463_vm0, %v1438_v9, %v1439_v35  ;;  %v11601_v46 = vsel %vm1463_vm0, %v1437_v33, %v1438_v9 }
  0x9f   : > { %v11554_v30 = vmul.f32 %v10831_v44, %v18561_v61  ;;  %v11560_v29 = vmul.f32 %v10831_v44, %v18562_v45  ;;  %v1443_v45 = vrot.slane %v11528_v48, 1  ;;  %v18566_v61 = vsub.f32 %v18565_v24, %v10769_v15 }
  0xa0   : > { %9755 = vrot.lane.b32.xlu1 %v9754_v22, %s10618_s22  ;;  %v11583_v47 = vmul.f32 %v10831_v44, %v18564_v31  ;;  %v18567_v22 = vpack.i.bf16 %v11305_v18, %v11296_v41  ;;  %v11611_v7 = vsel %vm1463_vm0, %v1439_v35, %v1440_v28  ;;  %v18569_v16 = vrot.slane %v10846_v50, 7  ;;  %v18576_v50 = vld [vmem:[#allocation21_spill] sm:$0xff] }
  0xa1   : > { %18563 = vst [vmem:[#allocation41_spill] sm:$0xff] %v11560_v29  ;;  %v11589_v3 = vmul.f32 %v10831_v44, %v18566_v61  ;;  %v1444_v31 = vrot.slane %v11554_v30, 1  ;;  %v1445_v24 = vrot.slane %v11560_v29, 1  ;;  %v11607_v61 = vsel %vm1463_vm0, %v1440_v28, %v1441_v1 }
  0xa2   : > { %9750 = vrot.lane.b32.xlu0 %v18567_v22, %s10617_s18  ;;  %v18568_v22 = vrot.slane %v10849_v51, 7  ;;  %v18571_v9 = vmov %v18569_v16  ;;  %v18572_v29 = vrot.slane %v10852_v52, 7  ;;  %v11631_v35 = vsel %vm1463_vm0, %v1442_v42, %v1443_v45  ;;  %v18579_v52 = vld [vmem:[#allocation9_spill] sm:$0xff] }
  0xa3   : > { %v11635_v28 = vsel %vm1463_vm0, %v1441_v1, %v1442_v42  ;;  %v18578_v1 = vld [vmem:[#allocation8_spill] sm:$0xff]  ;;  %v1269_v6 = vrot.slane %v18579_v52, 7 }
  0xa4   : > { %v11619_v33 = vsel %vm1330_vm1, %v18569_v16, %v18568_v22  ;;  %v11627_v40 = vsel %vm1330_vm1, %v18572_v29, %v18571_v9  ;;  %v18575_v16 = vsub.f32 %v18574_v0, %v10769_v15  ;;  %9765 = vrot.lane.b32.xlu1 %v9764_v23, %s10618_s22  ;;  %v1446_v9 = vrot.slane %v11583_v47, 1 }
  0xa5   : > { %18570 = vst [vmem:[#allocation18_spill] sm:$0xff] %v11619_v33  ;;  %18573 = vst [vmem:[#allocation42_spill] sm:$0xff] %v11627_v40  ;;  %v18577_v33 = vsub.f32 %v18576_v50, %v10769_v15  ;;  %v1268_v42 = vrot.slane %v18578_v1, 7  ;;  %v18580_v0 = vpack.i.bf16 %v11325_v20, %v11311_v25  ;;  %v11666_v23 = vsel %vm1463_vm0, %v1443_v45, %v1444_v31  ;;  %v18596_v40 = vld [vmem:[#allocation10_spill] sm:$0xff] }
  0xa6   : > { %v11641_v22 = vmul.f32 %v10831_v44, %v18575_v16  ;;  %18582 = vst [vmem:[#allocation21_spill] sm:$0xff] %v11666_v23  ;;  %v18584_v16 = vmov 0.0   ;;  %v18585_v50 = vrot.slane %v10849_v51, 7  ;;  %v18587_v1 = vpack.i.bf16 %v11451_v13, %v11455_v14  ;;  %v18592_v14 = vld [vmem:[#allocation22_spill] sm:$0xff] }
  0xa7   : > { %v11647_v29 = vmul.f32 %v10831_v44, %v18577_v33  ;;  %9760 = vrot.lane.b32.xlu0 %v18580_v0, %s10617_s18  ;;  %v11662_v33 = vsel %vm1463_vm0, %v1444_v31, %v1445_v24  ;;  %v11676_v0 = vsel %vm1330_vm1, %v1268_v42, %v1269_v6  ;;  %8733 = vmatprep.mubr.msk.bf16.mxu1 %vm10619_vm2, %v18584_v16 }
  0xa8   : > { %18581 = vst [vmem:[#allocation20_spill] sm:$0xff] %v11662_v33  ;;  %18583 = vst [vmem:[#allocation8_spill] sm:$0xff] %v11676_v0  ;;  %v11687_v52 = vsel %vm1330_vm1, %v18585_v50, %v1268_v42  ;;  %9775 = vrot.lane.b32.xlu1 %v18587_v1, %s10618_s22  ;;  %v18588_v0 = vrot.slane %v11589_v3, 1  ;;  %v11703_v51 = vsel %vm1463_vm0, %v1445_v24, %v1446_v9  ;;  %v18398_v50 = vmov 0  }
  0xa9   : > { %18586 = vst [vmem:[#allocation9_spill] sm:$0xff] %v11687_v52  ;;  %18590 = vst [vmem:[#allocation44_spill] sm:$0xff] %v11703_v51  ;;  %3899 = vmatprep.subr.bf16.mxu1 %v18398_v50  ;;  %v18591_v13 = vpack.i.bf16 %v11349_v59, %v11331_v17  ;;  %v18593_v1 = vsub.f32 %v18592_v14, %v10769_v15  ;;  %v18594_v24 = vsub.f32 %v11146_v2, %v10769_v15  ;;  %v18597_v14 = vld [vmem:[#allocation11_spill] sm:$0xff]  ;;  %v18600_v2 = vld [vmem:[#allocation14_spill] sm:$0xff] }
  0xaa   : > { %v11699_v45 = vsel %vm1463_vm0, %v1446_v9, %v18588_v0  ;;  %v18595_v31 = vsub.f32 %v11151_v55, %v10769_v15  ;;  %6015 = vmatprep.subr.bf16.mxu0 %v18398_v50  ;;  %v1271_v52 = vrot.slane %v18597_v14, 7  ;;  %v1274_v23 = vrot.slane %v18600_v2, 7  ;;  %v18604_v50 = vld [vmem:[#allocation24_spill] sm:$0xff]  ;;  %v18608_v2 = vld [vmem:[#allocation25_spill] sm:$0xff] }
  0xab   : > { %18589 = vst [vmem:[#allocation43_spill] sm:$0xff] %v11699_v45  ;;  %9770 = vrot.lane.b32.xlu0 %v18591_v13, %s10617_s18  ;;  %v11715_v0 = vmul.f32 %v10831_v44, %v18593_v1  ;;  %v11721_v9 = vmul.f32 %v10831_v44, %v18594_v24  ;;  %v1270_v13 = vrot.slane %v18596_v40, 7  ;;  %v18598_v1 = vld [vmem:[#allocation12_spill] sm:$0xff]  ;;  %v18599_v45 = vld [vmem:[#allocation13_spill] sm:$0xff]  ;;  %v18601_v24 = vsub.f32 %v11154_v53, %v10769_v15 }
  0xac   : > { %v11727_v42 = vmul.f32 %v10831_v44, %v18595_v31  ;;  %v1272_v16 = vrot.slane %v18598_v1, 7  ;;  %v1273_v51 = vrot.slane %v18599_v45, 7  ;;  %v18602_v31 = vld [vmem:[#allocation23_spill] sm:$0xff]  ;;  %v18605_v14 = vsub.f32 %v18604_v50, %v10769_v15 }
  0xad   : > { %v11739_v55 = vmul.f32 %v10831_v44, %v18601_v24  ;;  %v18603_v33 = vsub.f32 %v18602_v31, %v10769_v15  ;;  %v11755_v45 = vsel %vm1330_vm1, %v1269_v6, %v1270_v13  ;;  %v18607_v53 = vpack.i.bf16 %v11459_v4, %v11463_v11 }
  0xae   : > { %v11751_v1 = vmul.f32 %v10831_v44, %v18605_v14  ;;  %18606 = vst [vmem:[#allocation22_spill] sm:$0xff] %v11755_v45  ;;  %v18609_v24 = vsub.f32 %v18608_v2, %v10769_v15  ;;  %v11769_v50 = vsel %vm1330_vm1, %v1270_v13, %v1271_v52  ;;  %v11773_v31 = vsel %vm1330_vm1, %v1272_v16, %v1273_v51  ;;  %v18615_v13 = vld [vmem:[#allocation28_spill] sm:$0xff] }
  0xaf   : > { %v11745_v40 = vmul.f32 %v10831_v44, %v18603_v33  ;;  %9785 = vrot.lane.b32.xlu1 %v18607_v53, %s10618_s22  ;;  %18610 = vst [vmem:[#allocation10_spill] sm:$0xff] %v11769_v50  ;;  %18611 = vst [vmem:[#allocation11_spill] sm:$0xff] %v11773_v31  ;;  %v11777_v6 = vsel %vm1330_vm1, %v1271_v52, %v1272_v16  ;;  %v18613_v4 = vpack.i.bf16 %v11361_v43, %v11355_v63  ;;  %v18625_v50 = vld [vmem:[#allocation19_spill] sm:$0xff] }
  0xb0   : > { %v11765_v33 = vmul.f32 %v10831_v44, %v18609_v24  ;;  %18612 = vst [vmem:[#allocation12_spill] sm:$0xff] %v11777_v6  ;;  %v18614_v11 = vsub.f32 %v11210_v49, %v10769_v15  ;;  %v18616_v53 = vsub.f32 %v18615_v13, %v10769_v15  ;;  %v18617_v24 = vld [vmem:[#allocation29_spill] sm:$0xff]  ;;  %v18619_v6 = vld [vmem:[#allocation15_spill] sm:$0xff]  ;;  %v18620_v49 = vsub.f32 %v11227_v54, %v10769_v15 }
  0xb1   : > { %9780 = vrot.lane.b32.xlu0 %v18613_v4, %s10617_s18  ;;  %v18618_v16 = vsub.f32 %v18617_v24, %v10769_v15  ;;  %v1275_v4 = vrot.slane %v18619_v6, 7  ;;  %v18622_v13 = vsub.f32 %v11244_v58, %v10769_v15  ;;  %v11816_v24 = vsel %vm1330_vm1, %v1273_v51, %v1274_v23  ;;  %v18624_v54 = vld [vmem:[#allocation17_spill] sm:$0xff] }
  0xb2   : > { %v11787_v14 = vmul.f32 %v10831_v44, %v18614_v11  ;;  %v11793_v2 = vmul.f32 %v10831_v44, %v18616_v53  ;;  %v11806_v11 = vmul.f32 %v10831_v44, %v18620_v49  ;;  %v1277_v45 = vrot.slane %v18624_v54, 7 }
  0xb3   : > { %v11799_v52 = vmul.f32 %v10831_v44, %v18618_v16  ;;  %v11812_v53 = vmul.f32 %v10831_v44, %v18622_v13  ;;  %v18623_v16 = vld [vmem:[#allocation16_spill] sm:$0xff]  ;;  %v11821_v6 = vsel %vm1330_vm1, %v1274_v23, %v1275_v4  ;;  %v1278_v49 = vrot.slane %v11050_v39, 7  ;;  %v18627_v13 = vld [vmem:[#allocation26_spill] sm:$0xff] }
  0xb4   : > { %18621 = vst [vmem:[#allocation13_spill] sm:$0xff] %v11806_v11  ;;  %v1276_v31 = vrot.slane %v18623_v16, 7  ;;  %v1279_v11 = vrot.slane %v18625_v50, 7  ;;  %v18626_v44 = vpack.i.bf16 %v11512_v37, %v11516_v34  ;;  %v1280_v51 = vrot.slane %v11112_v32, 7 }
  0xb5   : > { %v1281_v23 = vrot.slane %v11177_v60, 7  ;;  %v1282_v16 = vrot.slane %v18627_v13, 7  ;;  %v18628_v39 = vpack.i.bf16 %v11409_v56, %v11367_v12  ;;  %v11851_v32 = vsel %vm1330_vm1, %v1277_v45, %v1278_v49  ;;  %v18629_v60 = vld [vmem:[#allocation27_spill] sm:$0xff]  ;;  %v18632_v13 = vld [vmem:[#allocation30_spill] sm:$0xff] }
  0xb6   : > { %9795 = vrot.lane.b32.xlu1 %v18626_v44, %s10618_s22  ;;  %v11832_v58 = vsel %vm1330_vm1, %v1275_v4, %v1276_v31  ;;  %v11843_v50 = vsel %vm1330_vm1, %v1276_v31, %v1277_v45  ;;  %v11847_v34 = vsel %vm1330_vm1, %v1278_v49, %v1279_v11  ;;  %v1283_v37 = vrot.slane %v18629_v60, 7  ;;  %v18633_v60 = vld [vmem:[#allocation31_spill] sm:$0xff] }
  0xb7   : > { %9790 = vrot.lane.b32.xlu0 %v18628_v39, %s10617_s18  ;;  %v11856_v4 = vsel %vm1330_vm1, %v1280_v51, %v1281_v23  ;;  %v11860_v54 = vsel %vm1330_vm1, %v1279_v11, %v1280_v51  ;;  %v11864_v31 = vsel %vm1330_vm1, %v1281_v23, %v1282_v16  ;;  %v1284_v44 = vrot.slane %v11196_v27, 7  ;;  %v18635_v27 = vld [vmem:[#allocation32_spill] sm:$0xff] }
  0xb8   : > { %18630 = vst [vmem:[#allocation14_spill] sm:$0xff] %v11864_v31  ;;  %v11869_v45 = vsel %vm1330_vm1, %v1282_v16, %v1283_v37  ;;  %v1285_v49 = vrot.slane %v11235_v26, 7  ;;  %v1286_v39 = vrot.slane %v18632_v13, 7  ;;  %v1287_v15 = vrot.slane %v18633_v60, 7  ;;  %v18636_v31 = vld [vmem:[#allocation33_spill] sm:$0xff] }
  0xb9   : > { %18631 = vst [vmem:[#allocation23_spill] sm:$0xff] %v11869_v45  ;;  %v18634_v11 = vpack.i.bf16 %v11533_v57, %v11537_v62  ;;  %v11880_v51 = vsel %vm1330_vm1, %v1283_v37, %v1284_v44  ;;  %v1288_v23 = vrot.slane %v18635_v27, 7  ;;  %v1289_v16 = vrot.slane %v18636_v31, 7 }
  0xba   : > { %v1290_v45 = vrot.slane %v11296_v41, 7  ;;  %v18637_v26 = vpack.i.bf16 %v11422_v5, %v11415_v21  ;;  %v11891_v13 = vsel %vm1330_vm1, %v1284_v44, %v1285_v49  ;;  %v11895_v57 = vsel %vm1330_vm1, %v1286_v39, %v1287_v15 }
  0xbb   : > { %9805 = vrot.lane.b32.xlu1 %v18634_v11, %s10618_s22  ;;  %v11899_v62 = vsel %vm1330_vm1, %v1285_v49, %v1286_v39  ;;  %v1291_v37 = vrot.slane %v11305_v18, 7  ;;  %v11904_v41 = vsel %vm1330_vm1, %v1288_v23, %v1289_v16  ;;  %v11908_v31 = vsel %vm1330_vm1, %v1287_v15, %v1288_v23  ;;  %v18638_v15 = vld [vmem:[#allocation40_spill] sm:$0xff] }
  0xbc   : > { %9800 = vrot.lane.b32.xlu0 %v18637_v26, %s10617_s18  ;;  %v11912_v44 = vsel %vm1330_vm1, %v1289_v16, %v1290_v45  ;;  %v1292_v60 = vrot.slane %v11311_v25, 7  ;;  %v1293_v18 = vrot.slane %v11325_v20, 7  ;;  %v1294_v39 = vrot.slane %v11331_v17, 7  ;;  %v18640_v20 = vld [vmem:[#allocation35_spill] sm:$0xff]  ;;  %v18641_v17 = vld [vmem:[#allocation34_spill] sm:$0xff] }
  0xbd   : > { %v11917_v49 = vsel %vm1330_vm1, %v1290_v45, %v1291_v37  ;;  %v1295_v11 = vrot.slane %v11349_v59, 7  ;;  %v18639_v27 = vpack.i.bf16 %v11541_v38, %v18638_v15  ;;  %v1296_v25 = vrot.slane %v11355_v63, 7 }
  0xbe   : > { %v11928_v23 = vsel %vm1330_vm1, %v1291_v37, %v1292_v60  ;;  %v1297_v45 = vrot.slane %v11361_v43, 7  ;;  %v1298_v16 = vrot.slane %v11367_v12, 7  ;;  %v18642_v26 = vpack.i.bf16 %v18640_v20, %v18641_v17 }
  0xbf   : > { %9815 = vrot.lane.b32.xlu1 %v18639_v27, %s10618_s22  ;;  %v11939_v59 = vsel %vm1330_vm1, %v1292_v60, %v1293_v18  ;;  %v11943_v38 = vsel %vm1330_vm1, %v1294_v39, %v1295_v11  ;;  %v11947_v63 = vsel %vm1330_vm1, %v1293_v18, %v1294_v39  ;;  %v1299_v43 = vrot.slane %v11409_v56, 7 }
  0xc0   : > { %9810 = vrot.lane.b32.xlu0 %v18642_v26, %s10617_s18  ;;  %v11952_v12 = vsel %vm1330_vm1, %v1296_v25, %v1297_v45  ;;  %v11956_v37 = vsel %vm1330_vm1, %v1295_v11, %v1296_v25  ;;  %v11960_v60 = vsel %vm1330_vm1, %v1297_v45, %v1298_v16  ;;  %v1300_v15 = vrot.slane %v11415_v21, 7  ;;  %v18646_v21 = vld [vmem:[#allocation36_spill] sm:$0xff]  ;;  %v18647_v26 = vld [vmem:[#allocation37_spill] sm:$0xff] }
  0xc1   : > { %18643 = vst [vmem:[#allocation24_spill] sm:$0xff] %v11960_v60  ;;  %v11965_v18 = vsel %vm1330_vm1, %v1298_v16, %v1299_v43  ;;  %v1301_v56 = vrot.slane %v11422_v5, 7  ;;  %v1302_v39 = vrot.slane %v18641_v17, 7  ;;  %v1303_v27 = vrot.slane %v18640_v20, 7  ;;  %v18648_v60 = vld [vmem:[#allocation38_spill] sm:$0xff]  ;;  %v18651_v17 = vld [vmem:[#allocation39_spill] sm:$0xff] }
  0xc2   : > { %18644 = vst [vmem:[#allocation25_spill] sm:$0xff] %v11965_v18  ;;  %v18645_v11 = vpack.i.bf16 %v11597_v36, %v11601_v46  ;;  %v11976_v25 = vsel %vm1330_vm1, %v1299_v43, %v1300_v15  ;;  %v1304_v45 = vrot.slane %v18646_v21, 7  ;;  %v1305_v16 = vrot.slane %v18647_v26, 7 }
  0xc3   : > { %v1306_v18 = vrot.slane %v18648_v60, 7  ;;  %v18649_v5 = vpack.i.bf16 %v18647_v26, %v18646_v21  ;;  %v11987_v20 = vsel %vm1330_vm1, %v1300_v15, %v1301_v56  ;;  %v11991_v36 = vsel %vm1330_vm1, %v1302_v39, %v1303_v27 }
  0xc4   : > { %9825 = vrot.lane.b32.xlu1 %v18645_v11, %s10618_s22  ;;  %v11995_v46 = vsel %vm1330_vm1, %v1301_v56, %v1302_v39  ;;  %v1307_v43 = vrot.slane %v18651_v17, 7  ;;  %v12000_v11 = vsel %vm1330_vm1, %v1304_v45, %v1305_v16  ;;  %v12004_v21 = vsel %vm1330_vm1, %v1303_v27, %v1304_v45 }
  0xc5   : > { %9820 = vrot.lane.b32.xlu0 %v18649_v5, %s10617_s18  ;;  %18650 = vst [vmem:[#allocation28_spill] sm:$0xff] %v11995_v46  ;;  %18652 = vst [vmem:[#allocation29_spill] sm:$0xff] %v12000_v11  ;;  %v12008_v15 = vsel %vm1330_vm1, %v1305_v16, %v1306_v18  ;;  %v1308_v26 = vrot.slane %v11508_v10, 7  ;;  %v1309_v39 = vrot.slane %v11522_v19, 7  ;;  %v1310_v5 = vrot.slane %v11528_v48, 7  ;;  %v18657_v16 = vld [vmem:[#allocation41_spill] sm:$0xff] }
  0xc6   : > { %18653 = vst [vmem:[#allocation15_spill] sm:$0xff] %v12004_v21  ;;  %18654 = vst [vmem:[#allocation16_spill] sm:$0xff] %v12008_v15  ;;  %v12013_v56 = vsel %vm1330_vm1, %v1306_v18, %v1307_v43  ;;  %v1311_v11 = vrot.slane %v11554_v30, 7  ;;  %v18656_v27 = vpack.i.bf16 %v11607_v61, %v11611_v7  ;;  %v1312_v15 = vrot.slane %v18657_v16, 7 }
  0xc7   : > { %18655 = vst [vmem:[#allocation17_spill] sm:$0xff] %v12013_v56  ;;  %v12024_v45 = vsel %vm1330_vm1, %v1307_v43, %v1308_v26  ;;  %v1313_v18 = vrot.slane %v11583_v47, 7  ;;  %v1314_v56 = vrot.slane %v11589_v3, 7  ;;  %v18658_v21 = vpack.i.bf16 %v18651_v17, %v18648_v60 }
  0xc8   : > { %9835 = vrot.lane.b32.xlu1 %v18656_v27, %s10618_s22  ;;  %v12035_v46 = vsel %vm1330_vm1, %v1308_v26, %v1309_v39  ;;  %v12039_v7 = vsel %vm1330_vm1, %v1310_v5, %v1311_v11  ;;  %v12043_v61 = vsel %vm1330_vm1, %v1309_v39, %v1310_v5  ;;  %v1315_v43 = vrot.slane %v11641_v22, 7 }
  0xc9   : > { %9830 = vrot.lane.b32.xlu0 %v18658_v21, %s10617_s18  ;;  %v12048_v27 = vsel %vm1330_vm1, %v1312_v15, %v1313_v18  ;;  %v12052_v60 = vsel %vm1330_vm1, %v1311_v11, %v1312_v15  ;;  %v12056_v17 = vsel %vm1330_vm1, %v1313_v18, %v1314_v56  ;;  %v1316_v21 = vrot.slane %v11647_v29, 7 }
  0xca   : > { %18659 = vst [vmem:[#allocation19_spill] sm:$0xff] %v12048_v27  ;;  %18660 = vst [vmem:[#allocation26_spill] sm:$0xff] %v12052_v60  ;;  %v12061_v26 = vsel %vm1330_vm1, %v1314_v56, %v1315_v43  ;;  %v1317_v39 = vrot.slane %v11715_v0, 7  ;;  %v1318_v5 = vrot.slane %v11721_v9, 7  ;;  %v1319_v27 = vrot.slane %v11727_v42, 7 }
  0xcb   : > { %18661 = vst [vmem:[#allocation27_spill] sm:$0xff] %v12056_v17  ;;  %18662 = vst [vmem:[#allocation30_spill] sm:$0xff] %v12061_v26  ;;  %v18663_v11 = vpack.i.bf16 %v11631_v35, %v11635_v28  ;;  %v12072_v15 = vsel %vm1330_vm1, %v1315_v43, %v1316_v21  ;;  %v1320_v18 = vrot.slane %v11739_v55, 7  ;;  %v1321_v56 = vrot.slane %v11745_v40, 7 }
  0xcc   : > { %v1322_v17 = vrot.slane %v11751_v1, 7  ;;  %v18664_v26 = vpack.i.bf16 %v11522_v19, %v11508_v10  ;;  %v12083_v60 = vsel %vm1330_vm1, %v1316_v21, %v1317_v39  ;;  %v12087_v35 = vsel %vm1330_vm1, %v1318_v5, %v1319_v27 }
  0xcd   : > { %9845 = vrot.lane.b32.xlu1 %v18663_v11, %s10618_s22  ;;  %18665 = vst [vmem:[#allocation31_spill] sm:$0xff] %v12087_v35  ;;  %v12091_v28 = vsel %vm1330_vm1, %v1317_v39, %v1318_v5  ;;  %v1323_v43 = vrot.slane %v11765_v33, 7  ;;  %v12096_v11 = vsel %vm1330_vm1, %v1320_v18, %v1321_v56  ;;  %v12100_v10 = vsel %vm1330_vm1, %v1319_v27, %v1320_v18  ;;  %v18672_v35 = vld [vmem:[#allocation20_spill] sm:$0xff]  ;;  %v18673_v27 = vld [vmem:[#allocation21_spill] sm:$0xff] }
  0xce   : > { %9840 = vrot.lane.b32.xlu0 %v18664_v26, %s10617_s18  ;;  %18666 = vst [vmem:[#allocation32_spill] sm:$0xff] %v12091_v28  ;;  %18667 = vst [vmem:[#allocation33_spill] sm:$0xff] %v12096_v11  ;;  %v12104_v19 = vsel %vm1330_vm1, %v1321_v56, %v1322_v17  ;;  %v1324_v21 = vrot.slane %v11787_v14, 7  ;;  %v1325_v39 = vrot.slane %v11793_v2, 7  ;;  %v1326_v5 = vrot.slane %v11799_v52, 7  ;;  %v18671_v28 = vld [vmem:[#allocation13_spill] sm:$0xff] }
  0xcf   : > { %18668 = vst [vmem:[#allocation40_spill] sm:$0xff] %v12100_v10  ;;  %18669 = vst [vmem:[#allocation35_spill] sm:$0xff] %v12104_v19  ;;  %v12109_v26 = vsel %vm1330_vm1, %v1322_v17, %v1323_v43  ;;  %v1327_v11 = vrot.slane %v18671_v28, 7  ;;  %v18674_v18 = vpack.i.bf16 %v18672_v35, %v18673_v27  ;;  %v18675_v17 = vpack.i.bf16 %v11554_v30, %v11528_v48  ;;  %v18678_v27 = vld [vmem:[#allocation43_spill] sm:$0xff] }
  0xd0   : > { %18670 = vst [vmem:[#allocation34_spill] sm:$0xff] %v12109_v26  ;;  %v12120_v56 = vsel %vm1330_vm1, %v1323_v43, %v1324_v21  ;;  %v12129_v26 = vsel %vm1330_vm1, %v1324_v21, %v1325_v39  ;;  %v12137_v35 = vsel %vm1330_vm1, %v1325_v39, %v1326_v5  ;;  %v18677_v43 = vld [vmem:[#allocation44_spill] sm:$0xff]  ;;  %v9859_v19 = vpack.i.bf16 %v11583_v47, %v18657_v16 }
  0xd1   : > { %9855 = vrot.lane.b32.xlu1 %v18674_v18, %s10618_s22  ;;  %v12133_v10 = vsel %vm1330_vm1, %v1326_v5, %v1327_v11  ;;  %18676 = vst [vmem:[#allocation36_spill] sm:$0xff] %v12137_v35  ;;  %v9864_v18 = vpack.i.bf16 %v18678_v27, %v18677_v43  ;;  %v18679_v48 = vrot.slane %v11812_v53, 7  ;;  %v18681_v21 = vrot.slane %v11647_v29, 1 }
  0xd2   : > { %9850 = vrot.lane.b32.xlu0 %v18675_v17, %s10617_s18  ;;  %v18682_v17 = vrot.slane %v11641_v22, 1  ;;  %v18684_v43 = vrot.slane %v11589_v3, 1  ;;  %v1450_v16 = vrot.slane %v11715_v0, 1  ;;  %v1451_v27 = vrot.slane %v11721_v9, 1 }
  0xd3   : > { %v12147_v30 = vsel %vm1330_vm1, %v1327_v11, %v18679_v48  ;;  %v9869_v48 = vpack.i.bf16 %v11641_v22, %v11589_v3  ;;  %v9879_v3 = vpack.i.bf16 %v11715_v0, %v11647_v29 }
  0xd4   : > { %18680 = vst [vmem:[#allocation37_spill] sm:$0xff] %v12147_v30  ;;  %v1477_v39 = vsel %vm1463_vm0, %v18682_v17, %v18681_v21  ;;  %v18683_v5 = vmov %v18682_v17  ;;  %v1475_v21 = vsel %vm1463_vm0, %v1450_v16, %v1451_v27  ;;  %v18685_v17 = vrot.slane %v11647_v29, 1 }
  0xd5   : > { %v1478_v47 = vsel %vm1463_vm0, %v18684_v43, %v18683_v5  ;;  %9865 = vrot.lane.b32.xlu1 %v9864_v18, %s10618_s22  ;;  %v1452_v43 = vrot.slane %v11727_v42, 1  ;;  %v1453_v30 = vrot.slane %v11739_v55, 1 }
  0xd6   : > { %9860 = vrot.lane.b32.xlu0 %v9859_v19, %s10617_s18  ;;  %v9874_v11 = vpack.i.bf16 %v1477_v39, %v1478_v47  ;;  %v1476_v5 = vsel %vm1463_vm0, %v18685_v17, %v1450_v16  ;;  %v1454_v39 = vrot.slane %v11745_v40, 1  ;;  %v1455_v47 = vrot.slane %v11751_v1, 1 }
  0xd7   : > { %v9884_v19 = vpack.i.bf16 %v1475_v21, %v1476_v5  ;;  %v1473_v22 = vsel %vm1463_vm0, %v1452_v43, %v1453_v30  ;;  %v1474_v18 = vsel %vm1463_vm0, %v1451_v27, %v1452_v43  ;;  %v1456_v27 = vrot.slane %v11765_v33, 1 }
  0xd8   : > { %v9894_v16 = vpack.i.bf16 %v1473_v22, %v1474_v18  ;;  %v1471_v29 = vsel %vm1463_vm0, %v1454_v39, %v1455_v47  ;;  %v1472_v0 = vsel %vm1463_vm0, %v1453_v30, %v1454_v39  ;;  %v9899_v17 = vpack.i.bf16 %v11745_v40, %v11739_v55 }
  0xd9   : > { %9875 = vrot.lane.b32.xlu1 %v9874_v11, %s10618_s22  ;;  %v9889_v11 = vpack.i.bf16 %v11727_v42, %v11721_v9  ;;  %v9904_v21 = vpack.i.bf16 %v1471_v29, %v1472_v0  ;;  %v1470_v9 = vsel %vm1463_vm0, %v1455_v47, %v1456_v27  ;;  %v1458_v30 = vrot.slane %v11793_v2, 1 }
  0xda   : > { %9870 = vrot.lane.b32.xlu0 %v9869_v48, %s10617_s18  ;;  %v1457_v48 = vrot.slane %v11787_v14, 1  ;;  %v1459_v5 = vrot.slane %v11799_v52, 1  ;;  %v18686_v43 = vmov 0.0   ;;  %v9909_v40 = vpack.i.bf16 %v11765_v33, %v11751_v1 }
  0xdb   : > { %v1460_v47 = vrot.slane %v18671_v28, 1 }
  0xdc   : > { %v1469_v42 = vsel %vm1463_vm0, %v1456_v27, %v1457_v48  ;;  %v1467_v18 = vsel %vm1463_vm0, %v1458_v30, %v1459_v5  ;;  %v1468_v39 = vsel %vm1463_vm0, %v1457_v48, %v1458_v30 }
  0xdd   : > { %9885 = vrot.lane.b32.xlu1 %v9884_v19, %s10618_s22  ;;  %v12208_v19 = vrot.slane %v18686_v43, 7  ;;  %v9914_v55 = vpack.i.bf16 %v1469_v42, %v1470_v9  ;;  %v9924_v48 = vpack.i.bf16 %v1467_v18, %v1468_v39  ;;  %v9919_v42 = vpack.i.bf16 %v11793_v2, %v11787_v14  ;;  %v18691_v18 = vld [vmem:[#allocation18_spill] sm:$0xff] }
  0xde   : > { %9880 = vrot.lane.b32.xlu0 %v9879_v3, %s10617_s18  ;;  %v9631_v3 = vpop.permute.xlu1 %9630  ;;  %v9621_v22 = vpop.permute.xlu0 %9620  ;;  %v9929_v9 = vpack.i.bf16 %v18671_v28, %v11799_v52 }
  0xdf   : > { %18687 = vst [vmem:[#allocation38_spill] sm:$0xff] %v12208_v19  ;;  %v9632_v29 = vunpack.i.l.bf16 %v9631_v3  ;;  %v9623_v0 = vunpack.i.h.bf16 %v9621_v22  ;;  %v9622_v27 = vunpack.i.l.bf16 %v9621_v22 }
  0xe1   : > { %9895 = vrot.lane.b32.xlu1 %v9894_v16, %s10618_s22  ;;  %v1461_v16 = vrot.slane %v11812_v53, 1  ;;  %v2059_v52 = vsel %vm2058_vm3, %v12208_v19, %v9622_v27 }
  0xe2   : > { %9890 = vrot.lane.b32.xlu0 %v9889_v11, %s10617_s18  ;;  %v9633_v11 = vunpack.i.h.bf16 %v9631_v3  ;;  %v9636_v33 = vpop.permute.xlu1 %9635  ;;  %v9626_v22 = vpop.permute.xlu0 %9625 }
  0xe3   : > { %v9638_v30 = vunpack.i.h.bf16 %v9636_v33  ;;  %v9637_v3 = vunpack.i.l.bf16 %v9636_v33  ;;  %v9628_v14 = vunpack.i.h.bf16 %v9626_v22  ;;  %v9627_v2 = vunpack.i.l.bf16 %v9626_v22 }
  0xe4   : > { %v2062_v39 = vsel %vm2058_vm3, %v18691_v18, %v9633_v11  ;;  %v18694_v18 = vld [vmem:[#allocation9_spill] sm:$0xff] }
  0xe5   : > { %9905 = vrot.lane.b32.xlu1 %v9904_v21, %s10618_s22  ;;  %v18688_v21 = vld [vmem:[#allocation7_spill] sm:$0xff]  ;;  %v2129_v35 = vsel %vm2125_vm4, %v2062_v39, %v9638_v30 }
  0xe6   : > { %9900 = vrot.lane.b32.xlu0 %v9899_v17, %s10617_s18  ;;  %v18689_v17 = vrot.slane %v18688_v21, 7  ;;  %v1466_v21 = vsel %vm1463_vm0, %v1459_v5, %v1460_v47 }
  0xe8   : > { %v1395_v1 = vsel %vm1330_vm1, %v12208_v19, %v18689_v17 }
  0xe9   : > { %9915 = vrot.lane.b32.xlu1 %v9914_v55, %s10618_s22  ;;  %v1465_v55 = vsel %vm1463_vm0, %v1460_v47, %v1461_v16  ;;  %v2060_v28 = vsel %vm2058_vm3, %v1395_v1, %v9623_v0  ;;  %v2126_v47 = vsel %vm2125_vm4, %v2059_v52, %v9627_v2  ;;  %v9641_v1 = vpop.permute.xlu0 %9640 }
  0xea   : > { %9910 = vrot.lane.b32.xlu0 %v9909_v40, %s10617_s18  ;;  %v18690_v40 = vld [vmem:[#allocation42_spill] sm:$0xff]  ;;  %v2127_v11 = vsel %vm2125_vm4, %v2060_v28, %v9628_v14  ;;  %v9934_v22 = vpack.i.bf16 %v1465_v55, %v1466_v21  ;;  %v9939_v55 = vpack.i.bf16 %v18686_v43, %v11812_v53  ;;  %v18693_v21 = vld [vmem:[#allocation8_spill] sm:$0xff] }
  0xeb   : > { %v2061_v17 = vsel %vm2058_vm3, %v18690_v40, %v9632_v29  ;;  %v9646_v29 = vpop.permute.xlu1 %9645  ;;  %v2192_v27 = vpack.c.bf16 %v2127_v11, %v2126_v47  ;;  %v18695_v11 = vmov 0  }
  0xec   : > { %v2128_v33 = vsel %vm2125_vm4, %v2061_v17, %v9637_v3  ;;  %v9648_v40 = vunpack.i.h.bf16 %v9646_v29  ;;  %v9647_v0 = vunpack.i.l.bf16 %v9646_v29  ;;  %v18692_v3 = vld [vmem:[#allocation6_spill] sm:$0xff] }
  0xed   : > { %9925 = vrot.lane.b32.xlu1 %v9924_v48, %s10618_s22  ;;  %v2193_v5 = vpack.c.bf16 %v2129_v35, %v2128_v33  ;;  %v10120_v48 = vld [vmem:[%s18342_s5] sm:$0xff]   ;;  %v1464_v30 = vsel %vm1463_vm0, %v1461_v16, %v18692_v3  ;;  %v9642_v35 = vunpack.i.l.bf16 %v9641_v1  ;;  %8734 = vmatmul.mubr.msk.bf16.vlgmr.msra.gmra.mrb[0].mxu1 %vm2280_vm5, %v2192_v27  ;;  %v9651_v28 = vpop.permute.xlu0 %9650  ;;  %v18696_v27 = vld [vmem:[#allocation10_spill] sm:$0xff] }
  0xee   : > { %9920 = vrot.lane.b32.xlu0 %v9919_v42, %s10617_s18  ;;  %v9643_v42 = vunpack.i.h.bf16 %v9641_v1  ;;  %3900 = vmatpush1.bf16.msra.mxu1 %v10120_v48  ;;  %v9944_v16 = vpack.i.bf16 %v18692_v3, %v1464_v30  ;;  %v9653_v29 = vunpack.i.h.bf16 %v9651_v28  ;;  %v18697_v30 = vld [vmem:[#allocation22_spill] sm:$0xff] }
  0xef   : > { %v2063_v39 = vsel %vm2058_vm3, %v18694_v18, %v9642_v35  ;;  %v9656_v14 = vpop.permute.xlu1 %9655  ;;  %8737 = vmatprep.mubr.msk.bf16.mxu1 %vm10619_vm2, %v18686_v43  ;;  %3901 = vmatprep.subr.bf16.mxu1 %v18695_v11 }
  0xf0   : > { %v2064_v17 = vsel %vm2058_vm3, %v18693_v21, %v9643_v42  ;;  %v9658_v2 = vunpack.i.h.bf16 %v9656_v14  ;;  %v9657_v52 = vunpack.i.l.bf16 %v9656_v14  ;;  %v2130_v33 = vsel %vm2125_vm4, %v2063_v39, %v9647_v0 }
  0xf1   : > { %9935 = vrot.lane.b32.xlu1 %v9934_v22, %s10618_s22  ;;  %v2131_v47 = vsel %vm2125_vm4, %v2064_v17, %v9648_v40  ;;  %v9652_v22 = vunpack.i.l.bf16 %v9651_v28  ;;  %v2066_v1 = vsel %vm2058_vm3, %v18696_v27, %v9653_v29  ;;  %v10122_v40 = vld [vmem:[%s18342_s5 + $0x10] sm:$0xff]   ;;  %v9661_v17 = vpop.permute.xlu0 %9660 }
  0xf2   : > { %9930 = vrot.lane.b32.xlu0 %v9929_v9, %s10617_s18  ;;  %v10121_v9 = vld [vmem:[%s18342_s5 + $0x8] sm:$0xff]   ;;  %v2194_v48 = vpack.c.bf16 %v2131_v47, %v2130_v33  ;;  %v9663_v39 = vunpack.i.h.bf16 %v9661_v17  ;;  %v9662_v14 = vunpack.i.l.bf16 %v9661_v17  ;;  %v18699_v33 = vld [vmem:[#allocation12_spill] sm:$0xff] }
  0xf3   : > { %v2065_v42 = vsel %vm2058_vm3, %v18697_v30, %v9652_v22  ;;  %v9666_v35 = vpop.permute.xlu1 %9665  ;;  %3902 = vmatpush1.bf16.msra.mxu1 %v10121_v9  ;;  %v18698_v9 = vld [vmem:[#allocation11_spill] sm:$0xff] }
  0xf4   : > { %v9668_v0 = vunpack.i.h.bf16 %v9666_v35  ;;  %v9667_v21 = vunpack.i.l.bf16 %v9666_v35  ;;  %v12280_v18 = vsel %vm2125_vm4, %v2065_v42, %v9657_v52  ;;  %3903 = vmatprep.subr.bf16.mxu1 %v18695_v11  ;;  %v2068_v28 = vsel %vm2058_vm3, %v18698_v9, %v9663_v39 }
  0xf5   : > { %9945 = vrot.lane.b32.xlu1 %v9944_v16, %s10618_s22  ;;  %8738 = vmatmul.mubr.msk.bf16.gmra.mrb[4].mxu1 %vm2280_vm5, %v2193_v5  ;;  %v2067_v47 = vsel %vm2058_vm3, %v18699_v33, %v9662_v14  ;;  %v9671_v27 = vpop.permute.xlu0 %9670 }
  0xf6   : > { %9940 = vrot.lane.b32.xlu0 %v9939_v55, %s10617_s18  ;;  %v12283_v55 = vsel %vm2125_vm4, %v2066_v1, %v9658_v2  ;;  %8741 = vmatprep.mubr.msk.bf16.mxu1 %vm10619_vm2, %v18686_v43  ;;  %v10123_v2 = vld [vmem:[%s18342_s5 + $0x18] sm:$0xff]   ;;  %v12299_v5 = vsel %vm2125_vm4, %v2067_v47, %v9667_v21  ;;  %v12302_v1 = vsel %vm2125_vm4, %v2068_v28, %v9668_v0  ;;  %v9673_v30 = vunpack.i.h.bf16 %v9671_v27  ;;  %v10124_v0 = vld [vmem:[%s18342_s5 + $0x20] sm:$0xff]  }
  0xf7   : > { %v2195_v16 = vpack.c.bf16 %v12283_v55, %v12280_v18  ;;  %v9676_v52 = vpop.permute.xlu1 %9675  ;;  %3904 = vmatpush1.bf16.msra.mxu1 %v10122_v40  ;;  %v9672_v42 = vunpack.i.l.bf16 %v9671_v27  ;;  %v2196_v35 = vpack.c.bf16 %v12302_v1, %v12299_v5 }
  0xf8   : > { %v9678_v29 = vunpack.i.h.bf16 %v9676_v52  ;;  %v9677_v22 = vunpack.i.l.bf16 %v9676_v52  ;;  %3905 = vmatprep.subr.bf16.mxu1 %v18695_v11  ;;  %v2070_v40 = vsel %vm2058_vm3, %v11821_v6, %v9673_v30 }
  0xf9   : > { %v2069_v17 = vsel %vm2058_vm3, %v11816_v24, %v9672_v42  ;;  %v9681_v39 = vpop.permute.xlu0 %9680 }
  0xfa   : > { %v12315_v14 = vsel %vm2125_vm4, %v2069_v17, %v9677_v22  ;;  %v12318_v9 = vsel %vm2125_vm4, %v2070_v40, %v9678_v29  ;;  %v9683_v6 = vunpack.i.h.bf16 %v9681_v39  ;;  %v9682_v28 = vunpack.i.l.bf16 %v9681_v39 }
  0xfb   : > { %v9686_v18 = vpop.permute.xlu1 %9685  ;;  %3906 = vmatpush1.bf16.msra.mxu1 %v10123_v2  ;;  %v2197_v24 = vpack.c.bf16 %v12318_v9, %v12315_v14  ;;  %v10125_v2 = vld [vmem:[%s18342_s5 + $0x28] sm:$0xff]  }
  0xfc   : > { %v9688_v21 = vunpack.i.h.bf16 %v9686_v18  ;;  %v9687_v55 = vunpack.i.l.bf16 %v9686_v18  ;;  %3907 = vmatprep.subr.bf16.mxu1 %v18695_v11  ;;  %v2072_v33 = vsel %vm2058_vm3, %v11843_v50, %v9683_v6  ;;  %v2071_v47 = vsel %vm2058_vm3, %v11832_v58, %v9682_v28 }
  0xfd   : > { %8742 = vmatmul.mubr.msk.bf16.gmra.mrb[8].mxu1 %vm2280_vm5, %v2194_v48  ;;  %v9691_v27 = vpop.permute.xlu0 %9690 }
  0xfe   : > { %8745 = vmatprep.mubr.msk.bf16.mxu1 %vm10619_vm2, %v18686_v43  ;;  %v12334_v48 = vsel %vm2125_vm4, %v2071_v47, %v9687_v55  ;;  %v12337_v50 = vsel %vm2125_vm4, %v2072_v33, %v9688_v21  ;;  %v9693_v58 = vunpack.i.h.bf16 %v9691_v27  ;;  %v9692_v30 = vunpack.i.l.bf16 %v9691_v27 }
  0xff   : > { %v9696_v52 = vpop.permute.xlu1 %9695  ;;  %3908 = vmatpush1.bf16.msra.mxu1 %v10124_v0  ;;  %v2198_v42 = vpack.c.bf16 %v12337_v50, %v12334_v48  ;;  %v10126_v0 = vld [vmem:[%s18342_s5 + $0x30] sm:$0xff]  }
 0x100   : > { %v9698_v29 = vunpack.i.h.bf16 %v9696_v52  ;;  %v9697_v22 = vunpack.i.l.bf16 %v9696_v52  ;;  %3909 = vmatprep.subr.bf16.mxu1 %v18695_v11  ;;  %v2074_v40 = vsel %vm2058_vm3, %v11847_v34, %v9693_v58  ;;  %v2073_v17 = vsel %vm2058_vm3, %v11851_v32, %v9692_v30 }
 0x101   : > { %v9701_v39 = vpop.permute.xlu0 %9700 }
 0x102   : > { %v12350_v6 = vsel %vm2125_vm4, %v2073_v17, %v9697_v22  ;;  %v12353_v28 = vsel %vm2125_vm4, %v2074_v40, %v9698_v29  ;;  %v9703_v34 = vunpack.i.h.bf16 %v9701_v39  ;;  %v9702_v33 = vunpack.i.l.bf16 %v9701_v39  ;;  %v10127_v29 = vld [vmem:[%s18342_s5 + $0x38] sm:$0xff]   ;;  %v18700_v17 = vld [vmem:[#allocation23_spill] sm:$0xff] }
 0x103   : > { %v9706_v18 = vpop.permute.xlu1 %9705  ;;  %3910 = vmatpush1.bf16.msra.mxu1 %v10125_v2  ;;  %v2199_v32 = vpack.c.bf16 %v12353_v28, %v12350_v6 }
 0x104   : > { %v9708_v21 = vunpack.i.h.bf16 %v9706_v18  ;;  %v9707_v55 = vunpack.i.l.bf16 %v9706_v18  ;;  %3911 = vmatprep.subr.bf16.mxu1 %v18695_v11  ;;  %v2076_v47 = vsel %vm2058_vm3, %v11856_v4, %v9703_v34  ;;  %v2075_v52 = vsel %vm2058_vm3, %v11860_v54, %v9702_v33 }
 0x105   : > { %8746 = vmatmul.mubr.msk.bf16.gmra.mrb[12].mxu1 %vm2280_vm5, %v2195_v16  ;;  %v9711_v58 = vpop.permute.xlu0 %9710 }
 0x106   : > { %8749 = vmatprep.mubr.msk.bf16.mxu1 %vm10619_vm2, %v18686_v43  ;;  %v12369_v16 = vsel %vm2125_vm4, %v2075_v52, %v9707_v55  ;;  %v12372_v4 = vsel %vm2125_vm4, %v2076_v47, %v9708_v21  ;;  %v9713_v54 = vunpack.i.h.bf16 %v9711_v58  ;;  %v9712_v30 = vunpack.i.l.bf16 %v9711_v58  ;;  %v10128_v21 = vld [vmem:[%s18342_s5 + $0x40] sm:$0xff]  }
 0x107   : > { %v9716_v2 = vpop.permute.xlu1 %9715  ;;  %3912 = vmatpush1.bf16.msra.mxu1 %v10126_v0  ;;  %v2200_v40 = vpack.c.bf16 %v12372_v4, %v12369_v16  ;;  %v18701_v0 = vld [vmem:[#allocation14_spill] sm:$0xff] }
 0x108   : > { %v9718_v22 = vunpack.i.h.bf16 %v9716_v2  ;;  %v9717_v27 = vunpack.i.l.bf16 %v9716_v2  ;;  %3913 = vmatprep.subr.bf16.mxu1 %v18695_v11  ;;  %v2078_v18 = vsel %vm2058_vm3, %v18700_v17, %v9713_v54  ;;  %v2077_v39 = vsel %vm2058_vm3, %v18701_v0, %v9712_v30  ;;  %v10129_v17 = vld [vmem:[%s18342_s5 + $0x48] sm:$0xff]  }
 0x109   : > { %v9721_v47 = vpop.permute.xlu0 %9720 }
 0x10a   : > { %v12385_v52 = vsel %vm2125_vm4, %v2077_v39, %v9717_v27  ;;  %v12388_v2 = vsel %vm2125_vm4, %v2078_v18, %v9718_v22  ;;  %v9723_v58 = vunpack.i.h.bf16 %v9721_v47  ;;  %v9722_v54 = vunpack.i.l.bf16 %v9721_v47 }
 0x10b   : > { %v9726_v34 = vpop.permute.xlu1 %9725  ;;  %3914 = vmatpush1.bf16.msra.mxu1 %v10127_v29  ;;  %v2201_v29 = vpack.c.bf16 %v12388_v2, %v12385_v52 }
 0x10c   : > { %v9728_v55 = vunpack.i.h.bf16 %v9726_v34  ;;  %v9727_v33 = vunpack.i.l.bf16 %v9726_v34  ;;  %3915 = vmatprep.subr.bf16.mxu1 %v18695_v11  ;;  %v2080_v30 = vsel %vm2058_vm3, %v11891_v13, %v9723_v58  ;;  %v2079_v27 = vsel %vm2058_vm3, %v11880_v51, %v9722_v54 }
 0x10d   : > { %8750 = vmatmul.mubr.msk.bf16.gmra.mrb[16].mxu1 %vm2280_vm5, %v2196_v35  ;;  %v9731_v5 = vpop.permute.xlu0 %9730 }
 0x10e   : > { %8753 = vmatprep.mubr.msk.bf16.mxu1 %vm10619_vm2, %v18686_v43  ;;  %v12407_v1 = vsel %vm2125_vm4, %v2079_v27, %v9727_v33  ;;  %v12410_v13 = vsel %vm2125_vm4, %v2080_v30, %v9728_v55  ;;  %v9733_v51 = vunpack.i.h.bf16 %v9731_v5  ;;  %v9732_v35 = vunpack.i.l.bf16 %v9731_v5  ;;  %v10130_v55 = vld [vmem:[%s18342_s5 + $0x50] sm:$0xff]  }
 0x10f   : > { %v9736_v22 = vpop.permute.xlu1 %9735  ;;  %3916 = vmatpush1.bf16.msra.mxu1 %v10128_v21  ;;  %v2202_v39 = vpack.c.bf16 %v12410_v13, %v12407_v1 }
 0x110   : > { %v9738_v18 = vunpack.i.h.bf16 %v9736_v22  ;;  %v9737_v0 = vunpack.i.l.bf16 %v9736_v22  ;;  %3917 = vmatprep.subr.bf16.mxu1 %v18695_v11  ;;  %v2082_v34 = vsel %vm2058_vm3, %v11895_v57, %v9733_v51  ;;  %v2081_v21 = vsel %vm2058_vm3, %v11899_v62, %v9732_v35 }
 0x111   : > { %v9741_v54 = vpop.permute.xlu0 %9740 }
 0x112   : > { %v12423_v30 = vsel %vm2125_vm4, %v2081_v21, %v9737_v0  ;;  %v12426_v27 = vsel %vm2125_vm4, %v2082_v34, %v9738_v18  ;;  %v9743_v57 = vunpack.i.h.bf16 %v9741_v54  ;;  %v9742_v22 = vunpack.i.l.bf16 %v9741_v54 }
 0x113   : > { %v9746_v47 = vpop.permute.xlu1 %9745  ;;  %3918 = vmatpush1.bf16.msra.mxu1 %v10129_v17  ;;  %v2203_v62 = vpack.c.bf16 %v12426_v27, %v12423_v30 }
 0x114   : > { %v9748_v33 = vunpack.i.h.bf16 %v9746_v47  ;;  %v9747_v58 = vunpack.i.l.bf16 %v9746_v47  ;;  %3919 = vmatprep.subr.bf16.mxu1 %v18695_v11  ;;  %v2084_v17 = vsel %vm2058_vm3, %v11904_v41, %v9743_v57  ;;  %v2083_v0 = vsel %vm2058_vm3, %v11908_v31, %v9742_v22 }
 0x115   : > { %8754 = vmatmul.mubr.msk.bf16.gmra.mrb[20].mxu1 %vm2280_vm5, %v2197_v24  ;;  %v9751_v35 = vpop.permute.xlu0 %9750 }
 0x116   : > { %8757 = vmatprep.mubr.msk.bf16.mxu1 %vm10619_vm2, %v18686_v43  ;;  %v12442_v34 = vsel %vm2125_vm4, %v2083_v0, %v9747_v58  ;;  %v12445_v14 = vsel %vm2125_vm4, %v2084_v17, %v9748_v33  ;;  %v9753_v41 = vunpack.i.h.bf16 %v9751_v35  ;;  %v9752_v9 = vunpack.i.l.bf16 %v9751_v35 }
 0x117   : > { %v9756_v18 = vpop.permute.xlu1 %9755  ;;  %3920 = vmatpush1.bf16.msra.mxu1 %v10130_v55  ;;  %v2204_v31 = vpack.c.bf16 %v12445_v14, %v12442_v34 }
 0x118   : > { %v9758_v5 = vunpack.i.h.bf16 %v9756_v18  ;;  %v9757_v51 = vunpack.i.l.bf16 %v9756_v18  ;;  %3921 = vmatprep.subr.bf16.mxu1 %v18695_v11  ;;  %v2086_v24 = vsel %vm2058_vm3, %v11917_v49, %v9753_v41  ;;  %v2085_v21 = vsel %vm2058_vm3, %v11912_v44, %v9752_v9  ;;  %v10131_v44 = vld [vmem:[%s18342_s5 + $0x58] sm:$0xff]  }
 0x119   : > { %v9761_v54 = vpop.permute.xlu0 %9760 }
 0x11a   : > { %v12455_v33 = vsel %vm2125_vm4, %v2085_v21, %v9757_v51  ;;  %v12458_v57 = vsel %vm2125_vm4, %v2086_v24, %v9758_v5  ;;  %v9763_v22 = vunpack.i.h.bf16 %v9761_v54  ;;  %v9762_v17 = vunpack.i.l.bf16 %v9761_v54 }
 0x11b   : > { %v9766_v47 = vpop.permute.xlu1 %9765  ;;  %v2205_v0 = vpack.c.bf16 %v12458_v57, %v12455_v33  ;;  %3922 = vmatpush1.bf16.msra.mxu1 %v10131_v44 }
 0x11c   : > { %v9768_v55 = vunpack.i.h.bf16 %v9766_v47  ;;  %v9767_v58 = vunpack.i.l.bf16 %v9766_v47  ;;  %v2088_v49 = vsel %vm2058_vm3, %v11939_v59, %v9763_v22  ;;  %v2087_v18 = vsel %vm2058_vm3, %v11928_v23, %v9762_v17  ;;  %3923 = vmatprep.subr.bf16.mxu1 %v18695_v11 }
 0x11d   : > { %8758 = vmatmul.mubr.msk.bf16.gmra.mrb[24].mxu1 %vm2280_vm5, %v2198_v42  ;;  %v9771_v41 = vpop.permute.xlu0 %9770 }
 0x11e   : > { %8761 = vmatprep.mubr.msk.bf16.mxu1 %vm10619_vm2, %v18686_v43  ;;  %v12476_v48 = vsel %vm2125_vm4, %v2087_v18, %v9767_v58  ;;  %v12479_v50 = vsel %vm2125_vm4, %v2088_v49, %v9768_v55  ;;  %v9773_v42 = vunpack.i.h.bf16 %v9771_v41  ;;  %v9772_v9 = vunpack.i.l.bf16 %v9771_v41 }
 0x11f   : > { %v9776_v5 = vpop.permute.xlu1 %9775  ;;  %v2206_v59 = vpack.c.bf16 %v12479_v50, %v12476_v48 }
 0x120   : > { %v9778_v51 = vunpack.i.h.bf16 %v9776_v5  ;;  %v9777_v35 = vunpack.i.l.bf16 %v9776_v5  ;;  %v2090_v23 = vsel %vm2058_vm3, %v11943_v38, %v9773_v42  ;;  %v2089_v24 = vsel %vm2058_vm3, %v11947_v63, %v9772_v9  ;;  %v18702_v42 = vld [vmem:[#allocation25_spill] sm:$0xff]  ;;  %v18703_v9 = vld [vmem:[#allocation24_spill] sm:$0xff] }
 0x122   : > { %v12489_v55 = vsel %vm2125_vm4, %v2089_v24, %v9777_v35  ;;  %v12492_v22 = vsel %vm2125_vm4, %v2090_v23, %v9778_v51 }
 0x123   : > { %v9786_v21 = vpop.permute.xlu1 %9785  ;;  %v9781_v54 = vpop.permute.xlu0 %9780  ;;  %v2207_v49 = vpack.c.bf16 %v12492_v22, %v12489_v55  ;;  %v10135_v55 = vld [vmem:[%s18342_s5 + $0x78] sm:$0xff]  }
 0x124   : > { %v9788_v47 = vunpack.i.h.bf16 %v9786_v21  ;;  %v9787_v58 = vunpack.i.l.bf16 %v9786_v21  ;;  %v9783_v17 = vunpack.i.h.bf16 %v9781_v54  ;;  %v9782_v44 = vunpack.i.l.bf16 %v9781_v54 }
 0x125   : > { %8762 = vmatmul.mubr.msk.bf16.gmra.mrb[28].mxu1 %vm2280_vm5, %v2199_v32 }
 0x126   : > { %v2092_v38 = vsel %vm2058_vm3, %v11952_v12, %v9783_v17  ;;  %v2091_v63 = vsel %vm2058_vm3, %v11956_v37, %v9782_v44  ;;  %8765 = vmatprep.mubr.msk.bf16.mxu1 %vm10619_vm2, %v18686_v43 }
 0x127   : > { %v12507_v41 = vsel %vm2125_vm4, %v2091_v63, %v9787_v58  ;;  %v12510_v6 = vsel %vm2125_vm4, %v2092_v38, %v9788_v47 }
 0x128   : > { %v9796_v18 = vpop.permute.xlu1 %9795  ;;  %v2208_v12 = vpack.c.bf16 %v12510_v6, %v12507_v41 }
 0x129   : > { %v9798_v5 = vunpack.i.h.bf16 %v9796_v18  ;;  %v9797_v51 = vunpack.i.l.bf16 %v9796_v18  ;;  %v9791_v35 = vpop.permute.xlu0 %9790  ;;  %v10132_v18 = vld [vmem:[%s18342_s5 + $0x60] sm:$0xff]  }
 0x12a   : > { %v9793_v28 = vunpack.i.h.bf16 %v9791_v35  ;;  %v9792_v32 = vunpack.i.l.bf16 %v9791_v35  ;;  %3924 = vmatpush1.bf16.msra.mxu1 %v10132_v18 }
 0x12b   : > { %3925 = vmatprep.subr.bf16.mxu1 %v18695_v11 }
 0x12c   : > { %v2094_v37 = vsel %vm2058_vm3, %v18702_v42, %v9793_v28  ;;  %v2093_v23 = vsel %vm2058_vm3, %v18703_v9, %v9792_v32  ;;  %v18704_v9 = vld [vmem:[#allocation28_spill] sm:$0xff] }
 0x12d   : > { %v9806_v24 = vpop.permute.xlu1 %9805  ;;  %v12519_v58 = vsel %vm2125_vm4, %v2093_v23, %v9797_v51  ;;  %v12522_v47 = vsel %vm2125_vm4, %v2094_v37, %v9798_v5  ;;  %8766 = vmatmul.mubr.msk.bf16.gmra.mrb[32].mxu1 %vm2280_vm5, %v2200_v40 }
 0x12e   : > { %v9808_v21 = vunpack.i.h.bf16 %v9806_v24  ;;  %v9807_v54 = vunpack.i.l.bf16 %v9806_v24  ;;  %v9801_v17 = vpop.permute.xlu0 %9800  ;;  %v2209_v63 = vpack.c.bf16 %v12522_v47, %v12519_v58  ;;  %8769 = vmatprep.mubr.msk.bf16.mxu1 %vm10619_vm2, %v18686_v43 }
 0x12f   : > { %v9803_v44 = vunpack.i.h.bf16 %v9801_v17  ;;  %v9802_v38 = vunpack.i.l.bf16 %v9801_v17 }
 0x131   : > { %v2096_v51 = vsel %vm2058_vm3, %v11987_v20, %v9803_v44  ;;  %v2095_v5 = vsel %vm2058_vm3, %v11976_v25, %v9802_v38  ;;  %v9816_v35 = vpop.permute.xlu1 %9815 }
 0x132   : > { %v9818_v28 = vunpack.i.h.bf16 %v9816_v35  ;;  %v9817_v32 = vunpack.i.l.bf16 %v9816_v35  ;;  %v9811_v42 = vpop.permute.xlu0 %9810  ;;  %v12540_v16 = vsel %vm2125_vm4, %v2095_v5, %v9807_v54  ;;  %v12543_v4 = vsel %vm2125_vm4, %v2096_v51, %v9808_v21 }
 0x133   : > { %v9813_v40 = vunpack.i.h.bf16 %v9811_v42  ;;  %v9812_v37 = vunpack.i.l.bf16 %v9811_v42  ;;  %v2210_v20 = vpack.c.bf16 %v12543_v4, %v12540_v16  ;;  %v18706_v42 = vld [vmem:[#allocation15_spill] sm:$0xff] }
 0x135   : > { %v2098_v25 = vsel %vm2058_vm3, %v11991_v36, %v9813_v40  ;;  %v2097_v23 = vsel %vm2058_vm3, %v18704_v9, %v9812_v37  ;;  %8770 = vmatmul.mubr.msk.bf16.gmra.mrb[36].mxu1 %vm2280_vm5, %v2201_v29  ;;  %v18705_v36 = vld [vmem:[#allocation29_spill] sm:$0xff] }
 0x136   : > { %v9826_v24 = vpop.permute.xlu1 %9825  ;;  %v12553_v21 = vsel %vm2125_vm4, %v2097_v23, %v9817_v32  ;;  %v12556_v38 = vsel %vm2125_vm4, %v2098_v25, %v9818_v28  ;;  %8773 = vmatprep.mubr.msk.bf16.mxu1 %vm10619_vm2, %v18686_v43 }
 0x137   : > { %v9828_v54 = vunpack.i.h.bf16 %v9826_v24  ;;  %v9827_v17 = vunpack.i.l.bf16 %v9826_v24  ;;  %v9821_v44 = vpop.permute.xlu0 %9820  ;;  %v18707_v24 = vld [vmem:[#allocation17_spill] sm:$0xff]  ;;  %v18722_v22 = vpack.c.bf16 %v12556_v38, %v12553_v21 }
 0x138   : > { %v9823_v18 = vunpack.i.h.bf16 %v9821_v44  ;;  %v9822_v51 = vunpack.i.l.bf16 %v9821_v44 }
 0x13a   : > { %v2100_v35 = vsel %vm2058_vm3, %v18705_v36, %v9823_v18  ;;  %v2099_v32 = vsel %vm2058_vm3, %v18706_v42, %v9822_v51  ;;  %v9836_v40 = vpop.permute.xlu1 %9835  ;;  %v18708_v18 = vld [vmem:[#allocation16_spill] sm:$0xff] }
 0x13b   : > { %v9838_v28 = vunpack.i.h.bf16 %v9836_v40  ;;  %v9837_v37 = vunpack.i.l.bf16 %v9836_v40  ;;  %v9831_v25 = vpop.permute.xlu0 %9830  ;;  %v12571_v9 = vsel %vm2125_vm4, %v2099_v32, %v9827_v17  ;;  %v12574_v52 = vsel %vm2125_vm4, %v2100_v35, %v9828_v54 }
 0x13c   : > { %v9833_v2 = vunpack.i.h.bf16 %v9831_v25  ;;  %v9832_v29 = vunpack.i.l.bf16 %v9831_v25  ;;  %v2212_v23 = vpack.c.bf16 %v12574_v52, %v12571_v9 }
 0x13d   : > { %8774 = vmatmul.mubr.msk.bf16.gmra.mrb[40].mxu1 %vm2280_vm5, %v2202_v39 }
 0x13e   : > { %v2102_v44 = vsel %vm2058_vm3, %v18707_v24, %v9833_v2  ;;  %v2101_v51 = vsel %vm2058_vm3, %v18708_v18, %v9832_v29  ;;  %8777 = vmatprep.mubr.msk.bf16.mxu1 %vm10619_vm2, %v18686_v43 }
 0x13f   : > { %v9846_v36 = vpop.permute.xlu1 %9845  ;;  %v12583_v17 = vsel %vm2125_vm4, %v2101_v51, %v9837_v37  ;;  %v12586_v54 = vsel %vm2125_vm4, %v2102_v44, %v9838_v28 }
 0x140   : > { %v9848_v42 = vunpack.i.h.bf16 %v9846_v36  ;;  %v9847_v40 = vunpack.i.l.bf16 %v9846_v36  ;;  %v9841_v5 = vpop.permute.xlu0 %9840  ;;  %v2213_v25 = vpack.c.bf16 %v12586_v54, %v12583_v17 }
 0x141   : > { %v9843_v35 = vunpack.i.h.bf16 %v9841_v5  ;;  %v9842_v32 = vunpack.i.l.bf16 %v9841_v5 }
 0x143   : > { %v2104_v2 = vsel %vm2058_vm3, %v12035_v46, %v9843_v35  ;;  %v2103_v37 = vsel %vm2058_vm3, %v12024_v45, %v9842_v32  ;;  %v9856_v29 = vpop.permute.xlu1 %9855 }
 0x144   : > { %v9858_v28 = vunpack.i.h.bf16 %v9856_v29  ;;  %v9857_v5 = vunpack.i.l.bf16 %v9856_v29  ;;  %v9851_v24 = vpop.permute.xlu0 %9850  ;;  %v12601_v44 = vsel %vm2125_vm4, %v2103_v37, %v9847_v40  ;;  %v12604_v1 = vsel %vm2125_vm4, %v2104_v2, %v9848_v42 }
 0x145   : > { %v9853_v13 = vunpack.i.h.bf16 %v9851_v24  ;;  %v9852_v39 = vunpack.i.l.bf16 %v9851_v24  ;;  %8778 = vmatmul.mubr.msk.bf16.gmra.mrb[44].mxu1 %vm2280_vm5, %v2203_v62  ;;  %v18710_v24 = vld [vmem:[#allocation26_spill] sm:$0xff] }
 0x146   : > { %8781 = vmatprep.mubr.msk.bf16.mxu1 %vm10619_vm2, %v18686_v43 }
 0x147   : > { %v2106_v45 = vsel %vm2058_vm3, %v12039_v7, %v9853_v13  ;;  %v2105_v18 = vsel %vm2058_vm3, %v12043_v61, %v9852_v39  ;;  %v9866_v51 = vpop.permute.xlu1 %9865  ;;  %v18709_v7 = vld [vmem:[#allocation19_spill] sm:$0xff] }
 0x148   : > { %v9868_v36 = vunpack.i.h.bf16 %v9866_v51  ;;  %v9867_v35 = vunpack.i.l.bf16 %v9866_v51  ;;  %v9861_v32 = vpop.permute.xlu0 %9860  ;;  %v12613_v40 = vsel %vm2125_vm4, %v2105_v18, %v9857_v5  ;;  %v12616_v42 = vsel %vm2125_vm4, %v2106_v45, %v9858_v28 }
 0x149   : > { %v9863_v2 = vunpack.i.h.bf16 %v9861_v32  ;;  %v9862_v37 = vunpack.i.l.bf16 %v9861_v32  ;;  %v18711_v32 = vld [vmem:[#allocation30_spill] sm:$0xff]  ;;  %v18724_v41 = vpack.c.bf16 %v12616_v42, %v12613_v40 }
 0x14b   : > { %v2108_v61 = vsel %vm2058_vm3, %v18709_v7, %v9863_v2  ;;  %v2107_v5 = vsel %vm2058_vm3, %v18710_v24, %v9862_v37  ;;  %v9876_v13 = vpop.permute.xlu1 %9875  ;;  %v18712_v37 = vld [vmem:[#allocation27_spill] sm:$0xff] }
 0x14c   : > { %v9878_v28 = vunpack.i.h.bf16 %v9876_v13  ;;  %v9877_v39 = vunpack.i.l.bf16 %v9876_v13  ;;  %v9871_v45 = vpop.permute.xlu0 %9870  ;;  %v12631_v18 = vsel %vm2125_vm4, %v2107_v5, %v9867_v35  ;;  %v12634_v30 = vsel %vm2125_vm4, %v2108_v61, %v9868_v36  ;;  %v10133_v61 = vld [vmem:[%s18342_s5 + $0x68] sm:$0xff]  }
 0x14d   : > { %v9873_v27 = vunpack.i.h.bf16 %v9871_v45  ;;  %v9872_v62 = vunpack.i.l.bf16 %v9871_v45  ;;  %8782 = vmatmul.mubr.msk.bf16.gmra.mrb[48].mxu1 %vm2280_vm5, %v2204_v31  ;;  %v18713_v31 = vld [vmem:[#allocation31_spill] sm:$0xff]  ;;  %v18725_v6 = vpack.c.bf16 %v12634_v30, %v12631_v18 }
 0x14e   : > { %8785 = vmatprep.mubr.msk.bf16.mxu1 %vm10619_vm2, %v18686_v43  ;;  %3926 = vmatpush1.bf16.msra.mxu1 %v10133_v61 }
 0x14f   : > { %v2110_v2 = vsel %vm2058_vm3, %v18711_v32, %v9873_v27  ;;  %v2109_v7 = vsel %vm2058_vm3, %v18712_v37, %v9872_v62  ;;  %v9886_v24 = vpop.permute.xlu1 %9885  ;;  %3927 = vmatprep.subr.bf16.mxu1 %v18695_v11 }
 0x150   : > { %v9888_v13 = vunpack.i.h.bf16 %v9886_v24  ;;  %v9887_v29 = vunpack.i.l.bf16 %v9886_v24  ;;  %v9881_v46 = vpop.permute.xlu0 %9880  ;;  %v12643_v35 = vsel %vm2125_vm4, %v2109_v7, %v9877_v39  ;;  %v12646_v36 = vsel %vm2125_vm4, %v2110_v2, %v9878_v28  ;;  %v18714_v24 = vld [vmem:[#allocation32_spill] sm:$0xff] }
 0x151   : > { %v9883_v5 = vunpack.i.h.bf16 %v9881_v46  ;;  %v9882_v45 = vunpack.i.l.bf16 %v9881_v46 }
 0x153   : > { %v2112_v39 = vsel %vm2058_vm3, %v12083_v60, %v9883_v5  ;;  %v2111_v28 = vsel %vm2058_vm3, %v12072_v15, %v9882_v45  ;;  %v9896_v62 = vpop.permute.xlu1 %9895 }
 0x154   : > { %v9898_v46 = vunpack.i.h.bf16 %v9896_v62  ;;  %v9897_v32 = vunpack.i.l.bf16 %v9896_v62  ;;  %v9891_v2 = vpop.permute.xlu0 %9890  ;;  %v12664_v37 = vsel %vm2125_vm4, %v2111_v28, %v9887_v29  ;;  %v12667_v34 = vsel %vm2125_vm4, %v2112_v39, %v9888_v13 }
 0x155   : > { %v9893_v60 = vunpack.i.h.bf16 %v9891_v2  ;;  %v9892_v14 = vunpack.i.l.bf16 %v9891_v2  ;;  %8786 = vmatmul.mubr.msk.bf16.gmra.mrb[52].mxu1 %vm2280_vm5, %v2205_v0  ;;  %v18727_v58 = vpack.c.bf16 %v12667_v34, %v12664_v37 }
 0x156   : > { %8789 = vmatprep.mubr.msk.bf16.mxu1 %vm10619_vm2, %v18686_v43 }
 0x157   : > { %v2114_v7 = vsel %vm2058_vm3, %v18713_v31, %v9893_v60  ;;  %v2113_v61 = vsel %vm2058_vm3, %v18714_v24, %v9892_v14  ;;  %v9906_v5 = vpop.permute.xlu1 %9905  ;;  %v18715_v60 = vld [vmem:[#allocation33_spill] sm:$0xff]  ;;  %v18716_v31 = vld [vmem:[#allocation40_spill] sm:$0xff] }
 0x158   : > { %v9908_v45 = vunpack.i.h.bf16 %v9906_v5  ;;  %v9907_v29 = vunpack.i.l.bf16 %v9906_v5  ;;  %v9901_v28 = vpop.permute.xlu0 %9900  ;;  %v12677_v13 = vsel %vm2125_vm4, %v2113_v61, %v9897_v32  ;;  %v12680_v39 = vsel %vm2125_vm4, %v2114_v7, %v9898_v46 }
 0x159   : > { %v9903_v62 = vunpack.i.h.bf16 %v9901_v28  ;;  %v9902_v2 = vunpack.i.l.bf16 %v9901_v28  ;;  %v18728_v9 = vpack.c.bf16 %v12680_v39, %v12677_v13 }
 0x15b   : > { %v2116_v14 = vsel %vm2058_vm3, %v18715_v60, %v9903_v62  ;;  %v2115_v32 = vsel %vm2058_vm3, %v18716_v31, %v9902_v2  ;;  %v9916_v24 = vpop.permute.xlu1 %9915  ;;  %v18717_v62 = vld [vmem:[#allocation34_spill] sm:$0xff]  ;;  %v18718_v60 = vld [vmem:[#allocation35_spill] sm:$0xff] }
 0x15c   : > { %v9918_v46 = vunpack.i.h.bf16 %v9916_v24  ;;  %v9917_v7 = vunpack.i.l.bf16 %v9916_v24  ;;  %v9911_v61 = vpop.permute.xlu0 %9910  ;;  %v12695_v5 = vsel %vm2125_vm4, %v2115_v32, %v9907_v29  ;;  %v12698_v33 = vsel %vm2125_vm4, %v2116_v14, %v9908_v45 }
 0x15d   : > { %v9913_v57 = vunpack.i.h.bf16 %v9911_v61  ;;  %v9912_v0 = vunpack.i.l.bf16 %v9911_v61  ;;  %v2220_v28 = vpack.c.bf16 %v12698_v33, %v12695_v5  ;;  %8790 = vmatmul.mubr.msk.bf16.gmra.mrb[56].mxu1 %vm2280_vm5, %v2206_v59 }
 0x15e   : > { %8793 = vmatprep.mubr.msk.bf16.mxu1 %vm10619_vm2, %v18686_v43 }
 0x15f   : > { %v2118_v2 = vsel %vm2058_vm3, %v18717_v62, %v9913_v57  ;;  %v2117_v31 = vsel %vm2058_vm3, %v18718_v60, %v9912_v0  ;;  %v9926_v15 = vpop.permute.xlu1 %9925  ;;  %v10134_v62 = vld [vmem:[%s18342_s5 + $0x70] sm:$0xff]   ;;  %v18719_v60 = vld [vmem:[#allocation36_spill] sm:$0xff] }
 0x160   : > { %v9928_v24 = vunpack.i.h.bf16 %v9926_v15  ;;  %v9927_v27 = vunpack.i.l.bf16 %v9926_v15  ;;  %v9921_v51 = vpop.permute.xlu0 %9920  ;;  %v12707_v29 = vsel %vm2125_vm4, %v2117_v31, %v9917_v7  ;;  %v12710_v45 = vsel %vm2125_vm4, %v2118_v2, %v9918_v46  ;;  %3928 = vmatpush1.bf16.msra.mxu1 %v10134_v62 }
 0x161   : > { %v9923_v14 = vunpack.i.h.bf16 %v9921_v51  ;;  %v9922_v32 = vunpack.i.l.bf16 %v9921_v51  ;;  %v2221_v61 = vpack.c.bf16 %v12710_v45, %v12707_v29  ;;  %3929 = vmatprep.subr.bf16.mxu1 %v18695_v11  ;;  %v18720_v62 = vrot.slane %v11812_v53, 7 }
 0x163   : > { %v2120_v15 = vsel %vm2058_vm3, %v12129_v26, %v9923_v14  ;;  %v2119_v7 = vsel %vm2058_vm3, %v12120_v56, %v9922_v32  ;;  %v9936_v57 = vpop.permute.xlu1 %9935 }
 0x164   : > { %v9938_v46 = vunpack.i.h.bf16 %v9936_v57  ;;  %v9937_v51 = vunpack.i.l.bf16 %v9936_v57  ;;  %v9931_v0 = vpop.permute.xlu0 %9930  ;;  %v12728_v48 = vsel %vm2125_vm4, %v2119_v7, %v9927_v27  ;;  %v12731_v50 = vsel %vm2125_vm4, %v2120_v15, %v9928_v24  ;;  %3930 = vmatpush1.bf16.msra.mxu1 %v10135_v55 }
 0x165   : > { %v9933_v26 = vunpack.i.h.bf16 %v9931_v0  ;;  %v9932_v59 = vunpack.i.l.bf16 %v9931_v0  ;;  %v2222_v56 = vpack.c.bf16 %v12731_v50, %v12728_v48  ;;  %8794 = vmatmul.mubr.msk.bf16.gmra.mrb[60].mxu1 %vm2280_vm5, %v2207_v49  ;;  %8865 = vmatprep.subr.bf16.mxu1 %v18686_v43  ;;  %v18723_v49 = vpack.c.bf16 %v12604_v1, %v12601_v44 }
 0x166   : > { %8797 = vmatprep.mubr.msk.bf16.mxu1 %vm10619_vm2, %v18686_v43 }
 0x167   : > { %v2122_v2 = vsel %vm2058_vm3, %v12133_v10, %v9933_v26  ;;  %v2121_v31 = vsel %vm2058_vm3, %v18719_v60, %v9932_v59  ;;  %v9946_v14 = vpop.permute.xlu1 %9945  ;;  %v1331_v26 = vsel %vm1330_vm1, %v18720_v62, %v12208_v19 }
 0x168   : > { %v9948_v27 = vunpack.i.h.bf16 %v9946_v14  ;;  %v9947_v32 = vunpack.i.l.bf16 %v9946_v14  ;;  %v9941_v7 = vpop.permute.xlu0 %9940  ;;  %v12741_v24 = vsel %vm2125_vm4, %v2121_v31, %v9937_v51  ;;  %v12744_v15 = vsel %vm2125_vm4, %v2122_v2, %v9938_v46  ;;  %v18721_v46 = vld [vmem:[#allocation37_spill] sm:$0xff] }
 0x169   : > { %v9943_v57 = vunpack.i.h.bf16 %v9941_v7  ;;  %v9942_v0 = vunpack.i.l.bf16 %v9941_v7  ;;  %v2223_v10 = vpack.c.bf16 %v12744_v15, %v12741_v24 }
 0x16b   : > { %v2124_v51 = vsel %vm2058_vm3, %v1331_v26, %v9943_v57  ;;  %v2123_v59 = vsel %vm2058_vm3, %v18721_v46, %v9942_v0 }
 0x16c   : > { %v12763_v2 = vsel %vm2125_vm4, %v2123_v59, %v9947_v32  ;;  %v12766_v53 = vsel %vm2125_vm4, %v2124_v51, %v9948_v27 }
 0x16d   : > { %v2224_v60 = vpack.c.bf16 %v12766_v53, %v12763_v2  ;;  %8798 = vmatmul.mubr.msk.bf16.gmra.mrb[64].mxu1 %vm2280_vm5, %v2208_v12  ;;  %v18726_v12 = vpack.c.bf16 %v12646_v36, %v12643_v35 }
 0x16e   : > { %8801 = vmatprep.mubr.msk.bf16.mxu1 %vm10619_vm2, %v18686_v43 }
 0x175   : > { %8802 = vmatmul.mubr.msk.bf16.gmra.mrb[68].mxu1 %vm2280_vm5, %v2209_v63  ;;  %v12843_v63 = vld [vmem:[%s18345_s8] ss:$0 sm:$0xff] }
 0x176   : > { %8805 = vmatprep.mubr.msk.bf16.mxu1 %vm10619_vm2, %v18686_v43 }
 0x17d   : > { %8806 = vmatmul.mubr.msk.bf16.gmra.mrb[72].mxu1 %vm2280_vm5, %v2210_v20 }
 0x17e   : > { %8809 = vmatprep.mubr.msk.bf16.mxu1 %vm10619_vm2, %v18686_v43 }
 0x185   : > { %8810 = vmatmul.mubr.msk.bf16.gmra.mrb[76].mxu1 %vm2280_vm5, %v18722_v22 }
 0x186   : > { %8813 = vmatprep.mubr.msk.bf16.mxu1 %vm10619_vm2, %v18686_v43 }
 0x18d   : > { %8814 = vmatmul.mubr.msk.bf16.gmra.mrb[80].mxu1 %vm2280_vm5, %v2212_v23 }
 0x18e   : > { %8817 = vmatprep.mubr.msk.bf16.mxu1 %vm10619_vm2, %v18686_v43 }
 0x195   : > { %8818 = vmatmul.mubr.msk.bf16.gmra.mrb[84].mxu1 %vm2280_vm5, %v2213_v25 }
 0x196   : > { %8821 = vmatprep.mubr.msk.bf16.mxu1 %vm10619_vm2, %v18686_v43 }
 0x19d   : > { %8822 = vmatmul.mubr.msk.bf16.gmra.mrb[88].mxu1 %vm2280_vm5, %v18723_v49 }
 0x19e   : > { %8825 = vmatprep.mubr.msk.bf16.mxu1 %vm10619_vm2, %v18686_v43 }
 0x1a5   : > { %8826 = vmatmul.mubr.msk.bf16.gmra.mrb[92].mxu1 %vm2280_vm5, %v18724_v41 }
 0x1a6   : > { %8829 = vmatprep.mubr.msk.bf16.mxu1 %vm10619_vm2, %v18686_v43 }
 0x1ad   : > { %8830 = vmatmul.mubr.msk.bf16.gmra.mrb[96].mxu1 %vm2280_vm5, %v18725_v6 }
 0x1ae   : > { %8833 = vmatprep.mubr.msk.bf16.mxu1 %vm10619_vm2, %v18686_v43 }
 0x1b5   : > { %8834 = vmatmul.mubr.msk.bf16.gmra.mrb[100].mxu1 %vm2280_vm5, %v18726_v12 }
 0x1b6   : > { %8837 = vmatprep.mubr.msk.bf16.mxu1 %vm10619_vm2, %v18686_v43 }
 0x1bd   : > { %8838 = vmatmul.mubr.msk.bf16.gmra.mrb[104].mxu1 %vm2280_vm5, %v18727_v58 }
 0x1be   : > { %8841 = vmatprep.mubr.msk.bf16.mxu1 %vm10619_vm2, %v18686_v43 }
 0x1c0   : > { %v2414_v47 = vpop.f32.mrb[0].mxu1 }
 0x1c1   : > { %v8735_v16 = vpop.f32.mrb[1].mxu1 }
 0x1c2   : > { %v2417_v4 = vpop.f32.mrb[2].mxu1 }
 0x1c3   : > { %v12846_v20 = vadd.f32 %v12843_v63, %v2417_v4  ;;  %v8736_v21 = vpop.f32.mrb[3].mxu1 }
 0x1c5   : > { %v2678_v38 = vmul.f32 %v12846_v20, %v12846_v20  ;;  %8842 = vmatmul.mubr.msk.bf16.gmra.mrb[108].mxu1 %vm2280_vm5, %v18728_v9 }
 0x1c6   : > { %8845 = vmatprep.mubr.msk.bf16.mxu1 %vm10619_vm2, %v18686_v43 }
 0x1c7   : > { %v2744_v52 = vmul.f32 %v2678_v38, %v12846_v20 }
 0x1c8   : > { %v2422_v23 = vpop.f32.mrb[4].mxu1 }
 0x1c9   : > { %v2810_v17 = vmul.f32 0.044715, %v2744_v52  ;;  %v12858_v54 = vadd.f32 %v12843_v63, %v2422_v23  ;;  %v8739_v25 = vpop.f32.mrb[5].mxu1 }
 0x1ca   : > { %v2425_v44 = vpop.f32.mrb[6].mxu1 }
 0x1cb   : > { %v2876_v1 = vadd.f32 %v2810_v17, %v12846_v20  ;;  %v2679_v40 = vmul.f32 %v12858_v54, %v12858_v54  ;;  %v12864_v42 = vadd.f32 %v12843_v63, %v2425_v44  ;;  %v8740_v18 = vpop.f32.mrb[7].mxu1 }
 0x1cd   : > { %v2745_v30 = vmul.f32 %v2679_v40, %v12858_v54  ;;  %v2680_v35 = vmul.f32 %v12864_v42, %v12864_v42  ;;  %8846 = vmatmul.mubr.msk.bf16.gmra.mrb[112].mxu1 %vm2280_vm5, %v2220_v28  ;;  %v2942_v36 = vmul.f32 0.7978846, %v2876_v1 }
 0x1ce   : > { %8849 = vmatprep.mubr.msk.bf16.mxu1 %vm10619_vm2, %v18686_v43 }
 0x1cf   : > { %v2811_v37 = vmul.f32 0.044715, %v2745_v30  ;;  %v2746_v34 = vmul.f32 %v2680_v35, %v12864_v42  ;;  %10182 = vtanh.f32 %v2942_v36 }
 0x1d0   : > { %v2430_v13 = vpop.f32.mrb[8].mxu1 }
 0x1d1   : > { %v2877_v39 = vadd.f32 %v2811_v37, %v12858_v54  ;;  %v2812_v31 = vmul.f32 0.044715, %v2746_v34  ;;  %v12878_v14 = vadd.f32 %v12843_v63, %v2430_v13  ;;  %v8743_v27 = vpop.f32.mrb[9].mxu1 }
 0x1d2   : > { %v2433_v32 = vpop.f32.mrb[10].mxu1 }
 0x1d3   : > { %v2878_v5 = vadd.f32 %v2812_v31, %v12864_v42  ;;  %v2681_v33 = vmul.f32 %v12878_v14, %v12878_v14  ;;  %v12884_v28 = vadd.f32 %v12843_v63, %v2433_v32  ;;  %v8744_v7 = vpop.f32.mrb[11].mxu1  ;;  %v2943_v57 = vmul.f32 0.7978846, %v2877_v39 }
 0x1d5   : > { %v2747_v0 = vmul.f32 %v2681_v33, %v12878_v14  ;;  %v2682_v62 = vmul.f32 %v12884_v28, %v12884_v28  ;;  %8850 = vmatmul.mubr.msk.bf16.gmra.mrb[116].mxu1 %vm2280_vm5, %v2221_v61  ;;  %v2944_v26 = vmul.f32 0.7978846, %v2878_v5  ;;  %10184 = vtanh.f32 %v2943_v57 }
 0x1d6   : > { %8853 = vmatprep.mubr.msk.bf16.mxu1 %vm10619_vm2, %v18686_v43 }
 0x1d7   : > { %v2813_v51 = vmul.f32 0.044715, %v2747_v0  ;;  %v2748_v46 = vmul.f32 %v2682_v62, %v12884_v28  ;;  %10186 = vtanh.f32 %v2944_v26 }
 0x1d8   : > { %v2438_v59 = vpop.f32.mrb[12].mxu1 }
 0x1d9   : > { %v10183_v55 = vpop.eup %10182  ;;  %v2879_v22 = vadd.f32 %v2813_v51, %v12878_v14  ;;  %v2814_v49 = vmul.f32 0.044715, %v2748_v46  ;;  %v12898_v41 = vadd.f32 %v12843_v63, %v2438_v59  ;;  %v8747_v29 = vpop.f32.mrb[13].mxu1 }
 0x1da   : > { %v2441_v45 = vpop.f32.mrb[14].mxu1  ;;  %v3074_v61 = vadd.f32 1.0, %v10183_v55 }
 0x1db   : > { %v2945_v6 = vmul.f32 0.7978846, %v2879_v22  ;;  %v2880_v12 = vadd.f32 %v2814_v49, %v12884_v28  ;;  %v2683_v58 = vmul.f32 %v12898_v41, %v12898_v41  ;;  %v12904_v47 = vadd.f32 %v12843_v63, %v2441_v45  ;;  %v8748_v16 = vpop.f32.mrb[15].mxu1 }
 0x1dc   : > { %v3140_v4 = vmul.f32 0.5, %v3074_v61 }
 0x1dd   : > { %10188 = vtanh.f32 %v2945_v6  ;;  %v2946_v21 = vmul.f32 0.7978846, %v2880_v12  ;;  %v2749_v38 = vmul.f32 %v2683_v58, %v12898_v41  ;;  %v2684_v9 = vmul.f32 %v12904_v47, %v12904_v47  ;;  %8854 = vmatmul.mubr.msk.bf16.gmra.mrb[120].mxu1 %vm2280_vm5, %v2222_v56 }
 0x1de   : > { %8857 = vmatprep.mubr.msk.bf16.mxu1 %vm10619_vm2, %v18686_v43  ;;  %v3206_v52 = vmul.f32 %v3140_v4, %v12846_v20 }
 0x1df   : > { %v10185_v23 = vpop.eup %10184  ;;  %10190 = vtanh.f32 %v2946_v21  ;;  %v2815_v17 = vmul.f32 0.044715, %v2749_v38  ;;  %v2750_v25 = vmul.f32 %v2684_v9, %v12904_v47 }
 0x1e0   : > { %v2446_v44 = vpop.f32.mrb[16].mxu1  ;;  %v3075_v1 = vadd.f32 1.0, %v10185_v23  ;;  %v3338_v35 = vrot.slane %v3206_v52, 7  ;;  %v3470_v36 = vrot.slane %v3206_v52, 1  ;;  %v3602_v32 = vpack.c.bf16 %v3206_v52, %v18686_v43 }
 0x1e1   : > { %v10187_v40 = vpop.eup %10186  ;;  %v2881_v18 = vadd.f32 %v2815_v17, %v12898_v41  ;;  %v2816_v30 = vmul.f32 0.044715, %v2750_v25  ;;  %v12919_v48 = vadd.f32 %v12843_v63, %v2446_v44  ;;  %v8751_v50 = vpop.f32.mrb[17].mxu1 }
 0x1e2   : > { %v2449_v56 = vpop.f32.mrb[18].mxu1  ;;  %v3076_v37 = vadd.f32 1.0, %v10187_v40  ;;  %v3141_v20 = vmul.f32 0.5, %v3075_v1 }
 0x1e3   : > { %v2947_v34 = vmul.f32 0.7978846, %v2881_v18  ;;  %v2882_v13 = vadd.f32 %v2816_v30, %v12904_v47  ;;  %v2685_v39 = vmul.f32 %v12919_v48, %v12919_v48  ;;  %v12925_v31 = vadd.f32 %v12843_v63, %v2449_v56  ;;  %v8752_v27 = vpop.f32.mrb[19].mxu1 }
 0x1e4   : > { %v3142_v5 = vmul.f32 0.5, %v3076_v37  ;;  %v12929_v33 = vmul.f32 %v3141_v20, %v12858_v54  ;;  %v12943_v54 = vsel %vm1330_vm1, %v12208_v19, %v3338_v35 }
 0x1e5   : > { %10192 = vtanh.f32 %v2947_v34  ;;  %v2948_v7 = vmul.f32 0.7978846, %v2882_v13  ;;  %v2751_v57 = vmul.f32 %v2685_v39, %v12919_v48  ;;  %v2686_v0 = vmul.f32 %v12925_v31, %v12925_v31  ;;  %8858 = vmatmul.mubr.msk.bf16.gmra.mrb[124].mxu1 %vm2280_vm5, %v2223_v10 }
 0x1e6   : > { %8861 = vmatprep.mubr.msk.bf16.mxu1 %vm10619_vm2, %v18686_v43  ;;  %v12946_v62 = vmul.f32 %v3142_v5, %v12864_v42  ;;  %v3471_v26 = vrot.slane %v12929_v33, 1  ;;  %v3339_v51 = vrot.slane %v12929_v33, 7  ;;  %v12954_v10 = vsel %vm1463_vm0, %v18692_v3, %v3470_v36 }
 0x1e7   : > { %v10189_v46 = vpop.eup %10188  ;;  %10194 = vtanh.f32 %v2948_v7  ;;  %v2817_v24 = vmul.f32 0.044715, %v2751_v57  ;;  %v2752_v15 = vmul.f32 %v2686_v0, %v12925_v31  ;;  %v3601_v2 = vpack.c.bf16 %v12943_v54, %v12208_v19 }
 0x1e8   : > { %v2454_v59 = vpop.f32.mrb[20].mxu1  ;;  %v3605_v55 = vpack.c.bf16 %v12946_v62, %v12929_v33  ;;  %v3340_v42 = vrot.slane %v12946_v62, 7  ;;  %v12961_v22 = vsel %vm1330_vm1, %v3338_v35, %v3339_v51  ;;  %v3077_v49 = vadd.f32 1.0, %v10189_v46  ;;  %v10136_v46 = vld [vmem:[%s18342_s5 + $0x80] sm:$0xff]  }
 0x1e9   : > { %v10191_v29 = vpop.eup %10190  ;;  %v2883_v45 = vadd.f32 %v2817_v24, %v12919_v48  ;;  %v2818_v61 = vmul.f32 0.044715, %v2752_v15  ;;  %v12965_v6 = vadd.f32 %v12843_v63, %v2454_v59  ;;  %v8755_v12 = vpop.f32.mrb[21].mxu1  ;;  %v12969_v58 = vsel %vm1463_vm0, %v3470_v36, %v3471_v26 }
 0x1ea   : > { %v2457_v16 = vpop.f32.mrb[22].mxu1  ;;  %v12973_v4 = vsel %vm1330_vm1, %v3339_v51, %v3340_v42  ;;  %v3078_v21 = vadd.f32 1.0, %v10191_v29  ;;  %v3143_v38 = vmul.f32 0.5, %v3077_v49  ;;  %v3472_v30 = vrot.slane %v12946_v62, 1 }
 0x1eb   : > { %v2949_v52 = vmul.f32 0.7978846, %v2883_v45  ;;  %v2884_v23 = vadd.f32 %v2818_v61, %v12925_v31  ;;  %v2687_v17 = vmul.f32 %v12965_v6, %v12965_v6  ;;  %v12981_v25 = vadd.f32 %v12843_v63, %v2457_v16  ;;  %v8756_v44 = vpop.f32.mrb[23].mxu1 }
 0x1ec   : > { %v3604_v1 = vpack.c.bf16 %v12973_v4, %v12961_v22  ;;  %v3144_v40 = vmul.f32 0.5, %v3078_v21  ;;  %v12986_v18 = vmul.f32 %v3143_v38, %v12878_v14  ;;  %v13003_v20 = vsel %vm1463_vm0, %v3471_v26, %v3472_v30 }
 0x1ed   : > { %10196 = vtanh.f32 %v2949_v52  ;;  %v2950_v50 = vmul.f32 0.7978846, %v2884_v23  ;;  %v2753_v56 = vmul.f32 %v2687_v17, %v12965_v6  ;;  %v2688_v35 = vmul.f32 %v12981_v25, %v12981_v25  ;;  %8862 = vmatmul.mubr.msk.bf16.gmra.mrb[128].mxu1 %vm2280_vm5, %v2224_v60 }
 0x1ee   : > { %3931 = vmatprep.mubr.bf16.mxu1 %v3602_v32  ;;  %v12997_v36 = vmul.f32 %v3144_v40, %v12884_v28  ;;  %v3341_v14 = vrot.slane %v12986_v18, 7  ;;  %v3473_v37 = vrot.slane %v12986_v18, 1 }
 0x1ef   : > { %v10193_v34 = vpop.eup %10192  ;;  %10198 = vtanh.f32 %v2950_v50  ;;  %v2819_v13 = vmul.f32 0.044715, %v2753_v56  ;;  %v2754_v39 = vmul.f32 %v2688_v35, %v12981_v25 }
 0x1f0   : > { %v2462_v53 = vpop.f32.mrb[24].mxu1  ;;  %v3608_v60 = vpack.c.bf16 %v12997_v36, %v12986_v18  ;;  %v3342_v28 = vrot.slane %v12997_v36, 7  ;;  %v13013_v27 = vsel %vm1330_vm1, %v3340_v42, %v3341_v14  ;;  %v3079_v32 = vadd.f32 1.0, %v10193_v34 }
 0x1f1   : > { %v10195_v5 = vpop.eup %10194  ;;  %v2885_v7 = vadd.f32 %v2819_v13, %v12965_v6  ;;  %v2820_v57 = vmul.f32 0.044715, %v2754_v39  ;;  %v13017_v0 = vadd.f32 %v12843_v63, %v2462_v53  ;;  %v8759_v26 = vpop.f32.mrb[25].mxu1  ;;  %v13021_v54 = vsel %vm1463_vm0, %v3472_v30, %v3473_v37  ;;  %v10137_v30 = vld [vmem:[%s18342_s5 + $0x88] sm:$0xff]  }
 0x1f2   : > { %v2465_v51 = vpop.f32.mrb[26].mxu1  ;;  %v13028_v24 = vsel %vm1330_vm1, %v3341_v14, %v3342_v28  ;;  %v3080_v15 = vadd.f32 1.0, %v10195_v5  ;;  %v3145_v59 = vmul.f32 0.5, %v3079_v32  ;;  %v3474_v52 = vrot.slane %v12997_v36, 1 }
 0x1f3   : > { %v2951_v49 = vmul.f32 0.7978846, %v2885_v7  ;;  %v2886_v29 = vadd.f32 %v2820_v57, %v12981_v25  ;;  %v2689_v45 = vmul.f32 %v13017_v0, %v13017_v0  ;;  %v13036_v61 = vadd.f32 %v12843_v63, %v2465_v51  ;;  %v8760_v12 = vpop.f32.mrb[27].mxu1  ;;  %v10138_v51 = vld [vmem:[%s18342_s5 + $0x90] sm:$0xff]  }
 0x1f4   : > { %v3607_v16 = vpack.c.bf16 %v13028_v24, %v13013_v27  ;;  %v3146_v21 = vmul.f32 0.5, %v3080_v15  ;;  %v13041_v38 = vmul.f32 %v3145_v59, %v12898_v41  ;;  %v13060_v56 = vsel %vm1463_vm0, %v3473_v37, %v3474_v52 }
 0x1f5   : > { %10200 = vtanh.f32 %v2951_v49  ;;  %v2952_v23 = vmul.f32 0.7978846, %v2886_v29  ;;  %v2755_v17 = vmul.f32 %v2689_v45, %v13017_v0  ;;  %v2690_v44 = vmul.f32 %v13036_v61, %v13036_v61  ;;  %3932 = vmatmul.mubr.bf16.vlgmr.msra.gmra.mrb[132].mxu1 %v3601_v2 }
 0x1f6   : > { %8866 = vmatpush3.bf16.msra.mxu1 %v10136_v46  ;;  %3939 = vmatprep.mubr.bf16.mxu1 %v3605_v55  ;;  %v13051_v40 = vmul.f32 %v3146_v21, %v12904_v47  ;;  %v3343_v41 = vrot.slane %v13041_v38, 7  ;;  %v3475_v50 = vrot.slane %v13041_v38, 1 }
 0x1f7   : > { %v10197_v35 = vpop.eup %10196  ;;  %10202 = vtanh.f32 %v2952_v23  ;;  %v2821_v14 = vmul.f32 0.044715, %v2755_v17  ;;  %v2756_v33 = vmul.f32 %v2690_v44, %v13036_v61  ;;  %8867 = vmatprep.subr.bf16.mxu1 %v18686_v43 }
 0x1f8   : > { %v2470_v47 = vpop.f32.mrb[28].mxu1  ;;  %v3611_v62 = vpack.c.bf16 %v13051_v40, %v13041_v38  ;;  %v3344_v55 = vrot.slane %v13051_v40, 7  ;;  %v13069_v34 = vsel %vm1330_vm1, %v3342_v28, %v3343_v41  ;;  %v3081_v13 = vadd.f32 1.0, %v10197_v35  ;;  %v10139_v35 = vld [vmem:[%s18342_s5 + $0x98] sm:$0xff]  }
 0x1f9   : > { %v10199_v37 = vpop.eup %10198  ;;  %v2887_v39 = vadd.f32 %v2821_v14, %v13017_v0  ;;  %v2822_v2 = vmul.f32 0.044715, %v2756_v33  ;;  %v13073_v53 = vadd.f32 %v12843_v63, %v2470_v47  ;;  %v8763_v32 = vpop.f32.mrb[29].mxu1  ;;  %v13077_v5 = vsel %vm1463_vm0, %v3474_v52, %v3475_v50 }
 0x1fa   : > { %v2473_v7 = vpop.f32.mrb[30].mxu1  ;;  %v13081_v57 = vsel %vm1330_vm1, %v3343_v41, %v3344_v55  ;;  %v3082_v28 = vadd.f32 1.0, %v10199_v37  ;;  %v3147_v26 = vmul.f32 0.5, %v3081_v13  ;;  %8868 = vmatpush3.bf16.msra.mxu1 %v10137_v30  ;;  %v3476_v23 = vrot.slane %v13051_v40, 1 }
 0x1fb   : > { %v2953_v15 = vmul.f32 0.7978846, %v2887_v39  ;;  %v2888_v59 = vadd.f32 %v2822_v2, %v13036_v61  ;;  %v2691_v49 = vmul.f32 %v13073_v53, %v13073_v53  ;;  %v13092_v29 = vadd.f32 %v12843_v63, %v2473_v7  ;;  %v8764_v45 = vpop.f32.mrb[31].mxu1  ;;  %8869 = vmatprep.subr.bf16.mxu1 %v18686_v43 }
 0x1fc   : > { %v3610_v12 = vpack.c.bf16 %v13081_v57, %v13069_v34  ;;  %v3148_v21 = vmul.f32 0.5, %v3082_v28  ;;  %v13098_v52 = vmul.f32 %v3147_v26, %v12919_v48  ;;  %v13120_v22 = vsel %vm1463_vm0, %v3475_v50, %v3476_v23 }
 0x1fd   : > { %10204 = vtanh.f32 %v2953_v15  ;;  %v2954_v17 = vmul.f32 0.7978846, %v2888_v59  ;;  %v2757_v44 = vmul.f32 %v2691_v49, %v13073_v53  ;;  %v2692_v41 = vmul.f32 %v13092_v29, %v13092_v29  ;;  %3940 = vmatmul.mubr.bf16.gmra.mrb[136].mxu1 %v3604_v1 }
 0x1fe   : > { %3947 = vmatprep.mubr.bf16.mxu1 %v3608_v60  ;;  %v13111_v48 = vmul.f32 %v3148_v21, %v12925_v31  ;;  %v3345_v30 = vrot.slane %v13098_v52, 7  ;;  %8870 = vmatpush3.bf16.msra.mxu1 %v10138_v51  ;;  %v3477_v14 = vrot.slane %v13098_v52, 1 }
 0x1ff   : > { %v10201_v4 = vpop.eup %10200  ;;  %10206 = vtanh.f32 %v2954_v17  ;;  %v2823_v1 = vmul.f32 0.044715, %v2757_v44  ;;  %v2758_v18 = vmul.f32 %v2692_v41, %v13092_v29  ;;  %8871 = vmatprep.subr.bf16.mxu1 %v18686_v43 }
 0x200   : > { %v2478_v31 = vpop.f32.mrb[32].mxu1  ;;  %v3614_v36 = vpack.c.bf16 %v13111_v48, %v13098_v52  ;;  %v3346_v60 = vrot.slane %v13111_v48, 7  ;;  %v13129_v33 = vsel %vm1330_vm1, %v3344_v55, %v3345_v30  ;;  %v3083_v47 = vadd.f32 1.0, %v10201_v4 }
 0x201   : > { %v10203_v50 = vpop.eup %10202  ;;  %v2889_v13 = vadd.f32 %v2823_v1, %v13073_v53  ;;  %v2824_v37 = vmul.f32 0.044715, %v2758_v18  ;;  %v13133_v39 = vadd.f32 %v12843_v63, %v2478_v31  ;;  %v8767_v2 = vpop.f32.mrb[33].mxu1  ;;  %v13137_v32 = vsel %vm1463_vm0, %v3476_v23, %v3477_v14  ;;  %v10140_v1 = vld [vmem:[%s18342_s5 + $0xa0] sm:$0xff]  }
 0x202   : > { %v2481_v7 = vpop.f32.mrb[34].mxu1  ;;  %v13141_v28 = vsel %vm1330_vm1, %v3345_v30, %v3346_v60  ;;  %v3084_v55 = vadd.f32 1.0, %v10203_v50  ;;  %v3149_v26 = vmul.f32 0.5, %v3083_v47  ;;  %8872 = vmatpush3.bf16.msra.mxu1 %v10139_v35  ;;  %v3478_v41 = vrot.slane %v13111_v48, 1 }
 0x203   : > { %v2955_v15 = vmul.f32 0.7978846, %v2889_v13  ;;  %v2890_v59 = vadd.f32 %v2824_v37, %v13092_v29  ;;  %v2693_v49 = vmul.f32 %v13133_v39, %v13133_v39  ;;  %v13149_v45 = vadd.f32 %v12843_v63, %v2481_v7  ;;  %v8768_v21 = vpop.f32.mrb[35].mxu1  ;;  %8873 = vmatprep.subr.bf16.mxu1 %v18686_v43 }
 0x204   : > { %v3613_v23 = vpack.c.bf16 %v13141_v28, %v13129_v33  ;;  %v3150_v17 = vmul.f32 0.5, %v3084_v55  ;;  %v13155_v44 = vmul.f32 %v3149_v26, %v12965_v6  ;;  %v13177_v47 = vsel %vm1463_vm0, %v3477_v14, %v3478_v41 }
 0x205   : > { %10208 = vtanh.f32 %v2955_v15  ;;  %v2956_v30 = vmul.f32 0.7978846, %v2890_v59  ;;  %v2759_v35 = vmul.f32 %v2693_v49, %v13133_v39  ;;  %v2694_v4 = vmul.f32 %v13149_v45, %v13149_v45  ;;  %3948 = vmatmul.mubr.bf16.gmra.mrb[140].mxu1 %v3607_v16 }
 0x206   : > { %3955 = vmatprep.mubr.bf16.mxu1 %v3611_v62  ;;  %v13171_v6 = vmul.f32 %v3150_v17, %v12981_v25  ;;  %v3347_v18 = vrot.slane %v13155_v44, 7  ;;  %v3479_v31 = vrot.slane %v13155_v44, 1  ;;  %8874 = vmatpush3.bf16.msra.mxu1 %v10140_v1 }
 0x207   : > { %v10205_v27 = vpop.eup %10204  ;;  %10210 = vtanh.f32 %v2956_v30  ;;  %v2825_v24 = vmul.f32 0.044715, %v2759_v35  ;;  %v2760_v16 = vmul.f32 %v2694_v4, %v13149_v45  ;;  %8875 = vmatprep.subr.bf16.mxu1 %v18686_v43 }
 0x208   : > { %v2486_v50 = vpop.f32.mrb[36].mxu1  ;;  %v3617_v38 = vpack.c.bf16 %v13171_v6, %v13155_v44  ;;  %v3348_v25 = vrot.slane %v13171_v6, 7  ;;  %v13185_v40 = vsel %vm1330_vm1, %v3346_v60, %v3347_v18  ;;  %v3085_v62 = vadd.f32 1.0, %v10205_v27 }
 0x209   : > { %v10207_v14 = vpop.eup %10206  ;;  %v2891_v13 = vadd.f32 %v2825_v24, %v13133_v39  ;;  %v2826_v37 = vmul.f32 0.044715, %v2760_v16  ;;  %v13190_v2 = vadd.f32 %v12843_v63, %v2486_v50  ;;  %v8771_v7 = vpop.f32.mrb[37].mxu1  ;;  %v13194_v55 = vsel %vm1463_vm0, %v3478_v41, %v3479_v31 }
 0x20a   : > { %v2489_v26 = vpop.f32.mrb[38].mxu1  ;;  %v13198_v60 = vsel %vm1330_vm1, %v3347_v18, %v3348_v25  ;;  %v3086_v15 = vadd.f32 1.0, %v10207_v14  ;;  %v3151_v59 = vmul.f32 0.5, %v3085_v62  ;;  %v3480_v27 = vrot.slane %v13171_v6, 1 }
 0x20b   : > { %v2957_v21 = vmul.f32 0.7978846, %v2891_v13  ;;  %v2892_v17 = vadd.f32 %v2826_v37, %v13149_v45  ;;  %v2695_v30 = vmul.f32 %v13190_v2, %v13190_v2  ;;  %v13206_v35 = vadd.f32 %v12843_v63, %v2489_v26  ;;  %v8772_v41 = vpop.f32.mrb[39].mxu1 }
 0x20c   : > { %v3616_v4 = vpack.c.bf16 %v13198_v60, %v13185_v40  ;;  %v3152_v1 = vmul.f32 0.5, %v3086_v15  ;;  %v13211_v18 = vmul.f32 %v3151_v59, %v13017_v0  ;;  %v13230_v13 = vsel %vm1463_vm0, %v3479_v31, %v3480_v27 }
 0x20d   : > { %10212 = vtanh.f32 %v2957_v21  ;;  %v2958_v24 = vmul.f32 0.7978846, %v2892_v17  ;;  %v2761_v16 = vmul.f32 %v2695_v30, %v13190_v2  ;;  %v2696_v50 = vmul.f32 %v13206_v35, %v13206_v35  ;;  %3956 = vmatmul.mubr.bf16.gmra.mrb[144].mxu1 %v3610_v12 }
 0x20e   : > { %3963 = vmatprep.mubr.bf16.mxu1 %v3614_v36  ;;  %v13224_v0 = vmul.f32 %v3152_v1, %v13036_v61  ;;  %v3349_v62 = vrot.slane %v13211_v18, 7  ;;  %v3481_v14 = vrot.slane %v13211_v18, 1 }
 0x20f   : > { %v10209_v37 = vpop.eup %10208  ;;  %10214 = vtanh.f32 %v2958_v24  ;;  %v2827_v7 = vmul.f32 0.044715, %v2761_v16  ;;  %v2762_v34 = vmul.f32 %v2696_v50, %v13206_v35 }
 0x210   : > { %v2494_v57 = vpop.f32.mrb[40].mxu1  ;;  %v3620_v12 = vpack.c.bf16 %v13224_v0, %v13211_v18  ;;  %v3350_v61 = vrot.slane %v13224_v0, 7  ;;  %v13238_v52 = vsel %vm1330_vm1, %v3348_v25, %v3349_v62  ;;  %v3087_v48 = vadd.f32 1.0, %v10209_v37 }
 0x211   : > { %v10211_v36 = vpop.eup %10210  ;;  %v2893_v31 = vadd.f32 %v2827_v7, %v13190_v2  ;;  %v2828_v26 = vmul.f32 0.044715, %v2762_v34  ;;  %v13242_v15 = vadd.f32 %v12843_v63, %v2494_v57  ;;  %v8775_v59 = vpop.f32.mrb[41].mxu1  ;;  %v13246_v21 = vsel %vm1463_vm0, %v3480_v27, %v3481_v14 }
 0x212   : > { %v2497_v17 = vpop.f32.mrb[42].mxu1  ;;  %v13250_v30 = vsel %vm1330_vm1, %v3349_v62, %v3350_v61  ;;  %v3088_v25 = vadd.f32 1.0, %v10211_v36  ;;  %v3153_v41 = vmul.f32 0.5, %v3087_v48  ;;  %v3482_v57 = vrot.slane %v13224_v0, 1 }
 0x213   : > { %v2959_v24 = vmul.f32 0.7978846, %v2893_v31  ;;  %v2894_v16 = vadd.f32 %v2828_v26, %v13206_v35  ;;  %v2697_v50 = vmul.f32 %v13242_v15, %v13242_v15  ;;  %v13258_v37 = vadd.f32 %v12843_v63, %v2497_v17  ;;  %v8776_v27 = vpop.f32.mrb[43].mxu1 }
 0x214   : > { %v3619_v7 = vpack.c.bf16 %v13250_v30, %v13238_v52  ;;  %v3154_v62 = vmul.f32 0.5, %v3088_v25  ;;  %v13263_v34 = vmul.f32 %v3153_v41, %v13073_v53  ;;  %v13282_v17 = vsel %vm1463_vm0, %v3481_v14, %v3482_v57  ;;  %v10141_v30 = vld [vmem:[%s18342_s5 + $0xa8] sm:$0xff]  }
 0x215   : > { %10216 = vtanh.f32 %v2959_v24  ;;  %v2960_v48 = vmul.f32 0.7978846, %v2894_v16  ;;  %v2763_v36 = vmul.f32 %v2697_v50, %v13242_v15  ;;  %v2698_v31 = vmul.f32 %v13258_v37, %v13258_v37  ;;  %3964 = vmatmul.mubr.bf16.gmra.mrb[148].mxu1 %v3613_v23 }
 0x216   : > { %3971 = vmatprep.mubr.bf16.mxu1 %v3617_v38  ;;  %v13276_v53 = vmul.f32 %v3154_v62, %v13092_v29  ;;  %v3351_v26 = vrot.slane %v13263_v34, 7  ;;  %v3483_v59 = vrot.slane %v13263_v34, 1  ;;  %8876 = vmatpush3.bf16.msra.mxu1 %v10141_v30 }
 0x217   : > { %v10213_v25 = vpop.eup %10212  ;;  %10218 = vtanh.f32 %v2960_v48  ;;  %v2829_v41 = vmul.f32 0.044715, %v2763_v36  ;;  %v2764_v33 = vmul.f32 %v2698_v31, %v13258_v37  ;;  %8877 = vmatprep.subr.bf16.mxu1 %v18686_v43 }
 0x218   : > { %v2502_v28 = vpop.f32.mrb[44].mxu1  ;;  %v3623_v23 = vpack.c.bf16 %v13276_v53, %v13263_v34  ;;  %v3352_v29 = vrot.slane %v13276_v53, 7  ;;  %v13290_v44 = vsel %vm1330_vm1, %v3350_v61, %v3351_v26  ;;  %v3089_v6 = vadd.f32 1.0, %v10213_v25 }
 0x219   : > { %v10215_v38 = vpop.eup %10214  ;;  %v2895_v14 = vadd.f32 %v2829_v41, %v13242_v15  ;;  %v2830_v24 = vmul.f32 0.044715, %v2764_v33  ;;  %v13294_v16 = vadd.f32 %v12843_v63, %v2502_v28  ;;  %v8779_v50 = vpop.f32.mrb[45].mxu1  ;;  %v13298_v27 = vsel %vm1463_vm0, %v3482_v57, %v3483_v59 }
 0x21a   : > { %v2505_v62 = vpop.f32.mrb[46].mxu1  ;;  %v13302_v48 = vsel %vm1330_vm1, %v3351_v26, %v3352_v29  ;;  %v3090_v61 = vadd.f32 1.0, %v10215_v38  ;;  %v3155_v36 = vmul.f32 0.5, %v3089_v6  ;;  %v3484_v6 = vrot.slane %v13276_v53, 1 }
 0x21b   : > { %v2961_v25 = vmul.f32 0.7978846, %v2895_v14  ;;  %v2896_v41 = vadd.f32 %v2830_v24, %v13258_v37  ;;  %v2699_v33 = vmul.f32 %v13294_v16, %v13294_v16  ;;  %v13310_v28 = vadd.f32 %v12843_v63, %v2505_v62  ;;  %v8780_v57 = vpop.f32.mrb[47].mxu1 }
 0x21c   : > { %v3622_v50 = vpack.c.bf16 %v13302_v48, %v13290_v44  ;;  %v3156_v26 = vmul.f32 0.5, %v3090_v61  ;;  %v13315_v38 = vmul.f32 %v3155_v36, %v13133_v39  ;;  %v13334_v36 = vsel %vm1463_vm0, %v3483_v59, %v3484_v6 }
 0x21d   : > { %10220 = vtanh.f32 %v2961_v25  ;;  %v2962_v14 = vmul.f32 0.7978846, %v2896_v41  ;;  %v2765_v24 = vmul.f32 %v2699_v33, %v13294_v16  ;;  %v2700_v31 = vmul.f32 %v13310_v28, %v13310_v28  ;;  %3972 = vmatmul.mubr.bf16.gmra.mrb[152].mxu1 %v3616_v4 }
 0x21e   : > { %3979 = vmatprep.mubr.bf16.mxu1 %v3620_v12  ;;  %v13328_v39 = vmul.f32 %v3156_v26, %v13149_v45  ;;  %v3353_v62 = vrot.slane %v13315_v38, 7  ;;  %v3485_v61 = vrot.slane %v13315_v38, 1 }
 0x21f   : > { %v10217_v25 = vpop.eup %10216  ;;  %10222 = vtanh.f32 %v2962_v14  ;;  %v2831_v41 = vmul.f32 0.044715, %v2765_v24  ;;  %v2766_v40 = vmul.f32 %v2700_v31, %v13310_v28 }
 0x220   : > { %v2510_v60 = vpop.f32.mrb[48].mxu1  ;;  %v3626_v4 = vpack.c.bf16 %v13328_v39, %v13315_v38  ;;  %v3354_v45 = vrot.slane %v13328_v39, 7  ;;  %v13342_v18 = vsel %vm1330_vm1, %v3352_v29, %v3353_v62  ;;  %v3091_v0 = vadd.f32 1.0, %v10217_v25 }
 0x221   : > { %v10219_v12 = vpop.eup %10218  ;;  %v2897_v59 = vadd.f32 %v2831_v41, %v13294_v16  ;;  %v2832_v33 = vmul.f32 0.044715, %v2766_v40  ;;  %v13346_v57 = vadd.f32 %v12843_v63, %v2510_v60  ;;  %v8783_v26 = vpop.f32.mrb[49].mxu1  ;;  %v13350_v31 = vsel %vm1463_vm0, %v3484_v6, %v3485_v61 }
 0x222   : > { %v2513_v14 = vpop.f32.mrb[50].mxu1  ;;  %v13354_v24 = vsel %vm1330_vm1, %v3353_v62, %v3354_v45  ;;  %v3092_v29 = vadd.f32 1.0, %v10219_v12  ;;  %v3157_v1 = vmul.f32 0.5, %v3091_v0  ;;  %v3486_v0 = vrot.slane %v13328_v39, 1 }
 0x223   : > { %v2963_v41 = vmul.f32 0.7978846, %v2897_v59  ;;  %v2898_v40 = vadd.f32 %v2832_v33, %v13310_v28  ;;  %v2701_v60 = vmul.f32 %v13346_v57, %v13346_v57  ;;  %v13362_v26 = vadd.f32 %v12843_v63, %v2513_v14  ;;  %v8784_v6 = vpop.f32.mrb[51].mxu1 }
 0x224   : > { %v3625_v49 = vpack.c.bf16 %v13354_v24, %v13342_v18  ;;  %v3158_v62 = vmul.f32 0.5, %v3092_v29  ;;  %v13367_v12 = vmul.f32 %v3157_v1, %v13190_v2  ;;  %v13386_v29 = vsel %vm1463_vm0, %v3485_v61, %v3486_v0 }
 0x225   : > { %10224 = vtanh.f32 %v2963_v41  ;;  %v2964_v59 = vmul.f32 0.7978846, %v2898_v40  ;;  %v2767_v33 = vmul.f32 %v2701_v60, %v13346_v57  ;;  %v2702_v25 = vmul.f32 %v13362_v26, %v13362_v26  ;;  %3980 = vmatmul.mubr.bf16.gmra.mrb[156].mxu1 %v3619_v7 }
 0x226   : > { %3987 = vmatprep.mubr.bf16.mxu1 %v3623_v23  ;;  %v13380_v2 = vmul.f32 %v3158_v62, %v13206_v35  ;;  %v3355_v1 = vrot.slane %v13367_v12, 7  ;;  %v3487_v14 = vrot.slane %v13367_v12, 1 }
 0x227   : > { %v10221_v41 = vpop.eup %10220  ;;  %10226 = vtanh.f32 %v2964_v59  ;;  %v2833_v40 = vmul.f32 0.044715, %v2767_v33  ;;  %v2768_v52 = vmul.f32 %v2702_v25, %v13362_v26 }
 0x228   : > { %v2518_v7 = vpop.f32.mrb[52].mxu1  ;;  %v3629_v35 = vpack.c.bf16 %v13380_v2, %v13367_v12  ;;  %v3356_v34 = vrot.slane %v13380_v2, 7  ;;  %v13397_v53 = vsel %vm1330_vm1, %v3354_v45, %v3355_v1  ;;  %v3093_v23 = vadd.f32 1.0, %v10221_v41 }
 0x229   : > { %v10223_v61 = vpop.eup %10222  ;;  %v2899_v60 = vadd.f32 %v2833_v40, %v13346_v57  ;;  %v2834_v6 = vmul.f32 0.044715, %v2768_v52  ;;  %v13401_v25 = vadd.f32 %v12843_v63, %v2518_v7  ;;  %v8787_v62 = vpop.f32.mrb[53].mxu1  ;;  %v13405_v59 = vsel %vm1463_vm0, %v3486_v0, %v3487_v14 }
 0x22a   : > { %v2521_v33 = vpop.f32.mrb[54].mxu1  ;;  %v13409_v51 = vsel %vm1330_vm1, %v3355_v1, %v3356_v34  ;;  %v3094_v45 = vadd.f32 1.0, %v10223_v61  ;;  %v3159_v41 = vmul.f32 0.5, %v3093_v23  ;;  %v3488_v46 = vrot.slane %v13380_v2, 1 }
 0x22b   : > { %v2965_v52 = vmul.f32 0.7978846, %v2899_v60  ;;  %v2900_v7 = vadd.f32 %v2834_v6, %v13362_v26  ;;  %v2703_v30 = vmul.f32 %v13401_v25, %v13401_v25  ;;  %v13418_v0 = vadd.f32 %v12843_v63, %v2521_v33  ;;  %v8788_v62 = vpop.f32.mrb[55].mxu1 }
 0x22c   : > { %v3628_v1 = vpack.c.bf16 %v13409_v51, %v13397_v53  ;;  %v3160_v61 = vmul.f32 0.5, %v3094_v45  ;;  %v13423_v23 = vmul.f32 %v3159_v41, %v13242_v15  ;;  %v13442_v41 = vsel %vm1463_vm0, %v3487_v14, %v3488_v46 }
 0x22d   : > { %10228 = vtanh.f32 %v2965_v52  ;;  %v2966_v60 = vmul.f32 0.7978846, %v2900_v7  ;;  %v2769_v6 = vmul.f32 %v2703_v30, %v13401_v25  ;;  %v2704_v40 = vmul.f32 %v13418_v0, %v13418_v0  ;;  %3988 = vmatmul.mubr.bf16.gmra.mrb[160].mxu1 %v3622_v50 }
 0x22e   : > { %3995 = vmatprep.mubr.bf16.mxu1 %v3626_v4  ;;  %v13436_v15 = vmul.f32 %v3160_v61, %v13258_v37  ;;  %v3357_v33 = vrot.slane %v13423_v23, 7  ;;  %v3489_v45 = vrot.slane %v13423_v23, 1 }
 0x22f   : > { %v10225_v52 = vpop.eup %10224  ;;  %10230 = vtanh.f32 %v2966_v60  ;;  %v2835_v7 = vmul.f32 0.044715, %v2769_v6  ;;  %v2770_v44 = vmul.f32 %v2704_v40, %v13418_v0 }
 0x230   : > { %v2526_v48 = vpop.f32.mrb[56].mxu1  ;;  %v3632_v50 = vpack.c.bf16 %v13436_v15, %v13423_v23  ;;  %v3358_v37 = vrot.slane %v13436_v15, 7  ;;  %v13450_v38 = vsel %vm1330_vm1, %v3356_v34, %v3357_v33  ;;  %v3095_v39 = vadd.f32 1.0, %v10225_v52 }
 0x231   : > { %v10227_v4 = vpop.eup %10226  ;;  %v2901_v14 = vadd.f32 %v2835_v7, %v13401_v25  ;;  %v2836_v30 = vmul.f32 0.044715, %v2770_v44  ;;  %v13454_v62 = vadd.f32 %v12843_v63, %v2526_v48  ;;  %v8791_v61 = vpop.f32.mrb[57].mxu1  ;;  %v13458_v40 = vsel %vm1463_vm0, %v3488_v46, %v3489_v45 }
 0x232   : > { %v2529_v60 = vpop.f32.mrb[58].mxu1  ;;  %v13462_v6 = vsel %vm1330_vm1, %v3357_v33, %v3358_v37  ;;  %v3096_v34 = vadd.f32 1.0, %v10227_v4  ;;  %v3161_v42 = vmul.f32 0.5, %v3095_v39  ;;  %v3490_v39 = vrot.slane %v13436_v15, 1 }
 0x233   : > { %v2967_v7 = vmul.f32 0.7978846, %v2901_v14  ;;  %v2902_v44 = vadd.f32 %v2836_v30, %v13418_v0  ;;  %v2705_v48 = vmul.f32 %v13454_v62, %v13454_v62  ;;  %v13470_v61 = vadd.f32 %v12843_v63, %v2529_v60  ;;  %v8792_v46 = vpop.f32.mrb[59].mxu1 }
 0x234   : > { %v3162_v33 = vmul.f32 0.5, %v3096_v34  ;;  %v13475_v4 = vmul.f32 %v3161_v42, %v13294_v16  ;;  %v13494_v60 = vsel %vm1463_vm0, %v3489_v45, %v3490_v39 }
 0x235   : > { %10232 = vtanh.f32 %v2967_v7  ;;  %v2968_v14 = vmul.f32 0.7978846, %v2902_v44  ;;  %v2771_v30 = vmul.f32 %v2705_v48, %v13454_v62  ;;  %v2706_v52 = vmul.f32 %v13470_v61, %v13470_v61  ;;  %3996 = vmatmul.mubr.bf16.gmra.mrb[164].mxu1 %v3625_v49  ;;  %v13508_v48 = vld [vmem:[%s18345_s8] ss:$0 sm:$0xff] }
 0x236   : > { %4003 = vmatprep.mubr.bf16.mxu1 %v3629_v35  ;;  %v13488_v63 = vmul.f32 %v3162_v33, %v13310_v28  ;;  %v3359_v42 = vrot.slane %v13475_v4, 7  ;;  %v3491_v16 = vrot.slane %v13475_v4, 1 }
 0x237   : > { %v10229_v34 = vpop.eup %10228  ;;  %10234 = vtanh.f32 %v2968_v14  ;;  %v2837_v7 = vmul.f32 0.044715, %v2771_v30  ;;  %v2772_v49 = vmul.f32 %v2706_v52, %v13470_v61 }
 0x238   : > { %v2534_v18 = vpop.f32.mrb[60].mxu1  ;;  %v3360_v28 = vrot.slane %v13488_v63, 7  ;;  %v13502_v12 = vsel %vm1330_vm1, %v3358_v37, %v3359_v42  ;;  %v3097_v2 = vadd.f32 1.0, %v10229_v34  ;;  %v13515_v33 = vsel %vm1463_vm0, %v3490_v39, %v3491_v16 }
 0x239   : > { %v10231_v35 = vpop.eup %10230  ;;  %v2903_v45 = vadd.f32 %v2837_v7, %v13454_v62  ;;  %v2838_v44 = vmul.f32 0.044715, %v2772_v49  ;;  %v13511_v52 = vadd.f32 %v13508_v48, %v2534_v18  ;;  %v8795_v46 = vpop.f32.mrb[61].mxu1 }
 0x23a   : > { %v2537_v37 = vpop.f32.mrb[62].mxu1  ;;  %v13519_v14 = vsel %vm1330_vm1, %v3359_v42, %v3360_v28  ;;  %v3098_v30 = vadd.f32 1.0, %v10231_v35  ;;  %v3163_v34 = vmul.f32 0.5, %v3097_v2  ;;  %v3492_v2 = vrot.slane %v13488_v63, 1 }
 0x23b   : > { %v2969_v49 = vmul.f32 0.7978846, %v2903_v45  ;;  %v2904_v24 = vadd.f32 %v2838_v44, %v13470_v61  ;;  %v2707_v18 = vmul.f32 %v13511_v52, %v13511_v52  ;;  %v13527_v46 = vadd.f32 %v13508_v48, %v2537_v37  ;;  %v8796_v39 = vpop.f32.mrb[63].mxu1 }
 0x23c   : > { %v3164_v42 = vmul.f32 0.5, %v3098_v30  ;;  %v13532_v35 = vmul.f32 %v3163_v34, %v13346_v57  ;;  %v13551_v30 = vsel %vm1463_vm0, %v3491_v16, %v3492_v2 }
 0x23d   : > { %10236 = vtanh.f32 %v2969_v49  ;;  %v2970_v45 = vmul.f32 0.7978846, %v2904_v24  ;;  %v2773_v44 = vmul.f32 %v2707_v18, %v13511_v52  ;;  %v2708_v7 = vmul.f32 %v13527_v46, %v13527_v46  ;;  %4004 = vmatmul.mubr.bf16.gmra.mrb[168].mxu1 %v3628_v1  ;;  %18729 = vst [vmem:[#allocation39_spill] sm:$0xff] %v13551_v30 }
 0x23e   : > { %4011 = vmatprep.mubr.bf16.mxu1 %v3632_v50  ;;  %v13545_v57 = vmul.f32 %v3164_v42, %v13362_v26  ;;  %v3361_v37 = vrot.slane %v13532_v35, 7  ;;  %v3493_v24 = vrot.slane %v13532_v35, 1 }
 0x23f   : > { %v10233_v34 = vpop.eup %10232  ;;  %10238 = vtanh.f32 %v2970_v45  ;;  %v2839_v49 = vmul.f32 0.044715, %v2773_v44  ;;  %v2774_v51 = vmul.f32 %v2708_v7, %v13527_v46 }
 0x240   : > { %v2542_v53 = vpop.f32.mrb[64].mxu1  ;;  %v3362_v26 = vrot.slane %v13545_v57, 7  ;;  %v13559_v23 = vsel %vm1330_vm1, %v3360_v28, %v3361_v37  ;;  %v3099_v15 = vadd.f32 1.0, %v10233_v34  ;;  %v13567_v7 = vsel %vm1463_vm0, %v3492_v2, %v3493_v24 }
 0x241   : > { %v10235_v50 = vpop.eup %10234  ;;  %v2905_v16 = vadd.f32 %v2839_v49, %v13511_v52  ;;  %v2840_v18 = vmul.f32 0.044715, %v2774_v51  ;;  %v13563_v39 = vadd.f32 %v13508_v48, %v2542_v53  ;;  %v8799_v42 = vpop.f32.mrb[65].mxu1 }
 0x242   : > { %v2545_v45 = vpop.f32.mrb[66].mxu1  ;;  %v13571_v44 = vsel %vm1330_vm1, %v3361_v37, %v3362_v26  ;;  %v3100_v28 = vadd.f32 1.0, %v10235_v50  ;;  %v3165_v1 = vmul.f32 0.5, %v3099_v15  ;;  %v3494_v15 = vrot.slane %v13545_v57, 1 }
 0x243   : > { %v2971_v49 = vmul.f32 0.7978846, %v2905_v16  ;;  %v2906_v51 = vadd.f32 %v2840_v18, %v13527_v46  ;;  %v2709_v53 = vmul.f32 %v13563_v39, %v13563_v39  ;;  %v13579_v42 = vadd.f32 %v13508_v48, %v2545_v45  ;;  %v8800_v2 = vpop.f32.mrb[67].mxu1 }
 0x244   : > { %v3166_v37 = vmul.f32 0.5, %v3100_v28  ;;  %v13584_v50 = vmul.f32 %v3165_v1, %v13401_v25  ;;  %v18730_v45 = vpack.c.bf16 %v13462_v6, %v13450_v38  ;;  %v18731_v2 = vpack.c.bf16 %v13488_v63, %v13475_v4  ;;  %v10142_v6 = vld [vmem:[%s18342_s5 + $0xb0] sm:$0xff]  }
 0x245   : > { %10240 = vtanh.f32 %v2971_v49  ;;  %v2972_v16 = vmul.f32 0.7978846, %v2906_v51  ;;  %v2775_v18 = vmul.f32 %v2709_v53, %v13563_v39  ;;  %v2710_v34 = vmul.f32 %v13579_v42, %v13579_v42  ;;  %8878 = vmatpush3.bf16.msra.mxu1 %v10142_v6 }
 0x246   : > { %4012 = vmatmul.mubr.bf16.gmra.mrb[172].mxu1 %v18730_v45  ;;  %v13597_v25 = vmul.f32 %v3166_v37, %v13418_v0  ;;  %v3363_v1 = vrot.slane %v13584_v50, 7  ;;  %v3495_v28 = vrot.slane %v13584_v50, 1  ;;  %v13603_v49 = vsel %vm1463_vm0, %v3493_v24, %v3494_v15  ;;  %8879 = vmatprep.subr.bf16.mxu1 %v18686_v43 }
 0x247   : > { %4019 = vmatprep.mubr.bf16.mxu1 %v18731_v2  ;;  %18732 = vst [vmem:[#allocation41_spill] sm:$0xff] %v13603_v49  ;;  %v10237_v51 = vpop.eup %10236  ;;  %10242 = vtanh.f32 %v2972_v16  ;;  %v2841_v53 = vmul.f32 0.044715, %v2775_v18  ;;  %v2776_v38 = vmul.f32 %v2710_v34, %v13579_v42 }
 0x248   : > { %v2550_v4 = vpop.f32.mrb[68].mxu1  ;;  %v3364_v63 = vrot.slane %v13597_v25, 7  ;;  %v13614_v37 = vsel %vm1330_vm1, %v3362_v26, %v3363_v1  ;;  %v3101_v24 = vadd.f32 1.0, %v10237_v51  ;;  %v13622_v9 = vsel %vm1463_vm0, %v3494_v15, %v3495_v28 }
 0x249   : > { %v10239_v45 = vpop.eup %10238  ;;  %v2907_v16 = vadd.f32 %v2841_v53, %v13563_v39  ;;  %v2842_v18 = vmul.f32 0.044715, %v2776_v38  ;;  %v13618_v34 = vadd.f32 %v13508_v48, %v2550_v4  ;;  %v8803_v2 = vpop.f32.mrb[69].mxu1  ;;  %18733 = vst [vmem:[#allocation13_spill] sm:$0xff] %v13622_v9  ;;  %v3496_v30 = vrot.slane %v13597_v25, 1 }
 0x24a   : > { %v2553_v0 = vpop.f32.mrb[70].mxu1  ;;  %v13626_v3 = vsel %vm1330_vm1, %v3363_v1, %v3364_v63  ;;  %v3102_v26 = vadd.f32 1.0, %v10239_v45  ;;  %v3167_v51 = vmul.f32 0.5, %v3101_v24 }
 0x24b   : > { %v2973_v38 = vmul.f32 0.7978846, %v2907_v16  ;;  %v2908_v4 = vadd.f32 %v2842_v18, %v13579_v42  ;;  %v2711_v6 = vmul.f32 %v13618_v34, %v13618_v34  ;;  %v13635_v15 = vadd.f32 %v13508_v48, %v2553_v0  ;;  %v8804_v2 = vpop.f32.mrb[71].mxu1 }
 0x24c   : > { %v3168_v45 = vmul.f32 0.5, %v3102_v26  ;;  %v13640_v24 = vmul.f32 %v3167_v51, %v13454_v62  ;;  %v18734_v0 = vpack.c.bf16 %v13519_v14, %v13502_v12  ;;  %v18735_v2 = vpack.c.bf16 %v13545_v57, %v13532_v35 }
 0x24d   : > { %10244 = vtanh.f32 %v2973_v38  ;;  %v2974_v16 = vmul.f32 0.7978846, %v2908_v4  ;;  %v2777_v18 = vmul.f32 %v2711_v6, %v13618_v34  ;;  %v2712_v53 = vmul.f32 %v13635_v15, %v13635_v15 }
 0x24e   : > { %4020 = vmatmul.mubr.bf16.gmra.mrb[176].mxu1 %v18734_v0  ;;  %v13653_v62 = vmul.f32 %v3168_v45, %v13470_v61  ;;  %v3365_v26 = vrot.slane %v13640_v24, 7  ;;  %v3497_v51 = vrot.slane %v13640_v24, 1  ;;  %v13659_v38 = vsel %vm1463_vm0, %v3495_v28, %v3496_v30 }
 0x24f   : > { %4027 = vmatprep.mubr.bf16.mxu1 %v18735_v2  ;;  %18736 = vst [vmem:[#allocation20_spill] sm:$0xff] %v13659_v38  ;;  %v10241_v4 = vpop.eup %10240  ;;  %10246 = vtanh.f32 %v2974_v16  ;;  %v2843_v6 = vmul.f32 0.044715, %v2777_v18  ;;  %v2778_v12 = vmul.f32 %v2712_v53, %v13635_v15 }
 0x250   : > { %v2558_v14 = vpop.f32.mrb[72].mxu1  ;;  %v3366_v61 = vrot.slane %v13653_v62, 7  ;;  %v13667_v57 = vsel %vm1330_vm1, %v3364_v63, %v3365_v26  ;;  %v3103_v45 = vadd.f32 1.0, %v10241_v4  ;;  %v13675_v53 = vsel %vm1463_vm0, %v3496_v30, %v3497_v51 }
 0x251   : > { %v10243_v0 = vpop.eup %10242  ;;  %v2909_v28 = vadd.f32 %v2843_v6, %v13618_v34  ;;  %v2844_v2 = vmul.f32 0.044715, %v2778_v12  ;;  %v13671_v16 = vadd.f32 %v13508_v48, %v2558_v14  ;;  %v8807_v18 = vpop.f32.mrb[73].mxu1 }
 0x252   : > { %v2561_v35 = vpop.f32.mrb[74].mxu1  ;;  %v13679_v1 = vsel %vm1330_vm1, %v3365_v26, %v3366_v61  ;;  %v3104_v63 = vadd.f32 1.0, %v10243_v0  ;;  %v3169_v49 = vmul.f32 0.5, %v3103_v45  ;;  %v3498_v45 = vrot.slane %v13653_v62, 1 }
 0x253   : > { %v2975_v6 = vmul.f32 0.7978846, %v2909_v28  ;;  %v2910_v12 = vadd.f32 %v2844_v2, %v13635_v15  ;;  %v2713_v14 = vmul.f32 %v13671_v16, %v13671_v16  ;;  %v13687_v18 = vadd.f32 %v13508_v48, %v2561_v35  ;;  %v8808_v30 = vpop.f32.mrb[75].mxu1 }
 0x254   : > { %v3170_v26 = vmul.f32 0.5, %v3104_v63  ;;  %v13692_v0 = vmul.f32 %v3169_v49, %v13511_v52  ;;  %v18737_v35 = vpack.c.bf16 %v13571_v44, %v13559_v23  ;;  %v18738_v30 = vpack.c.bf16 %v13597_v25, %v13584_v50  ;;  %v10143_v63 = vld [vmem:[%s18342_s5 + $0xb8] sm:$0xff]  }
 0x255   : > { %10248 = vtanh.f32 %v2975_v6  ;;  %v2976_v28 = vmul.f32 0.7978846, %v2910_v12  ;;  %v2779_v2 = vmul.f32 %v2713_v14, %v13671_v16  ;;  %v2714_v4 = vmul.f32 %v13687_v18, %v13687_v18  ;;  %8880 = vmatpush3.bf16.msra.mxu1 %v10143_v63 }
 0x256   : > { %4028 = vmatmul.mubr.bf16.gmra.mrb[180].mxu1 %v18737_v35  ;;  %v13705_v52 = vmul.f32 %v3170_v26, %v13527_v46  ;;  %v3367_v49 = vrot.slane %v13692_v0, 7  ;;  %v3499_v6 = vrot.slane %v13692_v0, 1  ;;  %v13714_v12 = vsel %vm1463_vm0, %v3497_v51, %v3498_v45  ;;  %9161 = vmatprep.subr.bf16.mxu1 %v18695_v11 }
 0x257   : > { %4035 = vmatprep.mubr.bf16.mxu1 %v18738_v30  ;;  %18739 = vst [vmem:[#allocation21_spill] sm:$0xff] %v13714_v12  ;;  %v10245_v23 = vpop.eup %10244  ;;  %10250 = vtanh.f32 %v2976_v28  ;;  %v2845_v44 = vmul.f32 0.044715, %v2779_v2  ;;  %v2780_v50 = vmul.f32 %v2714_v4, %v13687_v18 }
 0x258   : > { %v2566_v25 = vpop.f32.mrb[76].mxu1  ;;  %v3368_v14 = vrot.slane %v13705_v52, 7  ;;  %v13722_v26 = vsel %vm1330_vm1, %v3366_v61, %v3367_v49  ;;  %v3105_v35 = vadd.f32 1.0, %v10245_v23  ;;  %v13730_v2 = vsel %vm1463_vm0, %v3498_v45, %v3499_v6 }
 0x259   : > { %v10247_v30 = vpop.eup %10246  ;;  %v2911_v51 = vadd.f32 %v2845_v44, %v13671_v16  ;;  %v2846_v9 = vmul.f32 0.044715, %v2780_v50  ;;  %v13726_v28 = vadd.f32 %v13508_v48, %v2566_v25  ;;  %v8811_v4 = vpop.f32.mrb[77].mxu1  ;;  %18740 = vst [vmem:[#allocation44_spill] sm:$0xff] %v13730_v2 }
 0x25a   : > { %v2569_v46 = vpop.f32.mrb[78].mxu1  ;;  %v13735_v61 = vsel %vm1330_vm1, %v3367_v49, %v3368_v14  ;;  %v3106_v63 = vadd.f32 1.0, %v10247_v30  ;;  %v3171_v23 = vmul.f32 0.5, %v3105_v35  ;;  %v3500_v35 = vrot.slane %v13705_v52, 1 }
 0x25b   : > { %v2977_v50 = vmul.f32 0.7978846, %v2911_v51  ;;  %v2912_v25 = vadd.f32 %v2846_v9, %v13687_v18  ;;  %v2715_v4 = vmul.f32 %v13726_v28, %v13726_v28  ;;  %v13743_v45 = vadd.f32 %v13508_v48, %v2569_v46  ;;  %v8812_v11 = vpop.f32.mrb[79].mxu1 }
 0x25c   : > { %v3172_v49 = vmul.f32 0.5, %v3106_v63  ;;  %v13748_v30 = vmul.f32 %v3171_v23, %v13563_v39  ;;  %v18741_v46 = vpack.c.bf16 %v13626_v3, %v13614_v37  ;;  %v18742_v11 = vpack.c.bf16 %v13653_v62, %v13640_v24 }
 0x25d   : > { %10252 = vtanh.f32 %v2977_v50  ;;  %v2978_v51 = vmul.f32 0.7978846, %v2912_v25  ;;  %v2781_v9 = vmul.f32 %v2715_v4, %v13726_v28  ;;  %v2716_v44 = vmul.f32 %v13743_v45, %v13743_v45 }
 0x25e   : > { %4036 = vmatmul.mubr.bf16.gmra.mrb[184].mxu1 %v18741_v46  ;;  %v13761_v39 = vmul.f32 %v3172_v49, %v13579_v42  ;;  %v3369_v63 = vrot.slane %v13748_v30, 7  ;;  %v3501_v23 = vrot.slane %v13748_v30, 1  ;;  %v13767_v50 = vsel %vm1463_vm0, %v3499_v6, %v3500_v35 }
 0x25f   : > { %4043 = vmatprep.mubr.bf16.mxu1 %v18742_v11  ;;  %18743 = vst [vmem:[#allocation43_spill] sm:$0xff] %v13767_v50  ;;  %v10249_v25 = vpop.eup %10248  ;;  %10254 = vtanh.f32 %v2978_v51  ;;  %v2847_v4 = vmul.f32 0.044715, %v2781_v9  ;;  %v2782_v3 = vmul.f32 %v2716_v44, %v13743_v45 }
 0x260   : > { %v2574_v37 = vpop.f32.mrb[80].mxu1  ;;  %v3370_v42 = vrot.slane %v13761_v39, 7  ;;  %v13775_v62 = vsel %vm1330_vm1, %v3368_v14, %v3369_v63  ;;  %v3107_v49 = vadd.f32 1.0, %v10249_v25  ;;  %v13783_v44 = vsel %vm1463_vm0, %v3500_v35, %v3501_v23 }
 0x261   : > { %v10251_v46 = vpop.eup %10250  ;;  %v2913_v6 = vadd.f32 %v2847_v4, %v13726_v28  ;;  %v2848_v11 = vmul.f32 0.044715, %v2782_v3  ;;  %v13779_v51 = vadd.f32 %v13508_v48, %v2574_v37  ;;  %v8815_v9 = vpop.f32.mrb[81].mxu1  ;;  %18744 = vst [vmem:[#allocation7_spill] sm:$0xff] %v13783_v44 }
 0x262   : > { %v2577_v24 = vpop.f32.mrb[82].mxu1  ;;  %v13787_v38 = vsel %vm1330_vm1, %v3369_v63, %v3370_v42  ;;  %v3108_v14 = vadd.f32 1.0, %v10251_v46  ;;  %v3173_v12 = vmul.f32 0.5, %v3107_v49  ;;  %v3502_v49 = vrot.slane %v13761_v39, 1 }
 0x263   : > { %v2979_v4 = vmul.f32 0.7978846, %v2913_v6  ;;  %v2914_v3 = vadd.f32 %v2848_v11, %v13743_v45  ;;  %v2717_v37 = vmul.f32 %v13779_v51, %v13779_v51  ;;  %v13795_v9 = vadd.f32 %v13508_v48, %v2577_v24  ;;  %v8816_v35 = vpop.f32.mrb[83].mxu1 }
 0x264   : > { %v3174_v63 = vmul.f32 0.5, %v3108_v14  ;;  %v13800_v46 = vmul.f32 %v3173_v12, %v13618_v34  ;;  %v18745_v24 = vpack.c.bf16 %v13679_v1, %v13667_v57  ;;  %v18746_v35 = vpack.c.bf16 %v13705_v52, %v13692_v0 }
 0x265   : > { %10256 = vtanh.f32 %v2979_v4  ;;  %v2980_v6 = vmul.f32 0.7978846, %v2914_v3  ;;  %v2783_v11 = vmul.f32 %v2717_v37, %v13779_v51  ;;  %v2718_v25 = vmul.f32 %v13795_v9, %v13795_v9 }
 0x266   : > { %4044 = vmatmul.mubr.bf16.gmra.mrb[188].mxu1 %v18745_v24  ;;  %v13813_v34 = vmul.f32 %v3174_v63, %v13635_v15  ;;  %v3371_v12 = vrot.slane %v13800_v46, 7  ;;  %v3503_v14 = vrot.slane %v13800_v46, 1  ;;  %v13819_v4 = vsel %vm1463_vm0, %v3501_v23, %v3502_v49 }
 0x267   : > { %4051 = vmatprep.mubr.bf16.mxu1 %v18746_v35  ;;  %18747 = vst [vmem:[#allocation42_spill] sm:$0xff] %v13819_v4  ;;  %v10253_v3 = vpop.eup %10252  ;;  %10258 = vtanh.f32 %v2980_v6  ;;  %v2849_v37 = vmul.f32 0.044715, %v2783_v11  ;;  %v2784_v1 = vmul.f32 %v2718_v25, %v13795_v9 }
 0x268   : > { %v2582_v57 = vpop.f32.mrb[84].mxu1  ;;  %v3372_v15 = vrot.slane %v13813_v34, 7  ;;  %v13827_v52 = vsel %vm1330_vm1, %v3370_v42, %v3371_v12  ;;  %v3109_v63 = vadd.f32 1.0, %v10253_v3  ;;  %v13835_v25 = vsel %vm1463_vm0, %v3502_v49, %v3503_v14 }
 0x269   : > { %v10255_v24 = vpop.eup %10254  ;;  %v2915_v23 = vadd.f32 %v2849_v37, %v13779_v51  ;;  %v2850_v35 = vmul.f32 0.044715, %v2784_v1  ;;  %v13831_v6 = vadd.f32 %v13508_v48, %v2582_v57  ;;  %v8819_v11 = vpop.f32.mrb[85].mxu1  ;;  %18748 = vst [vmem:[#allocation18_spill] sm:$0xff] %v13835_v25 }
 0x26a   : > { %v2585_v0 = vpop.f32.mrb[86].mxu1  ;;  %v13839_v2 = vsel %vm1330_vm1, %v3371_v12, %v3372_v15  ;;  %v3110_v42 = vadd.f32 1.0, %v10255_v24  ;;  %v3175_v50 = vmul.f32 0.5, %v3109_v63  ;;  %v3504_v63 = vrot.slane %v13813_v34, 1 }
 0x26b   : > { %v2981_v37 = vmul.f32 0.7978846, %v2915_v23  ;;  %v2916_v1 = vadd.f32 %v2850_v35, %v13795_v9  ;;  %v2719_v57 = vmul.f32 %v13831_v6, %v13831_v6  ;;  %v13847_v11 = vadd.f32 %v13508_v48, %v2585_v0  ;;  %v8820_v49 = vpop.f32.mrb[87].mxu1 }
 0x26c   : > { %v3176_v12 = vmul.f32 0.5, %v3110_v42  ;;  %v13852_v24 = vmul.f32 %v3175_v50, %v13671_v16  ;;  %v18749_v0 = vpack.c.bf16 %v13735_v61, %v13722_v26  ;;  %v18750_v49 = vpack.c.bf16 %v13761_v39, %v13748_v30 }
 0x26d   : > { %10260 = vtanh.f32 %v2981_v37  ;;  %v2982_v23 = vmul.f32 0.7978846, %v2916_v1  ;;  %v2785_v35 = vmul.f32 %v2719_v57, %v13831_v6  ;;  %v2720_v3 = vmul.f32 %v13847_v11, %v13847_v11 }
 0x26e   : > { %4052 = vmatmul.mubr.bf16.gmra.mrb[192].mxu1 %v18749_v0  ;;  %v13865_v16 = vmul.f32 %v3176_v12, %v13687_v18  ;;  %v3373_v50 = vrot.slane %v13852_v24, 7  ;;  %v3505_v42 = vrot.slane %v13852_v24, 1  ;;  %v13871_v37 = vsel %vm1463_vm0, %v3503_v14, %v3504_v63 }
 0x26f   : > { %4059 = vmatprep.mubr.bf16.mxu1 %v18750_v49  ;;  %18751 = vst [vmem:[#allocation8_spill] sm:$0xff] %v13871_v37  ;;  %v10257_v1 = vpop.eup %10256  ;;  %10262 = vtanh.f32 %v2982_v23  ;;  %v2851_v57 = vmul.f32 0.044715, %v2785_v35  ;;  %v2786_v26 = vmul.f32 %v2720_v3, %v13847_v11 }
 0x270   : > { %v2590_v61 = vpop.f32.mrb[88].mxu1  ;;  %v3374_v18 = vrot.slane %v13865_v16, 7  ;;  %v13879_v39 = vsel %vm1330_vm1, %v3372_v15, %v3373_v50  ;;  %v3111_v12 = vadd.f32 1.0, %v10257_v1  ;;  %v13887_v3 = vsel %vm1463_vm0, %v3504_v63, %v3505_v42 }
 0x271   : > { %v10259_v0 = vpop.eup %10258  ;;  %v2917_v14 = vadd.f32 %v2851_v57, %v13831_v6  ;;  %v2852_v49 = vmul.f32 0.044715, %v2786_v26  ;;  %v13883_v23 = vadd.f32 %v13508_v48, %v2590_v61  ;;  %v8823_v35 = vpop.f32.mrb[89].mxu1  ;;  %18752 = vst [vmem:[#allocation9_spill] sm:$0xff] %v13887_v3 }
 0x272   : > { %v2593_v30 = vpop.f32.mrb[90].mxu1  ;;  %v13891_v44 = vsel %vm1330_vm1, %v3373_v50, %v3374_v18  ;;  %v3112_v15 = vadd.f32 1.0, %v10259_v0  ;;  %v3177_v4 = vmul.f32 0.5, %v3111_v12  ;;  %v3506_v12 = vrot.slane %v13865_v16, 1 }
 0x273   : > { %v2983_v57 = vmul.f32 0.7978846, %v2917_v14  ;;  %v2918_v26 = vadd.f32 %v2852_v49, %v13847_v11  ;;  %v2721_v61 = vmul.f32 %v13883_v23, %v13883_v23  ;;  %v13899_v35 = vadd.f32 %v13508_v48, %v2593_v30  ;;  %v8824_v63 = vpop.f32.mrb[91].mxu1 }
 0x274   : > { %v3178_v50 = vmul.f32 0.5, %v3112_v15  ;;  %v13904_v0 = vmul.f32 %v3177_v4, %v13726_v28  ;;  %v18753_v30 = vpack.c.bf16 %v13787_v38, %v13775_v62  ;;  %v18754_v63 = vpack.c.bf16 %v13813_v34, %v13800_v46 }
 0x275   : > { %10264 = vtanh.f32 %v2983_v57  ;;  %v2984_v14 = vmul.f32 0.7978846, %v2918_v26  ;;  %v2787_v49 = vmul.f32 %v2721_v61, %v13883_v23  ;;  %v2722_v1 = vmul.f32 %v13899_v35, %v13899_v35 }
 0x276   : > { %4060 = vmatmul.mubr.bf16.gmra.mrb[196].mxu1 %v18753_v30  ;;  %v13917_v28 = vmul.f32 %v3178_v50, %v13743_v45  ;;  %v3375_v4 = vrot.slane %v13904_v0, 7  ;;  %v3507_v15 = vrot.slane %v13904_v0, 1  ;;  %v13923_v57 = vsel %vm1463_vm0, %v3505_v42, %v3506_v12 }
 0x277   : > { %4067 = vmatprep.mubr.bf16.mxu1 %v18754_v63  ;;  %18755 = vst [vmem:[#allocation10_spill] sm:$0xff] %v13923_v57  ;;  %v10261_v26 = vpop.eup %10260  ;;  %10266 = vtanh.f32 %v2984_v14  ;;  %v2853_v61 = vmul.f32 0.044715, %v2787_v49  ;;  %v2788_v38 = vmul.f32 %v2722_v1, %v13899_v35 }
 0x278   : > { %v2598_v62 = vpop.f32.mrb[92].mxu1  ;;  %v3376_v45 = vrot.slane %v13917_v28, 7  ;;  %v13931_v34 = vsel %vm1330_vm1, %v3374_v18, %v3375_v4  ;;  %v3113_v50 = vadd.f32 1.0, %v10261_v26  ;;  %v13939_v1 = vsel %vm1463_vm0, %v3506_v12, %v3507_v15 }
 0x279   : > { %v10263_v30 = vpop.eup %10262  ;;  %v2919_v42 = vadd.f32 %v2853_v61, %v13883_v23  ;;  %v2854_v63 = vmul.f32 0.044715, %v2788_v38  ;;  %v13935_v14 = vadd.f32 %v13508_v48, %v2598_v62  ;;  %v8827_v49 = vpop.f32.mrb[93].mxu1  ;;  %18756 = vst [vmem:[#allocation22_spill] sm:$0xff] %v13939_v1 }
 0x27a   : > { %v2601_v46 = vpop.f32.mrb[94].mxu1  ;;  %v13943_v25 = vsel %vm1330_vm1, %v3375_v4, %v3376_v45  ;;  %v3114_v18 = vadd.f32 1.0, %v10263_v30  ;;  %v3179_v37 = vmul.f32 0.5, %v3113_v50  ;;  %v3508_v50 = vrot.slane %v13917_v28, 1 }
 0x27b   : > { %v2985_v61 = vmul.f32 0.7978846, %v2919_v42  ;;  %v2920_v38 = vadd.f32 %v2854_v63, %v13899_v35  ;;  %v2723_v62 = vmul.f32 %v13935_v14, %v13935_v14  ;;  %v13951_v49 = vadd.f32 %v13508_v48, %v2601_v46  ;;  %v8828_v12 = vpop.f32.mrb[95].mxu1 }
 0x27c   : > { %v3180_v4 = vmul.f32 0.5, %v3114_v18  ;;  %v13956_v30 = vmul.f32 %v3179_v37, %v13779_v51  ;;  %v18757_v46 = vpack.c.bf16 %v13839_v2, %v13827_v52  ;;  %v18758_v12 = vpack.c.bf16 %v13865_v16, %v13852_v24 }
 0x27d   : > { %10268 = vtanh.f32 %v2985_v61  ;;  %v2986_v42 = vmul.f32 0.7978846, %v2920_v38  ;;  %v2789_v63 = vmul.f32 %v2723_v62, %v13935_v14  ;;  %v2724_v26 = vmul.f32 %v13951_v49, %v13951_v49 }
 0x27e   : > { %4068 = vmatmul.mubr.bf16.gmra.mrb[200].mxu1 %v18757_v46  ;;  %v13969_v51 = vmul.f32 %v3180_v4, %v13795_v9  ;;  %v3377_v37 = vrot.slane %v13956_v30, 7  ;;  %v3509_v18 = vrot.slane %v13956_v30, 1  ;;  %v13975_v61 = vsel %vm1463_vm0, %v3507_v15, %v3508_v50 }
 0x27f   : > { %4075 = vmatprep.mubr.bf16.mxu1 %v18758_v12  ;;  %18759 = vst [vmem:[#allocation11_spill] sm:$0xff] %v13975_v61  ;;  %v10265_v38 = vpop.eup %10264  ;;  %10270 = vtanh.f32 %v2986_v42  ;;  %v2855_v62 = vmul.f32 0.044715, %v2789_v63  ;;  %v2790_v2 = vmul.f32 %v2724_v26, %v13951_v49 }
 0x280   : > { %v2606_v52 = vpop.f32.mrb[96].mxu1  ;;  %v3378_v9 = vrot.slane %v13969_v51, 7  ;;  %v13983_v16 = vsel %vm1330_vm1, %v3376_v45, %v3377_v37  ;;  %v3115_v4 = vadd.f32 1.0, %v10265_v38  ;;  %v13991_v26 = vsel %vm1463_vm0, %v3508_v50, %v3509_v18 }
 0x281   : > { %v10267_v46 = vpop.eup %10266  ;;  %v2921_v15 = vadd.f32 %v2855_v62, %v13935_v14  ;;  %v2856_v12 = vmul.f32 0.044715, %v2790_v2  ;;  %v13987_v42 = vadd.f32 %v13508_v48, %v2606_v52  ;;  %v8831_v63 = vpop.f32.mrb[97].mxu1  ;;  %18760 = vst [vmem:[#allocation12_spill] sm:$0xff] %v13991_v26 }
 0x282   : > { %v2609_v24 = vpop.f32.mrb[98].mxu1  ;;  %v13995_v3 = vsel %vm1330_vm1, %v3377_v37, %v3378_v9  ;;  %v3116_v45 = vadd.f32 1.0, %v10267_v46  ;;  %v3181_v57 = vmul.f32 0.5, %v3115_v4  ;;  %v3510_v4 = vrot.slane %v13969_v51, 1 }
 0x283   : > { %v2987_v62 = vmul.f32 0.7978846, %v2921_v15  ;;  %v2922_v2 = vadd.f32 %v2856_v12, %v13951_v49  ;;  %v2725_v52 = vmul.f32 %v13987_v42, %v13987_v42  ;;  %v14003_v63 = vadd.f32 %v13508_v48, %v2609_v24  ;;  %v8832_v50 = vpop.f32.mrb[99].mxu1 }
 0x284   : > { %v3182_v37 = vmul.f32 0.5, %v3116_v45  ;;  %v14008_v46 = vmul.f32 %v3181_v57, %v13831_v6  ;;  %v18761_v24 = vpack.c.bf16 %v13891_v44, %v13879_v39  ;;  %v18762_v50 = vpack.c.bf16 %v13917_v28, %v13904_v0 }
 0x285   : > { %10272 = vtanh.f32 %v2987_v62  ;;  %v2988_v15 = vmul.f32 0.7978846, %v2922_v2  ;;  %v2791_v12 = vmul.f32 %v2725_v52, %v13987_v42  ;;  %v2726_v38 = vmul.f32 %v14003_v63, %v14003_v63 }
 0x286   : > { %4076 = vmatmul.mubr.bf16.gmra.mrb[204].mxu1 %v18761_v24  ;;  %v14021_v6 = vmul.f32 %v3182_v37, %v13847_v11  ;;  %v3379_v57 = vrot.slane %v14008_v46, 7  ;;  %v3511_v45 = vrot.slane %v14008_v46, 1  ;;  %v14027_v62 = vsel %vm1463_vm0, %v3509_v18, %v3510_v4 }
 0x287   : > { %4083 = vmatprep.mubr.bf16.mxu1 %v18762_v50  ;;  %18763 = vst [vmem:[#allocation23_spill] sm:$0xff] %v14027_v62  ;;  %v10269_v2 = vpop.eup %10268  ;;  %10274 = vtanh.f32 %v2988_v15  ;;  %v2857_v52 = vmul.f32 0.044715, %v2791_v12  ;;  %v2792_v44 = vmul.f32 %v2726_v38, %v14003_v63 }
 0x288   : > { %v2614_v39 = vpop.f32.mrb[100].mxu1  ;;  %v3380_v11 = vrot.slane %v14021_v6, 7  ;;  %v14035_v28 = vsel %vm1330_vm1, %v3378_v9, %v3379_v57  ;;  %v3117_v37 = vadd.f32 1.0, %v10269_v2  ;;  %v14043_v38 = vsel %vm1463_vm0, %v3510_v4, %v3511_v45 }
 0x289   : > { %v10271_v24 = vpop.eup %10270  ;;  %v2923_v18 = vadd.f32 %v2857_v52, %v13987_v42  ;;  %v2858_v50 = vmul.f32 0.044715, %v2792_v44  ;;  %v14039_v15 = vadd.f32 %v13508_v48, %v2614_v39  ;;  %v8835_v12 = vpop.f32.mrb[101].mxu1  ;;  %18764 = vst [vmem:[#allocation14_spill] sm:$0xff] %v14043_v38 }
 0x28a   : > { %v2617_v0 = vpop.f32.mrb[102].mxu1  ;;  %v14047_v1 = vsel %vm1330_vm1, %v3379_v57, %v3380_v11  ;;  %v3118_v9 = vadd.f32 1.0, %v10271_v24  ;;  %v3183_v61 = vmul.f32 0.5, %v3117_v37  ;;  %v3512_v37 = vrot.slane %v14021_v6, 1 }
 0x28b   : > { %v2989_v52 = vmul.f32 0.7978846, %v2923_v18  ;;  %v2924_v44 = vadd.f32 %v2858_v50, %v14003_v63  ;;  %v2727_v39 = vmul.f32 %v14039_v15, %v14039_v15  ;;  %v14055_v12 = vadd.f32 %v13508_v48, %v2617_v0  ;;  %v8836_v4 = vpop.f32.mrb[103].mxu1 }
 0x28c   : > { %v3184_v57 = vmul.f32 0.5, %v3118_v9  ;;  %v14060_v24 = vmul.f32 %v3183_v61, %v13883_v23  ;;  %v18765_v0 = vpack.c.bf16 %v13943_v25, %v13931_v34  ;;  %v18766_v4 = vpack.c.bf16 %v13969_v51, %v13956_v30 }
 0x28d   : > { %10276 = vtanh.f32 %v2989_v52  ;;  %v2990_v18 = vmul.f32 0.7978846, %v2924_v44  ;;  %v2793_v50 = vmul.f32 %v2727_v39, %v14039_v15  ;;  %v2728_v2 = vmul.f32 %v14055_v12, %v14055_v12 }
 0x28e   : > { %4084 = vmatmul.mubr.bf16.gmra.mrb[208].mxu1 %v18765_v0  ;;  %v14073_v23 = vmul.f32 %v3184_v57, %v13899_v35  ;;  %v3381_v61 = vrot.slane %v14060_v24, 7  ;;  %v3513_v9 = vrot.slane %v14060_v24, 1  ;;  %v14079_v52 = vsel %vm1463_vm0, %v3511_v45, %v3512_v37 }
 0x28f   : > { %4091 = vmatprep.mubr.bf16.mxu1 %v18766_v4  ;;  %18767 = vst [vmem:[#allocation25_spill] sm:$0xff] %v14079_v52  ;;  %v10273_v44 = vpop.eup %10272  ;;  %10278 = vtanh.f32 %v2990_v18  ;;  %v2859_v39 = vmul.f32 0.044715, %v2793_v50  ;;  %v2794_v25 = vmul.f32 %v2728_v2, %v14055_v12 }
 0x290   : > { %v2622_v34 = vpop.f32.mrb[104].mxu1  ;;  %v3382_v35 = vrot.slane %v14073_v23, 7  ;;  %v14087_v51 = vsel %vm1330_vm1, %v3380_v11, %v3381_v61  ;;  %v3119_v57 = vadd.f32 1.0, %v10273_v44  ;;  %v14095_v2 = vsel %vm1463_vm0, %v3512_v37, %v3513_v9 }
 0x291   : > { %v10275_v0 = vpop.eup %10274  ;;  %v2925_v45 = vadd.f32 %v2859_v39, %v14039_v15  ;;  %v2860_v4 = vmul.f32 0.044715, %v2794_v25  ;;  %v14091_v18 = vadd.f32 %v13508_v48, %v2622_v34  ;;  %v8839_v50 = vpop.f32.mrb[105].mxu1  ;;  %18768 = vst [vmem:[#allocation24_spill] sm:$0xff] %v14095_v2 }
 0x292   : > { %v2625_v30 = vpop.f32.mrb[106].mxu1  ;;  %v14099_v26 = vsel %vm1330_vm1, %v3381_v61, %v3382_v35  ;;  %v3120_v11 = vadd.f32 1.0, %v10275_v0  ;;  %v3185_v62 = vmul.f32 0.5, %v3119_v57  ;;  %v3514_v57 = vrot.slane %v14073_v23, 1 }
 0x293   : > { %v2991_v39 = vmul.f32 0.7978846, %v2925_v45  ;;  %v2926_v25 = vadd.f32 %v2860_v4, %v14055_v12  ;;  %v2729_v34 = vmul.f32 %v14091_v18, %v14091_v18  ;;  %v14107_v50 = vadd.f32 %v13508_v48, %v2625_v30  ;;  %v8840_v37 = vpop.f32.mrb[107].mxu1 }
 0x294   : > { %v3186_v61 = vmul.f32 0.5, %v3120_v11  ;;  %v14112_v0 = vmul.f32 %v3185_v62, %v13935_v14  ;;  %v18769_v30 = vpack.c.bf16 %v13995_v3, %v13983_v16  ;;  %v18770_v37 = vpack.c.bf16 %v14021_v6, %v14008_v46 }
 0x295   : > { %10280 = vtanh.f32 %v2991_v39  ;;  %v2992_v45 = vmul.f32 0.7978846, %v2926_v25  ;;  %v2795_v4 = vmul.f32 %v2729_v34, %v14091_v18  ;;  %v2730_v44 = vmul.f32 %v14107_v50, %v14107_v50 }
 0x296   : > { %4092 = vmatmul.mubr.bf16.gmra.mrb[212].mxu1 %v18769_v30  ;;  %v14125_v14 = vmul.f32 %v3186_v61, %v13951_v49  ;;  %v3383_v62 = vrot.slane %v14112_v0, 7  ;;  %v3515_v11 = vrot.slane %v14112_v0, 1  ;;  %v14131_v39 = vsel %vm1463_vm0, %v3513_v9, %v3514_v57 }
 0x297   : > { %4099 = vmatprep.mubr.bf16.mxu1 %v18770_v37  ;;  %18771 = vst [vmem:[#allocation28_spill] sm:$0xff] %v14131_v39  ;;  %v10277_v25 = vpop.eup %10276  ;;  %10282 = vtanh.f32 %v2992_v45  ;;  %v2861_v34 = vmul.f32 0.044715, %v2795_v4  ;;  %v2796_v3 = vmul.f32 %v2730_v44, %v14107_v50 }
 0x298   : > { %v2630_v16 = vpop.f32.mrb[108].mxu1  ;;  %v3384_v49 = vrot.slane %v14125_v14, 7  ;;  %v14139_v6 = vsel %vm1330_vm1, %v3382_v35, %v3383_v62  ;;  %v3121_v61 = vadd.f32 1.0, %v10277_v25  ;;  %v14147_v44 = vsel %vm1463_vm0, %v3514_v57, %v3515_v11 }
 0x299   : > { %v10279_v30 = vpop.eup %10278  ;;  %v2927_v9 = vadd.f32 %v2861_v34, %v14091_v18  ;;  %v2862_v37 = vmul.f32 0.044715, %v2796_v3  ;;  %v14143_v45 = vadd.f32 %v13508_v48, %v2630_v16  ;;  %v8843_v4 = vpop.f32.mrb[109].mxu1  ;;  %18772 = vst [vmem:[#allocation29_spill] sm:$0xff] %v14147_v44 }
 0x29a   : > { %v2633_v46 = vpop.f32.mrb[110].mxu1  ;;  %v14151_v38 = vsel %vm1330_vm1, %v3383_v62, %v3384_v49  ;;  %v3122_v35 = vadd.f32 1.0, %v10279_v30  ;;  %v3187_v52 = vmul.f32 0.5, %v3121_v61  ;;  %v3516_v61 = vrot.slane %v14125_v14, 1 }
 0x29b   : > { %v2993_v34 = vmul.f32 0.7978846, %v2927_v9  ;;  %v2928_v3 = vadd.f32 %v2862_v37, %v14107_v50  ;;  %v2731_v16 = vmul.f32 %v14143_v45, %v14143_v45  ;;  %v14159_v4 = vadd.f32 %v13508_v48, %v2633_v46  ;;  %v8844_v57 = vpop.f32.mrb[111].mxu1 }
 0x29c   : > { %v3188_v62 = vmul.f32 0.5, %v3122_v35  ;;  %v14164_v30 = vmul.f32 %v3187_v52, %v13987_v42  ;;  %v18773_v48 = vpack.c.bf16 %v14047_v1, %v14035_v28  ;;  %v18774_v46 = vpack.c.bf16 %v14073_v23, %v14060_v24 }
 0x29d   : > { %10284 = vtanh.f32 %v2993_v34  ;;  %v2994_v9 = vmul.f32 0.7978846, %v2928_v3  ;;  %v2797_v37 = vmul.f32 %v2731_v16, %v14143_v45  ;;  %v2732_v25 = vmul.f32 %v14159_v4, %v14159_v4 }
 0x29e   : > { %4100 = vmatmul.mubr.bf16.gmra.mrb[216].mxu1 %v18773_v48  ;;  %v14177_v42 = vmul.f32 %v3188_v62, %v14003_v63  ;;  %v3385_v52 = vrot.slane %v14164_v30, 7  ;;  %v3517_v35 = vrot.slane %v14164_v30, 1  ;;  %v14183_v34 = vsel %vm1463_vm0, %v3515_v11, %v3516_v61 }
 0x29f   : > { %4107 = vmatprep.mubr.bf16.mxu1 %v18774_v46  ;;  %18775 = vst [vmem:[#allocation15_spill] sm:$0xff] %v14183_v34  ;;  %v10281_v3 = vpop.eup %10280  ;;  %10286 = vtanh.f32 %v2994_v9  ;;  %v2863_v16 = vmul.f32 0.044715, %v2797_v37  ;;  %v2798_v1 = vmul.f32 %v2732_v25, %v14159_v4  ;;  %v14197_v9 = vld [vmem:[%s18345_s8] ss:$0 sm:$0xff] }
 0x2a0   : > { %v2638_v28 = vpop.f32.mrb[112].mxu1  ;;  %v3386_v63 = vrot.slane %v14177_v42, 7  ;;  %v14191_v23 = vsel %vm1330_vm1, %v3384_v49, %v3385_v52  ;;  %v3123_v57 = vadd.f32 1.0, %v10281_v3  ;;  %v14204_v46 = vsel %vm1463_vm0, %v3516_v61, %v3517_v35 }
 0x2a1   : > { %v10283_v62 = vpop.eup %10282  ;;  %v2929_v11 = vadd.f32 %v2863_v16, %v14143_v45  ;;  %v2864_v48 = vmul.f32 0.044715, %v2798_v1  ;;  %v14200_v25 = vadd.f32 %v14197_v9, %v2638_v28  ;;  %v8847_v37 = vpop.f32.mrb[113].mxu1  ;;  %18776 = vst [vmem:[#allocation17_spill] sm:$0xff] %v14204_v46 }
 0x2a2   : > { %v2641_v49 = vpop.f32.mrb[114].mxu1  ;;  %v14208_v3 = vsel %vm1330_vm1, %v3385_v52, %v3386_v63  ;;  %v3124_v16 = vadd.f32 1.0, %v10283_v62  ;;  %v3189_v1 = vmul.f32 0.5, %v3123_v57  ;;  %v3518_v57 = vrot.slane %v14177_v42, 1 }
 0x2a3   : > { %v2995_v2 = vmul.f32 0.7978846, %v2929_v11  ;;  %v2930_v39 = vadd.f32 %v2864_v48, %v14159_v4  ;;  %v2733_v28 = vmul.f32 %v14200_v25, %v14200_v25  ;;  %v14216_v37 = vadd.f32 %v14197_v9, %v2641_v49  ;;  %v8848_v61 = vpop.f32.mrb[115].mxu1 }
 0x2a4   : > { %v3190_v52 = vmul.f32 0.5, %v3124_v16  ;;  %v14221_v62 = vmul.f32 %v3189_v1, %v14039_v15  ;;  %v18777_v49 = vpack.c.bf16 %v14099_v26, %v14087_v51  ;;  %v18778_v61 = vpack.c.bf16 %v14125_v14, %v14112_v0 }
 0x2a5   : > { %10288 = vtanh.f32 %v2995_v2  ;;  %v2996_v11 = vmul.f32 0.7978846, %v2930_v39  ;;  %v2799_v48 = vmul.f32 %v2733_v28, %v14200_v25  ;;  %v2734_v24 = vmul.f32 %v14216_v37, %v14216_v37 }
 0x2a6   : > { %4108 = vmatmul.mubr.bf16.gmra.mrb[220].mxu1 %v18777_v49  ;;  %v14234_v15 = vmul.f32 %v3190_v52, %v14055_v12  ;;  %v3387_v16 = vrot.slane %v14221_v62, 7  ;;  %v3519_v2 = vrot.slane %v14221_v62, 1  ;;  %v14240_v39 = vsel %vm1463_vm0, %v3517_v35, %v3518_v57 }
 0x2a7   : > { %4115 = vmatprep.mubr.bf16.mxu1 %v18778_v61  ;;  %18779 = vst [vmem:[#allocation16_spill] sm:$0xff] %v14240_v39  ;;  %v10285_v1 = vpop.eup %10284  ;;  %10290 = vtanh.f32 %v2996_v11  ;;  %v2865_v28 = vmul.f32 0.044715, %v2799_v48  ;;  %v2800_v26 = vmul.f32 %v2734_v24, %v14216_v37 }
 0x2a8   : > { %v2646_v51 = vpop.f32.mrb[116].mxu1  ;;  %v3388_v12 = vrot.slane %v14234_v15, 7  ;;  %v14248_v14 = vsel %vm1330_vm1, %v3386_v63, %v3387_v16  ;;  %v3125_v52 = vadd.f32 1.0, %v10285_v1  ;;  %v14256_v24 = vsel %vm1463_vm0, %v3518_v57, %v3519_v2 }
 0x2a9   : > { %v10287_v49 = vpop.eup %10286  ;;  %v2931_v35 = vadd.f32 %v2865_v28, %v14200_v25  ;;  %v2866_v61 = vmul.f32 0.044715, %v2800_v26  ;;  %v14252_v11 = vadd.f32 %v14197_v9, %v2646_v51  ;;  %v8851_v48 = vpop.f32.mrb[117].mxu1  ;;  %18780 = vst [vmem:[#allocation19_spill] sm:$0xff] %v14256_v24 }
 0x2aa   : > { %v2649_v0 = vpop.f32.mrb[118].mxu1  ;;  %v14260_v44 = vsel %vm1330_vm1, %v3387_v16, %v3388_v12  ;;  %v3126_v63 = vadd.f32 1.0, %v10287_v49  ;;  %v3191_v34 = vmul.f32 0.5, %v3125_v52  ;;  %v3520_v52 = vrot.slane %v14234_v15, 1 }
 0x2ab   : > { %v2997_v28 = vmul.f32 0.7978846, %v2931_v35  ;;  %v2932_v26 = vadd.f32 %v2866_v61, %v14216_v37  ;;  %v2735_v51 = vmul.f32 %v14252_v11, %v14252_v11  ;;  %v14268_v48 = vadd.f32 %v14197_v9, %v2649_v0  ;;  %v8852_v57 = vpop.f32.mrb[119].mxu1 }
 0x2ac   : > { %v3192_v16 = vmul.f32 0.5, %v3126_v63  ;;  %v14273_v49 = vmul.f32 %v3191_v34, %v14091_v18  ;;  %v18781_v0 = vpack.c.bf16 %v14151_v38, %v14139_v6  ;;  %v18782_v57 = vpack.c.bf16 %v14177_v42, %v14164_v30 }
 0x2ad   : > { %10292 = vtanh.f32 %v2997_v28  ;;  %v2998_v35 = vmul.f32 0.7978846, %v2932_v26  ;;  %v2801_v61 = vmul.f32 %v2735_v51, %v14252_v11  ;;  %v2736_v1 = vmul.f32 %v14268_v48, %v14268_v48 }
 0x2ae   : > { %4116 = vmatmul.mubr.bf16.gmra.mrb[224].mxu1 %v18781_v0  ;;  %v14286_v18 = vmul.f32 %v3192_v16, %v14107_v50  ;;  %v3389_v34 = vrot.slane %v14273_v49, 7  ;;  %v3521_v63 = vrot.slane %v14273_v49, 1  ;;  %v14292_v28 = vsel %vm1463_vm0, %v3519_v2, %v3520_v52 }
 0x2af   : > { %4123 = vmatprep.mubr.bf16.mxu1 %v18782_v57  ;;  %18783 = vst [vmem:[#allocation26_spill] sm:$0xff] %v14292_v28  ;;  %v10289_v26 = vpop.eup %10288  ;;  %10294 = vtanh.f32 %v2998_v35  ;;  %v2867_v51 = vmul.f32 0.044715, %v2801_v61  ;;  %v2802_v38 = vmul.f32 %v2736_v1, %v14268_v48 }
 0x2b0   : > { %v2654_v6 = vpop.f32.mrb[120].mxu1  ;;  %v3390_v50 = vrot.slane %v14286_v18, 7  ;;  %v14300_v42 = vsel %vm1330_vm1, %v3388_v12, %v3389_v34  ;;  %v3127_v16 = vadd.f32 1.0, %v10289_v26  ;;  %v14308_v1 = vsel %vm1463_vm0, %v3520_v52, %v3521_v63 }
 0x2b1   : > { %v10291_v0 = vpop.eup %10290  ;;  %v2933_v2 = vadd.f32 %v2867_v51, %v14252_v11  ;;  %v2868_v57 = vmul.f32 0.044715, %v2802_v38  ;;  %v14304_v35 = vadd.f32 %v14197_v9, %v2654_v6  ;;  %v8855_v61 = vpop.f32.mrb[121].mxu1  ;;  %18784 = vst [vmem:[#allocation30_spill] sm:$0xff] %v14308_v1 }
 0x2b2   : > { %v2657_v30 = vpop.f32.mrb[122].mxu1  ;;  %v14312_v46 = vsel %vm1330_vm1, %v3389_v34, %v3390_v50  ;;  %v3128_v12 = vadd.f32 1.0, %v10291_v0  ;;  %v3193_v39 = vmul.f32 0.5, %v3127_v16  ;;  %v3522_v16 = vrot.slane %v14286_v18, 1 }
 0x2b3   : > { %v2999_v51 = vmul.f32 0.7978846, %v2933_v2  ;;  %v2934_v38 = vadd.f32 %v2868_v57, %v14268_v48  ;;  %v2737_v6 = vmul.f32 %v14304_v35, %v14304_v35  ;;  %v14320_v61 = vadd.f32 %v14197_v9, %v2657_v30  ;;  %v8856_v52 = vpop.f32.mrb[123].mxu1 }
 0x2b4   : > { %v3194_v34 = vmul.f32 0.5, %v3128_v12  ;;  %v14325_v0 = vmul.f32 %v3193_v39, %v14143_v45  ;;  %v18785_v30 = vpack.c.bf16 %v14208_v3, %v14191_v23  ;;  %v18786_v52 = vpack.c.bf16 %v14234_v15, %v14221_v62 }
 0x2b5   : > { %10296 = vtanh.f32 %v2999_v51  ;;  %v3000_v2 = vmul.f32 0.7978846, %v2934_v38  ;;  %v2803_v57 = vmul.f32 %v2737_v6, %v14304_v35  ;;  %v2738_v26 = vmul.f32 %v14320_v61, %v14320_v61 }
 0x2b6   : > { %4124 = vmatmul.mubr.bf16.gmra.mrb[228].mxu1 %v18785_v30  ;;  %v14338_v45 = vmul.f32 %v3194_v34, %v14159_v4  ;;  %v3391_v39 = vrot.slane %v14325_v0, 7  ;;  %v3523_v12 = vrot.slane %v14325_v0, 1  ;;  %v14344_v51 = vsel %vm1463_vm0, %v3521_v63, %v3522_v16 }
 0x2b7   : > { %4131 = vmatprep.mubr.bf16.mxu1 %v18786_v52  ;;  %18787 = vst [vmem:[#allocation27_spill] sm:$0xff] %v14344_v51  ;;  %v10293_v38 = vpop.eup %10292  ;;  %10298 = vtanh.f32 %v3000_v2  ;;  %v2869_v6 = vmul.f32 0.044715, %v2803_v57  ;;  %v2804_v23 = vmul.f32 %v2738_v26, %v14320_v61 }
 0x2b8   : > { %v2662_v3 = vpop.f32.mrb[124].mxu1  ;;  %v3392_v4 = vrot.slane %v14338_v45, 7  ;;  %v14352_v15 = vsel %vm1330_vm1, %v3390_v50, %v3391_v39  ;;  %v3129_v34 = vadd.f32 1.0, %v10293_v38  ;;  %v14360_v26 = vsel %vm1463_vm0, %v3522_v16, %v3523_v12 }
 0x2b9   : > { %v10295_v30 = vpop.eup %10294  ;;  %v2935_v63 = vadd.f32 %v2869_v6, %v14304_v35  ;;  %v2870_v52 = vmul.f32 0.044715, %v2804_v23  ;;  %v14356_v2 = vadd.f32 %v14197_v9, %v2662_v3  ;;  %v8859_v57 = vpop.f32.mrb[125].mxu1 }
 0x2ba   : > { %v2665_v62 = vpop.f32.mrb[126].mxu1  ;;  %v14364_v24 = vsel %vm1330_vm1, %v3391_v39, %v3392_v4  ;;  %v3130_v50 = vadd.f32 1.0, %v10295_v30  ;;  %v3195_v28 = vmul.f32 0.5, %v3129_v34  ;;  %v3524_v34 = vrot.slane %v14338_v45, 1 }
 0x2bb   : > { %v3001_v6 = vmul.f32 0.7978846, %v2935_v63  ;;  %v2936_v23 = vadd.f32 %v2870_v52, %v14320_v61  ;;  %v2739_v3 = vmul.f32 %v14356_v2, %v14356_v2  ;;  %v14372_v57 = vadd.f32 %v14197_v9, %v2665_v62  ;;  %v8860_v16 = vpop.f32.mrb[127].mxu1 }
 0x2bc   : > { %v3196_v39 = vmul.f32 0.5, %v3130_v50  ;;  %v14377_v30 = vmul.f32 %v3195_v28, %v14200_v25  ;;  %v18788_v62 = vpack.c.bf16 %v14260_v44, %v14248_v14  ;;  %v18789_v16 = vpack.c.bf16 %v14286_v18, %v14273_v49 }
 0x2bd   : > { %10300 = vtanh.f32 %v3001_v6  ;;  %v3002_v63 = vmul.f32 0.7978846, %v2936_v23  ;;  %v2805_v52 = vmul.f32 %v2739_v3, %v14356_v2  ;;  %v2740_v38 = vmul.f32 %v14372_v57, %v14372_v57 }
 0x2be   : > { %4132 = vmatmul.mubr.bf16.gmra.mrb[232].mxu1 %v18788_v62  ;;  %v14390_v25 = vmul.f32 %v3196_v39, %v14216_v37  ;;  %v3393_v28 = vrot.slane %v14377_v30, 7  ;;  %v3525_v50 = vrot.slane %v14377_v30, 1  ;;  %v14396_v6 = vsel %vm1463_vm0, %v3523_v12, %v3524_v34 }
 0x2bf   : > { %4139 = vmatprep.mubr.bf16.mxu1 %v18789_v16  ;;  %v10297_v23 = vpop.eup %10296  ;;  %10302 = vtanh.f32 %v3002_v63  ;;  %v2871_v3 = vmul.f32 0.044715, %v2805_v52  ;;  %v2806_v44 = vmul.f32 %v2740_v38, %v14372_v57 }
 0x2c0   : > { %v2670_v14 = vpop.f32.mrb[128].mxu1  ;;  %v3686_v49 = vpack.c.bf16 %v14390_v25, %v14377_v30  ;;  %v3394_v37 = vrot.slane %v14390_v25, 7  ;;  %v14404_v18 = vsel %vm1330_vm1, %v3392_v4, %v3393_v28  ;;  %v3131_v39 = vadd.f32 1.0, %v10297_v23 }
 0x2c1   : > { %v10299_v62 = vpop.eup %10298  ;;  %v2937_v12 = vadd.f32 %v2871_v3, %v14356_v2  ;;  %v2872_v16 = vmul.f32 0.044715, %v2806_v44  ;;  %v14408_v63 = vadd.f32 %v14197_v9, %v2670_v14  ;;  %v8863_v52 = vpop.f32.mrb[129].mxu1  ;;  %v14412_v38 = vsel %vm1463_vm0, %v3524_v34, %v3525_v50 }
 0x2c2   : > { %v2673_v30 = vpop.f32.mrb[130].mxu1  ;;  %v14416_v1 = vsel %vm1330_vm1, %v3393_v28, %v3394_v37  ;;  %v3132_v4 = vadd.f32 1.0, %v10299_v62  ;;  %v3197_v51 = vmul.f32 0.5, %v3131_v39  ;;  %v3684_v23 = vpack.c.bf16 %v14412_v38, %v14396_v6 }
 0x2c3   : > { %v3003_v3 = vmul.f32 0.7978846, %v2937_v12  ;;  %v2938_v44 = vadd.f32 %v2872_v16, %v14372_v57  ;;  %v2741_v9 = vmul.f32 %v14408_v63, %v14408_v63  ;;  %v8864_v14 = vpop.f32.mrb[131].mxu1  ;;  %v3685_v34 = vpack.c.bf16 %v14416_v1, %v14404_v18 }
 0x2c4   : > { %v3198_v52 = vmul.f32 0.5, %v3132_v4  ;;  %v3263_v30 = vmul.f32 %v3197_v51, %v14252_v11  ;;  %v3526_v28 = vrot.slane %v14390_v25, 1  ;;  %v18790_v12 = vpack.c.bf16 %v14312_v46, %v14300_v42 }
 0x2c5   : > { %10304 = vtanh.f32 %v3003_v3  ;;  %v3004_v39 = vmul.f32 0.7978846, %v2938_v44  ;;  %v2807_v62 = vmul.f32 %v2741_v9, %v14408_v63  ;;  %v18791_v16 = vpack.c.bf16 %v14338_v45, %v14325_v0 }
 0x2c6   : > { %4140 = vmatmul.mubr.bf16.gmra.mrb[236].mxu1 %v18790_v12  ;;  %v3264_v14 = vmul.f32 %v3198_v52, %v14268_v48  ;;  %v3395_v1 = vrot.slane %v3263_v30, 7  ;;  %v3527_v18 = vrot.slane %v3263_v30, 1  ;;  %v14437_v11 = vsel %vm1463_vm0, %v3525_v50, %v3526_v28 }
 0x2c7   : > { %4147 = vmatprep.mubr.bf16.mxu1 %v18791_v16  ;;  %v10301_v51 = vpop.eup %10300  ;;  %10306 = vtanh.f32 %v3004_v39  ;;  %v2873_v25 = vmul.f32 0.044715, %v2807_v62 }
 0x2c8   : > { %v3689_v4 = vpack.c.bf16 %v3264_v14, %v3263_v30  ;;  %v3396_v3 = vrot.slane %v3264_v14, 7  ;;  %v3410_v46 = vsel %vm1330_vm1, %v3394_v37, %v3395_v1  ;;  %v3133_v42 = vadd.f32 1.0, %v10301_v51 }
 0x2c9   : > { %v10303_v44 = vpop.eup %10302  ;;  %v2939_v0 = vadd.f32 %v2873_v25, %v14408_v63  ;;  %v14444_v48 = vsel %vm1463_vm0, %v3526_v28, %v3527_v18  ;;  %v3528_v45 = vrot.slane %v3264_v14, 1  ;;  %v18792_v28 = vpack.c.bf16 %v14364_v24, %v14352_v15 }
 0x2ca   : > { %v3409_v50 = vsel %vm1330_vm1, %v3395_v1, %v3396_v3  ;;  %v3134_v9 = vadd.f32 1.0, %v10303_v44  ;;  %v3199_v52 = vmul.f32 0.5, %v3133_v42  ;;  %v3687_v30 = vpack.c.bf16 %v14444_v48, %v14437_v11 }
 0x2cb   : > { %v3005_v39 = vmul.f32 0.7978846, %v2939_v0  ;;  %v3688_v62 = vpack.c.bf16 %v3409_v50, %v3410_v46  ;;  %v14452_v37 = vsel %vm1463_vm0, %v3527_v18, %v3528_v45 }
 0x2cc   : > { %v3200_v12 = vmul.f32 0.5, %v3134_v9  ;;  %v3265_v16 = vmul.f32 %v3199_v52, %v14304_v35 }
 0x2cd   : > { %10308 = vtanh.f32 %v3005_v39 }
 0x2ce   : > { %4148 = vmatmul.mubr.bf16.gmra.mrb[240].mxu1 %v18792_v28  ;;  %v3266_v14 = vmul.f32 %v3200_v12, %v14320_v61  ;;  %v3397_v1 = vrot.slane %v3265_v16, 7  ;;  %v3529_v51 = vrot.slane %v3265_v16, 1 }
 0x2cf   : > { %4155 = vmatprep.mubr.bf16.mxu1 %v3686_v49  ;;  %v10305_v25 = vpop.eup %10304 }
 0x2d0   : > { %v3692_v42 = vpack.c.bf16 %v3266_v14, %v3265_v16  ;;  %v3398_v46 = vrot.slane %v3266_v14, 7  ;;  %v3408_v18 = vsel %vm1330_vm1, %v3396_v3, %v3397_v1  ;;  %v3135_v44 = vadd.f32 1.0, %v10305_v25 }
 0x2d1   : > { %v10307_v0 = vpop.eup %10306  ;;  %v14463_v35 = vsel %vm1463_vm0, %v3528_v45, %v3529_v51  ;;  %v3530_v50 = vrot.slane %v3266_v14, 1 }
 0x2d2   : > { %v3407_v24 = vsel %vm1330_vm1, %v3397_v1, %v3398_v46  ;;  %v3136_v15 = vadd.f32 1.0, %v10307_v0  ;;  %v3201_v61 = vmul.f32 0.5, %v3135_v44  ;;  %v3690_v49 = vpack.c.bf16 %v14463_v35, %v14452_v37 }
 0x2d3   : > { %v3691_v9 = vpack.c.bf16 %v3407_v24, %v3408_v18  ;;  %v14471_v52 = vsel %vm1463_vm0, %v3529_v51, %v3530_v50 }
 0x2d4   : > { %v3202_v3 = vmul.f32 0.5, %v3136_v15  ;;  %v3267_v39 = vmul.f32 %v3201_v61, %v14356_v2 }
 0x2d6   : > { %4156 = vmatmul.mubr.bf16.gmra.mrb[244].mxu1 %v3685_v34  ;;  %v3268_v45 = vmul.f32 %v3202_v3, %v14372_v57  ;;  %v3399_v12 = vrot.slane %v3267_v39, 7  ;;  %v3531_v16 = vrot.slane %v3267_v39, 1 }
 0x2d7   : > { %4163 = vmatprep.mubr.bf16.mxu1 %v3689_v4  ;;  %v10309_v28 = vpop.eup %10308 }
 0x2d8   : > { %v3400_v14 = vrot.slane %v3268_v45, 7  ;;  %v3406_v1 = vsel %vm1330_vm1, %v3398_v46, %v3399_v12  ;;  %v3532_v25 = vrot.slane %v3268_v45, 1  ;;  %v3695_v18 = vpack.c.bf16 %v3268_v45, %v3267_v39 }
 0x2d9   : > { %v3137_v44 = vadd.f32 1.0, %v10309_v28  ;;  %v14479_v51 = vsel %vm1463_vm0, %v3530_v50, %v3531_v16  ;;  %v18793_v39 = vpack.c.bf16 %v12969_v58, %v12954_v10  ;;  %v18795_v45 = vpack.c.bf16 %v13077_v5, %v13060_v56 }
 0x2da   : > { %v3405_v2 = vsel %vm1330_vm1, %v3399_v12, %v3400_v14  ;;  %v14485_v57 = vsel %vm1463_vm0, %v3531_v16, %v3532_v25  ;;  %v3693_v34 = vpack.c.bf16 %v14479_v51, %v14471_v52  ;;  %v18796_v10 = vpack.c.bf16 %v13137_v32, %v13120_v22  ;;  %v18820_v12 = vld [vmem:[#allocation9_spill] sm:$0xff]  ;;  %v18821_v16 = vld [vmem:[#allocation8_spill] sm:$0xff] }
 0x2db   : > { %v3694_v4 = vpack.c.bf16 %v3405_v2, %v3406_v1  ;;  %v3203_v0 = vmul.f32 0.5, %v3137_v44  ;;  %v18797_v58 = vpack.c.bf16 %v13194_v55, %v13177_v47  ;;  %v18800_v56 = vpack.c.bf16 %v13350_v31, %v13334_v36  ;;  %v18804_v47 = vld [vmem:[#allocation39_spill] sm:$0xff]  ;;  %v18811_v31 = vld [vmem:[#allocation44_spill] sm:$0xff]  ;;  %v18824_v1 = vld [vmem:[#allocation10_spill] sm:$0xff] }
 0x2dc   : > { %v18801_v5 = vpack.c.bf16 %v13405_v59, %v13386_v29  ;;  %v18802_v22 = vpack.c.bf16 %v13458_v40, %v13442_v41  ;;  %v18803_v32 = vpack.c.bf16 %v13515_v33, %v13494_v60  ;;  %v18805_v55 = vpack.c.bf16 %v13567_v7, %v18804_v47  ;;  %v18812_v29 = vld [vmem:[#allocation21_spill] sm:$0xff]  ;;  %v18814_v41 = vld [vmem:[#allocation7_spill] sm:$0xff]  ;;  %v18817_v33 = vld [vmem:[#allocation18_spill] sm:$0xff] }
 0x2dd   : > { %v14490_v46 = vmul.f32 %v3203_v0, %v14408_v63  ;;  %v18813_v59 = vpack.c.bf16 %v18811_v31, %v18812_v29  ;;  %v18815_v40 = vld [vmem:[#allocation43_spill] sm:$0xff]  ;;  %v18818_v7 = vld [vmem:[#allocation42_spill] sm:$0xff]  ;;  %v18822_v28 = vpack.c.bf16 %v18820_v12, %v18821_v16  ;;  %v10144_v47 = vld [vmem:[%s18343_s6] sm:$0xff]  }
 0x2de   : > { %4164 = vmatmul.mubr.bf16.gmra.mrb[248].mxu1 %v3688_v62  ;;  %v18816_v60 = vpack.c.bf16 %v18814_v41, %v18815_v40  ;;  %v18827_v44 = vld [vmem:[#allocation11_spill] sm:$0xff]  ;;  %6016 = vmatpush1.bf16.msra.mxu0 %v10144_v47  ;;  %v14665_v29 = vld [vmem:[%s18346_s9] ss:$0 sm:$0xff]  ;;  %v10155_v52 = vld [vmem:[%s18343_s6 + $0x58] sm:$0xff]  }
 0x2df   : > { %4171 = vmatprep.mubr.bf16.mxu1 %v3692_v42  ;;  %v3401_v50 = vrot.slane %v14490_v46, 7  ;;  %v3533_v24 = vrot.slane %v14490_v46, 1  ;;  %v3698_v3 = vpack.c.bf16 %v18686_v43, %v14490_v46  ;;  %v18830_v0 = vld [vmem:[#allocation23_spill] sm:$0xff] }
 0x2e1   : > { %v3403_v15 = vsel %vm1330_vm1, %v3401_v50, %v12208_v19  ;;  %v3404_v61 = vsel %vm1330_vm1, %v3400_v14, %v3401_v50  ;;  %v14503_v62 = vsel %vm1463_vm0, %v3532_v25, %v3533_v24  ;;  %v18823_v14 = vld [vmem:[#allocation22_spill] sm:$0xff] }
 0x2e2   : > { %v3697_v63 = vpack.c.bf16 %v3403_v15, %v3404_v61  ;;  %v3696_v42 = vpack.c.bf16 %v14503_v62, %v14485_v57  ;;  %v18825_v25 = vpack.c.bf16 %v18823_v14, %v18824_v1  ;;  %v18832_v15 = vld [vmem:[#allocation24_spill] sm:$0xff]  ;;  %v18833_v61 = vld [vmem:[#allocation25_spill] sm:$0xff] }
 0x2e6   : > { %4172 = vmatmul.mubr.bf16.gmra.mrb[252].mxu1 %v3691_v9  ;;  %v18794_v9 = vpack.c.bf16 %v13021_v54, %v13003_v20  ;;  %v18798_v20 = vpack.c.bf16 %v13246_v21, %v13230_v13  ;;  %v18799_v54 = vpack.c.bf16 %v13298_v27, %v13282_v17  ;;  %v18806_v13 = vld [vmem:[#allocation13_spill] sm:$0xff]  ;;  %v18809_v27 = vld [vmem:[#allocation20_spill] sm:$0xff] }
 0x2e7   : > { %4179 = vmatprep.mubr.bf16.mxu1 %v3695_v18  ;;  %v18807_v21 = vld [vmem:[#allocation41_spill] sm:$0xff]  ;;  %v18810_v36 = vpack.c.bf16 %v13675_v53, %v18809_v27  ;;  %v18819_v53 = vpack.c.bf16 %v18817_v33, %v18818_v7  ;;  %v18826_v18 = vld [vmem:[#allocation12_spill] sm:$0xff]  ;;  %v10146_v27 = vld [vmem:[%s18343_s6 + $0x10] sm:$0xff]  }
 0x2e8   : > { %v18808_v17 = vpack.c.bf16 %v18806_v13, %v18807_v21  ;;  %v18828_v2 = vpack.c.bf16 %v18826_v18, %v18827_v44  ;;  %v18847_v13 = vmov 0   ;;  %v18848_v21 = vld [vmem:[#allocation27_spill] sm:$0xff]  ;;  %v10148_v33 = vld [vmem:[%s18343_s6 + $0x20] sm:$0xff]  }
 0x2e9   : > { %6017 = vmatprep.subr.bf16.mxu0 %v18847_v13 }
 0x2ee   : > { %4180 = vmatmul.mubr.bf16.gmra.mrb[0].mxu1 %v3694_v4  ;;  %v18829_v4 = vld [vmem:[#allocation14_spill] sm:$0xff] }
 0x2ef   : > { %4187 = vmatprep.mubr.bf16.mxu1 %v3698_v3  ;;  %v18831_v50 = vpack.c.bf16 %v18829_v4, %v18830_v0  ;;  %v18835_v3 = vld [vmem:[#allocation29_spill] sm:$0xff]  ;;  %v10150_v4 = vld [vmem:[%s18343_s6 + $0x30] sm:$0xff]  }
 0x2f6   : > { %4188 = vmatmul.mubr.bf16.gmra.mrb[4].mxu1 %v3697_v63  ;;  %v18834_v63 = vpack.c.bf16 %v18832_v15, %v18833_v61  ;;  %v10151_v15 = vld [vmem:[%s18343_s6 + $0x38] sm:$0xff]  }
 0x2f7   : > { %8881 = vmatprep.mubr.msk.bf16.mxu1 %vm10619_vm2, %v18686_v43 }
 0x2fe   : > { %8882 = vmatmul.mubr.bf16.vlgmr.msra.gmra.mrb[132].mxu1 %v18793_v39  ;;  %v18836_v39 = vld [vmem:[#allocation28_spill] sm:$0xff] }
 0x2ff   : > { %8885 = vmatprep.mubr.msk.bf16.mxu1 %vm10619_vm2, %v18686_v43  ;;  %9173 = vmatpush1.bf16.msra.mxu1 %v10144_v47  ;;  %v10153_v47 = vld [vmem:[%s18343_s6 + $0x48] sm:$0xff]  }
 0x300   : > { %9162 = vmatprep.subr.bf16.mxu1 %v18847_v13 }
 0x306   : > { %8886 = vmatmul.mubr.bf16.gmra.mrb[136].mxu1 %v18794_v9  ;;  %v18837_v9 = vpack.c.bf16 %v18835_v3, %v18836_v39 }
 0x307   : > { %8889 = vmatprep.mubr.msk.bf16.mxu1 %vm10619_vm2, %v18686_v43 }
 0x30e   : > { %8890 = vmatmul.mubr.bf16.gmra.mrb[140].mxu1 %v18795_v45  ;;  %v18838_v45 = vld [vmem:[#allocation17_spill] sm:$0xff] }
 0x30f   : > { %8893 = vmatprep.mubr.msk.bf16.mxu1 %vm10619_vm2, %v18686_v43 }
 0x316   : > { %8894 = vmatmul.mubr.bf16.gmra.mrb[144].mxu1 %v18796_v10  ;;  %v18839_v10 = vld [vmem:[#allocation15_spill] sm:$0xff] }
 0x317   : > { %8897 = vmatprep.mubr.msk.bf16.mxu1 %vm10619_vm2, %v18686_v43 }
 0x31e   : > { %8898 = vmatmul.mubr.bf16.gmra.mrb[148].mxu1 %v18797_v58  ;;  %v18840_v58 = vpack.c.bf16 %v18838_v45, %v18839_v10 }
 0x31f   : > { %8901 = vmatprep.mubr.msk.bf16.mxu1 %vm10619_vm2, %v18686_v43 }
 0x326   : > { %8902 = vmatmul.mubr.bf16.gmra.mrb[152].mxu1 %v18798_v20  ;;  %v18841_v20 = vld [vmem:[#allocation19_spill] sm:$0xff] }
 0x327   : > { %8905 = vmatprep.mubr.msk.bf16.mxu1 %vm10619_vm2, %v18686_v43 }
 0x32e   : > { %8906 = vmatmul.mubr.bf16.gmra.mrb[156].mxu1 %v18799_v54  ;;  %v18842_v54 = vld [vmem:[#allocation16_spill] sm:$0xff] }
 0x32f   : > { %8909 = vmatprep.mubr.msk.bf16.mxu1 %vm10619_vm2, %v18686_v43 }
 0x336   : > { %8910 = vmatmul.mubr.bf16.gmra.mrb[160].mxu1 %v18800_v56  ;;  %v18843_v56 = vpack.c.bf16 %v18841_v20, %v18842_v54 }
 0x337   : > { %8913 = vmatprep.mubr.msk.bf16.mxu1 %vm10619_vm2, %v18686_v43 }
 0x33e   : > { %8914 = vmatmul.mubr.bf16.gmra.mrb[164].mxu1 %v18801_v5  ;;  %v18844_v5 = vld [vmem:[#allocation30_spill] sm:$0xff] }
 0x33f   : > { %8917 = vmatprep.mubr.msk.bf16.mxu1 %vm10619_vm2, %v18686_v43 }
 0x346   : > { %8918 = vmatmul.mubr.bf16.gmra.mrb[168].mxu1 %v18802_v22  ;;  %v18845_v22 = vld [vmem:[#allocation26_spill] sm:$0xff] }
 0x347   : > { %8921 = vmatprep.mubr.msk.bf16.mxu1 %vm10619_vm2, %v18686_v43 }
 0x34e   : > { %8922 = vmatmul.mubr.bf16.gmra.mrb[172].mxu1 %v18803_v32  ;;  %v18846_v32 = vpack.c.bf16 %v18844_v5, %v18845_v22  ;;  %v10152_v5 = vld [vmem:[%s18343_s6 + $0x40] sm:$0xff]  }
 0x34f   : > { %8925 = vmatprep.mubr.msk.bf16.mxu1 %vm10619_vm2, %v18686_v43 }
 0x356   : > { %8926 = vmatmul.mubr.bf16.gmra.mrb[176].mxu1 %v18805_v55  ;;  %v10145_v55 = vld [vmem:[%s18343_s6 + $0x8] sm:$0xff]  }
 0x357   : > { %8929 = vmatprep.mubr.msk.bf16.mxu1 %vm10619_vm2, %v18686_v43  ;;  %6018 = vmatpush1.bf16.msra.mxu0 %v10145_v55 }
 0x358   : > { %9174 = vmatpush1.bf16.msra.mxu1 %v10145_v55  ;;  %6019 = vmatprep.subr.bf16.mxu0 %v18847_v13 }
 0x359   : > { %9163 = vmatprep.subr.bf16.mxu1 %v18847_v13 }
 0x35b   : > { %6020 = vmatpush1.bf16.msra.mxu0 %v10146_v27 }
 0x35c   : > { %9175 = vmatpush1.bf16.msra.mxu1 %v10146_v27  ;;  %6021 = vmatprep.subr.bf16.mxu0 %v18847_v13 }
 0x35d   : > { %9164 = vmatprep.subr.bf16.mxu1 %v18847_v13 }
 0x35e   : > { %8930 = vmatmul.mubr.bf16.gmra.mrb[180].mxu1 %v18808_v17  ;;  %v18849_v17 = vpack.c.bf16 %v14360_v26, %v18848_v21 }
 0x35f   : > { %8933 = vmatprep.mubr.msk.bf16.mxu1 %vm10619_vm2, %v18686_v43 }
 0x366   : > { %8934 = vmatmul.mubr.bf16.gmra.mrb[184].mxu1 %v18810_v36  ;;  %v10147_v36 = vld [vmem:[%s18343_s6 + $0x18] sm:$0xff]  }
 0x367   : > { %8937 = vmatprep.mubr.msk.bf16.mxu1 %vm10619_vm2, %v18686_v43  ;;  %6022 = vmatpush1.bf16.msra.mxu0 %v10147_v36 }
 0x368   : > { %9176 = vmatpush1.bf16.msra.mxu1 %v10147_v36  ;;  %6023 = vmatprep.subr.bf16.mxu0 %v18847_v13 }
 0x369   : > { %9165 = vmatprep.subr.bf16.mxu1 %v18847_v13 }
 0x36b   : > { %6024 = vmatpush1.bf16.msra.mxu0 %v10148_v33 }
 0x36c   : > { %9177 = vmatpush1.bf16.msra.mxu1 %v10148_v33  ;;  %6025 = vmatprep.subr.bf16.mxu0 %v18847_v13 }
 0x36d   : > { %9166 = vmatprep.subr.bf16.mxu1 %v18847_v13 }
 0x36e   : > { %8938 = vmatmul.mubr.bf16.gmra.mrb[188].mxu1 %v18813_v59 }
 0x36f   : > { %8941 = vmatprep.mubr.msk.bf16.mxu1 %vm10619_vm2, %v18686_v43 }
 0x376   : > { %8942 = vmatmul.mubr.bf16.gmra.mrb[192].mxu1 %v18816_v60 }
 0x377   : > { %8945 = vmatprep.mubr.msk.bf16.mxu1 %vm10619_vm2, %v18686_v43 }
 0x37e   : > { %8946 = vmatmul.mubr.bf16.gmra.mrb[196].mxu1 %v18819_v53  ;;  %v10149_v53 = vld [vmem:[%s18343_s6 + $0x28] sm:$0xff]  }
 0x37f   : > { %8949 = vmatprep.mubr.msk.bf16.mxu1 %vm10619_vm2, %v18686_v43  ;;  %6026 = vmatpush1.bf16.msra.mxu0 %v10149_v53 }
 0x380   : > { %9178 = vmatpush1.bf16.msra.mxu1 %v10149_v53  ;;  %6027 = vmatprep.subr.bf16.mxu0 %v18847_v13 }
 0x381   : > { %9167 = vmatprep.subr.bf16.mxu1 %v18847_v13 }
 0x383   : > { %6028 = vmatpush1.bf16.msra.mxu0 %v10150_v4 }
 0x384   : > { %9179 = vmatpush1.bf16.msra.mxu1 %v10150_v4  ;;  %6029 = vmatprep.subr.bf16.mxu0 %v18847_v13 }
 0x385   : > { %9168 = vmatprep.subr.bf16.mxu1 %v18847_v13 }
 0x386   : > { %8950 = vmatmul.mubr.bf16.gmra.mrb[200].mxu1 %v18822_v28 }
 0x387   : > { %8953 = vmatprep.mubr.msk.bf16.mxu1 %vm10619_vm2, %v18686_v43  ;;  %6030 = vmatpush1.bf16.msra.mxu0 %v10151_v15 }
 0x388   : > { %9180 = vmatpush1.bf16.msra.mxu1 %v10151_v15  ;;  %6031 = vmatprep.subr.bf16.mxu0 %v18847_v13 }
 0x389   : > { %9169 = vmatprep.subr.bf16.mxu1 %v18847_v13 }
 0x38b   : > { %6032 = vmatpush1.bf16.msra.mxu0 %v10152_v5 }
 0x38c   : > { %9181 = vmatpush1.bf16.msra.mxu1 %v10152_v5  ;;  %6033 = vmatprep.subr.bf16.mxu0 %v18847_v13 }
 0x38d   : > { %9170 = vmatprep.subr.bf16.mxu1 %v18847_v13 }
 0x38e   : > { %8954 = vmatmul.mubr.bf16.gmra.mrb[204].mxu1 %v18825_v25 }
 0x38f   : > { %8957 = vmatprep.mubr.msk.bf16.mxu1 %vm10619_vm2, %v18686_v43  ;;  %6034 = vmatpush1.bf16.msra.mxu0 %v10153_v47 }
 0x390   : > { %9182 = vmatpush1.bf16.msra.mxu1 %v10153_v47  ;;  %6035 = vmatprep.subr.bf16.mxu0 %v18847_v13 }
 0x391   : > { %9171 = vmatprep.subr.bf16.mxu1 %v18847_v13 }
 0x396   : > { %8958 = vmatmul.mubr.bf16.gmra.mrb[208].mxu1 %v18828_v2 }
 0x397   : > { %8961 = vmatprep.mubr.msk.bf16.mxu1 %vm10619_vm2, %v18686_v43 }
 0x39e   : > { %8962 = vmatmul.mubr.bf16.gmra.mrb[212].mxu1 %v18831_v50 }
 0x39f   : > { %8965 = vmatprep.mubr.msk.bf16.mxu1 %vm10619_vm2, %v18686_v43 }
 0x3a6   : > { %8966 = vmatmul.mubr.bf16.gmra.mrb[216].mxu1 %v18834_v63 }
 0x3a7   : > { %8969 = vmatprep.mubr.msk.bf16.mxu1 %vm10619_vm2, %v18686_v43 }
 0x3ae   : > { %8970 = vmatmul.mubr.bf16.gmra.mrb[220].mxu1 %v18837_v9 }
 0x3af   : > { %8973 = vmatprep.mubr.msk.bf16.mxu1 %vm10619_vm2, %v18686_v43 }
 0x3b6   : > { %8974 = vmatmul.mubr.bf16.gmra.mrb[224].mxu1 %v18840_v58 }
 0x3b7   : > { %8977 = vmatprep.mubr.msk.bf16.mxu1 %vm10619_vm2, %v18686_v43 }
 0x3be   : > { %8978 = vmatmul.mubr.bf16.gmra.mrb[228].mxu1 %v18843_v56 }
 0x3bf   : > { %8981 = vmatprep.mubr.msk.bf16.mxu1 %vm10619_vm2, %v18686_v43 }
 0x3c6   : > { %8982 = vmatmul.mubr.bf16.gmra.mrb[232].mxu1 %v18846_v32 }
 0x3c7   : > { %8985 = vmatprep.mubr.msk.bf16.mxu1 %vm10619_vm2, %v18686_v43 }
 0x3ce   : > { %8986 = vmatmul.mubr.bf16.gmra.mrb[236].mxu1 %v18849_v17 }
 0x3cf   : > { %8989 = vmatprep.mubr.msk.bf16.mxu1 %vm10619_vm2, %v18686_v43 }
 0x3d1   : > { %v4230_v31 = vpop.f32.mrb[132].mxu1 }
 0x3d2   : > { %v8883_v26 = vpop.f32.mrb[133].mxu1 }
 0x3d3   : > { %v4233_v59 = vpop.f32.mrb[134].mxu1 }
 0x3d4   : > { %v14670_v41 = vadd.f32 %v14665_v29, %v4233_v59  ;;  %v8884_v40 = vpop.f32.mrb[135].mxu1 }
 0x3d6   : > { %v4494_v60 = vmul.f32 %v14670_v41, %v14670_v41  ;;  %8990 = vmatmul.mubr.bf16.gmra.mrb[240].mxu1 %v3684_v23 }
 0x3d7   : > { %8993 = vmatprep.mubr.msk.bf16.mxu1 %vm10619_vm2, %v18686_v43 }
 0x3d8   : > { %v4560_v7 = vmul.f32 %v14670_v41, %v4494_v60 }
 0x3d9   : > { %v4238_v12 = vpop.f32.mrb[136].mxu1 }
 0x3da   : > { %v4626_v6 = vmul.f32 0.044715, %v4560_v7  ;;  %v14691_v38 = vadd.f32 %v14665_v29, %v4238_v12  ;;  %v8887_v23 = vpop.f32.mrb[137].mxu1 }
 0x3db   : > { %v4241_v16 = vpop.f32.mrb[138].mxu1 }
 0x3dc   : > { %v4692_v28 = vadd.f32 %v14670_v41, %v4626_v6  ;;  %v4495_v14 = vmul.f32 %v14691_v38, %v14691_v38  ;;  %v14697_v1 = vadd.f32 %v14665_v29, %v4241_v16  ;;  %v8888_v25 = vpop.f32.mrb[139].mxu1  ;;  %v10154_v6 = vld [vmem:[%s18343_s6 + $0x50] sm:$0xff]  }
 0x3dd   : > { %6036 = vmatpush1.bf16.msra.mxu0 %v10154_v6  ;;  %9183 = vmatpush1.bf16.msra.mxu1 %v10154_v6 }
 0x3de   : > { %v4758_v18 = vmul.f32 0.7978846, %v4692_v28  ;;  %v4561_v44 = vmul.f32 %v14691_v38, %v4495_v14  ;;  %v4496_v2 = vmul.f32 %v14697_v1, %v14697_v1  ;;  %8994 = vmatmul.mubr.bf16.gmra.mrb[244].mxu1 %v3687_v30  ;;  %6037 = vmatprep.subr.bf16.mxu0 %v18847_v13 }
 0x3df   : > { %8997 = vmatprep.mubr.msk.bf16.mxu1 %vm10619_vm2, %v18686_v43  ;;  %9172 = vmatprep.subr.bf16.mxu1 %v18847_v13 }
 0x3e0   : > { %10310 = vtanh.f32 %v4758_v18  ;;  %v4627_v0 = vmul.f32 0.044715, %v4561_v44  ;;  %v4562_v50 = vmul.f32 %v14697_v1, %v4496_v2  ;;  %v18850_v18 = vld [vmem:[#allocation6_spill] sm:$0xff] }
 0x3e1   : > { %v4246_v61 = vpop.f32.mrb[140].mxu1  ;;  %v14786_v44 = vsel %vm1463_vm0, %v3533_v24, %v18850_v18  ;;  %6038 = vmatpush1.bf16.msra.mxu0 %v10155_v52  ;;  %9184 = vmatpush1.bf16.msra.mxu1 %v10155_v52 }
 0x3e2   : > { %v4693_v11 = vadd.f32 %v14691_v38, %v4627_v0  ;;  %v4628_v48 = vmul.f32 0.044715, %v4562_v50  ;;  %v14720_v30 = vadd.f32 %v14665_v29, %v4246_v61  ;;  %v8891_v63 = vpop.f32.mrb[141].mxu1  ;;  %7534 = vmatprep.subr.bf16.mxu0 %v18847_v13 }
 0x3e3   : > { %v4249_v3 = vpop.f32.mrb[142].mxu1 }
 0x3e4   : > { %v4759_v39 = vmul.f32 0.7978846, %v4693_v11  ;;  %v4694_v9 = vadd.f32 %v14697_v1, %v4628_v48  ;;  %v4497_v45 = vmul.f32 %v14720_v30, %v14720_v30  ;;  %v14726_v10 = vadd.f32 %v14665_v29, %v4249_v3  ;;  %v8892_v58 = vpop.f32.mrb[143].mxu1 }
 0x3e6   : > { %10312 = vtanh.f32 %v4759_v39  ;;  %v4760_v20 = vmul.f32 0.7978846, %v4694_v9  ;;  %v4563_v54 = vmul.f32 %v14720_v30, %v4497_v45  ;;  %v4498_v56 = vmul.f32 %v14726_v10, %v14726_v10  ;;  %8998 = vmatmul.mubr.bf16.gmra.mrb[248].mxu1 %v3690_v49 }
 0x3e7   : > { %9001 = vmatprep.mubr.msk.bf16.mxu1 %vm10619_vm2, %v18686_v43  ;;  %v3699_v9 = vpack.c.bf16 %v18850_v18, %v14786_v44 }
 0x3e8   : > { %10314 = vtanh.f32 %v4760_v20  ;;  %v4629_v22 = vmul.f32 0.044715, %v4563_v54  ;;  %v4564_v32 = vmul.f32 %v14726_v10, %v4498_v56 }
 0x3e9   : > { %v4254_v55 = vpop.f32.mrb[144].mxu1 }
 0x3ea   : > { %v10311_v37 = vpop.eup %10310  ;;  %v4695_v35 = vadd.f32 %v14720_v30, %v4629_v22  ;;  %v4630_v49 = vmul.f32 0.044715, %v4564_v32  ;;  %v14749_v21 = vadd.f32 %v14665_v29, %v4254_v55  ;;  %v8895_v17 = vpop.f32.mrb[145].mxu1 }
 0x3eb   : > { %v4257_v27 = vpop.f32.mrb[146].mxu1  ;;  %v4890_v36 = vadd.f32 1.0, %v10311_v37 }
 0x3ec   : > { %v4761_v31 = vmul.f32 0.7978846, %v4695_v35  ;;  %v4696_v26 = vadd.f32 %v14726_v10, %v4630_v49  ;;  %v4499_v59 = vmul.f32 %v14749_v21, %v14749_v21  ;;  %v14755_v40 = vadd.f32 %v14665_v29, %v4257_v27  ;;  %v8896_v60 = vpop.f32.mrb[147].mxu1 }
 0x3ed   : > { %v4956_v33 = vmul.f32 0.5, %v4890_v36 }
 0x3ee   : > { %10316 = vtanh.f32 %v4761_v31  ;;  %v4762_v7 = vmul.f32 0.7978846, %v4696_v26  ;;  %v4565_v53 = vmul.f32 %v14749_v21, %v4499_v59  ;;  %v4500_v12 = vmul.f32 %v14755_v40, %v14755_v40  ;;  %9002 = vmatmul.mubr.bf16.gmra.mrb[252].mxu1 %v3693_v34 }
 0x3ef   : > { %v14769_v23 = vmul.f32 %v14670_v41, %v4956_v33  ;;  %9005 = vmatprep.mubr.msk.bf16.mxu1 %vm10619_vm2, %v18686_v43 }
 0x3f0   : > { %v10313_v16 = vpop.eup %10312  ;;  %10318 = vtanh.f32 %v4762_v7  ;;  %v4631_v28 = vmul.f32 0.044715, %v4565_v53  ;;  %v4566_v14 = vmul.f32 %v14755_v40, %v4500_v12 }
 0x3f1   : > { %v4262_v51 = vpop.f32.mrb[148].mxu1  ;;  %v9949_v34 = vpack.i.bf16 %v14769_v23, %v18686_v43  ;;  %v4891_v41 = vadd.f32 1.0, %v10313_v16  ;;  %v5286_v48 = vrot.slane %v14769_v23, 1  ;;  %v18434_v32 = vrot.slane %v14769_v23, 7 }
 0x3f2   : > { %v10315_v25 = vpop.eup %10314  ;;  %v4697_v2 = vadd.f32 %v14749_v21, %v4631_v28  ;;  %v4632_v4 = vmul.f32 0.044715, %v4566_v14  ;;  %v14790_v0 = vadd.f32 %v14665_v29, %v4262_v51  ;;  %v8899_v50 = vpop.f32.mrb[149].mxu1 }
 0x3f3   : > { %9950 = vrot.lane.b32.xlu0 %v9949_v34, %s10618_s22  ;;  %v4265_v15 = vpop.f32.mrb[150].mxu1  ;;  %v4892_v61 = vadd.f32 1.0, %v10315_v25  ;;  %v4957_v11 = vmul.f32 0.5, %v4891_v41 }
 0x3f4   : > { %v4763_v63 = vmul.f32 0.7978846, %v4697_v2  ;;  %v4698_v46 = vadd.f32 %v14755_v40, %v4632_v4  ;;  %v4501_v24 = vmul.f32 %v14790_v0, %v14790_v0  ;;  %v14798_v3 = vadd.f32 %v14665_v29, %v4265_v15  ;;  %v8900_v39 = vpop.f32.mrb[151].mxu1 }
 0x3f5   : > { %v4958_v45 = vmul.f32 0.5, %v4892_v61  ;;  %v5023_v58 = vmul.f32 %v14691_v38, %v4957_v11  ;;  %v5415_v38 = vsel %vm1463_vm0, %v18850_v18, %v5286_v48 }
 0x3f6   : > { %10320 = vtanh.f32 %v4763_v63  ;;  %v4764_v20 = vmul.f32 0.7978846, %v4698_v46  ;;  %v4567_v54 = vmul.f32 %v14790_v0, %v4501_v24  ;;  %v4502_v56 = vmul.f32 %v14798_v3, %v14798_v3  ;;  %9006 = vmatmul.mubr.bf16.gmra.mrb[0].mxu1 %v3696_v42 }
 0x3f7   : > { %v14811_v5 = vmul.f32 %v14697_v1, %v4958_v45  ;;  %v5287_v22 = vrot.slane %v5023_v58, 1  ;;  %9009 = vmatprep.mubr.msk.bf16.mxu1 %vm10619_vm2, %v18686_v43  ;;  %v5155_v57 = vrot.slane %v5023_v58, 7 }
 0x3f8   : > { %v10317_v47 = vpop.eup %10316  ;;  %10322 = vtanh.f32 %v4764_v20  ;;  %v4633_v55 = vmul.f32 0.044715, %v4567_v54  ;;  %v4568_v37 = vmul.f32 %v14798_v3, %v4502_v56 }
 0x3f9   : > { %v4270_v62 = vpop.f32.mrb[152].mxu1  ;;  %v9954_v42 = vpack.i.bf16 %v14811_v5, %v5023_v58  ;;  %v5414_v1 = vsel %vm1463_vm0, %v5286_v48, %v5287_v22  ;;  %v4893_v35 = vadd.f32 1.0, %v10317_v47  ;;  %v5288_v49 = vrot.slane %v14811_v5, 1 }
 0x3fa   : > { %v10319_v17 = vpop.eup %10318  ;;  %v4699_v27 = vadd.f32 %v14790_v0, %v4633_v55  ;;  %v4634_v36 = vmul.f32 0.044715, %v4568_v37  ;;  %v14826_v31 = vadd.f32 %v14665_v29, %v4270_v62  ;;  %v8903_v26 = vpop.f32.mrb[153].mxu1  ;;  %v5748_v59 = vpack.c.bf16 %v5414_v1, %v5415_v38 }
 0x3fb   : > { %9955 = vrot.lane.b32.xlu1 %v9954_v42, %s10618_s22  ;;  %v4273_v60 = vpop.f32.mrb[154].mxu1  ;;  %v4894_v33 = vadd.f32 1.0, %v10319_v17  ;;  %v4959_v7 = vmul.f32 0.5, %v4893_v35  ;;  %v14831_v53 = vsel %vm1463_vm0, %v5287_v22, %v5288_v49  ;;  %v5156_v12 = vrot.slane %v14811_v5, 7 }
 0x3fc   : > { %v4765_v6 = vmul.f32 0.7978846, %v4699_v27  ;;  %v4700_v16 = vadd.f32 %v14798_v3, %v4634_v36  ;;  %v4503_v28 = vmul.f32 %v14826_v31, %v14826_v31  ;;  %v14838_v14 = vadd.f32 %v14665_v29, %v4273_v60  ;;  %v8904_v52 = vpop.f32.mrb[155].mxu1  ;;  %8538 = vmatprep.mubr.msk.bf16.mxu0 %vm2125_vm4, %v5748_v59 }
 0x3fd   : > { %v4960_v51 = vmul.f32 0.5, %v4894_v33  ;;  %v5025_v34 = vmul.f32 %v14720_v30, %v4959_v7  ;;  %v14844_v41 = vsel %vm1330_vm1, %v5155_v57, %v5156_v12  ;;  %v14850_v25 = vsel %vm1330_vm1, %v18434_v32, %v5155_v57 }
 0x3fe   : > { %10324 = vtanh.f32 %v4765_v6  ;;  %v4766_v44 = vmul.f32 0.7978846, %v4700_v16  ;;  %v4569_v2 = vmul.f32 %v14826_v31, %v4503_v28  ;;  %v4504_v4 = vmul.f32 %v14838_v14, %v14838_v14  ;;  %9010 = vmatmul.mubr.bf16.gmra.mrb[4].mxu1 %v3699_v9 }
 0x3ff   : > { %v14856_v30 = vmul.f32 %v14726_v10, %v4960_v51  ;;  %v5289_v50 = vrot.slane %v5025_v34, 1  ;;  %v5157_v48 = vrot.slane %v5025_v34, 7 }
 0x400   : > { %v10321_v15 = vpop.eup %10320  ;;  %10326 = vtanh.f32 %v4766_v44  ;;  %v4635_v61 = vmul.f32 0.044715, %v4569_v2  ;;  %v4570_v11 = vmul.f32 %v14838_v14, %v4504_v4 }
 0x401   : > { %v4278_v63 = vpop.f32.mrb[156].mxu1  ;;  %v9959_v46 = vpack.i.bf16 %v14856_v30, %v5025_v34  ;;  %v4895_v24 = vadd.f32 1.0, %v10321_v15  ;;  %v14862_v39 = vsel %vm1463_vm0, %v5288_v49, %v5289_v50  ;;  %v5290_v9 = vrot.slane %v14856_v30, 1 }
 0x402   : > { %v10323_v45 = vpop.eup %10322  ;;  %v4701_v10 = vadd.f32 %v14826_v31, %v4635_v61  ;;  %v4636_v58 = vmul.f32 0.044715, %v4570_v11  ;;  %v14867_v20 = vadd.f32 %v14665_v29, %v4278_v63  ;;  %v8907_v54 = vpop.f32.mrb[157].mxu1  ;;  %v5158_v55 = vrot.slane %v14856_v30, 7 }
 0x403   : > { %9960 = vrot.lane.b32.xlu0 %v9959_v46, %s10618_s22  ;;  %v4281_v5 = vpop.f32.mrb[158].mxu1  ;;  %v4896_v22 = vadd.f32 1.0, %v10323_v45  ;;  %v4961_v38 = vmul.f32 0.5, %v4895_v24  ;;  %v14874_v47 = vsel %vm1463_vm0, %v5289_v50, %v5290_v9  ;;  %v14890_v27 = vsel %vm1330_vm1, %v5156_v12, %v5157_v48 }
 0x404   : > { %v4767_v37 = vmul.f32 0.7978846, %v4701_v10  ;;  %v4702_v57 = vadd.f32 %v14838_v14, %v4636_v58  ;;  %v4505_v62 = vmul.f32 %v14867_v20, %v14867_v20  ;;  %v14881_v42 = vadd.f32 %v14665_v29, %v4281_v5  ;;  %v8908_v1 = vpop.f32.mrb[159].mxu1 }
 0x405   : > { %v4962_v35 = vmul.f32 0.5, %v4896_v22  ;;  %v5027_v49 = vmul.f32 %v14749_v21, %v4961_v38  ;;  %v14886_v17 = vsel %vm1330_vm1, %v5157_v48, %v5158_v55 }
 0x406   : > { %10328 = vtanh.f32 %v4767_v37  ;;  %v4768_v36 = vmul.f32 0.7978846, %v4702_v57  ;;  %v4571_v26 = vmul.f32 %v14867_v20, %v4505_v62  ;;  %v4506_v59 = vmul.f32 %v14881_v42, %v14881_v42 }
 0x407   : > { %v14896_v60 = vmul.f32 %v14755_v40, %v4962_v35  ;;  %v5291_v33 = vrot.slane %v5027_v49, 1  ;;  %v5159_v16 = vrot.slane %v5027_v49, 7 }
 0x408   : > { %v10325_v21 = vpop.eup %10324  ;;  %10330 = vtanh.f32 %v4768_v36  ;;  %v4637_v7 = vmul.f32 0.044715, %v4571_v26  ;;  %v4572_v6 = vmul.f32 %v14881_v42, %v4506_v59 }
 0x409   : > { %v4286_v28 = vpop.f32.mrb[160].mxu1  ;;  %v9964_v12 = vpack.i.bf16 %v14896_v60, %v5027_v49  ;;  %v4897_v52 = vadd.f32 1.0, %v10325_v21  ;;  %v14902_v51 = vsel %vm1463_vm0, %v5290_v9, %v5291_v33  ;;  %v5292_v34 = vrot.slane %v14896_v60, 1 }
 0x40a   : > { %v10327_v44 = vpop.eup %10326  ;;  %v4703_v40 = vadd.f32 %v14867_v20, %v4637_v7  ;;  %v4638_v2 = vmul.f32 0.044715, %v4572_v6  ;;  %v14907_v4 = vadd.f32 %v14665_v29, %v4286_v28  ;;  %v8911_v30 = vpop.f32.mrb[161].mxu1  ;;  %v5160_v63 = vrot.slane %v14896_v60, 7 }
 0x40b   : > { %9965 = vrot.lane.b32.xlu1 %v9964_v12, %s10618_s22  ;;  %v4289_v15 = vpop.f32.mrb[162].mxu1  ;;  %v4898_v61 = vadd.f32 1.0, %v10327_v44  ;;  %v4963_v11 = vmul.f32 0.5, %v4897_v52  ;;  %v14914_v48 = vsel %vm1463_vm0, %v5291_v33, %v5292_v34  ;;  %v14930_v22 = vsel %vm1330_vm1, %v5158_v55, %v5159_v16 }
 0x40c   : > { %v4769_v46 = vmul.f32 0.7978846, %v4703_v40  ;;  %v4704_v24 = vadd.f32 %v14881_v42, %v4638_v2  ;;  %v4507_v9 = vmul.f32 %v14907_v4, %v14907_v4  ;;  %v14921_v45 = vadd.f32 %v14665_v29, %v4289_v15  ;;  %v8912_v10 = vpop.f32.mrb[163].mxu1 }
 0x40d   : > { %v4964_v58 = vmul.f32 0.5, %v4898_v61  ;;  %v5029_v54 = vmul.f32 %v14790_v0, %v4963_v11  ;;  %v14926_v5 = vsel %vm1330_vm1, %v5159_v16, %v5160_v63 }
 0x40e   : > { %10332 = vtanh.f32 %v4769_v46  ;;  %v4770_v38 = vmul.f32 0.7978846, %v4704_v24  ;;  %v4573_v37 = vmul.f32 %v14907_v4, %v4507_v9  ;;  %v4508_v57 = vmul.f32 %v14921_v45, %v14921_v45 }
 0x40f   : > { %v14936_v62 = vmul.f32 %v14798_v3, %v4964_v58  ;;  %v5293_v1 = vrot.slane %v5029_v54, 1  ;;  %v5161_v36 = vrot.slane %v5029_v54, 7 }
 0x410   : > { %v10329_v0 = vpop.eup %10328  ;;  %10334 = vtanh.f32 %v4770_v38  ;;  %v4639_v35 = vmul.f32 0.044715, %v4573_v37  ;;  %v4574_v49 = vmul.f32 %v14921_v45, %v4508_v57 }
 0x411   : > { %v4294_v26 = vpop.f32.mrb[164].mxu1  ;;  %v9969_v55 = vpack.i.bf16 %v14936_v62, %v5029_v54  ;;  %v4899_v59 = vadd.f32 1.0, %v10329_v0  ;;  %v14942_v60 = vsel %vm1463_vm0, %v5292_v34, %v5293_v1  ;;  %v5294_v33 = vrot.slane %v14936_v62, 1 }
 0x412   : > { %v10331_v21 = vpop.eup %10330  ;;  %v4705_v3 = vadd.f32 %v14907_v4, %v4639_v35  ;;  %v4640_v7 = vmul.f32 0.044715, %v4574_v49  ;;  %v14947_v6 = vadd.f32 %v14665_v29, %v4294_v26  ;;  %v8915_v16 = vpop.f32.mrb[165].mxu1  ;;  %v5162_v40 = vrot.slane %v14936_v62, 7 }
 0x413   : > { %9970 = vrot.lane.b32.xlu0 %v9969_v55, %s10618_s22  ;;  %v4297_v12 = vpop.f32.mrb[166].mxu1  ;;  %v4900_v52 = vadd.f32 1.0, %v10331_v21  ;;  %v4965_v44 = vmul.f32 0.5, %v4899_v59  ;;  %v14954_v34 = vsel %vm1463_vm0, %v5293_v1, %v5294_v33  ;;  %v14970_v10 = vsel %vm1330_vm1, %v5160_v63, %v5161_v36 }
 0x414   : > { %v4771_v2 = vmul.f32 0.7978846, %v4705_v3  ;;  %v4706_v30 = vadd.f32 %v14921_v45, %v4640_v7  ;;  %v4509_v15 = vmul.f32 %v14947_v6, %v14947_v6  ;;  %v14961_v61 = vadd.f32 %v14665_v29, %v4297_v12  ;;  %v8916_v11 = vpop.f32.mrb[167].mxu1 }
 0x415   : > { %v4966_v46 = vmul.f32 0.5, %v4900_v52  ;;  %v5031_v24 = vmul.f32 %v14826_v31, %v4965_v44  ;;  %v14966_v9 = vsel %vm1330_vm1, %v5161_v36, %v5162_v40 }
 0x416   : > { %10336 = vtanh.f32 %v4771_v2  ;;  %v4772_v58 = vmul.f32 0.7978846, %v4706_v30  ;;  %v4575_v54 = vmul.f32 %v14947_v6, %v4509_v15  ;;  %v4510_v38 = vmul.f32 %v14961_v61, %v14961_v61 }
 0x417   : > { %v14976_v37 = vmul.f32 %v14838_v14, %v4966_v46  ;;  %v5295_v57 = vrot.slane %v5031_v24, 1  ;;  %v5163_v0 = vrot.slane %v5031_v24, 7 }
 0x418   : > { %v10333_v31 = vpop.eup %10332  ;;  %10338 = vtanh.f32 %v4772_v58  ;;  %v4641_v62 = vmul.f32 0.044715, %v4575_v54  ;;  %v4576_v1 = vmul.f32 %v14961_v61, %v4510_v38 }
 0x419   : > { %v4302_v35 = vpop.f32.mrb[168].mxu1  ;;  %v9974_v63 = vpack.i.bf16 %v14976_v37, %v5031_v24  ;;  %v4901_v49 = vadd.f32 1.0, %v10333_v31  ;;  %v14982_v36 = vsel %vm1463_vm0, %v5294_v33, %v5295_v57  ;;  %v5296_v26 = vrot.slane %v14976_v37, 1 }
 0x41a   : > { %v10335_v55 = vpop.eup %10334  ;;  %v4707_v14 = vadd.f32 %v14947_v6, %v4641_v62  ;;  %v4642_v59 = vmul.f32 0.044715, %v4576_v1  ;;  %v14987_v21 = vadd.f32 %v14665_v29, %v4302_v35  ;;  %v8919_v3 = vpop.f32.mrb[169].mxu1  ;;  %v5164_v44 = vrot.slane %v14976_v37, 7 }
 0x41b   : > { %9975 = vrot.lane.b32.xlu1 %v9974_v63, %s10618_s22  ;;  %v4305_v16 = vpop.f32.mrb[170].mxu1  ;;  %v4902_v12 = vadd.f32 1.0, %v10335_v55  ;;  %v4967_v52 = vmul.f32 0.5, %v4901_v49  ;;  %v14994_v33 = vsel %vm1463_vm0, %v5295_v57, %v5296_v26  ;;  %v15010_v38 = vsel %vm1330_vm1, %v5162_v40, %v5163_v0 }
 0x41c   : > { %v4773_v2 = vmul.f32 0.7978846, %v4707_v14  ;;  %v4708_v30 = vadd.f32 %v14961_v61, %v4642_v59  ;;  %v4511_v15 = vmul.f32 %v14987_v21, %v14987_v21  ;;  %v15001_v11 = vadd.f32 %v14665_v29, %v4305_v16  ;;  %v8920_v46 = vpop.f32.mrb[171].mxu1 }
 0x41d   : > { %v4968_v24 = vmul.f32 0.5, %v4902_v12  ;;  %v5033_v58 = vmul.f32 %v14867_v20, %v4967_v52  ;;  %v15006_v54 = vsel %vm1330_vm1, %v5163_v0, %v5164_v44 }
 0x41e   : > { %10340 = vtanh.f32 %v4773_v2  ;;  %v4774_v37 = vmul.f32 0.7978846, %v4708_v30  ;;  %v4577_v57 = vmul.f32 %v14987_v21, %v4511_v15  ;;  %v4512_v31 = vmul.f32 %v15001_v11, %v15001_v11 }
 0x41f   : > { %v15016_v62 = vmul.f32 %v14881_v42, %v4968_v24  ;;  %v5297_v1 = vrot.slane %v5033_v58, 1  ;;  %v5165_v49 = vrot.slane %v5033_v58, 7 }
 0x420   : > { %v10337_v20 = vpop.eup %10336  ;;  %10342 = vtanh.f32 %v4774_v37  ;;  %v4643_v35 = vmul.f32 0.044715, %v4577_v57  ;;  %v4578_v63 = vmul.f32 %v15001_v11, %v4512_v31 }
 0x421   : > { %v4310_v55 = vpop.f32.mrb[172].mxu1  ;;  %v9979_v40 = vpack.i.bf16 %v15016_v62, %v5033_v58  ;;  %v4903_v0 = vadd.f32 1.0, %v10337_v20  ;;  %v15022_v14 = vsel %vm1463_vm0, %v5296_v26, %v5297_v1  ;;  %v5298_v59 = vrot.slane %v15016_v62, 1 }
 0x422   : > { %v10339_v3 = vpop.eup %10338  ;;  %v4709_v42 = vadd.f32 %v14987_v21, %v4643_v35  ;;  %v4644_v16 = vmul.f32 0.044715, %v4578_v63  ;;  %v15027_v12 = vadd.f32 %v14665_v29, %v4310_v55  ;;  %v8923_v52 = vpop.f32.mrb[173].mxu1  ;;  %v5166_v24 = vrot.slane %v15016_v62, 7 }
 0x423   : > { %9980 = vrot.lane.b32.xlu0 %v9979_v40, %s10618_s22  ;;  %v4313_v30 = vpop.f32.mrb[174].mxu1  ;;  %v4904_v15 = vadd.f32 1.0, %v10339_v3  ;;  %v4969_v46 = vmul.f32 0.5, %v4903_v0  ;;  %v15034_v26 = vsel %vm1463_vm0, %v5297_v1, %v5298_v59  ;;  %v15050_v62 = vsel %vm1330_vm1, %v5164_v44, %v5165_v49 }
 0x424   : > { %v4775_v58 = vmul.f32 0.7978846, %v4709_v42  ;;  %v4710_v37 = vadd.f32 %v15001_v11, %v4644_v16  ;;  %v4513_v57 = vmul.f32 %v15027_v12, %v15027_v12  ;;  %v15041_v31 = vadd.f32 %v14665_v29, %v4313_v30  ;;  %v8924_v20 = vpop.f32.mrb[175].mxu1 }
 0x425   : > { %v4970_v35 = vmul.f32 0.5, %v4904_v15  ;;  %v5035_v63 = vmul.f32 %v14907_v4, %v4969_v46  ;;  %v15046_v55 = vsel %vm1330_vm1, %v5165_v49, %v5166_v24 }
 0x426   : > { %10344 = vtanh.f32 %v4775_v58  ;;  %v4776_v1 = vmul.f32 0.7978846, %v4710_v37  ;;  %v4579_v40 = vmul.f32 %v15027_v12, %v4513_v57  ;;  %v4514_v0 = vmul.f32 %v15041_v31, %v15041_v31 }
 0x427   : > { %v15056_v3 = vmul.f32 %v14921_v45, %v4970_v35  ;;  %v5299_v42 = vrot.slane %v5035_v63, 1  ;;  %v5167_v30 = vrot.slane %v5035_v63, 7 }
 0x428   : > { %v10341_v4 = vpop.eup %10340  ;;  %10346 = vtanh.f32 %v4776_v1  ;;  %v4645_v16 = vmul.f32 0.044715, %v4579_v40  ;;  %v4580_v52 = vmul.f32 %v15041_v31, %v4514_v0 }
 0x429   : > { %v4318_v15 = vpop.f32.mrb[176].mxu1  ;;  %v9984_v44 = vpack.i.bf16 %v15056_v3, %v5035_v63  ;;  %v4905_v49 = vadd.f32 1.0, %v10341_v4  ;;  %v15062_v46 = vsel %vm1463_vm0, %v5298_v59, %v5299_v42  ;;  %v5300_v58 = vrot.slane %v15056_v3, 1 }
 0x42a   : > { %v10343_v37 = vpop.eup %10342  ;;  %v4711_v45 = vadd.f32 %v15027_v12, %v4645_v16  ;;  %v4646_v57 = vmul.f32 0.044715, %v4580_v52  ;;  %v15067_v20 = vadd.f32 %v14665_v29, %v4318_v15  ;;  %v8927_v35 = vpop.f32.mrb[177].mxu1  ;;  %v5168_v4 = vrot.slane %v15056_v3, 7 }
 0x42b   : > { %9985 = vrot.lane.b32.xlu1 %v9984_v44, %s10618_s22  ;;  %v4321_v63 = vpop.f32.mrb[178].mxu1  ;;  %v4906_v40 = vadd.f32 1.0, %v10343_v37  ;;  %v4971_v0 = vmul.f32 0.5, %v4905_v49  ;;  %v15074_v59 = vsel %vm1463_vm0, %v5299_v42, %v5300_v58  ;;  %v15090_v3 = vsel %vm1330_vm1, %v5166_v24, %v5167_v30 }
 0x42c   : > { %v4777_v16 = vmul.f32 0.7978846, %v4711_v45  ;;  %v4712_v52 = vadd.f32 %v15041_v31, %v4646_v57  ;;  %v4515_v15 = vmul.f32 %v15067_v20, %v15067_v20  ;;  %v15081_v35 = vadd.f32 %v14665_v29, %v4321_v63  ;;  %v8928_v1 = vpop.f32.mrb[179].mxu1 }
 0x42d   : > { %v4972_v44 = vmul.f32 0.5, %v4906_v40  ;;  %v5037_v37 = vmul.f32 %v14947_v6, %v4971_v0  ;;  %v15086_v49 = vsel %vm1330_vm1, %v5167_v30, %v5168_v4 }
 0x42e   : > { %10348 = vtanh.f32 %v4777_v16  ;;  %v4778_v42 = vmul.f32 0.7978846, %v4712_v52  ;;  %v4581_v45 = vmul.f32 %v15067_v20, %v4515_v15  ;;  %v4516_v57 = vmul.f32 %v15081_v35, %v15081_v35 }
 0x42f   : > { %v15096_v1 = vmul.f32 %v14961_v61, %v4972_v44  ;;  %v5301_v63 = vrot.slane %v5037_v37, 1  ;;  %v5169_v2 = vrot.slane %v5037_v37, 7 }
 0x430   : > { %v10345_v6 = vpop.eup %10344  ;;  %10350 = vtanh.f32 %v4778_v42  ;;  %v4647_v40 = vmul.f32 0.044715, %v4581_v45  ;;  %v4582_v0 = vmul.f32 %v15081_v35, %v4516_v57 }
 0x431   : > { %v4326_v7 = vpop.f32.mrb[180].mxu1  ;;  %v9989_v24 = vpack.i.bf16 %v15096_v1, %v5037_v37  ;;  %v4907_v30 = vadd.f32 1.0, %v10345_v6  ;;  %v15102_v16 = vsel %vm1463_vm0, %v5300_v58, %v5301_v63  ;;  %v5302_v52 = vrot.slane %v15096_v1, 1 }
 0x432   : > { %v10347_v15 = vpop.eup %10346  ;;  %v4713_v61 = vadd.f32 %v15067_v20, %v4647_v40  ;;  %v4648_v44 = vmul.f32 0.044715, %v4582_v0  ;;  %v15107_v42 = vadd.f32 %v14665_v29, %v4326_v7  ;;  %v8931_v45 = vpop.f32.mrb[181].mxu1  ;;  %v5170_v50 = vrot.slane %v15096_v1, 7 }
 0x433   : > { %9990 = vrot.lane.b32.xlu0 %v9989_v24, %s10618_s22  ;;  %v4329_v37 = vpop.f32.mrb[182].mxu1  ;;  %v4908_v6 = vadd.f32 1.0, %v10347_v15  ;;  %v4973_v28 = vmul.f32 0.5, %v4907_v30  ;;  %v15114_v58 = vsel %vm1463_vm0, %v5301_v63, %v5302_v52  ;;  %v15130_v1 = vsel %vm1330_vm1, %v5168_v4, %v5169_v2 }
 0x434   : > { %18851 = vst [vmem:[#allocation31_spill] sm:$0xff] %v15114_v58  ;;  %v4779_v40 = vmul.f32 0.7978846, %v4713_v61  ;;  %v4714_v0 = vadd.f32 %v15081_v35, %v4648_v44  ;;  %v4517_v7 = vmul.f32 %v15107_v42, %v15107_v42  ;;  %v15121_v45 = vadd.f32 %v14665_v29, %v4329_v37  ;;  %v8932_v57 = vpop.f32.mrb[183].mxu1  ;;  %18853 = vst [vmem:[#allocation33_spill] sm:$0xff] %v15130_v1 }
 0x435   : > { %v4974_v24 = vmul.f32 0.5, %v4908_v6  ;;  %v5039_v15 = vmul.f32 %v14987_v21, %v4973_v28  ;;  %v15126_v30 = vsel %vm1330_vm1, %v5169_v2, %v5170_v50 }
 0x436   : > { %18852 = vst [vmem:[#allocation32_spill] sm:$0xff] %v15126_v30  ;;  %10352 = vtanh.f32 %v4779_v40  ;;  %v4780_v63 = vmul.f32 0.7978846, %v4714_v0  ;;  %v4583_v61 = vmul.f32 %v15107_v42, %v4517_v7  ;;  %v4518_v44 = vmul.f32 %v15121_v45, %v15121_v45 }
 0x437   : > { %v15136_v57 = vmul.f32 %v15001_v11, %v4974_v24  ;;  %v5303_v37 = vrot.slane %v5039_v15, 1  ;;  %v5171_v56 = vrot.slane %v5039_v15, 7 }
 0x438   : > { %v10349_v28 = vpop.eup %10348  ;;  %10354 = vtanh.f32 %v4780_v63  ;;  %v4649_v21 = vmul.f32 0.044715, %v4583_v61  ;;  %v4584_v6 = vmul.f32 %v15121_v45, %v4518_v44 }
 0x439   : > { %v4334_v32 = vpop.f32.mrb[184].mxu1  ;;  %v9994_v2 = vpack.i.bf16 %v15136_v57, %v5039_v15  ;;  %v4909_v4 = vadd.f32 1.0, %v10349_v28  ;;  %v15142_v40 = vsel %vm1463_vm0, %v5302_v52, %v5303_v37  ;;  %v5304_v0 = vrot.slane %v15136_v57, 1 }
 0x43a   : > { %v10351_v7 = vpop.eup %10350  ;;  %v4715_v11 = vadd.f32 %v15107_v42, %v4649_v21  ;;  %v4650_v24 = vmul.f32 0.044715, %v4584_v6  ;;  %v15147_v63 = vadd.f32 %v14665_v29, %v4334_v32  ;;  %v8935_v61 = vpop.f32.mrb[185].mxu1  ;;  %v5172_v43 = vrot.slane %v15136_v57, 7 }
 0x43b   : > { %9995 = vrot.lane.b32.xlu1 %v9994_v2, %s10618_s22  ;;  %v4337_v15 = vpop.f32.mrb[186].mxu1  ;;  %v4910_v28 = vadd.f32 1.0, %v10351_v7  ;;  %v4975_v18 = vmul.f32 0.5, %v4909_v4  ;;  %v15154_v52 = vsel %vm1463_vm0, %v5303_v37, %v5304_v0  ;;  %v15170_v57 = vsel %vm1330_vm1, %v5170_v50, %v5171_v56 }
 0x43c   : > { %18854 = vst [vmem:[#allocation40_spill] sm:$0xff] %v15154_v52  ;;  %v4781_v21 = vmul.f32 0.7978846, %v4715_v11  ;;  %v4716_v6 = vadd.f32 %v15121_v45, %v4650_v24  ;;  %v4519_v32 = vmul.f32 %v15147_v63, %v15147_v63  ;;  %v15161_v61 = vadd.f32 %v14665_v29, %v4337_v15  ;;  %v8936_v44 = vpop.f32.mrb[187].mxu1  ;;  %18856 = vst [vmem:[#allocation35_spill] sm:$0xff] %v15170_v57 }
 0x43d   : > { %v4976_v2 = vmul.f32 0.5, %v4910_v28  ;;  %v5041_v7 = vmul.f32 %v15027_v12, %v4975_v18  ;;  %v15166_v4 = vsel %vm1330_vm1, %v5171_v56, %v5172_v43 }
 0x43e   : > { %18855 = vst [vmem:[#allocation34_spill] sm:$0xff] %v15166_v4  ;;  %10356 = vtanh.f32 %v4781_v21  ;;  %v4782_v37 = vmul.f32 0.7978846, %v4716_v6  ;;  %v4585_v11 = vmul.f32 %v15147_v63, %v4519_v32  ;;  %v4520_v24 = vmul.f32 %v15161_v61, %v15161_v61 }
 0x43f   : > { %v15176_v44 = vmul.f32 %v15041_v31, %v4976_v2  ;;  %v5305_v15 = vrot.slane %v5041_v7, 1  ;;  %v5173_v4 = vrot.slane %v5041_v7, 7 }
 0x440   : > { %v10353_v18 = vpop.eup %10352  ;;  %10358 = vtanh.f32 %v4782_v37  ;;  %v4651_v12 = vmul.f32 0.044715, %v4585_v11  ;;  %v4586_v28 = vmul.f32 %v15161_v61, %v4520_v24 }
 0x441   : > { %v4342_v30 = vpop.f32.mrb[188].mxu1  ;;  %v9999_v56 = vpack.i.bf16 %v15176_v44, %v5041_v7  ;;  %v4911_v50 = vadd.f32 1.0, %v10353_v18  ;;  %v15182_v21 = vsel %vm1463_vm0, %v5304_v0, %v5305_v15  ;;  %v5306_v6 = vrot.slane %v15176_v44, 1 }
 0x442   : > { %18857 = vst [vmem:[#allocation36_spill] sm:$0xff] %v15182_v21  ;;  %v10355_v32 = vpop.eup %10354  ;;  %v4717_v31 = vadd.f32 %v15147_v63, %v4651_v12  ;;  %v4652_v2 = vmul.f32 0.044715, %v4586_v28  ;;  %v15187_v37 = vadd.f32 %v14665_v29, %v4342_v30  ;;  %v8939_v11 = vpop.f32.mrb[189].mxu1  ;;  %v5174_v1 = vrot.slane %v15176_v44, 7 }
 0x443   : > { %10000 = vrot.lane.b32.xlu0 %v9999_v56, %s10618_s22  ;;  %v4345_v7 = vpop.f32.mrb[190].mxu1  ;;  %v4912_v18 = vadd.f32 1.0, %v10355_v32  ;;  %v4977_v57 = vmul.f32 0.5, %v4911_v50  ;;  %v15194_v0 = vsel %vm1463_vm0, %v5305_v15, %v5306_v6  ;;  %v15210_v44 = vsel %vm1330_vm1, %v5172_v43, %v5173_v4 }
 0x444   : > { %18858 = vst [vmem:[#allocation37_spill] sm:$0xff] %v15194_v0  ;;  %v4783_v12 = vmul.f32 0.7978846, %v4717_v31  ;;  %v4718_v28 = vadd.f32 %v15161_v61, %v4652_v2  ;;  %v4521_v30 = vmul.f32 %v15187_v37, %v15187_v37  ;;  %v15201_v11 = vadd.f32 %v14665_v29, %v4345_v7  ;;  %v8940_v24 = vpop.f32.mrb[191].mxu1  ;;  %18860 = vst [vmem:[#allocation13_spill] sm:$0xff] %v15210_v44 }
 0x445   : > { %v4978_v56 = vmul.f32 0.5, %v4912_v18  ;;  %v5043_v32 = vmul.f32 %v15067_v20, %v4977_v57  ;;  %v15206_v50 = vsel %vm1330_vm1, %v5173_v4, %v5174_v1 }
 0x446   : > { %18859 = vst [vmem:[#allocation39_spill] sm:$0xff] %v15206_v50  ;;  %10360 = vtanh.f32 %v4783_v12  ;;  %v4784_v15 = vmul.f32 0.7978846, %v4718_v28  ;;  %v4587_v31 = vmul.f32 %v15187_v37, %v4521_v30  ;;  %v4522_v29 = vmul.f32 %v15201_v11, %v15201_v11 }
 0x447   : > { %v15216_v2 = vmul.f32 %v15081_v35, %v4978_v56  ;;  %v5307_v24 = vrot.slane %v5043_v32, 1  ;;  %v5175_v18 = vrot.slane %v5043_v32, 7 }
 0x448   : > { %v10357_v20 = vpop.eup %10356  ;;  %10362 = vtanh.f32 %v4784_v15  ;;  %v4653_v57 = vmul.f32 0.044715, %v4587_v31  ;;  %v4588_v7 = vmul.f32 %v15201_v11, %v4522_v29  ;;  %v15229_v15 = vld [vmem:[%s18346_s9] ss:$0 sm:$0xff] }
 0x449   : > { %v4350_v50 = vpop.f32.mrb[192].mxu1  ;;  %v10004_v43 = vpack.i.bf16 %v15216_v2, %v5043_v32  ;;  %v4913_v4 = vadd.f32 1.0, %v10357_v20  ;;  %v15222_v12 = vsel %vm1463_vm0, %v5306_v6, %v5307_v24  ;;  %v5308_v28 = vrot.slane %v15216_v2, 1 }
 0x44a   : > { %18861 = vst [vmem:[#allocation41_spill] sm:$0xff] %v15222_v12  ;;  %v10359_v30 = vpop.eup %10358  ;;  %v4719_v35 = vadd.f32 %v15187_v37, %v4653_v57  ;;  %v4654_v56 = vmul.f32 0.044715, %v4588_v7  ;;  %v15232_v31 = vadd.f32 %v15229_v15, %v4350_v50  ;;  %v8943_v32 = vpop.f32.mrb[193].mxu1  ;;  %v5176_v7 = vrot.slane %v15216_v2, 7 }
 0x44b   : > { %10005 = vrot.lane.b32.xlu1 %v10004_v43, %s10618_s22  ;;  %v4353_v6 = vpop.f32.mrb[194].mxu1  ;;  %v4914_v20 = vadd.f32 1.0, %v10359_v30  ;;  %v4979_v44 = vmul.f32 0.5, %v4913_v4  ;;  %v15239_v57 = vsel %vm1463_vm0, %v5307_v24, %v5308_v28  ;;  %v15255_v2 = vsel %vm1330_vm1, %v5174_v1, %v5175_v18 }
 0x44c   : > { %18862 = vst [vmem:[#allocation20_spill] sm:$0xff] %v15239_v57  ;;  %v4785_v52 = vmul.f32 0.7978846, %v4719_v35  ;;  %v4720_v21 = vadd.f32 %v15201_v11, %v4654_v56  ;;  %v4523_v50 = vmul.f32 %v15232_v31, %v15232_v31  ;;  %v15246_v32 = vadd.f32 %v15229_v15, %v4353_v6  ;;  %v8944_v29 = vpop.f32.mrb[195].mxu1  ;;  %18864 = vst [vmem:[#allocation21_spill] sm:$0xff] %v15255_v2 }
 0x44d   : > { %v4980_v43 = vmul.f32 0.5, %v4914_v20  ;;  %v5045_v30 = vmul.f32 %v15107_v42, %v4979_v44  ;;  %v15251_v4 = vsel %vm1330_vm1, %v5175_v18, %v5176_v7 }
 0x44e   : > { %18863 = vst [vmem:[#allocation44_spill] sm:$0xff] %v15251_v4  ;;  %10364 = vtanh.f32 %v4785_v52  ;;  %v4786_v24 = vmul.f32 0.7978846, %v4720_v21  ;;  %v4589_v35 = vmul.f32 %v15232_v31, %v4523_v50  ;;  %v4524_v56 = vmul.f32 %v15246_v32, %v15246_v32 }
 0x44f   : > { %v15261_v29 = vmul.f32 %v15121_v45, %v4980_v43  ;;  %v5309_v6 = vrot.slane %v5045_v30, 1  ;;  %v5177_v4 = vrot.slane %v5045_v30, 7 }
 0x450   : > { %v10361_v42 = vpop.eup %10360  ;;  %10366 = vtanh.f32 %v4786_v24  ;;  %v4655_v44 = vmul.f32 0.044715, %v4589_v35  ;;  %v4590_v20 = vmul.f32 %v15246_v32, %v4524_v56 }
 0x451   : > { %v4358_v0 = vpop.f32.mrb[196].mxu1  ;;  %v10009_v1 = vpack.i.bf16 %v15261_v29, %v5045_v30  ;;  %v4915_v52 = vadd.f32 1.0, %v10361_v42  ;;  %v15267_v21 = vsel %vm1463_vm0, %v5308_v28, %v5309_v6  ;;  %v5310_v18 = vrot.slane %v15261_v29, 1 }
 0x452   : > { %18865 = vst [vmem:[#allocation7_spill] sm:$0xff] %v15267_v21  ;;  %v10363_v50 = vpop.eup %10362  ;;  %v4721_v45 = vadd.f32 %v15232_v31, %v4655_v44  ;;  %v4656_v43 = vmul.f32 0.044715, %v4590_v20  ;;  %v15272_v24 = vadd.f32 %v15229_v15, %v4358_v0  ;;  %v8947_v35 = vpop.f32.mrb[197].mxu1  ;;  %v5178_v12 = vrot.slane %v15261_v29, 7 }
 0x453   : > { %10010 = vrot.lane.b32.xlu0 %v10009_v1, %s10618_s22  ;;  %v4361_v30 = vpop.f32.mrb[198].mxu1  ;;  %v4916_v42 = vadd.f32 1.0, %v10363_v50  ;;  %v4981_v2 = vmul.f32 0.5, %v4915_v52  ;;  %v15279_v28 = vsel %vm1463_vm0, %v5309_v6, %v5310_v18  ;;  %v15295_v29 = vsel %vm1330_vm1, %v5176_v7, %v5177_v4 }
 0x454   : > { %18866 = vst [vmem:[#allocation43_spill] sm:$0xff] %v15279_v28  ;;  %v4787_v44 = vmul.f32 0.7978846, %v4721_v45  ;;  %v4722_v20 = vadd.f32 %v15246_v32, %v4656_v43  ;;  %v4525_v0 = vmul.f32 %v15272_v24, %v15272_v24  ;;  %v15286_v35 = vadd.f32 %v15229_v15, %v4361_v30  ;;  %v8948_v56 = vpop.f32.mrb[199].mxu1  ;;  %18868 = vst [vmem:[#allocation42_spill] sm:$0xff] %v15295_v29 }
 0x455   : > { %v4982_v1 = vmul.f32 0.5, %v4916_v42  ;;  %v5047_v50 = vmul.f32 %v15147_v63, %v4981_v2  ;;  %v15291_v52 = vsel %vm1330_vm1, %v5177_v4, %v5178_v12 }
 0x456   : > { %18867 = vst [vmem:[#allocation18_spill] sm:$0xff] %v15291_v52  ;;  %10368 = vtanh.f32 %v4787_v44  ;;  %v4788_v6 = vmul.f32 0.7978846, %v4722_v20  ;;  %v4591_v45 = vmul.f32 %v15272_v24, %v4525_v0  ;;  %v4526_v43 = vmul.f32 %v15286_v35, %v15286_v35 }
 0x457   : > { %v15301_v56 = vmul.f32 %v15161_v61, %v4982_v1  ;;  %v5311_v30 = vrot.slane %v5047_v50, 1  ;;  %v5179_v52 = vrot.slane %v5047_v50, 7 }
 0x458   : > { %v10365_v63 = vpop.eup %10364  ;;  %10370 = vtanh.f32 %v4788_v6  ;;  %v4657_v2 = vmul.f32 0.044715, %v4591_v45  ;;  %v4592_v42 = vmul.f32 %v15286_v35, %v4526_v43 }
 0x459   : > { %v4366_v57 = vpop.f32.mrb[200].mxu1  ;;  %v10014_v7 = vpack.i.bf16 %v15301_v56, %v5047_v50  ;;  %v4917_v4 = vadd.f32 1.0, %v10365_v63  ;;  %v15307_v44 = vsel %vm1463_vm0, %v5310_v18, %v5311_v30  ;;  %v5312_v20 = vrot.slane %v15301_v56, 1 }
 0x45a   : > { %18869 = vst [vmem:[#allocation9_spill] sm:$0xff] %v15307_v44  ;;  %v10367_v0 = vpop.eup %10366  ;;  %v4723_v61 = vadd.f32 %v15272_v24, %v4657_v2  ;;  %v4658_v1 = vmul.f32 0.044715, %v4592_v42  ;;  %v15312_v6 = vadd.f32 %v15229_v15, %v4366_v57  ;;  %v8951_v45 = vpop.f32.mrb[201].mxu1  ;;  %v5180_v21 = vrot.slane %v15301_v56, 7 }
 0x45b   : > { %10015 = vrot.lane.b32.xlu1 %v10014_v7, %s10618_s22  ;;  %v4369_v50 = vpop.f32.mrb[202].mxu1  ;;  %v4918_v63 = vadd.f32 1.0, %v10367_v0  ;;  %v4983_v29 = vmul.f32 0.5, %v4917_v4  ;;  %v15319_v18 = vsel %vm1463_vm0, %v5311_v30, %v5312_v20  ;;  %v15335_v56 = vsel %vm1330_vm1, %v5178_v12, %v5179_v52 }
 0x45c   : > { %18870 = vst [vmem:[#allocation8_spill] sm:$0xff] %v15319_v18  ;;  %v4789_v2 = vmul.f32 0.7978846, %v4723_v61  ;;  %v4724_v42 = vadd.f32 %v15286_v35, %v4658_v1  ;;  %v4527_v57 = vmul.f32 %v15312_v6, %v15312_v6  ;;  %v15326_v45 = vadd.f32 %v15229_v15, %v4369_v50  ;;  %v8952_v43 = vpop.f32.mrb[203].mxu1  ;;  %18872 = vst [vmem:[#allocation10_spill] sm:$0xff] %v15335_v56 }
 0x45d   : > { %v4984_v7 = vmul.f32 0.5, %v4918_v63  ;;  %v5049_v0 = vmul.f32 %v15187_v37, %v4983_v29  ;;  %v15331_v4 = vsel %vm1330_vm1, %v5179_v52, %v5180_v21  ;;  %v18873_v37 = vrot.slane %v14769_v23, 7 }
 0x45e   : > { %18871 = vst [vmem:[#allocation22_spill] sm:$0xff] %v15331_v4  ;;  %10372 = vtanh.f32 %v4789_v2  ;;  %v4790_v30 = vmul.f32 0.7978846, %v4724_v42  ;;  %v4593_v61 = vmul.f32 %v15312_v6, %v4527_v57  ;;  %v4528_v1 = vmul.f32 %v15326_v45, %v15326_v45 }
 0x45f   : > { %v15341_v43 = vmul.f32 %v15201_v11, %v4984_v7  ;;  %v5283_v29 = vsel %vm1330_vm1, %v12208_v19, %v18873_v37  ;;  %v5313_v50 = vrot.slane %v5049_v0, 1  ;;  %v5181_v2 = vrot.slane %v5049_v0, 7 }
 0x460   : > { %v10369_v63 = vpop.eup %10368  ;;  %10374 = vtanh.f32 %v4790_v30  ;;  %v4659_v12 = vmul.f32 0.044715, %v4593_v61  ;;  %v4594_v52 = vmul.f32 %v15326_v45, %v4528_v1 }
 0x461   : > { %v4374_v42 = vpop.f32.mrb[204].mxu1  ;;  %v10019_v57 = vpack.i.bf16 %v15341_v43, %v5049_v0  ;;  %v4919_v4 = vadd.f32 1.0, %v10369_v63  ;;  %v15352_v11 = vsel %vm1463_vm0, %v5312_v20, %v5313_v50  ;;  %v5314_v23 = vrot.slane %v15341_v43, 1 }
 0x462   : > { %18874 = vst [vmem:[#allocation12_spill] sm:$0xff] %v15352_v11  ;;  %v10371_v7 = vpop.eup %10370  ;;  %v4725_v37 = vadd.f32 %v15312_v6, %v4659_v12  ;;  %v4660_v56 = vmul.f32 0.044715, %v4594_v52  ;;  %v15357_v30 = vadd.f32 %v15229_v15, %v4374_v42  ;;  %v8955_v61 = vpop.f32.mrb[205].mxu1  ;;  %v18446_v44 = vrot.slane %v15341_v43, 7 }
 0x463   : > { %10020 = vrot.lane.b32.xlu0 %v10019_v57, %s10618_s22  ;;  %v4377_v0 = vpop.f32.mrb[206].mxu1  ;;  %v4920_v63 = vadd.f32 1.0, %v10371_v7  ;;  %v4985_v28 = vmul.f32 0.5, %v4919_v4  ;;  %v15364_v20 = vsel %vm1463_vm0, %v5313_v50, %v5314_v23 }
 0x464   : > { %v4791_v12 = vmul.f32 0.7978846, %v4725_v37  ;;  %v4726_v52 = vadd.f32 %v15326_v45, %v4660_v56  ;;  %v4529_v42 = vmul.f32 %v15357_v30, %v15357_v30  ;;  %v15371_v61 = vadd.f32 %v15229_v15, %v4377_v0  ;;  %v8956_v1 = vpop.f32.mrb[207].mxu1 }
 0x465   : > { %v9951_v57 = vpop.permute.xlu0 %9950  ;;  %v4986_v18 = vmul.f32 0.5, %v4920_v63  ;;  %v15374_v4 = vmul.f32 %v15232_v31, %v4985_v28  ;;  %v15380_v50 = vsel %vm1330_vm1, %v5181_v2, %v18446_v44  ;;  %v15384_v56 = vsel %vm1330_vm1, %v5180_v21, %v5181_v2 }
 0x466   : > { %18875 = vst [vmem:[#allocation11_spill] sm:$0xff] %v15380_v50  ;;  %18876 = vst [vmem:[#allocation14_spill] sm:$0xff] %v15384_v56  ;;  %10376 = vtanh.f32 %v4791_v12  ;;  %v4792_v7 = vmul.f32 0.7978846, %v4726_v52  ;;  %v4595_v37 = vmul.f32 %v15357_v30, %v4529_v42  ;;  %v4530_v1 = vmul.f32 %v15371_v61, %v15371_v61 }
 0x467   : > { %v9953_v0 = vunpack.i.h.bf16 %v9951_v57  ;;  %v9952_v31 = vunpack.i.l.bf16 %v9951_v57  ;;  %v15390_v28 = vmul.f32 %v15246_v32, %v4986_v18  ;;  %v5315_v63 = vrot.slane %v15374_v4, 1  ;;  %v10156_v32 = vld [vmem:[%s18344_s7] sm:$0xff]  }
 0x468   : > { %v10373_v44 = vpop.eup %10372  ;;  %10378 = vtanh.f32 %v4792_v7  ;;  %v4661_v50 = vmul.f32 0.044715, %v4595_v37  ;;  %v4596_v21 = vmul.f32 %v15371_v61, %v4530_v1 }
 0x469   : > { %v4382_v12 = vpop.f32.mrb[208].mxu1  ;;  %v5681_v52 = vsel %vm2125_vm4, %v12208_v19, %v9952_v31  ;;  %v5682_v42 = vsel %vm2125_vm4, %v5283_v29, %v9953_v0  ;;  %v10024_v18 = vpack.i.bf16 %v15390_v28, %v15374_v4  ;;  %v4921_v57 = vadd.f32 1.0, %v10373_v44 }
 0x46a   : > { %v10375_v7 = vpop.eup %10374  ;;  %v4727_v37 = vadd.f32 %v15357_v30, %v4661_v50  ;;  %v4662_v1 = vmul.f32 0.044715, %v4596_v21  ;;  %v15405_v2 = vadd.f32 %v15229_v15, %v4382_v12  ;;  %v8959_v56 = vpop.f32.mrb[209].mxu1  ;;  %v5747_v11 = vpack.c.bf16 %v5682_v42, %v5681_v52 }
 0x46b   : > { %10025 = vrot.lane.b32.xlu1 %v10024_v18, %s10618_s22  ;;  %v4385_v29 = vpop.f32.mrb[210].mxu1  ;;  %v4922_v0 = vadd.f32 1.0, %v10375_v7  ;;  %v4987_v31 = vmul.f32 0.5, %v4921_v57  ;;  %v15410_v19 = vsel %vm1463_vm0, %v5314_v23, %v5315_v63  ;;  %v5316_v44 = vrot.slane %v15390_v28, 1  ;;  %v10157_v57 = vld [vmem:[%s18344_s7 + $0x8] sm:$0xff]  }
 0x46c   : > { %v4793_v58 = vmul.f32 0.7978846, %v4727_v37  ;;  %v4728_v50 = vadd.f32 %v15371_v61, %v4662_v1  ;;  %v4531_v21 = vmul.f32 %v15405_v2, %v15405_v2  ;;  %6048 = vmatmul.mubr.bf16.vlgmr.msra.gmra.mrb[0].mxu0 %v5747_v11  ;;  %v15417_v56 = vadd.f32 %v15229_v15, %v4385_v29  ;;  %v8960_v12 = vpop.f32.mrb[211].mxu1 }
 0x46d   : > { %7535 = vmatpush1.bf16.msra.mxu0 %v10156_v32  ;;  %v18877_v52 = vpack.c.bf16 %v14862_v39, %v14831_v53  ;;  %v9956_v23 = vpop.permute.xlu1 %9955  ;;  %v4988_v42 = vmul.f32 0.5, %v4922_v0  ;;  %v15424_v18 = vmul.f32 %v15272_v24, %v4987_v31  ;;  %v15433_v32 = vsel %vm1463_vm0, %v5315_v63, %v5316_v44 }
 0x46e   : > { %10380 = vtanh.f32 %v4793_v58  ;;  %v4794_v53 = vmul.f32 0.7978846, %v4728_v50  ;;  %v4597_v39 = vmul.f32 %v15405_v2, %v4531_v21  ;;  %v4532_v7 = vmul.f32 %v15417_v56, %v15417_v56  ;;  %7536 = vmatprep.subr.bf16.mxu0 %v18847_v13 }
 0x46f   : > { %8539 = vmatprep.mubr.msk.bf16.mxu0 %vm2125_vm4, %v18877_v52  ;;  %v9958_v24 = vunpack.i.h.bf16 %v9956_v23  ;;  %v9957_v37 = vunpack.i.l.bf16 %v9956_v23  ;;  %v15440_v1 = vmul.f32 %v15286_v35, %v4988_v42  ;;  %v5317_v29 = vrot.slane %v15424_v18, 1  ;;  %v10158_v23 = vld [vmem:[%s18344_s7 + $0x10] sm:$0xff]  }
 0x470   : > { %v10377_v0 = vpop.eup %10376  ;;  %10382 = vtanh.f32 %v4794_v53  ;;  %v4663_v63 = vmul.f32 0.044715, %v4597_v39  ;;  %v4598_v58 = vmul.f32 %v15417_v56, %v4532_v7  ;;  %v5184_v31 = vrot.slane %v15390_v28, 7  ;;  %v10162_v28 = vld [vmem:[%s18344_s7 + $0x30] sm:$0xff]  }
 0x471   : > { %v4390_v50 = vpop.f32.mrb[212].mxu1  ;;  %v5683_v21 = vsel %vm2125_vm4, %v14850_v25, %v9957_v37  ;;  %v5684_v12 = vsel %vm2125_vm4, %v14844_v41, %v9958_v24  ;;  %v10029_v35 = vpack.i.bf16 %v15440_v1, %v15424_v18  ;;  %7537 = vmatpush1.bf16.msra.mxu0 %v10157_v57  ;;  %v4923_v52 = vadd.f32 1.0, %v10377_v0 }
 0x472   : > { %v10379_v42 = vpop.eup %10378  ;;  %v4729_v53 = vadd.f32 %v15405_v2, %v4663_v63  ;;  %v4664_v39 = vmul.f32 0.044715, %v4598_v58  ;;  %v15456_v7 = vadd.f32 %v15229_v15, %v4390_v50  ;;  %v8963_v25 = vpop.f32.mrb[213].mxu1  ;;  %v5749_v37 = vpack.c.bf16 %v5684_v12, %v5683_v21  ;;  %7538 = vmatprep.subr.bf16.mxu0 %v18847_v13 }
 0x473   : > { %10030 = vrot.lane.b32.xlu0 %v10029_v35, %s10618_s22  ;;  %v4393_v41 = vpop.f32.mrb[214].mxu1  ;;  %v4924_v57 = vadd.f32 1.0, %v10379_v42  ;;  %v4989_v24 = vmul.f32 0.5, %v4923_v52  ;;  %v15464_v0 = vsel %vm1463_vm0, %v5316_v44, %v5317_v29  ;;  %v18878_v63 = vrot.slane %v15374_v4, 7 }
 0x474   : > { %v4795_v50 = vmul.f32 0.7978846, %v4729_v53  ;;  %v4730_v21 = vadd.f32 %v15417_v56, %v4664_v39  ;;  %v4533_v12 = vmul.f32 %v15456_v7, %v15456_v7  ;;  %6056 = vmatmul.mubr.bf16.gmra.mrb[4].mxu0 %v5749_v37  ;;  %v15478_v35 = vadd.f32 %v15229_v15, %v4393_v41  ;;  %v8964_v44 = vpop.f32.mrb[215].mxu1  ;;  %v10159_v53 = vld [vmem:[%s18344_s7 + $0x18] sm:$0xff]  }
 0x475   : > { %v15472_v58 = vsel %vm1330_vm1, %v18878_v63, %v5184_v31  ;;  %v18879_v52 = vpack.c.bf16 %v14902_v51, %v14874_v47  ;;  %v9961_v42 = vpop.permute.xlu0 %9960  ;;  %v4990_v25 = vmul.f32 0.5, %v4924_v57  ;;  %v15485_v63 = vmul.f32 %v15312_v6, %v4989_v24  ;;  %7539 = vmatpush1.bf16.msra.mxu0 %v10158_v23 }
 0x476   : > { %v18880_v37 = vrot.slane %v15374_v4, 7  ;;  %v18881_v41 = vrot.slane %v15341_v43, 7  ;;  %10384 = vtanh.f32 %v4795_v50  ;;  %v4796_v51 = vmul.f32 0.7978846, %v4730_v21  ;;  %7540 = vmatprep.subr.bf16.mxu0 %v18847_v13 }
 0x477   : > { %8540 = vmatprep.mubr.msk.bf16.mxu0 %vm2125_vm4, %v18879_v52  ;;  %v4599_v6 = vmul.f32 %v15456_v7, %v4533_v12  ;;  %v4534_v23 = vmul.f32 %v15478_v35, %v15478_v35  ;;  %v9963_v57 = vunpack.i.h.bf16 %v9961_v42  ;;  %v9962_v24 = vunpack.i.l.bf16 %v9961_v42 }
 0x478   : > { %v15498_v47 = vsel %vm1330_vm1, %v18881_v41, %v18880_v37  ;;  %v15505_v44 = vmul.f32 %v15326_v45, %v4990_v25  ;;  %v5318_v43 = vrot.slane %v15440_v1, 1  ;;  %v10381_v4 = vpop.eup %10380  ;;  %10386 = vtanh.f32 %v4796_v51  ;;  %v10160_v25 = vld [vmem:[%s18344_s7 + $0x20] sm:$0xff]  }
 0x479   : > { %v4665_v52 = vmul.f32 0.044715, %v4599_v6  ;;  %v4600_v50 = vmul.f32 %v15478_v35, %v4534_v23  ;;  %v5319_v21 = vrot.slane %v15485_v63, 1  ;;  %v4398_v12 = vpop.f32.mrb[216].mxu1  ;;  %v5685_v37 = vsel %vm2125_vm4, %v14890_v27, %v9962_v24  ;;  %7541 = vmatpush1.bf16.msra.mxu0 %v10159_v53 }
 0x47a   : > { %v5686_v41 = vsel %vm2125_vm4, %v14886_v17, %v9963_v57  ;;  %v10034_v45 = vpack.i.bf16 %v15505_v44, %v15485_v63  ;;  %v4925_v42 = vadd.f32 1.0, %v10381_v4  ;;  %v10383_v51 = vpop.eup %10382  ;;  %v15521_v39 = vadd.f32 %v15229_v15, %v4398_v12  ;;  %v8967_v27 = vpop.f32.mrb[217].mxu1  ;;  %7542 = vmatprep.subr.bf16.mxu0 %v18847_v13 }
 0x47b   : > { %v4731_v6 = vadd.f32 %v15456_v7, %v4665_v52  ;;  %v4666_v23 = vmul.f32 0.044715, %v4600_v50  ;;  %v5751_v24 = vpack.c.bf16 %v5686_v41, %v5685_v37  ;;  %v4401_v17 = vpop.f32.mrb[218].mxu1  ;;  %v4926_v57 = vadd.f32 1.0, %v10383_v51 }
 0x47c   : > { %10035 = vrot.lane.b32.xlu1 %v10034_v45, %s10618_s22  ;;  %v4991_v53 = vmul.f32 0.5, %v4925_v42  ;;  %v15529_v4 = vsel %vm1463_vm0, %v5318_v43, %v5319_v21  ;;  %v15535_v52 = vsel %vm1463_vm0, %v5317_v29, %v5318_v43  ;;  %v4535_v37 = vmul.f32 %v15521_v39, %v15521_v39  ;;  %v8968_v45 = vpop.f32.mrb[219].mxu1  ;;  %v10161_v43 = vld [vmem:[%s18344_s7 + $0x28] sm:$0xff]  }
 0x47d   : > { %v4797_v50 = vmul.f32 0.7978846, %v4731_v6  ;;  %v4732_v12 = vadd.f32 %v15478_v35, %v4666_v23  ;;  %6064 = vmatmul.mubr.bf16.gmra.mrb[8].mxu0 %v5751_v24  ;;  %v15541_v41 = vadd.f32 %v15229_v15, %v4401_v17  ;;  %v18882_v42 = vpack.c.bf16 %v14942_v60, %v14914_v48  ;;  %v9966_v51 = vpop.permute.xlu1 %9965 }
 0x47e   : > { %v4992_v27 = vmul.f32 0.5, %v4926_v57  ;;  %v15548_v29 = vmul.f32 %v15357_v30, %v4991_v53  ;;  %7543 = vmatpush1.bf16.msra.mxu0 %v10160_v25  ;;  %v5185_v23 = vrot.slane %v15424_v18, 7  ;;  %v4601_v48 = vmul.f32 %v15521_v39, %v4535_v37 }
 0x47f   : > { %8541 = vmatprep.mubr.msk.bf16.mxu0 %vm2125_vm4, %v18882_v42  ;;  %10388 = vtanh.f32 %v4797_v50  ;;  %v4798_v24 = vmul.f32 0.7978846, %v4732_v12  ;;  %v4536_v60 = vmul.f32 %v15541_v41, %v15541_v41  ;;  %7544 = vmatprep.subr.bf16.mxu0 %v18847_v13  ;;  %v9968_v30 = vunpack.i.h.bf16 %v9966_v51 }
 0x480   : > { %v9967_v25 = vunpack.i.l.bf16 %v9966_v51  ;;  %v15561_v17 = vmul.f32 %v15371_v61, %v4992_v27  ;;  %v5186_v57 = vrot.slane %v15440_v1, 7  ;;  %v10385_v53 = vpop.eup %10384  ;;  %v4667_v45 = vmul.f32 0.044715, %v4601_v48 }
 0x481   : > { %10390 = vtanh.f32 %v4798_v24  ;;  %v4602_v18 = vmul.f32 %v15541_v41, %v4536_v60  ;;  %v15569_v50 = vsel %vm1330_vm1, %v5184_v31, %v5185_v23  ;;  %v4406_v12 = vpop.f32.mrb[220].mxu1  ;;  %v5688_v61 = vsel %vm2125_vm4, %v14926_v5, %v9968_v30 }
 0x482   : > { %v5687_v37 = vsel %vm2125_vm4, %v14930_v22, %v9967_v25  ;;  %v10039_v42 = vpack.i.bf16 %v15561_v17, %v15548_v29  ;;  %v4927_v51 = vadd.f32 1.0, %v10385_v53  ;;  %7545 = vmatpush1.bf16.msra.mxu0 %v10161_v43  ;;  %v10387_v27 = vpop.eup %10386  ;;  %v4733_v31 = vadd.f32 %v15521_v39, %v4667_v45  ;;  %v8971_v22 = vpop.f32.mrb[221].mxu1 }
 0x483   : > { %v4668_v24 = vmul.f32 0.044715, %v4602_v18  ;;  %v15582_v48 = vadd.f32 %v15229_v15, %v4406_v12  ;;  %v5753_v60 = vpack.c.bf16 %v5688_v61, %v5687_v37  ;;  %7546 = vmatprep.subr.bf16.mxu0 %v18847_v13  ;;  %v4409_v5 = vpop.f32.mrb[222].mxu1  ;;  %v4928_v30 = vadd.f32 1.0, %v10387_v27 }
 0x484   : > { %10040 = vrot.lane.b32.xlu0 %v10039_v42, %s10618_s22  ;;  %v4993_v43 = vmul.f32 0.5, %v4927_v51  ;;  %v15590_v25 = vsel %vm1330_vm1, %v5185_v23, %v5186_v57  ;;  %v5320_v53 = vrot.slane %v15505_v44, 1  ;;  %v4799_v45 = vmul.f32 0.7978846, %v4733_v31  ;;  %v8972_v61 = vpop.f32.mrb[223].mxu1  ;;  %v10163_v31 = vld [vmem:[%s18344_s7 + $0x38] sm:$0xff]  }
 0x485   : > { %v4734_v18 = vadd.f32 %v15541_v41, %v4668_v24  ;;  %v4537_v12 = vmul.f32 %v15582_v48, %v15582_v48  ;;  %6072 = vmatmul.mubr.bf16.gmra.mrb[12].mxu0 %v5753_v60  ;;  %v15597_v37 = vadd.f32 %v15229_v15, %v4409_v5  ;;  %v18883_v42 = vpack.c.bf16 %v14982_v36, %v14954_v34  ;;  %v9971_v23 = vpop.permute.xlu0 %9970 }
 0x486   : > { %v4994_v51 = vmul.f32 0.5, %v4928_v30  ;;  %v15604_v27 = vmul.f32 %v15405_v2, %v4993_v43  ;;  %7547 = vmatpush1.bf16.msra.mxu0 %v10162_v28  ;;  %v5321_v24 = vrot.slane %v15548_v29, 1  ;;  %v15614_v22 = vsel %vm1463_vm0, %v5319_v21, %v5320_v53 }
 0x487   : > { %8542 = vmatprep.mubr.msk.bf16.mxu0 %vm2125_vm4, %v18883_v42  ;;  %10392 = vtanh.f32 %v4799_v45  ;;  %v4800_v34 = vmul.f32 0.7978846, %v4734_v18  ;;  %v4603_v36 = vmul.f32 %v15582_v48, %v4537_v12  ;;  %v4538_v2 = vmul.f32 %v15597_v37, %v15597_v37  ;;  %7548 = vmatprep.subr.bf16.mxu0 %v18847_v13 }
 0x488   : > { %v9973_v28 = vunpack.i.h.bf16 %v9971_v23  ;;  %v9972_v60 = vunpack.i.l.bf16 %v9971_v23  ;;  %v15621_v5 = vmul.f32 %v15417_v56, %v4994_v51  ;;  %v15627_v21 = vsel %vm1463_vm0, %v5320_v53, %v5321_v24  ;;  %v10164_v23 = vld [vmem:[%s18344_s7 + $0x40] sm:$0xff]  }
 0x489   : > { %v10389_v30 = vpop.eup %10388  ;;  %10394 = vtanh.f32 %v4800_v34  ;;  %v4669_v43 = vmul.f32 0.044715, %v4603_v36  ;;  %v4604_v45 = vmul.f32 %v15597_v37, %v4538_v2  ;;  %v4414_v12 = vpop.f32.mrb[224].mxu1  ;;  %v5188_v18 = vrot.slane %v15505_v44, 7 }
 0x48a   : > { %v5689_v61 = vsel %vm2125_vm4, %v14970_v10, %v9972_v60  ;;  %v5690_v56 = vsel %vm2125_vm4, %v14966_v9, %v9973_v28  ;;  %v10044_v42 = vpack.i.bf16 %v15621_v5, %v15604_v27  ;;  %v4929_v53 = vadd.f32 1.0, %v10389_v30  ;;  %7549 = vmatpush1.bf16.msra.mxu0 %v10163_v31  ;;  %v8975_v10 = vpop.f32.mrb[225].mxu1 }
 0x48b   : > { %v10391_v51 = vpop.eup %10390  ;;  %v4735_v34 = vadd.f32 %v15582_v48, %v4669_v43  ;;  %v4670_v36 = vmul.f32 0.044715, %v4604_v45  ;;  %v15643_v2 = vadd.f32 %v15229_v15, %v4414_v12  ;;  %v5755_v60 = vpack.c.bf16 %v5690_v56, %v5689_v61  ;;  %7550 = vmatprep.subr.bf16.mxu0 %v18847_v13  ;;  %v4417_v9 = vpop.f32.mrb[226].mxu1 }
 0x48c   : > { %10045 = vrot.lane.b32.xlu1 %v10044_v42, %s10618_s22  ;;  %v4930_v28 = vadd.f32 1.0, %v10391_v51  ;;  %v4995_v31 = vmul.f32 0.5, %v4929_v53  ;;  %v5187_v30 = vrot.slane %v15485_v63, 7  ;;  %v15653_v12 = vadd.f32 %v15229_v15, %v4417_v9  ;;  %v8976_v61 = vpop.f32.mrb[227].mxu1 }
 0x48d   : > { %v4801_v6 = vmul.f32 0.7978846, %v4735_v34  ;;  %v4736_v43 = vadd.f32 %v15597_v37, %v4670_v36  ;;  %v4539_v45 = vmul.f32 %v15643_v2, %v15643_v2  ;;  %6080 = vmatmul.mubr.bf16.gmra.mrb[16].mxu0 %v5755_v60  ;;  %v18884_v56 = vpack.c.bf16 %v15022_v14, %v14994_v33  ;;  %v9976_v42 = vpop.permute.xlu1 %9975  ;;  %v10165_v33 = vld [vmem:[%s18344_s7 + $0x48] sm:$0xff]   ;;  %v10166_v61 = vld [vmem:[%s18344_s7 + $0x50] sm:$0xff]  }
 0x48e   : > { %v4996_v63 = vmul.f32 0.5, %v4930_v28  ;;  %v15660_v53 = vmul.f32 %v15456_v7, %v4995_v31  ;;  %7551 = vmatpush1.bf16.msra.mxu0 %v10164_v23  ;;  %v15666_v51 = vsel %vm1330_vm1, %v5187_v30, %v5188_v18  ;;  %v15672_v34 = vsel %vm1330_vm1, %v5186_v57, %v5187_v30 }
 0x48f   : > { %8543 = vmatprep.mubr.msk.bf16.mxu0 %vm2125_vm4, %v18884_v56  ;;  %10396 = vtanh.f32 %v4801_v6  ;;  %v4802_v14 = vmul.f32 0.7978846, %v4736_v43  ;;  %v4605_v7 = vmul.f32 %v15643_v2, %v4539_v45  ;;  %v4540_v23 = vmul.f32 %v15653_v12, %v15653_v12  ;;  %7552 = vmatprep.subr.bf16.mxu0 %v18847_v13 }
 0x490   : > { %v9978_v36 = vunpack.i.h.bf16 %v9976_v42  ;;  %v9977_v10 = vunpack.i.l.bf16 %v9976_v42  ;;  %v15682_v1 = vmul.f32 %v15478_v35, %v4996_v63  ;;  %v5322_v57 = vrot.slane %v15561_v17, 1 }
 0x491   : > { %v10393_v60 = vpop.eup %10392  ;;  %10398 = vtanh.f32 %v4802_v14  ;;  %v4671_v9 = vmul.f32 0.044715, %v4605_v7  ;;  %v4606_v6 = vmul.f32 %v15653_v12, %v4540_v23  ;;  %v5323_v28 = vrot.slane %v15604_v27, 1  ;;  %v4422_v31 = vpop.f32.mrb[228].mxu1 }
 0x492   : > { %v5691_v30 = vsel %vm2125_vm4, %v15010_v38, %v9977_v10  ;;  %v5692_v43 = vsel %vm2125_vm4, %v15006_v54, %v9978_v36  ;;  %v10049_v35 = vpack.i.bf16 %v15682_v1, %v15660_v53  ;;  %v4931_v45 = vadd.f32 1.0, %v10393_v60  ;;  %7553 = vmatpush1.bf16.msra.mxu0 %v10165_v33  ;;  %v8979_v38 = vpop.f32.mrb[229].mxu1 }
 0x493   : > { %v10395_v56 = vpop.eup %10394  ;;  %v4737_v42 = vadd.f32 %v15643_v2, %v4671_v9  ;;  %v4672_v63 = vmul.f32 0.044715, %v4606_v6  ;;  %v15698_v14 = vadd.f32 %v15229_v15, %v4422_v31  ;;  %v5757_v7 = vpack.c.bf16 %v5692_v43, %v5691_v30  ;;  %7554 = vmatprep.subr.bf16.mxu0 %v18847_v13  ;;  %v4425_v54 = vpop.f32.mrb[230].mxu1 }
 0x494   : > { %10050 = vrot.lane.b32.xlu0 %v10049_v35, %s10618_s22  ;;  %v4932_v23 = vadd.f32 1.0, %v10395_v56  ;;  %v4997_v33 = vmul.f32 0.5, %v4931_v45  ;;  %v15706_v36 = vsel %vm1463_vm0, %v5322_v57, %v5323_v28  ;;  %v15712_v10 = vsel %vm1463_vm0, %v5321_v24, %v5322_v57  ;;  %v8980_v30 = vpop.f32.mrb[231].mxu1 }
 0x495   : > { %v4803_v60 = vmul.f32 0.7978846, %v4737_v42  ;;  %v4738_v9 = vadd.f32 %v15653_v12, %v4672_v63  ;;  %v4541_v6 = vmul.f32 %v15698_v14, %v15698_v14  ;;  %6088 = vmatmul.mubr.bf16.gmra.mrb[20].mxu0 %v5757_v7  ;;  %v15718_v31 = vadd.f32 %v15229_v15, %v4425_v54  ;;  %v9981_v35 = vpop.permute.xlu0 %9980 }
 0x496   : > { %v18885_v43 = vpack.c.bf16 %v15062_v46, %v15034_v26  ;;  %v4998_v45 = vmul.f32 0.5, %v4932_v23  ;;  %v15725_v24 = vmul.f32 %v15521_v39, %v4997_v33  ;;  %v5189_v56 = vrot.slane %v15548_v29, 7  ;;  %7555 = vmatpush1.bf16.msra.mxu0 %v10166_v61 }
 0x497   : > { %10400 = vtanh.f32 %v4803_v60  ;;  %v4804_v42 = vmul.f32 0.7978846, %v4738_v9  ;;  %v4607_v63 = vmul.f32 %v15698_v14, %v4541_v6  ;;  %v4542_v26 = vmul.f32 %v15718_v31, %v15718_v31  ;;  %7556 = vmatprep.subr.bf16.mxu0 %v18847_v13 }
 0x498   : > { %8544 = vmatprep.mubr.msk.bf16.mxu0 %vm2125_vm4, %v18885_v43  ;;  %v9983_v46 = vunpack.i.h.bf16 %v9981_v35  ;;  %v9982_v38 = vunpack.i.l.bf16 %v9981_v35  ;;  %v15735_v39 = vmul.f32 %v15541_v41, %v4998_v45  ;;  %v5190_v7 = vrot.slane %v15561_v17, 7 }
 0x499   : > { %v10397_v54 = vpop.eup %10396  ;;  %10402 = vtanh.f32 %v4804_v42  ;;  %v4673_v29 = vmul.f32 0.044715, %v4607_v63  ;;  %v4608_v61 = vmul.f32 %v15718_v31, %v4542_v26  ;;  %v15743_v23 = vsel %vm1330_vm1, %v5188_v18, %v5189_v56  ;;  %v4430_v33 = vpop.f32.mrb[232].mxu1 }
 0x49a   : > { %v5693_v60 = vsel %vm2125_vm4, %v15050_v62, %v9982_v38  ;;  %v5694_v41 = vsel %vm2125_vm4, %v15046_v55, %v9983_v46  ;;  %v10054_v9 = vpack.i.bf16 %v15735_v39, %v15725_v24  ;;  %v4933_v6 = vadd.f32 1.0, %v10397_v54  ;;  %v8983_v18 = vpop.f32.mrb[233].mxu1 }
 0x49b   : > { %v10399_v30 = vpop.eup %10398  ;;  %v4739_v43 = vadd.f32 %v15698_v14, %v4673_v29  ;;  %v4674_v35 = vmul.f32 0.044715, %v4608_v61  ;;  %v15753_v44 = vadd.f32 %v15229_v15, %v4430_v33  ;;  %v5759_v45 = vpack.c.bf16 %v5694_v41, %v5693_v60  ;;  %v4433_v42 = vpop.f32.mrb[234].mxu1  ;;  %v10167_v33 = vld [vmem:[%s18344_s7 + $0x58] sm:$0xff]  }
 0x49c   : > { %10055 = vrot.lane.b32.xlu1 %v10054_v9, %s10618_s22  ;;  %v4934_v62 = vadd.f32 1.0, %v10399_v30  ;;  %v4999_v63 = vmul.f32 0.5, %v4933_v6  ;;  %v15760_v55 = vsel %vm1330_vm1, %v5189_v56, %v5190_v7  ;;  %v5324_v26 = vrot.slane %v15621_v5, 1  ;;  %v8984_v61 = vpop.f32.mrb[235].mxu1  ;;  %7557 = vmatpush1.bf16.msra.mxu0 %v10167_v33 }
 0x49d   : > { %v4805_v46 = vmul.f32 0.7978846, %v4739_v43  ;;  %v4740_v38 = vadd.f32 %v15718_v31, %v4674_v35  ;;  %v4543_v54 = vmul.f32 %v15753_v44, %v15753_v44  ;;  %6096 = vmatmul.mubr.bf16.gmra.mrb[24].mxu0 %v5759_v45  ;;  %v15767_v29 = vadd.f32 %v15229_v15, %v4433_v42  ;;  %v9986_v60 = vpop.permute.xlu1 %9985  ;;  %7558 = vmatprep.subr.bf16.mxu0 %v18847_v13 }
 0x49e   : > { %v18886_v56 = vpack.c.bf16 %v15102_v16, %v15074_v59  ;;  %v5000_v41 = vmul.f32 0.5, %v4934_v62  ;;  %v15777_v9 = vmul.f32 %v15582_v48, %v4999_v63  ;;  %v5325_v6 = vrot.slane %v15660_v53, 1 }
 0x49f   : > { %v15784_v30 = vsel %vm1463_vm0, %v5323_v28, %v5324_v26  ;;  %10404 = vtanh.f32 %v4805_v46  ;;  %v4806_v43 = vmul.f32 0.7978846, %v4740_v38  ;;  %v4609_v35 = vmul.f32 %v15753_v44, %v4543_v54 }
 0x4a0   : > { %8545 = vmatprep.mubr.msk.bf16.mxu0 %vm2125_vm4, %v18886_v56  ;;  %v4544_v59 = vmul.f32 %v15767_v29, %v15767_v29  ;;  %v9988_v16 = vunpack.i.h.bf16 %v9986_v60  ;;  %v9987_v18 = vunpack.i.l.bf16 %v9986_v60  ;;  %v15790_v48 = vmul.f32 %v15597_v37, %v5000_v41 }
 0x4a1   : > { %v15796_v45 = vsel %vm1463_vm0, %v5324_v26, %v5325_v6  ;;  %v10401_v28 = vpop.eup %10400  ;;  %10406 = vtanh.f32 %v4806_v43  ;;  %v4675_v42 = vmul.f32 0.044715, %v4609_v35  ;;  %v4438_v46 = vpop.f32.mrb[236].mxu1 }
 0x4a2   : > { %v4610_v62 = vmul.f32 %v15767_v29, %v4544_v59  ;;  %v5695_v37 = vsel %vm2125_vm4, %v15090_v3, %v9987_v18  ;;  %v5696_v38 = vsel %vm2125_vm4, %v15086_v49, %v9988_v16  ;;  %v10059_v26 = vpack.i.bf16 %v15790_v48, %v15777_v9  ;;  %v8987_v41 = vpop.f32.mrb[237].mxu1 }
 0x4a3   : > { %v4935_v54 = vadd.f32 1.0, %v10401_v28  ;;  %v10403_v61 = vpop.eup %10402  ;;  %v4741_v33 = vadd.f32 %v15753_v44, %v4675_v42  ;;  %v15810_v60 = vadd.f32 %v15229_v15, %v4438_v46  ;;  %v5761_v43 = vpack.c.bf16 %v5696_v38, %v5695_v37  ;;  %v4441_v35 = vpop.f32.mrb[238].mxu1  ;;  %v18887_v37 = vld [vmem:[#allocation31_spill] sm:$0xff] }
 0x4a4   : > { %v4676_v56 = vmul.f32 0.044715, %v4610_v62  ;;  %10060 = vrot.lane.b32.xlu0 %v10059_v26, %s10618_s22  ;;  %v4936_v3 = vadd.f32 1.0, %v10403_v61  ;;  %v5191_v49 = vrot.slane %v15604_v27, 7  ;;  %v5192_v16 = vrot.slane %v15621_v5, 7  ;;  %v8988_v46 = vpop.f32.mrb[239].mxu1 }
 0x4a5   : > { %v5001_v59 = vmul.f32 0.5, %v4935_v54  ;;  %v4807_v18 = vmul.f32 0.7978846, %v4741_v33  ;;  %v4545_v42 = vmul.f32 %v15810_v60, %v15810_v60  ;;  %6104 = vmatmul.mubr.bf16.gmra.mrb[28].mxu0 %v5761_v43  ;;  %v15819_v62 = vadd.f32 %v15229_v15, %v4441_v35  ;;  %v9991_v26 = vpop.permute.xlu0 %9990 }
 0x4a6   : > { %v4742_v28 = vadd.f32 %v15767_v29, %v4676_v56  ;;  %v18888_v38 = vpack.c.bf16 %v15142_v40, %v18887_v37  ;;  %v5002_v27 = vmul.f32 0.5, %v4936_v3  ;;  %v15832_v61 = vsel %vm1330_vm1, %v5191_v49, %v5192_v16 }
 0x4a7   : > { %v15826_v54 = vmul.f32 %v15643_v2, %v5001_v59  ;;  %18889 = vst [vmem:[#allocation23_spill] sm:$0xff] %v15832_v61  ;;  %v15838_v15 = vsel %vm1330_vm1, %v5190_v7, %v5191_v49  ;;  %10408 = vtanh.f32 %v4807_v18  ;;  %v4611_v33 = vmul.f32 %v15810_v60, %v4545_v42  ;;  %v18890_v18 = vld [vmem:[#allocation33_spill] sm:$0xff]  ;;  %v18891_v42 = vld [vmem:[#allocation32_spill] sm:$0xff] }
 0x4a8   : > { %8546 = vmatprep.mubr.msk.bf16.mxu0 %vm2125_vm4, %v18888_v38  ;;  %v4808_v40 = vmul.f32 0.7978846, %v4742_v28  ;;  %v4546_v2 = vmul.f32 %v15819_v62, %v15819_v62  ;;  %v9993_v56 = vunpack.i.h.bf16 %v9991_v26  ;;  %v9992_v41 = vunpack.i.l.bf16 %v9991_v26 }
 0x4a9   : > { %v15844_v43 = vmul.f32 %v15653_v12, %v5002_v27  ;;  %v5326_v35 = vrot.slane %v15682_v1, 1  ;;  %v10405_v3 = vpop.eup %10404  ;;  %v4677_v17 = vmul.f32 0.044715, %v4611_v33  ;;  %v18451_v59 = vrot.slane %v15725_v24, 1  ;;  %v4446_v49 = vpop.f32.mrb[240].mxu1 }
 0x4aa   : > { %10410 = vtanh.f32 %v4808_v40  ;;  %v4612_v7 = vmul.f32 %v15819_v62, %v4546_v2  ;;  %v5697_v28 = vsel %vm2125_vm4, %v18890_v18, %v9992_v41  ;;  %v5698_v46 = vsel %vm2125_vm4, %v18891_v42, %v9993_v56  ;;  %v15859_v40 = vld [vmem:[%s18346_s9] ss:$0 sm:$0xff]  ;;  %v8991_v2 = vpop.f32.mrb[241].mxu1 }
 0x4ab   : > { %v10064_v12 = vpack.i.bf16 %v15844_v43, %v15826_v54  ;;  %v4937_v37 = vadd.f32 1.0, %v10405_v3  ;;  %v10407_v38 = vpop.eup %10406  ;;  %v4743_v26 = vadd.f32 %v15810_v60, %v4677_v17  ;;  %v15862_v33 = vadd.f32 %v15859_v40, %v4446_v49  ;;  %v4449_v56 = vpop.f32.mrb[242].mxu1  ;;  %v18895_v2 = vld [vmem:[#allocation40_spill] sm:$0xff] }
 0x4ac   : > { %v4678_v27 = vmul.f32 0.044715, %v4612_v7  ;;  %v5763_v41 = vpack.c.bf16 %v5698_v46, %v5697_v28  ;;  %v4938_v18 = vadd.f32 1.0, %v10407_v38  ;;  %v15869_v3 = vsel %vm1463_vm0, %v5326_v35, %v18451_v59  ;;  %v18894_v38 = vld [vmem:[#allocation36_spill] sm:$0xff] }
 0x4ad   : > { %10065 = vrot.lane.b32.xlu1 %v10064_v12, %s10618_s22  ;;  %v5003_v42 = vmul.f32 0.5, %v4937_v37  ;;  %18892 = vst [vmem:[#allocation24_spill] sm:$0xff] %v15869_v3  ;;  %v15875_v17 = vsel %vm1463_vm0, %v5325_v6, %v5326_v35  ;;  %v4809_v7 = vmul.f32 0.7978846, %v4743_v26  ;;  %v4547_v28 = vmul.f32 %v15862_v33, %v15862_v33  ;;  %v8992_v12 = vpop.f32.mrb[243].mxu1  ;;  %v10168_v37 = vld [vmem:[%s18344_s7 + $0x60] sm:$0xff]   ;;  %v9996_v6 = vpop.permute.xlu1 %9995 }
 0x4ae   : > { %18893 = vst [vmem:[#allocation25_spill] sm:$0xff] %v15875_v17  ;;  %v4744_v49 = vadd.f32 %v15819_v62, %v4678_v27  ;;  %6112 = vmatmul.mubr.bf16.gmra.mrb[32].mxu0 %v5763_v41  ;;  %v15881_v46 = vadd.f32 %v15859_v40, %v4449_v56  ;;  %v18896_v63 = vpack.c.bf16 %v18894_v38, %v18895_v2  ;;  %v5004_v35 = vmul.f32 0.5, %v4938_v18  ;;  %v18899_v2 = vld [vmem:[#allocation34_spill] sm:$0xff] }
 0x4af   : > { %v15891_v26 = vmul.f32 %v15698_v14, %v5003_v42  ;;  %v5193_v41 = vrot.slane %v15660_v53, 7  ;;  %10412 = vtanh.f32 %v4809_v7  ;;  %v4613_v12 = vmul.f32 %v15862_v33, %v4547_v28  ;;  %7559 = vmatpush1.bf16.msra.mxu0 %v10168_v37  ;;  %v18898_v37 = vld [vmem:[#allocation35_spill] sm:$0xff] }
 0x4b0   : > { %8547 = vmatprep.mubr.msk.bf16.mxu0 %vm2125_vm4, %v18896_v63  ;;  %v4810_v56 = vmul.f32 0.7978846, %v4744_v49  ;;  %v4548_v57 = vmul.f32 %v15881_v46, %v15881_v46  ;;  %v9998_v38 = vunpack.i.h.bf16 %v9996_v6  ;;  %v9997_v63 = vunpack.i.l.bf16 %v9996_v6  ;;  %7560 = vmatprep.subr.bf16.mxu0 %v18847_v13 }
 0x4b1   : > { %v15900_v18 = vmul.f32 %v15718_v31, %v5004_v35  ;;  %v18452_v14 = vrot.slane %v15682_v1, 7  ;;  %v10409_v42 = vpop.eup %10408  ;;  %v4679_v53 = vmul.f32 0.044715, %v4613_v12  ;;  %v15909_v49 = vsel %vm1330_vm1, %v5192_v16, %v5193_v41  ;;  %v4454_v28 = vpop.f32.mrb[244].mxu1 }
 0x4b2   : > { %10414 = vtanh.f32 %v4810_v56  ;;  %v4614_v7 = vmul.f32 %v15881_v46, %v4548_v57  ;;  %18897 = vst [vmem:[#allocation29_spill] sm:$0xff] %v15909_v49  ;;  %v5699_v31 = vsel %vm2125_vm4, %v18898_v37, %v9997_v63  ;;  %v5700_v6 = vsel %vm2125_vm4, %v18899_v2, %v9998_v38  ;;  %v8995_v16 = vpop.f32.mrb[245].mxu1 }
 0x4b3   : > { %v10069_v35 = vpack.i.bf16 %v15900_v18, %v15891_v26  ;;  %v4939_v56 = vadd.f32 1.0, %v10409_v42  ;;  %v4745_v57 = vadd.f32 %v15862_v33, %v4679_v53  ;;  %v15919_v5 = vadd.f32 %v15859_v40, %v4454_v28  ;;  %v4457_v59 = vpop.f32.mrb[246].mxu1 }
 0x4b4   : > { %v10411_v12 = vpop.eup %10410  ;;  %v4680_v27 = vmul.f32 0.044715, %v4614_v7  ;;  %v5765_v11 = vpack.c.bf16 %v5700_v6, %v5699_v31  ;;  %v15926_v38 = vsel %vm1330_vm1, %v5193_v41, %v18452_v14  ;;  %v5328_v42 = vrot.slane %v15735_v39, 1  ;;  %v8996_v2 = vpop.f32.mrb[247].mxu1  ;;  %v18901_v6 = vld [vmem:[#allocation41_spill] sm:$0xff] }
 0x4b5   : > { %10070 = vrot.lane.b32.xlu0 %v10069_v35, %s10618_s22  ;;  %v4940_v63 = vadd.f32 1.0, %v10411_v12  ;;  %v5005_v37 = vmul.f32 0.5, %v4939_v56  ;;  %18900 = vst [vmem:[#allocation28_spill] sm:$0xff] %v15926_v38  ;;  %v4811_v53 = vmul.f32 0.7978846, %v4745_v57  ;;  %v4549_v28 = vmul.f32 %v15919_v5, %v15919_v5  ;;  %v18902_v35 = vld [vmem:[#allocation37_spill] sm:$0xff]  ;;  %v10001_v41 = vpop.permute.xlu0 %10000 }
 0x4b6   : > { %v4746_v7 = vadd.f32 %v15881_v46, %v4680_v27  ;;  %6120 = vmatmul.mubr.bf16.gmra.mrb[36].mxu0 %v5765_v11  ;;  %v15933_v31 = vadd.f32 %v15859_v40, %v4457_v59  ;;  %v18903_v56 = vpack.c.bf16 %v18901_v6, %v18902_v35  ;;  %v18453_v27 = vrot.slane %v15777_v9, 1  ;;  %v18907_v14 = vld [vmem:[#allocation13_spill] sm:$0xff] }
 0x4b7   : > { %v5006_v12 = vmul.f32 0.5, %v4940_v63  ;;  %v15940_v16 = vmul.f32 %v15753_v44, %v5005_v37  ;;  %v18904_v57 = vrot.slane %v15725_v24, 1  ;;  %10416 = vtanh.f32 %v4811_v53 }
 0x4b8   : > { %8548 = vmatprep.mubr.msk.bf16.mxu0 %vm2125_vm4, %v18903_v56  ;;  %v4812_v59 = vmul.f32 0.7978846, %v4746_v7  ;;  %v4615_v2 = vmul.f32 %v15919_v5, %v4549_v28  ;;  %v4550_v6 = vmul.f32 %v15933_v31, %v15933_v31  ;;  %v10003_v35 = vunpack.i.h.bf16 %v10001_v41 }
 0x4b9   : > { %v15947_v11 = vsel %vm1463_vm0, %v18904_v57, %v5328_v42  ;;  %v10002_v63 = vunpack.i.l.bf16 %v10001_v41  ;;  %v15953_v44 = vmul.f32 %v15767_v29, %v5006_v12  ;;  %v15959_v37 = vsel %vm1463_vm0, %v5328_v42, %v18453_v27  ;;  %v10413_v56 = vpop.eup %10412  ;;  %v4462_v57 = vpop.f32.mrb[248].mxu1  ;;  %v18908_v29 = vld [vmem:[#allocation39_spill] sm:$0xff] }
 0x4ba   : > { %18905 = vst [vmem:[#allocation17_spill] sm:$0xff] %v15947_v11  ;;  %18906 = vst [vmem:[#allocation15_spill] sm:$0xff] %v15959_v37  ;;  %10418 = vtanh.f32 %v4812_v59  ;;  %v4681_v53 = vmul.f32 0.044715, %v4615_v2  ;;  %v4616_v7 = vmul.f32 %v15933_v31, %v4550_v6  ;;  %v5702_v12 = vsel %vm2125_vm4, %v18908_v29, %v10003_v35  ;;  %v8999_v49 = vpop.f32.mrb[249].mxu1 }
 0x4bb   : > { %v5701_v41 = vsel %vm2125_vm4, %v18907_v14, %v10002_v63  ;;  %v10074_v38 = vpack.i.bf16 %v15953_v44, %v15940_v16  ;;  %v4941_v42 = vadd.f32 1.0, %v10413_v56  ;;  %v15972_v6 = vadd.f32 %v15859_v40, %v4462_v57  ;;  %v4465_v11 = vpop.f32.mrb[250].mxu1  ;;  %v18910_v57 = vld [vmem:[#allocation20_spill] sm:$0xff] }
 0x4bc   : > { %v10415_v27 = vpop.eup %10414  ;;  %v4747_v59 = vadd.f32 %v15919_v5, %v4681_v53  ;;  %v4682_v2 = vmul.f32 0.044715, %v4616_v7  ;;  %v5767_v28 = vpack.c.bf16 %v5702_v12, %v5701_v41  ;;  %v5195_v35 = vrot.slane %v15725_v24, 7  ;;  %v9000_v49 = vpop.f32.mrb[251].mxu1 }
 0x4bd   : > { %10075 = vrot.lane.b32.xlu1 %v10074_v38, %s10618_s22  ;;  %v4942_v14 = vadd.f32 1.0, %v10415_v27  ;;  %v5007_v63 = vmul.f32 0.5, %v4941_v42  ;;  %v18456_v29 = vrot.slane %v15735_v39, 7  ;;  %v4551_v53 = vmul.f32 %v15972_v6, %v15972_v6  ;;  %v10169_v38 = vld [vmem:[%s18344_s7 + $0x68] sm:$0xff]   ;;  %v18909_v27 = vld [vmem:[#allocation7_spill] sm:$0xff]  ;;  %v10006_v41 = vpop.permute.xlu1 %10005 }
 0x4be   : > { %v4813_v37 = vmul.f32 0.7978846, %v4747_v59  ;;  %v4748_v56 = vadd.f32 %v15933_v31, %v4682_v2  ;;  %6128 = vmatmul.mubr.bf16.gmra.mrb[40].mxu0 %v5767_v28  ;;  %v15981_v7 = vadd.f32 %v15859_v40, %v4465_v11  ;;  %v18911_v24 = vpack.c.bf16 %v18909_v27, %v18910_v57 }
 0x4bf   : > { %v5008_v12 = vmul.f32 0.5, %v4942_v14  ;;  %v15991_v42 = vmul.f32 %v15810_v60, %v5007_v63  ;;  %v15997_v11 = vsel %vm1330_vm1, %v5195_v35, %v18456_v29  ;;  %v18913_v28 = vrot.slane %v15682_v1, 7  ;;  %7561 = vmatpush1.bf16.msra.mxu0 %v10169_v38 }
 0x4c0   : > { %8549 = vmatprep.mubr.msk.bf16.mxu0 %vm2125_vm4, %v18911_v24  ;;  %18912 = vst [vmem:[#allocation19_spill] sm:$0xff] %v15997_v11  ;;  %10420 = vtanh.f32 %v4813_v37  ;;  %v4814_v2 = vmul.f32 0.7978846, %v4748_v56  ;;  %v4617_v49 = vmul.f32 %v15972_v6, %v4551_v53  ;;  %v4552_v60 = vmul.f32 %v15981_v7, %v15981_v7  ;;  %7562 = vmatprep.subr.bf16.mxu0 %v18847_v13  ;;  %v18915_v24 = vld [vmem:[#allocation21_spill] sm:$0xff] }
 0x4c1   : > { %v16003_v59 = vsel %vm1330_vm1, %v18913_v28, %v5195_v35  ;;  %v10008_v14 = vunpack.i.h.bf16 %v10006_v41  ;;  %v10007_v63 = vunpack.i.l.bf16 %v10006_v41  ;;  %v16009_v27 = vmul.f32 %v15819_v62, %v5008_v12  ;;  %v10417_v1 = vpop.eup %10416  ;;  %v4470_v53 = vpop.f32.mrb[252].mxu1  ;;  %v18916_v28 = vld [vmem:[#allocation44_spill] sm:$0xff] }
 0x4c2   : > { %18914 = vst [vmem:[#allocation16_spill] sm:$0xff] %v16003_v59  ;;  %v5330_v57 = vrot.slane %v15790_v48, 1  ;;  %10422 = vtanh.f32 %v4814_v2  ;;  %v4683_v35 = vmul.f32 0.044715, %v4617_v49  ;;  %v4618_v37 = vmul.f32 %v15981_v7, %v4552_v60  ;;  %v9003_v60 = vpop.f32.mrb[253].mxu1 }
 0x4c3   : > { %v5703_v38 = vsel %vm2125_vm4, %v18915_v24, %v10007_v63  ;;  %v5704_v41 = vsel %vm2125_vm4, %v18916_v28, %v10008_v14  ;;  %v10079_v62 = vpack.i.bf16 %v16009_v27, %v15991_v42  ;;  %v4943_v12 = vadd.f32 1.0, %v10417_v1  ;;  %v4473_v59 = vpop.f32.mrb[254].mxu1 }
 0x4c4   : > { %v10419_v29 = vpop.eup %10418  ;;  %v4749_v11 = vadd.f32 %v15972_v6, %v4683_v35  ;;  %v4684_v2 = vmul.f32 0.044715, %v4618_v37  ;;  %v16023_v49 = vadd.f32 %v15859_v40, %v4470_v53  ;;  %v5769_v56 = vpack.c.bf16 %v5704_v41, %v5703_v38  ;;  %v9004_v41 = vpop.f32.mrb[255].mxu1 }
 0x4c5   : > { %10080 = vrot.lane.b32.xlu0 %v10079_v62, %s10618_s22  ;;  %v4944_v63 = vadd.f32 1.0, %v10419_v29  ;;  %v5009_v24 = vmul.f32 0.5, %v4943_v12  ;;  %v18917_v14 = vrot.slane %v15826_v54, 1  ;;  %v18919_v1 = vrot.slane %v15777_v9, 1  ;;  %v18921_v62 = vld [vmem:[#allocation9_spill] sm:$0xff]  ;;  %v18922_v12 = vld [vmem:[#allocation43_spill] sm:$0xff] }
 0x4c6   : > { %v4815_v37 = vmul.f32 0.7978846, %v4749_v11  ;;  %v4750_v53 = vadd.f32 %v15981_v7, %v4684_v2  ;;  %v4553_v38 = vmul.f32 %v16023_v49, %v16023_v49  ;;  %6136 = vmatmul.mubr.bf16.gmra.mrb[44].mxu0 %v5769_v56  ;;  %v16042_v29 = vadd.f32 %v15859_v40, %v4473_v59  ;;  %v18927_v11 = vld [vmem:[#allocation18_spill] sm:$0xff] }
 0x4c7   : > { %v16030_v28 = vsel %vm1463_vm0, %v5330_v57, %v18917_v14  ;;  %v16036_v35 = vsel %vm1463_vm0, %v18919_v1, %v5330_v57  ;;  %v18923_v60 = vpack.c.bf16 %v18921_v62, %v18922_v12  ;;  %v10011_v14 = vpop.permute.xlu0 %10010  ;;  %v5010_v17 = vmul.f32 0.5, %v4944_v63 }
 0x4c8   : > { %18918 = vst [vmem:[#allocation30_spill] sm:$0xff] %v16030_v28  ;;  %18920 = vst [vmem:[#allocation26_spill] sm:$0xff] %v16036_v35  ;;  %v16049_v57 = vmul.f32 %v15862_v33, %v5009_v24  ;;  %v5197_v2 = vrot.slane %v15777_v9, 7  ;;  %10424 = vtanh.f32 %v4815_v37  ;;  %v4816_v56 = vmul.f32 0.7978846, %v4750_v53 }
 0x4c9   : > { %8550 = vmatprep.mubr.msk.bf16.mxu0 %vm2125_vm4, %v18923_v60  ;;  %v4619_v59 = vmul.f32 %v16023_v49, %v4553_v38  ;;  %v4554_v1 = vmul.f32 %v16042_v29, %v16042_v29  ;;  %v10013_v41 = vunpack.i.h.bf16 %v10011_v14  ;;  %v10012_v62 = vunpack.i.l.bf16 %v10011_v14  ;;  %v4478_v53 = vpop.f32.mrb[0].mxu1  ;;  %v18926_v38 = vld [vmem:[#allocation42_spill] sm:$0xff] }
 0x4ca   : > { %v16058_v12 = vmul.f32 %v15881_v46, %v5010_v17  ;;  %v10421_v63 = vpop.eup %10420  ;;  %10426 = vtanh.f32 %v4816_v56  ;;  %v18924_v9 = vrot.slane %v15735_v39, 7  ;;  %v16076_v39 = vadd.f32 %v15859_v40, %v4478_v53 }
 0x4cb   : > { %v4685_v24 = vmul.f32 0.044715, %v4619_v59  ;;  %v4620_v60 = vmul.f32 %v16042_v29, %v4554_v1  ;;  %v5705_v14 = vsel %vm2125_vm4, %v18926_v38, %v10012_v62  ;;  %v5706_v17 = vsel %vm2125_vm4, %v18927_v11, %v10013_v41 }
 0x4cc   : > { %v16066_v37 = vsel %vm1330_vm1, %v18924_v9, %v5197_v2  ;;  %v10084_v46 = vpack.i.bf16 %v16058_v12, %v16049_v57  ;;  %v4945_v56 = vadd.f32 1.0, %v10421_v63  ;;  %v10423_v59 = vpop.eup %10422  ;;  %v9007_v9 = vpop.f32.mrb[1].mxu1  ;;  %v18928_v11 = vrot.slane %v15790_v48, 7 }
 0x4cd   : > { %18925 = vst [vmem:[#allocation27_spill] sm:$0xff] %v16066_v37  ;;  %v4751_v1 = vadd.f32 %v16023_v49, %v4685_v24  ;;  %v4686_v33 = vmul.f32 0.044715, %v4620_v60  ;;  %v5771_v37 = vpack.c.bf16 %v5706_v17, %v5705_v14  ;;  %v4481_v35 = vpop.f32.mrb[2].mxu1  ;;  %v4946_v62 = vadd.f32 1.0, %v10423_v59 }
 0x4ce   : > { %10085 = vrot.lane.b32.xlu1 %v10084_v46, %s10618_s22  ;;  %v5011_v38 = vmul.f32 0.5, %v4945_v56  ;;  %v16083_v41 = vsel %vm1330_vm1, %v5197_v2, %v18928_v11  ;;  %v5332_v63 = vrot.slane %v15844_v43, 1  ;;  %v4555_v53 = vmul.f32 %v16076_v39, %v16076_v39  ;;  %v9008_v17 = vpop.f32.mrb[3].mxu1  ;;  %v18930_v46 = vld [vmem:[#allocation12_spill] sm:$0xff]  ;;  %v10016_v2 = vpop.permute.xlu1 %10015 }
 0x4cf   : > { %18929 = vst [vmem:[#allocation31_spill] sm:$0xff] %v16083_v41  ;;  %v4817_v24 = vmul.f32 0.7978846, %v4751_v1  ;;  %v4752_v60 = vadd.f32 %v16042_v29, %v4686_v33  ;;  %6144 = vmatmul.mubr.bf16.gmra.mrb[48].mxu0 %v5771_v37  ;;  %v16090_v14 = vadd.f32 %v15859_v40, %v4481_v35  ;;  %v18931_v56 = vld [vmem:[#allocation8_spill] sm:$0xff]  ;;  %v5012_v9 = vmul.f32 0.5, %v4946_v62  ;;  %v18936_v41 = vld [vmem:[#allocation10_spill] sm:$0xff] }
 0x4d0   : > { %v18932_v59 = vpack.c.bf16 %v18930_v46, %v18931_v56  ;;  %v16097_v11 = vmul.f32 %v15919_v5, %v5011_v38  ;;  %v5333_v33 = vrot.slane %v15891_v26, 1  ;;  %v18933_v1 = vrot.slane %v15826_v54, 1 }
 0x4d1   : > { %10428 = vtanh.f32 %v4817_v24  ;;  %v4818_v35 = vmul.f32 0.7978846, %v4752_v60  ;;  %v4621_v17 = vmul.f32 %v16076_v39, %v4555_v53  ;;  %v4556_v46 = vmul.f32 %v16090_v14, %v16090_v14  ;;  %v4486_v53 = vpop.f32.mrb[4].mxu1 }
 0x4d2   : > { %8551 = vmatprep.mubr.msk.bf16.mxu0 %vm2125_vm4, %v18932_v59  ;;  %v16104_v37 = vsel %vm1463_vm0, %v18933_v1, %v5332_v63  ;;  %v10018_v56 = vunpack.i.h.bf16 %v10016_v2  ;;  %v10017_v62 = vunpack.i.l.bf16 %v10016_v2  ;;  %v16110_v5 = vmul.f32 %v15933_v31, %v5012_v9  ;;  %v10425_v59 = vpop.eup %10424  ;;  %v18937_v2 = vld [vmem:[#allocation22_spill] sm:$0xff]  ;;  %v9011_v61 = vpop.f32.mrb[5].mxu1 }
 0x4d3   : > { %18934 = vst [vmem:[#allocation33_spill] sm:$0xff] %v16104_v37  ;;  %v16114_v38 = vsel %vm1463_vm0, %v5332_v63, %v5333_v33  ;;  %10430 = vtanh.f32 %v4818_v35  ;;  %v4687_v1 = vmul.f32 0.044715, %v4621_v17  ;;  %v4622_v24 = vmul.f32 %v16090_v14, %v4556_v46  ;;  %v4489_v37 = vpop.f32.mrb[6].mxu1 }
 0x4d4   : > { %18935 = vst [vmem:[#allocation32_spill] sm:$0xff] %v16114_v38  ;;  %v5707_v28 = vsel %vm2125_vm4, %v18936_v41, %v10017_v62  ;;  %v5708_v31 = vsel %vm2125_vm4, %v18937_v2, %v10018_v56  ;;  %v10089_v9 = vpack.i.bf16 %v16110_v5, %v16097_v11  ;;  %v4947_v63 = vadd.f32 1.0, %v10425_v59  ;;  %v10427_v3 = vpop.eup %10426 }
 0x4d5   : > { %v4753_v35 = vadd.f32 %v16076_v39, %v4687_v1  ;;  %v4688_v17 = vmul.f32 0.044715, %v4622_v24  ;;  %v16127_v46 = vadd.f32 %v15859_v40, %v4486_v53  ;;  %v5773_v60 = vpack.c.bf16 %v5708_v31, %v5707_v28  ;;  %v9012_v40 = vpop.f32.mrb[7].mxu1 }
 0x4d6   : > { %10090 = vrot.lane.b32.xlu0 %v10089_v9, %s10618_s22  ;;  %v4948_v41 = vadd.f32 1.0, %v10427_v3  ;;  %v5013_v62 = vmul.f32 0.5, %v4947_v63  ;;  %v5199_v56 = vrot.slane %v15826_v54, 7  ;;  %v5200_v2 = vrot.slane %v15844_v43, 7  ;;  %v10021_v3 = vpop.permute.xlu0 %10020 }
 0x4d7   : > { %v4819_v38 = vmul.f32 0.7978846, %v4753_v35  ;;  %v4754_v59 = vadd.f32 %v16090_v14, %v4688_v17  ;;  %v4557_v1 = vmul.f32 %v16127_v46, %v16127_v46  ;;  %6152 = vmatmul.mubr.bf16.gmra.mrb[52].mxu0 %v5773_v60  ;;  %v5334_v61 = vrot.slane %v15900_v18, 1  ;;  %v18940_v17 = vld [vmem:[#allocation11_spill] sm:$0xff] }
 0x4d8   : > { %v18938_v28 = vpack.c.bf16 %v15410_v19, %v15364_v20  ;;  %v5014_v37 = vmul.f32 0.5, %v4948_v41  ;;  %v16141_v54 = vmul.f32 %v15972_v6, %v5013_v62  ;;  %v16145_v43 = vsel %vm1330_vm1, %v5199_v56, %v5200_v2  ;;  %v10170_v6 = vld [vmem:[%s18344_s7 + $0x70] sm:$0xff]  }
 0x4d9   : > { %v18939_v24 = vrot.slane %v15790_v48, 7  ;;  %10432 = vtanh.f32 %v4819_v38  ;;  %v4820_v53 = vmul.f32 0.7978846, %v4754_v59  ;;  %v4623_v19 = vmul.f32 %v16127_v46, %v4557_v1  ;;  %7563 = vmatpush1.bf16.msra.mxu0 %v10170_v6 }
 0x4da   : > { %8552 = vmatprep.mubr.msk.bf16.mxu0 %vm2125_vm4, %v18938_v28  ;;  %v10023_v20 = vunpack.i.h.bf16 %v10021_v3  ;;  %v10022_v31 = vunpack.i.l.bf16 %v10021_v3  ;;  %v16158_v9 = vmul.f32 %v15981_v7, %v5014_v37  ;;  %v5335_v63 = vrot.slane %v15940_v16, 1  ;;  %7564 = vmatprep.subr.bf16.mxu0 %v18847_v13 }
 0x4db   : > { %v16151_v60 = vsel %vm1330_vm1, %v18939_v24, %v5199_v56  ;;  %v16163_v48 = vsel %vm1463_vm0, %v5333_v33, %v5334_v61  ;;  %v10429_v35 = vpop.eup %10428  ;;  %10434 = vtanh.f32 %v4820_v53  ;;  %v4689_v38 = vmul.f32 0.044715, %v4623_v19  ;;  %v18941_v56 = vld [vmem:[#allocation14_spill] sm:$0xff] }
 0x4dc   : > { %v5710_v41 = vsel %vm2125_vm4, %v18940_v17, %v10023_v20  ;;  %v5201_v62 = vrot.slane %v15891_v26, 7  ;;  %v5709_v59 = vsel %vm2125_vm4, %v18941_v56, %v10022_v31  ;;  %v10094_v7 = vpack.i.bf16 %v16158_v9, %v16141_v54 }
 0x4dd   : > { %v4949_v1 = vadd.f32 1.0, %v10429_v35  ;;  %v16174_v33 = vsel %vm1463_vm0, %v5334_v61, %v5335_v63  ;;  %v10431_v40 = vpop.eup %10430  ;;  %v4755_v28 = vadd.f32 %v16127_v46, %v4689_v38  ;;  %v5775_v3 = vpack.c.bf16 %v5710_v41, %v5709_v59  ;;  %v10026_v35 = vpop.permute.xlu1 %10025 }
 0x4de   : > { %v5796_v26 = vpack.c.bf16 %v16174_v33, %v16163_v48  ;;  %v5202_v37 = vrot.slane %v15900_v18, 7  ;;  %10095 = vrot.lane.b32.xlu1 %v10094_v7, %s10618_s22  ;;  %v4950_v24 = vadd.f32 1.0, %v10431_v40  ;;  %v16184_v19 = vsel %vm1330_vm1, %v5200_v2, %v5201_v62 }
 0x4df   : > { %v5015_v53 = vmul.f32 0.5, %v4949_v1  ;;  %v5336_v61 = vrot.slane %v15953_v44, 1  ;;  %v4821_v13 = vmul.f32 0.7978846, %v4755_v28  ;;  %6160 = vmatmul.mubr.bf16.gmra.mrb[56].mxu0 %v5775_v3  ;;  %v5337_v6 = vrot.slane %v15991_v42, 1 }
 0x4e0   : > { %v16189_v20 = vsel %vm1330_vm1, %v5201_v62, %v5202_v37  ;;  %v5203_v18 = vrot.slane %v15940_v16, 7  ;;  %v18942_v31 = vpack.c.bf16 %v15464_v0, %v15433_v32  ;;  %v5016_v2 = vmul.f32 0.5, %v4950_v24 }
 0x4e1   : > { %v16198_v38 = vmul.f32 %v16023_v49, %v5015_v53  ;;  %v16202_v17 = vsel %vm1463_vm0, %v5335_v63, %v5336_v61  ;;  %v5204_v41 = vrot.slane %v15953_v44, 7  ;;  %10436 = vtanh.f32 %v4821_v13 }
 0x4e2   : > { %8553 = vmatprep.mubr.msk.bf16.mxu0 %vm2125_vm4, %v18942_v31  ;;  %v10028_v62 = vunpack.i.h.bf16 %v10026_v35  ;;  %v10027_v56 = vunpack.i.l.bf16 %v10026_v35  ;;  %v16207_v16 = vsel %vm1463_vm0, %v5336_v61, %v5337_v6  ;;  %v16210_v32 = vmul.f32 %v16042_v29, %v5016_v2 }
 0x4e3   : > { %v5798_v0 = vpack.c.bf16 %v16207_v16, %v16202_v17  ;;  %v16216_v49 = vsel %vm1330_vm1, %v5203_v18, %v5204_v41  ;;  %v16220_v44 = vsel %vm1330_vm1, %v5202_v37, %v5203_v18  ;;  %v10433_v63 = vpop.eup %10432  ;;  %v5338_v29 = vrot.slane %v16009_v27, 1 }
 0x4e4   : > { %v5711_v59 = vsel %vm2125_vm4, %v15498_v47, %v10027_v56  ;;  %v5712_v7 = vsel %vm2125_vm4, %v15472_v58, %v10028_v62  ;;  %v5339_v1 = vrot.slane %v16049_v57, 1  ;;  %v10099_v28 = vpack.i.bf16 %v16210_v32, %v16198_v38 }
 0x4e5   : > { %v5777_v40 = vpack.c.bf16 %v5712_v7, %v5711_v59  ;;  %v4951_v3 = vadd.f32 1.0, %v10433_v63  ;;  %v5205_v24 = vrot.slane %v15991_v42, 7  ;;  %v10435_v37 = vpop.eup %10434  ;;  %v16237_v47 = vsel %vm1463_vm0, %v5337_v6, %v5338_v29 }
 0x4e6   : > { %v16233_v53 = vsel %vm1463_vm0, %v5338_v29, %v5339_v1  ;;  %v5206_v58 = vrot.slane %v16009_v27, 7  ;;  %v5340_v61 = vrot.slane %v16058_v12, 1  ;;  %10100 = vrot.lane.b32.xlu0 %v10099_v28, %s10618_s22  ;;  %v4952_v13 = vadd.f32 1.0, %v10435_v37 }
 0x4e7   : > { %v5017_v18 = vmul.f32 0.5, %v4951_v3  ;;  %v5800_v42 = vpack.c.bf16 %v16233_v53, %v16237_v47  ;;  %v16246_v31 = vsel %vm1330_vm1, %v5204_v41, %v5205_v24  ;;  %6168 = vmatmul.mubr.bf16.gmra.mrb[60].mxu0 %v5777_v40  ;;  %v5341_v27 = vrot.slane %v16097_v11, 1  ;;  %v10031_v41 = vpop.permute.xlu0 %10030 }
 0x4e8   : > { %v16250_v6 = vsel %vm1330_vm1, %v5205_v24, %v5206_v58  ;;  %v16255_v35 = vsel %vm1463_vm0, %v5339_v1, %v5340_v61  ;;  %v5207_v2 = vrot.slane %v16049_v57, 7  ;;  %v18943_v62 = vpack.c.bf16 %v15529_v4, %v15535_v52  ;;  %v10171_v52 = vld [vmem:[%s18344_s7 + $0x78] sm:$0xff]  }
 0x4e9   : > { %v5018_v56 = vmul.f32 0.5, %v4952_v13  ;;  %v16263_v63 = vmul.f32 %v16076_v39, %v5017_v18  ;;  %v5208_v59 = vrot.slane %v16058_v12, 7  ;;  %v5342_v7 = vrot.slane %v16110_v5, 1  ;;  %7565 = vmatpush1.bf16.msra.mxu0 %v10171_v52 }
 0x4ea   : > { %8554 = vmatprep.mubr.msk.bf16.mxu0 %vm2125_vm4, %v18943_v62  ;;  %v10033_v29 = vunpack.i.h.bf16 %v10031_v41  ;;  %v10032_v40 = vunpack.i.l.bf16 %v10031_v41  ;;  %v16269_v1 = vsel %vm1463_vm0, %v5340_v61, %v5341_v27  ;;  %v16273_v4 = vsel %vm1330_vm1, %v5206_v58, %v5207_v2 }
 0x4eb   : > { %v16279_v57 = vmul.f32 %v16090_v14, %v5018_v56  ;;  %v5802_v12 = vpack.c.bf16 %v16269_v1, %v16255_v35  ;;  %v16285_v39 = vsel %vm1330_vm1, %v5207_v2, %v5208_v59  ;;  %v5343_v28 = vrot.slane %v16141_v54, 1  ;;  %v10437_v3 = vpop.eup %10436 }
 0x4ec   : > { %v5713_v24 = vsel %vm2125_vm4, %v15569_v50, %v10032_v40  ;;  %v5714_v37 = vsel %vm2125_vm4, %v15590_v25, %v10033_v29  ;;  %v16294_v14 = vsel %vm1463_vm0, %v5341_v27, %v5342_v7  ;;  %v5209_v58 = vrot.slane %v16097_v11, 7 }
 0x4ed   : > { %v4953_v61 = vadd.f32 1.0, %v10437_v3  ;;  %v5779_v13 = vpack.c.bf16 %v5714_v37, %v5713_v24  ;;  %v10104_v18 = vpack.i.bf16 %v16279_v57, %v16263_v63  ;;  %v16301_v2 = vsel %vm1463_vm0, %v5342_v7, %v5343_v28 }
 0x4ee   : > { %v18944_v50 = vmov 0.0   ;;  %v5804_v25 = vpack.c.bf16 %v16301_v2, %v16294_v14  ;;  %v5210_v27 = vrot.slane %v16110_v5, 7  ;;  %v16309_v11 = vsel %vm1330_vm1, %v5208_v59, %v5209_v58 }
 0x4ef   : > { %9013 = vmatprep.subr.bf16.mxu0 %v18944_v50  ;;  %v5344_v62 = vrot.slane %v16158_v9, 1  ;;  %v5019_v41 = vmul.f32 0.5, %v4953_v61  ;;  %10105 = vrot.lane.b32.xlu1 %v10104_v18, %s10618_s22  ;;  %v5345_v56 = vrot.slane %v16198_v38, 1  ;;  %v5211_v7 = vrot.slane %v16141_v54, 7 }
 0x4f0   : > { %v5212_v29 = vrot.slane %v16158_v9, 7  ;;  %6176 = vmatmul.mubr.bf16.gmra.mrb[64].mxu0 %v5779_v13  ;;  %v16318_v40 = vsel %vm1330_vm1, %v5209_v58, %v5210_v27  ;;  %v5346_v59 = vrot.slane %v16210_v32, 1  ;;  %v5347_v52 = vrot.slane %v16263_v63, 1  ;;  %v10036_v9 = vpop.permute.xlu1 %10035 }
 0x4f1   : > { %v16322_v5 = vsel %vm1463_vm0, %v5343_v28, %v5344_v62  ;;  %v16327_v3 = vmul.f32 %v16127_v46, %v5019_v41  ;;  %v18945_v54 = vpack.c.bf16 %v15627_v21, %v15614_v22  ;;  %v16335_v24 = vsel %vm1463_vm0, %v5344_v62, %v5345_v56  ;;  %v18946_v22 = vld [vmem:[#allocation6_spill] sm:$0xff] }
 0x4f2   : > { %v16339_v28 = vsel %vm1330_vm1, %v5211_v7, %v5212_v29  ;;  %v16343_v37 = vsel %vm1330_vm1, %v5210_v27, %v5211_v7  ;;  %v10038_v46 = vunpack.i.h.bf16 %v10036_v9  ;;  %v10037_v58 = vunpack.i.l.bf16 %v10036_v9 }
 0x4f3   : > { %8555 = vmatprep.mubr.msk.bf16.mxu0 %vm2125_vm4, %v18945_v54  ;;  %v16349_v21 = vsel %vm1463_vm0, %v5346_v59, %v5347_v52  ;;  %v10109_v61 = vpack.i.bf16 %v18944_v50, %v16327_v3  ;;  %v5349_v13 = vrot.slane %v16327_v3, 1  ;;  %v16356_v18 = vsel %vm1463_vm0, %v5345_v56, %v5346_v59 }
 0x4f4   : > { %v5213_v27 = vrot.slane %v16198_v38, 7  ;;  %v5715_v62 = vsel %vm2125_vm4, %v15672_v34, %v10037_v58  ;;  %v5716_v41 = vsel %vm2125_vm4, %v15666_v51, %v10038_v46  ;;  %v5808_v7 = vpack.c.bf16 %v16349_v21, %v16356_v18 }
 0x4f5   : > { %v5214_v54 = vrot.slane %v16210_v32, 7  ;;  %10110 = vrot.lane.b32.xlu0 %v10109_v61, %s10618_s22  ;;  %v5781_v9 = vpack.c.bf16 %v5716_v41, %v5715_v62  ;;  %v5351_v56 = vsel %vm1463_vm0, %v5349_v13, %v18946_v22  ;;  %v5348_v34 = vrot.slane %v16279_v57, 1 }
 0x4f6   : > { %v16372_v38 = vsel %vm1330_vm1, %v5212_v29, %v5213_v27  ;;  %v5812_v51 = vpack.c.bf16 %v18946_v22, %v5351_v56  ;;  %v5216_v32 = vrot.slane %v16279_v57, 7  ;;  %v5217_v46 = vrot.slane %v16327_v3, 7 }
 0x4f7   : > { %v16378_v59 = vsel %vm1330_vm1, %v5213_v27, %v5214_v54  ;;  %v16384_v58 = vsel %vm1463_vm0, %v5348_v34, %v5349_v13  ;;  %v16388_v29 = vsel %vm1463_vm0, %v5347_v52, %v5348_v34  ;;  %v5215_v61 = vrot.slane %v16263_v63, 7  ;;  %v10041_v52 = vpop.permute.xlu0 %10040 }
 0x4f8   : > { %6184 = vmatmul.mubr.bf16.gmra.mrb[68].mxu0 %v5781_v9  ;;  %8570 = vmatprep.mubr.msk.bf16.mxu1 %vm2125_vm4, %v5812_v51  ;;  %v5810_v27 = vpack.c.bf16 %v16384_v58, %v16388_v29  ;;  %v16398_v57 = vsel %vm1330_vm1, %v5216_v32, %v5217_v46  ;;  %v18947_v13 = vpack.c.bf16 %v15706_v36, %v15712_v10  ;;  %v10043_v41 = vunpack.i.h.bf16 %v10041_v52 }
 0x4f9   : > { %v16406_v63 = vsel %vm1330_vm1, %v5215_v61, %v5216_v32  ;;  %v16410_v62 = vsel %vm1330_vm1, %v5214_v54, %v5215_v61  ;;  %v10042_v9 = vunpack.i.l.bf16 %v10041_v52  ;;  %v18948_v10 = vpack.c.bf16 %v15796_v45, %v15784_v30  ;;  %v18949_v61 = vld [vmem:[#allocation23_spill] sm:$0xff] }
 0x4fa   : > { %8556 = vmatprep.mubr.msk.bf16.mxu0 %vm2125_vm4, %v18947_v13  ;;  %v5718_v34 = vsel %vm2125_vm4, %v15760_v55, %v10043_v41  ;;  %v18951_v55 = vld [vmem:[#allocation25_spill] sm:$0xff] }
 0x4fb   : > { %v5717_v56 = vsel %vm2125_vm4, %v15743_v23, %v10042_v9  ;;  %v18950_v9 = vld [vmem:[#allocation24_spill] sm:$0xff] }
 0x4fc   : > { %v5783_v36 = vpack.c.bf16 %v5718_v34, %v5717_v56  ;;  %v18952_v41 = vpack.c.bf16 %v18950_v9, %v18951_v55  ;;  %v18953_v34 = vld [vmem:[#allocation29_spill] sm:$0xff]  ;;  %v18958_v9 = vld [vmem:[#allocation16_spill] sm:$0xff] }
 0x4fe   : > { %v10046_v51 = vpop.permute.xlu1 %10045 }
 0x4ff   : > { %v10048_v32 = vunpack.i.h.bf16 %v10046_v51  ;;  %v10047_v13 = vunpack.i.l.bf16 %v10046_v51 }
 0x500   : > { %6192 = vmatmul.mubr.bf16.gmra.mrb[72].mxu0 %v5783_v36 }
 0x501   : > { %8557 = vmatprep.mubr.msk.bf16.mxu0 %vm2125_vm4, %v18948_v10  ;;  %v5719_v54 = vsel %vm2125_vm4, %v15838_v15, %v10047_v13  ;;  %v5720_v52 = vsel %vm2125_vm4, %v18949_v61, %v10048_v32  ;;  %v18954_v10 = vld [vmem:[#allocation28_spill] sm:$0xff]  ;;  %v18955_v13 = vld [vmem:[#allocation15_spill] sm:$0xff]  ;;  %v18956_v32 = vld [vmem:[#allocation17_spill] sm:$0xff] }
 0x502   : > { %v5785_v23 = vpack.c.bf16 %v5720_v52, %v5719_v54  ;;  %v18957_v54 = vpack.c.bf16 %v18955_v13, %v18956_v32  ;;  %v18963_v13 = vld [vmem:[#allocation27_spill] sm:$0xff] }
 0x506   : > { %v10051_v56 = vpop.permute.xlu0 %10050 }
 0x507   : > { %v10053_v30 = vunpack.i.h.bf16 %v10051_v56  ;;  %v10052_v45 = vunpack.i.l.bf16 %v10051_v56 }
 0x508   : > { %6200 = vmatmul.mubr.bf16.gmra.mrb[76].mxu0 %v5785_v23 }
 0x509   : > { %8558 = vmatprep.mubr.msk.bf16.mxu0 %vm2125_vm4, %v18952_v41  ;;  %v5721_v36 = vsel %vm2125_vm4, %v18953_v34, %v10052_v45  ;;  %v5722_v51 = vsel %vm2125_vm4, %v18954_v10, %v10053_v30  ;;  %v18959_v41 = vld [vmem:[#allocation19_spill] sm:$0xff]  ;;  %v18960_v34 = vld [vmem:[#allocation30_spill] sm:$0xff] }
 0x50a   : > { %v5787_v15 = vpack.c.bf16 %v5722_v51, %v5721_v36  ;;  %v18961_v30 = vld [vmem:[#allocation26_spill] sm:$0xff] }
 0x50b   : > { %v18962_v36 = vpack.c.bf16 %v18960_v34, %v18961_v30 }
 0x50e   : > { %v10056_v61 = vpop.permute.xlu1 %10055 }
 0x50f   : > { %v10058_v52 = vunpack.i.h.bf16 %v10056_v61  ;;  %v10057_v23 = vunpack.i.l.bf16 %v10056_v61 }
 0x510   : > { %6208 = vmatmul.mubr.bf16.gmra.mrb[80].mxu0 %v5787_v15 }
 0x511   : > { %8559 = vmatprep.mubr.msk.bf16.mxu0 %vm2125_vm4, %v18957_v54  ;;  %v5723_v55 = vsel %vm2125_vm4, %v18958_v9, %v10057_v23  ;;  %v5724_v56 = vsel %vm2125_vm4, %v18959_v41, %v10058_v52  ;;  %v18964_v54 = vld [vmem:[#allocation31_spill] sm:$0xff]  ;;  %v18965_v9 = vld [vmem:[#allocation32_spill] sm:$0xff]  ;;  %v18966_v52 = vld [vmem:[#allocation33_spill] sm:$0xff] }
 0x512   : > { %v5789_v45 = vpack.c.bf16 %v5724_v56, %v5723_v55  ;;  %v18967_v55 = vpack.c.bf16 %v18965_v9, %v18966_v52 }
 0x516   : > { %v10061_v10 = vpop.permute.xlu0 %10060 }
 0x517   : > { %v10063_v51 = vunpack.i.h.bf16 %v10061_v10  ;;  %v10062_v15 = vunpack.i.l.bf16 %v10061_v10 }
 0x518   : > { %6216 = vmatmul.mubr.bf16.gmra.mrb[84].mxu0 %v5789_v45 }
 0x519   : > { %8560 = vmatprep.mubr.msk.bf16.mxu0 %vm2125_vm4, %v18962_v36  ;;  %v5725_v32 = vsel %vm2125_vm4, %v18963_v13, %v10062_v15  ;;  %v5726_v61 = vsel %vm2125_vm4, %v18964_v54, %v10063_v51 }
 0x51a   : > { %v5791_v23 = vpack.c.bf16 %v5726_v61, %v5725_v32 }
 0x51f   : > { %v10066_v41 = vpop.permute.xlu1 %10065 }
 0x520   : > { %6224 = vmatmul.mubr.bf16.gmra.mrb[88].mxu0 %v5791_v23  ;;  %v10068_v56 = vunpack.i.h.bf16 %v10066_v41  ;;  %v10067_v45 = vunpack.i.l.bf16 %v10066_v41  ;;  %v16487_v23 = vld [vmem:[%s18347_s10] ss:$0 sm:$0xff] }
 0x521   : > { %8561 = vmatprep.mubr.msk.bf16.mxu0 %vm2125_vm4, %v18967_v55 }
 0x522   : > { %v5727_v34 = vsel %vm2125_vm4, %v16151_v60, %v10067_v45  ;;  %v5728_v30 = vsel %vm2125_vm4, %v16145_v43, %v10068_v56 }
 0x523   : > { %v5793_v36 = vpack.c.bf16 %v5728_v30, %v5727_v34 }
 0x527   : > { %v10071_v10 = vpop.permute.xlu0 %10070 }
 0x528   : > { %6232 = vmatmul.mubr.bf16.gmra.mrb[92].mxu0 %v5793_v36  ;;  %v10073_v51 = vunpack.i.h.bf16 %v10071_v10  ;;  %v10072_v15 = vunpack.i.l.bf16 %v10071_v10 }
 0x529   : > { %8562 = vmatprep.mubr.msk.bf16.mxu0 %vm2125_vm4, %v5796_v26 }
 0x52a   : > { %v5729_v13 = vsel %vm2125_vm4, %v16184_v19, %v10072_v15  ;;  %v5730_v32 = vsel %vm2125_vm4, %v16189_v20, %v10073_v51 }
 0x52b   : > { %v5795_v60 = vpack.c.bf16 %v5730_v32, %v5729_v13 }
 0x52f   : > { %v10076_v43 = vpop.permute.xlu1 %10075 }
 0x530   : > { %6240 = vmatmul.mubr.bf16.gmra.mrb[96].mxu0 %v5795_v60  ;;  %v10078_v48 = vunpack.i.h.bf16 %v10076_v43  ;;  %v10077_v33 = vunpack.i.l.bf16 %v10076_v43 }
 0x531   : > { %8563 = vmatprep.mubr.msk.bf16.mxu0 %vm2125_vm4, %v5798_v0 }
 0x532   : > { %v5731_v26 = vsel %vm2125_vm4, %v16220_v44, %v10077_v33  ;;  %v5732_v54 = vsel %vm2125_vm4, %v16216_v49, %v10078_v48 }
 0x533   : > { %v5797_v19 = vpack.c.bf16 %v5732_v54, %v5731_v26 }
 0x537   : > { %v10081_v20 = vpop.permute.xlu0 %10080 }
 0x538   : > { %6248 = vmatmul.mubr.bf16.gmra.mrb[100].mxu0 %v5797_v19  ;;  %v10083_v17 = vunpack.i.h.bf16 %v10081_v20  ;;  %v10082_v16 = vunpack.i.l.bf16 %v10081_v20 }
 0x539   : > { %8564 = vmatprep.mubr.msk.bf16.mxu0 %vm2125_vm4, %v5800_v42 }
 0x53a   : > { %v5733_v0 = vsel %vm2125_vm4, %v16246_v31, %v10082_v16  ;;  %v5734_v61 = vsel %vm2125_vm4, %v16250_v6, %v10083_v17 }
 0x53b   : > { %v5799_v44 = vpack.c.bf16 %v5734_v61, %v5733_v0 }
 0x53f   : > { %v6049_v42 = vpop.f32.mrb[0].mxu0 }
 0x540   : > { %6256 = vmatmul.mubr.bf16.gmra.mrb[104].mxu0 %v5799_v44  ;;  %v10086_v49 = vpop.permute.xlu1 %10085  ;;  %v6051_v31 = vpop.f32.mrb[1].mxu0 }
 0x541   : > { %8565 = vmatprep.mubr.msk.bf16.mxu0 %vm2125_vm4, %v5802_v12  ;;  %v10088_v53 = vunpack.i.h.bf16 %v10086_v49  ;;  %v10087_v47 = vunpack.i.l.bf16 %v10086_v49  ;;  %v6052_v52 = vpop.f32.mrb[2].mxu0 }
 0x542   : > { %v16494_v1 = vadd.f32 %v16487_v23, %v6052_v52  ;;  %v6054_v12 = vpop.f32.mrb[3].mxu0 }
 0x543   : > { %v5735_v6 = vsel %vm2125_vm4, %v16273_v4, %v10087_v47  ;;  %v5736_v9 = vsel %vm2125_vm4, %v16285_v39, %v10088_v53 }
 0x544   : > { %v5801_v35 = vpack.c.bf16 %v5736_v9, %v5735_v6  ;;  %v6313_v55 = vmul.f32 %v16494_v1, %v16494_v1 }
 0x546   : > { %v6379_v4 = vmul.f32 %v6313_v55, %v16494_v1 }
 0x547   : > { %v6057_v45 = vpop.f32.mrb[4].mxu0 }
 0x548   : > { %6264 = vmatmul.mubr.bf16.gmra.mrb[108].mxu0 %v5801_v35  ;;  %v10091_v41 = vpop.permute.xlu0 %10090  ;;  %v6445_v34 = vmul.f32 0.044715, %v6379_v4  ;;  %v16504_v30 = vadd.f32 %v16487_v23, %v6057_v45  ;;  %v6059_v36 = vpop.f32.mrb[5].mxu0 }
 0x549   : > { %8566 = vmatprep.mubr.msk.bf16.mxu0 %vm2125_vm4, %v5804_v25  ;;  %v10093_v56 = vunpack.i.h.bf16 %v10091_v41  ;;  %v10092_v39 = vunpack.i.l.bf16 %v10091_v41  ;;  %v6060_v14 = vpop.f32.mrb[6].mxu0 }
 0x54a   : > { %v6511_v25 = vadd.f32 %v6445_v34, %v16494_v1  ;;  %v6314_v15 = vmul.f32 %v16504_v30, %v16504_v30  ;;  %v16514_v13 = vadd.f32 %v16487_v23, %v6060_v14  ;;  %v6062_v32 = vpop.f32.mrb[7].mxu0 }
 0x54b   : > { %v5737_v10 = vsel %vm2125_vm4, %v16309_v11, %v10092_v39  ;;  %v5738_v51 = vsel %vm2125_vm4, %v16318_v40, %v10093_v56  ;;  %v18968_v40 = vpack.c.bf16 %v16335_v24, %v16322_v5 }
 0x54c   : > { %v5803_v2 = vpack.c.bf16 %v5738_v51, %v5737_v10  ;;  %v6380_v60 = vmul.f32 %v6314_v15, %v16504_v30  ;;  %v6315_v43 = vmul.f32 %v16514_v13, %v16514_v13  ;;  %v6577_v11 = vmul.f32 0.7978846, %v6511_v25 }
 0x54e   : > { %v6446_v33 = vmul.f32 0.044715, %v6380_v60  ;;  %v6381_v26 = vmul.f32 %v6315_v43, %v16514_v13  ;;  %10438 = vtanh.f32 %v6577_v11 }
 0x550   : > { %6272 = vmatmul.mubr.bf16.gmra.mrb[112].mxu0 %v5803_v2  ;;  %v10096_v48 = vpop.permute.xlu1 %10095  ;;  %v6065_v20 = vpop.f32.mrb[8].mxu0  ;;  %v6512_v17 = vadd.f32 %v6446_v33, %v16504_v30  ;;  %v6447_v16 = vmul.f32 0.044715, %v6381_v26 }
 0x551   : > { %8567 = vmatprep.mubr.msk.bf16.mxu0 %vm2125_vm4, %v18968_v40  ;;  %v10098_v54 = vunpack.i.h.bf16 %v10096_v48  ;;  %v10097_v19 = vunpack.i.l.bf16 %v10096_v48  ;;  %v16526_v0 = vadd.f32 %v16487_v23, %v6065_v20  ;;  %v6067_v61 = vpop.f32.mrb[9].mxu0  ;;  %v18969_v20 = vld [vmem:[#allocation38_spill] sm:$0xff] }
 0x552   : > { %v6068_v24 = vpop.f32.mrb[10].mxu0  ;;  %v6578_v49 = vmul.f32 0.7978846, %v6512_v17  ;;  %v6513_v53 = vadd.f32 %v6447_v16, %v16514_v13  ;;  %v5219_v17 = vsel %vm1330_vm1, %v5217_v46, %v18969_v20 }
 0x553   : > { %v5739_v5 = vsel %vm2125_vm4, %v16343_v37, %v10097_v19  ;;  %v5740_v44 = vsel %vm2125_vm4, %v16339_v28, %v10098_v54  ;;  %v6316_v47 = vmul.f32 %v16526_v0, %v16526_v0  ;;  %v16536_v42 = vadd.f32 %v16487_v23, %v6068_v24  ;;  %v6070_v31 = vpop.f32.mrb[11].mxu0 }
 0x554   : > { %v5805_v6 = vpack.c.bf16 %v5740_v44, %v5739_v5  ;;  %10440 = vtanh.f32 %v6578_v49  ;;  %v6579_v9 = vmul.f32 0.7978846, %v6513_v53 }
 0x555   : > { %v6382_v52 = vmul.f32 %v6316_v47, %v16526_v0  ;;  %v6317_v37 = vmul.f32 %v16536_v42, %v16536_v42 }
 0x556   : > { %10442 = vtanh.f32 %v6579_v9 }
 0x557   : > { %v6448_v35 = vmul.f32 0.044715, %v6382_v52  ;;  %v6383_v12 = vmul.f32 %v6317_v37, %v16536_v42 }
 0x558   : > { %6280 = vmatmul.mubr.bf16.gmra.mrb[116].mxu0 %v5805_v6  ;;  %v10101_v28 = vpop.permute.xlu0 %10100  ;;  %v6073_v4 = vpop.f32.mrb[12].mxu0 }
 0x559   : > { %8568 = vmatprep.mubr.msk.bf16.mxu0 %vm2125_vm4, %v5808_v7  ;;  %v10103_v55 = vunpack.i.h.bf16 %v10101_v28  ;;  %v10102_v41 = vunpack.i.l.bf16 %v10101_v28  ;;  %v6514_v56 = vadd.f32 %v6448_v35, %v16526_v0  ;;  %v6449_v39 = vmul.f32 0.044715, %v6383_v12  ;;  %v6075_v34 = vpop.f32.mrb[13].mxu0  ;;  %v10439_v10 = vpop.eup %10438 }
 0x55a   : > { %v16548_v45 = vadd.f32 %v16487_v23, %v6073_v4  ;;  %v6076_v51 = vpop.f32.mrb[14].mxu0  ;;  %v6709_v32 = vadd.f32 1.0, %v10439_v10 }
 0x55b   : > { %v5742_v36 = vsel %vm2125_vm4, %v16378_v59, %v10103_v55  ;;  %v5741_v21 = vsel %vm2125_vm4, %v16372_v38, %v10102_v41  ;;  %v6580_v18 = vmul.f32 0.7978846, %v6514_v56  ;;  %v6515_v7 = vadd.f32 %v6449_v39, %v16536_v42  ;;  %v6078_v25 = vpop.f32.mrb[15].mxu0 }
 0x55c   : > { %v6318_v14 = vmul.f32 %v16548_v45, %v16548_v45  ;;  %v16558_v2 = vadd.f32 %v16487_v23, %v6076_v51  ;;  %v5807_v15 = vpack.c.bf16 %v5742_v36, %v5741_v21  ;;  %v6775_v11 = vmul.f32 0.5, %v6709_v32 }
 0x55d   : > { %10444 = vtanh.f32 %v6580_v18  ;;  %v6581_v60 = vmul.f32 0.7978846, %v6515_v7 }
 0x55e   : > { %v6384_v59 = vmul.f32 %v6318_v14, %v16548_v45  ;;  %v6319_v43 = vmul.f32 %v16558_v2, %v16558_v2  ;;  %v10441_v40 = vpop.eup %10440  ;;  %v16574_v16 = vmul.f32 %v6775_v11, %v16494_v1 }
 0x55f   : > { %10446 = vtanh.f32 %v6581_v60  ;;  %v6710_v61 = vadd.f32 1.0, %v10441_v40 }
 0x560   : > { %6288 = vmatmul.mubr.bf16.gmra.mrb[120].mxu0 %v5807_v15  ;;  %v6450_v48 = vmul.f32 0.044715, %v6384_v59  ;;  %v6385_v33 = vmul.f32 %v6319_v43, %v16558_v2  ;;  %v6081_v19 = vpop.f32.mrb[16].mxu0  ;;  %v10443_v5 = vpop.eup %10442  ;;  %v6973_v46 = vrot.slane %v16574_v16, 7  ;;  %v7105_v1 = vrot.slane %v16574_v16, 1 }
 0x561   : > { %v10106_v38 = vpop.permute.xlu1 %10105  ;;  %8569 = vmatprep.mubr.msk.bf16.mxu0 %vm2125_vm4, %v5810_v27  ;;  %v16578_v58 = vadd.f32 %v16487_v23, %v6081_v19  ;;  %v6083_v29 = vpop.f32.mrb[17].mxu0  ;;  %v7237_v53 = vpack.c.bf16 %v16574_v16, %v18944_v50  ;;  %v6711_v28 = vadd.f32 1.0, %v10443_v5  ;;  %v6776_v35 = vmul.f32 0.5, %v6710_v61  ;;  %v10172_v61 = vld [vmem:[%s18344_s7 + $0x80] sm:$0xff]  }
 0x562   : > { %v10108_v26 = vunpack.i.h.bf16 %v10106_v38  ;;  %v10107_v54 = vunpack.i.l.bf16 %v10106_v38  ;;  %v6516_v24 = vadd.f32 %v6450_v48, %v16548_v45  ;;  %v6451_v44 = vmul.f32 0.044715, %v6385_v33  ;;  %v6084_v49 = vpop.f32.mrb[18].mxu0 }
 0x563   : > { %v6320_v6 = vmul.f32 %v16578_v58, %v16578_v58  ;;  %v16592_v9 = vadd.f32 %v16487_v23, %v6084_v49  ;;  %v6777_v34 = vmul.f32 0.5, %v6711_v28  ;;  %v16603_v21 = vmul.f32 %v6776_v35, %v16504_v30 }
 0x564   : > { %v5744_v27 = vsel %vm2125_vm4, %v16406_v63, %v10108_v26  ;;  %v5743_v3 = vsel %vm2125_vm4, %v16410_v62, %v10107_v54  ;;  %v6582_v47 = vmul.f32 0.7978846, %v6516_v24  ;;  %v6517_v31 = vadd.f32 %v6451_v44, %v16558_v2  ;;  %v6086_v63 = vpop.f32.mrb[19].mxu0 }
 0x565   : > { %v5809_v37 = vpack.c.bf16 %v5744_v27, %v5743_v3  ;;  %v7102_v62 = vsel %vm1330_vm1, %v18969_v20, %v6973_v46  ;;  %v6386_v55 = vmul.f32 %v6320_v6, %v16578_v58  ;;  %v6321_v41 = vmul.f32 %v16592_v9, %v16592_v9 }
 0x566   : > { %10448 = vtanh.f32 %v6582_v47  ;;  %v6583_v12 = vmul.f32 0.7978846, %v6517_v31  ;;  %v7236_v39 = vpack.c.bf16 %v7102_v62, %v18969_v20  ;;  %v16609_v25 = vmul.f32 %v6777_v34, %v16514_v13 }
 0x567   : > { %v10111_v52 = vpop.permute.xlu0 %10110  ;;  %v10445_v36 = vpop.eup %10444  ;;  %v6452_v10 = vmul.f32 0.044715, %v6386_v55  ;;  %v6387_v51 = vmul.f32 %v6321_v41, %v16592_v9  ;;  %v7106_v40 = vrot.slane %v16603_v21, 1  ;;  %v6974_v48 = vrot.slane %v16603_v21, 7 }
 0x568   : > { %v10113_v4 = vunpack.i.h.bf16 %v10111_v52  ;;  %v10112_v56 = vunpack.i.l.bf16 %v10111_v52  ;;  %6296 = vmatmul.mubr.bf16.gmra.mrb[124].mxu0 %v5809_v37  ;;  %10450 = vtanh.f32 %v6583_v12  ;;  %v6089_v14 = vpop.f32.mrb[20].mxu0  ;;  %v6712_v15 = vadd.f32 1.0, %v10445_v36 }
 0x569   : > { %7566 = vmatprep.mubr.bf16.mxu0 %v7237_v53  ;;  %v10447_v32 = vpop.eup %10446  ;;  %v6518_v60 = vadd.f32 %v6452_v10, %v16578_v58  ;;  %v6453_v59 = vmul.f32 0.044715, %v6387_v51  ;;  %v16613_v38 = vadd.f32 %v16487_v23, %v6089_v14  ;;  %v6091_v30 = vpop.f32.mrb[21].mxu0  ;;  %v6975_v13 = vrot.slane %v16609_v25, 7 }
 0x56a   : > { %v5745_v18 = vsel %vm2125_vm4, %v16398_v57, %v10112_v56  ;;  %v5746_v7 = vsel %vm2125_vm4, %v5219_v17, %v10113_v4  ;;  %v6092_v11 = vpop.f32.mrb[22].mxu0  ;;  %v7240_v57 = vpack.c.bf16 %v16609_v25, %v16603_v21  ;;  %v7101_v24 = vsel %vm1330_vm1, %v6973_v46, %v6974_v48 }
 0x56b   : > { %v5811_v43 = vpack.c.bf16 %v5746_v7, %v5745_v18  ;;  %v6584_v33 = vmul.f32 0.7978846, %v6518_v60  ;;  %v6519_v26 = vadd.f32 %v6453_v59, %v16592_v9  ;;  %v6322_v54 = vmul.f32 %v16613_v38, %v16613_v38  ;;  %v6094_v17 = vpop.f32.mrb[23].mxu0 }
 0x56c   : > { %v16624_v19 = vadd.f32 %v16487_v23, %v6092_v11  ;;  %v7100_v5 = vsel %vm1330_vm1, %v6974_v48, %v6975_v13  ;;  %v6713_v44 = vadd.f32 1.0, %v10447_v32  ;;  %v6778_v29 = vmul.f32 0.5, %v6712_v15  ;;  %v10174_v32 = vld [vmem:[%s18344_s7 + $0x90] sm:$0xff]  }
 0x56d   : > { %6304 = vmatmul.mubr.bf16.vlgmr.msra.gmra.mrb[8].mxu1 %v5811_v43  ;;  %10452 = vtanh.f32 %v6584_v33  ;;  %v6585_v27 = vmul.f32 0.7978846, %v6519_v26  ;;  %v6388_v49 = vmul.f32 %v6322_v54, %v16613_v38  ;;  %v7239_v53 = vpack.c.bf16 %v7100_v5, %v7101_v24  ;;  %v10175_v24 = vld [vmem:[%s18344_s7 + $0x98] sm:$0xff]  }
 0x56e   : > { %v6323_v3 = vmul.f32 %v16624_v19, %v16624_v19  ;;  %v6779_v47 = vmul.f32 0.5, %v6713_v44  ;;  %v16637_v31 = vmul.f32 %v6778_v29, %v16526_v0  ;;  %v16645_v46 = vsel %vm1463_vm0, %v7105_v1, %v7106_v40  ;;  %v10173_v0 = vld [vmem:[%s18344_s7 + $0x88] sm:$0xff]  }
 0x56f   : > { %10454 = vtanh.f32 %v6585_v27  ;;  %v6454_v63 = vmul.f32 0.044715, %v6388_v49  ;;  %v16656_v37 = vsel %vm1463_vm0, %v18946_v22, %v7105_v1 }
 0x570   : > { %7567 = vmatmul.mubr.bf16.vlgmr.msra.gmra.mrb[128].mxu0 %v7236_v39  ;;  %v10449_v6 = vpop.eup %10448  ;;  %v6389_v52 = vmul.f32 %v6323_v3, %v16624_v19  ;;  %v6097_v62 = vpop.f32.mrb[24].mxu0  ;;  %v16659_v28 = vmul.f32 %v6779_v47, %v16536_v42  ;;  %v6976_v35 = vrot.slane %v16637_v31, 7  ;;  %v7107_v39 = vrot.slane %v16609_v25, 1 }
 0x571   : > { %9014 = vmatpush3.bf16.msra.mxu0 %v10172_v61  ;;  %7573 = vmatprep.mubr.bf16.mxu0 %v7240_v57  ;;  %v6714_v12 = vadd.f32 1.0, %v10449_v6  ;;  %v6520_v16 = vadd.f32 %v6454_v63, %v16613_v38  ;;  %v16667_v56 = vadd.f32 %v16487_v23, %v6097_v62  ;;  %v6099_v1 = vpop.f32.mrb[25].mxu0  ;;  %v7108_v30 = vrot.slane %v16637_v31, 1 }
 0x572   : > { %9015 = vmatprep.subr.bf16.mxu0 %v18944_v50  ;;  %v10451_v41 = vpop.eup %10450  ;;  %v6455_v4 = vmul.f32 0.044715, %v6389_v52  ;;  %v6100_v42 = vpop.f32.mrb[26].mxu0  ;;  %v7243_v34 = vpack.c.bf16 %v16659_v28, %v16637_v31  ;;  %v6977_v36 = vrot.slane %v16659_v28, 7  ;;  %v16675_v10 = vsel %vm1330_vm1, %v6975_v13, %v6976_v35 }
 0x573   : > { %v6715_v51 = vadd.f32 1.0, %v10451_v41  ;;  %v6586_v18 = vmul.f32 0.7978846, %v6520_v16  ;;  %v6324_v14 = vmul.f32 %v16667_v56, %v16667_v56  ;;  %v16681_v15 = vadd.f32 %v16487_v23, %v6100_v42  ;;  %v6102_v25 = vpop.f32.mrb[27].mxu0 }
 0x574   : > { %v6521_v7 = vadd.f32 %v6455_v4, %v16624_v19  ;;  %v7098_v60 = vsel %vm1330_vm1, %v6976_v35, %v6977_v36  ;;  %v6780_v59 = vmul.f32 0.5, %v6714_v12  ;;  %v16702_v54 = vsel %vm1463_vm0, %v7107_v39, %v7108_v30 }
 0x575   : > { %9016 = vmatpush3.bf16.msra.mxu0 %v10173_v0  ;;  %v6781_v43 = vmul.f32 0.5, %v6715_v51  ;;  %10456 = vtanh.f32 %v6586_v18  ;;  %v6390_v57 = vmul.f32 %v6324_v14, %v16667_v56  ;;  %v6325_v48 = vmul.f32 %v16681_v15, %v16681_v15  ;;  %v10176_v18 = vld [vmem:[%s18344_s7 + $0xa0] sm:$0xff]  }
 0x576   : > { %9017 = vmatprep.subr.bf16.mxu0 %v18944_v50  ;;  %v6587_v11 = vmul.f32 0.7978846, %v6521_v7  ;;  %v7242_v13 = vpack.c.bf16 %v7098_v60, %v16675_v10  ;;  %v16695_v33 = vmul.f32 %v6780_v59, %v16548_v45  ;;  %v16712_v45 = vsel %vm1463_vm0, %v7106_v40, %v7107_v39 }
 0x577   : > { %v16698_v26 = vmul.f32 %v6781_v43, %v16558_v2  ;;  %v10453_v17 = vpop.eup %10452  ;;  %v6456_v61 = vmul.f32 0.044715, %v6390_v57  ;;  %v6391_v5 = vmul.f32 %v6325_v48, %v16681_v15 }
 0x578   : > { %7574 = vmatmul.mubr.bf16.gmra.mrb[132].mxu0 %v7239_v53  ;;  %10458 = vtanh.f32 %v6587_v11  ;;  %v6105_v2 = vpop.f32.mrb[28].mxu0  ;;  %v6978_v29 = vrot.slane %v16695_v33, 7  ;;  %v6716_v49 = vadd.f32 1.0, %v10453_v17  ;;  %v7110_v14 = vrot.slane %v16695_v33, 1 }
 0x579   : > { %7581 = vmatprep.mubr.bf16.mxu0 %v7243_v34  ;;  %9018 = vmatpush3.bf16.msra.mxu0 %v10174_v32  ;;  %v7246_v44 = vpack.c.bf16 %v16698_v26, %v16695_v33  ;;  %v6979_v27 = vrot.slane %v16698_v26, 7  ;;  %v10455_v3 = vpop.eup %10454  ;;  %v6522_v53 = vadd.f32 %v6456_v61, %v16667_v56  ;;  %v6457_v47 = vmul.f32 0.044715, %v6391_v5  ;;  %v6107_v40 = vpop.f32.mrb[29].mxu0 }
 0x57a   : > { %9019 = vmatprep.subr.bf16.mxu0 %v18944_v50  ;;  %v16721_v21 = vadd.f32 %v16487_v23, %v6105_v2  ;;  %v6108_v6 = vpop.f32.mrb[30].mxu0  ;;  %v7097_v52 = vsel %vm1330_vm1, %v6977_v36, %v6978_v29  ;;  %v6717_v0 = vadd.f32 1.0, %v10455_v3  ;;  %v6782_v62 = vmul.f32 0.5, %v6716_v49 }
 0x57b   : > { %v7096_v63 = vsel %vm1330_vm1, %v6978_v29, %v6979_v27  ;;  %v6588_v35 = vmul.f32 0.7978846, %v6522_v53  ;;  %v6523_v12 = vadd.f32 %v6457_v47, %v16681_v15  ;;  %v16733_v16 = vadd.f32 %v16487_v23, %v6108_v6  ;;  %v6110_v4 = vpop.f32.mrb[31].mxu0 }
 0x57c   : > { %v6326_v41 = vmul.f32 %v16721_v21, %v16721_v21  ;;  %v7245_v1 = vpack.c.bf16 %v7096_v63, %v7097_v52  ;;  %v6783_v39 = vmul.f32 0.5, %v6717_v0  ;;  %v16736_v42 = vmul.f32 %v6782_v62, %v16578_v58 }
 0x57d   : > { %9020 = vmatpush3.bf16.msra.mxu0 %v10175_v24  ;;  %v7109_v34 = vrot.slane %v16659_v28, 1  ;;  %10460 = vtanh.f32 %v6588_v35  ;;  %v6589_v36 = vmul.f32 0.7978846, %v6523_v12  ;;  %v6327_v51 = vmul.f32 %v16733_v16, %v16733_v16 }
 0x57e   : > { %9021 = vmatprep.subr.bf16.mxu0 %v18944_v50  ;;  %v6392_v10 = vmul.f32 %v6326_v41, %v16721_v21  ;;  %v16747_v7 = vmul.f32 %v6783_v39, %v16592_v9  ;;  %v6980_v58 = vrot.slane %v16736_v42, 7  ;;  %v7111_v59 = vrot.slane %v16698_v26, 1 }
 0x57f   : > { %v16753_v28 = vsel %vm1463_vm0, %v7108_v30, %v7109_v34  ;;  %v10457_v25 = vpop.eup %10456  ;;  %10462 = vtanh.f32 %v6589_v36  ;;  %v6393_v60 = vmul.f32 %v6327_v51, %v16733_v16  ;;  %v16771_v61 = vsel %vm1463_vm0, %v7109_v34, %v7110_v14 }
 0x580   : > { %7582 = vmatmul.mubr.bf16.gmra.mrb[136].mxu0 %v7242_v13  ;;  %v6458_v32 = vmul.f32 0.044715, %v6392_v10  ;;  %v7249_v9 = vpack.c.bf16 %v16747_v7, %v16736_v42  ;;  %v6981_v11 = vrot.slane %v16747_v7, 7  ;;  %v16762_v57 = vsel %vm1330_vm1, %v6979_v27, %v6980_v58 }
 0x581   : > { %7589 = vmatprep.mubr.bf16.mxu0 %v7246_v44  ;;  %9022 = vmatpush3.bf16.msra.mxu0 %v10176_v18  ;;  %v6113_v43 = vpop.f32.mrb[32].mxu0  ;;  %v6718_v30 = vadd.f32 1.0, %v10457_v25  ;;  %v6459_v33 = vmul.f32 0.044715, %v6393_v60  ;;  %v7112_v52 = vrot.slane %v16736_v42, 1 }
 0x582   : > { %9023 = vmatprep.subr.bf16.mxu0 %v18944_v50  ;;  %v10459_v48 = vpop.eup %10458  ;;  %v6524_v13 = vadd.f32 %v6458_v32, %v16721_v21  ;;  %v16767_v17 = vadd.f32 %v16487_v23, %v6113_v43  ;;  %v6115_v26 = vpop.f32.mrb[33].mxu0  ;;  %v7094_v24 = vsel %vm1330_vm1, %v6980_v58, %v6981_v11 }
 0x583   : > { %v6116_v5 = vpop.f32.mrb[34].mxu0  ;;  %v6719_v2 = vadd.f32 1.0, %v10459_v48  ;;  %v6784_v44 = vmul.f32 0.5, %v6718_v30  ;;  %v6525_v49 = vadd.f32 %v6459_v33, %v16733_v16  ;;  %v7248_v40 = vpack.c.bf16 %v7094_v24, %v16762_v57 }
 0x584   : > { %v6590_v27 = vmul.f32 0.7978846, %v6524_v13  ;;  %v6328_v3 = vmul.f32 %v16767_v17, %v16767_v17  ;;  %v16781_v53 = vadd.f32 %v16487_v23, %v6116_v5  ;;  %v6118_v47 = vpop.f32.mrb[35].mxu0  ;;  %v16797_v4 = vsel %vm1463_vm0, %v7111_v59, %v7112_v52 }
 0x585   : > { %v6785_v6 = vmul.f32 0.5, %v6719_v2  ;;  %v16785_v63 = vmul.f32 %v6784_v44, %v16613_v38  ;;  %v6591_v0 = vmul.f32 0.7978846, %v6525_v49  ;;  %v16801_v38 = vsel %vm1463_vm0, %v7110_v14, %v7111_v59 }
 0x586   : > { %10464 = vtanh.f32 %v6590_v27  ;;  %v6394_v62 = vmul.f32 %v6328_v3, %v16767_v17  ;;  %v6329_v35 = vmul.f32 %v16781_v53, %v16781_v53  ;;  %v7113_v59 = vrot.slane %v16747_v7, 1 }
 0x587   : > { %v16792_v12 = vmul.f32 %v6785_v6, %v16624_v19  ;;  %v6982_v41 = vrot.slane %v16785_v63, 7  ;;  %v10461_v39 = vpop.eup %10460  ;;  %10466 = vtanh.f32 %v6591_v0 }
 0x588   : > { %7590 = vmatmul.mubr.bf16.gmra.mrb[140].mxu0 %v7245_v1  ;;  %v6460_v42 = vmul.f32 0.044715, %v6394_v62  ;;  %v6395_v34 = vmul.f32 %v6329_v35, %v16781_v53  ;;  %v6720_v18 = vadd.f32 1.0, %v10461_v39 }
 0x589   : > { %7597 = vmatprep.mubr.bf16.mxu0 %v7249_v9  ;;  %v6121_v1 = vpop.f32.mrb[36].mxu0  ;;  %v7252_v36 = vpack.c.bf16 %v16792_v12, %v16785_v63  ;;  %v6983_v10 = vrot.slane %v16792_v12, 7  ;;  %v16811_v51 = vsel %vm1330_vm1, %v6981_v11, %v6982_v41  ;;  %v10463_v58 = vpop.eup %10462  ;;  %v7114_v11 = vrot.slane %v16785_v63, 1 }
 0x58a   : > { %v6526_v14 = vadd.f32 %v6460_v42, %v16767_v17  ;;  %v6461_v25 = vmul.f32 0.044715, %v6395_v34  ;;  %v16815_v32 = vadd.f32 %v16487_v23, %v6121_v1  ;;  %v6123_v60 = vpop.f32.mrb[37].mxu0  ;;  %v6721_v57 = vadd.f32 1.0, %v10463_v58 }
 0x58b   : > { %v6124_v43 = vpop.f32.mrb[38].mxu0  ;;  %v7092_v9 = vsel %vm1330_vm1, %v6982_v41, %v6983_v10  ;;  %v6786_v30 = vmul.f32 0.5, %v6720_v18  ;;  %v16833_v44 = vsel %vm1463_vm0, %v7113_v59, %v7114_v11  ;;  %v7115_v63 = vrot.slane %v16792_v12, 1 }
 0x58c   : > { %v6592_v48 = vmul.f32 0.7978846, %v6526_v14  ;;  %v6527_v13 = vadd.f32 %v6461_v25, %v16781_v53  ;;  %v6330_v33 = vmul.f32 %v16815_v32, %v16815_v32  ;;  %v16825_v26 = vadd.f32 %v16487_v23, %v6124_v43  ;;  %v6126_v5 = vpop.f32.mrb[39].mxu0 }
 0x58d   : > { %v7251_v7 = vpack.c.bf16 %v7092_v9, %v16811_v51  ;;  %v6787_v24 = vmul.f32 0.5, %v6721_v57  ;;  %v16829_v2 = vmul.f32 %v6786_v30, %v16667_v56  ;;  %v16844_v56 = vsel %vm1463_vm0, %v7112_v52, %v7113_v59 }
 0x58e   : > { %10468 = vtanh.f32 %v6592_v48  ;;  %v6593_v27 = vmul.f32 0.7978846, %v6527_v13  ;;  %v6396_v49 = vmul.f32 %v6330_v33, %v16815_v32  ;;  %v6331_v3 = vmul.f32 %v16825_v26, %v16825_v26 }
 0x58f   : > { %v16839_v47 = vmul.f32 %v6787_v24, %v16681_v15  ;;  %v6984_v6 = vrot.slane %v16829_v2, 7  ;;  %v7116_v18 = vrot.slane %v16829_v2, 1 }
 0x590   : > { %7598 = vmatmul.mubr.bf16.gmra.mrb[144].mxu0 %v7248_v40  ;;  %v10465_v0 = vpop.eup %10464  ;;  %10470 = vtanh.f32 %v6593_v27  ;;  %v6462_v62 = vmul.f32 0.044715, %v6396_v49  ;;  %v6397_v35 = vmul.f32 %v6331_v3, %v16825_v26 }
 0x591   : > { %7605 = vmatprep.mubr.bf16.mxu0 %v7252_v36  ;;  %v6129_v41 = vpop.f32.mrb[40].mxu0  ;;  %v7255_v15 = vpack.c.bf16 %v16839_v47, %v16829_v2  ;;  %v6985_v39 = vrot.slane %v16839_v47, 7  ;;  %v16855_v52 = vsel %vm1330_vm1, %v6983_v10, %v6984_v6  ;;  %v6722_v12 = vadd.f32 1.0, %v10465_v0  ;;  %v10467_v42 = vpop.eup %10466 }
 0x592   : > { %v6528_v34 = vadd.f32 %v6462_v62, %v16815_v32  ;;  %v6463_v1 = vmul.f32 0.044715, %v6397_v35  ;;  %v16859_v36 = vadd.f32 %v16487_v23, %v6129_v41  ;;  %v6131_v51 = vpop.f32.mrb[41].mxu0  ;;  %v6723_v25 = vadd.f32 1.0, %v10467_v42 }
 0x593   : > { %v6132_v58 = vpop.f32.mrb[42].mxu0  ;;  %v7090_v14 = vsel %vm1330_vm1, %v6984_v6, %v6985_v39  ;;  %v6788_v60 = vmul.f32 0.5, %v6722_v12  ;;  %v16866_v10 = vsel %vm1463_vm0, %v7114_v11, %v7115_v63  ;;  %v16880_v11 = vsel %vm1463_vm0, %v7115_v63, %v7116_v18 }
 0x594   : > { %v6594_v59 = vmul.f32 0.7978846, %v6528_v34  ;;  %v6529_v43 = vadd.f32 %v6463_v1, %v16825_v26  ;;  %v6332_v9 = vmul.f32 %v16859_v36, %v16859_v36  ;;  %v16872_v57 = vadd.f32 %v16487_v23, %v6132_v58  ;;  %v6134_v30 = vpop.f32.mrb[43].mxu0 }
 0x595   : > { %v7254_v48 = vpack.c.bf16 %v7090_v14, %v16855_v52  ;;  %v6789_v13 = vmul.f32 0.5, %v6723_v25  ;;  %v16876_v33 = vmul.f32 %v6788_v60, %v16721_v21  ;;  %v7117_v3 = vrot.slane %v16839_v47, 1 }
 0x596   : > { %10472 = vtanh.f32 %v6594_v59  ;;  %v6595_v5 = vmul.f32 0.7978846, %v6529_v43  ;;  %v6398_v24 = vmul.f32 %v6332_v9, %v16859_v36  ;;  %v6333_v2 = vmul.f32 %v16872_v57, %v16872_v57 }
 0x597   : > { %v16886_v27 = vmul.f32 %v6789_v13, %v16733_v16  ;;  %v6986_v49 = vrot.slane %v16876_v33, 7  ;;  %v7118_v62 = vrot.slane %v16876_v33, 1  ;;  %v16913_v25 = vsel %vm1463_vm0, %v7116_v18, %v7117_v3 }
 0x598   : > { %7606 = vmatmul.mubr.bf16.gmra.mrb[148].mxu0 %v7251_v7  ;;  %v10469_v6 = vpop.eup %10468  ;;  %10474 = vtanh.f32 %v6595_v5  ;;  %v6464_v63 = vmul.f32 0.044715, %v6398_v24  ;;  %v6399_v0 = vmul.f32 %v6333_v2, %v16872_v57 }
 0x599   : > { %7613 = vmatprep.mubr.bf16.mxu0 %v7255_v15  ;;  %v6137_v35 = vpop.f32.mrb[44].mxu0  ;;  %v7258_v16 = vpack.c.bf16 %v16886_v27, %v16876_v33  ;;  %v6987_v7 = vrot.slane %v16886_v27, 7  ;;  %v16899_v41 = vsel %vm1330_vm1, %v6985_v39, %v6986_v49  ;;  %v6724_v52 = vadd.f32 1.0, %v10469_v6 }
 0x59a   : > { %v10471_v47 = vpop.eup %10470  ;;  %v6530_v12 = vadd.f32 %v6464_v63, %v16859_v36  ;;  %v6465_v42 = vmul.f32 0.044715, %v6399_v0  ;;  %v16903_v34 = vadd.f32 %v16487_v23, %v6137_v35  ;;  %v6139_v15 = vpop.f32.mrb[45].mxu0  ;;  %v16907_v1 = vsel %vm1463_vm0, %v7117_v3, %v7118_v62 }
 0x59b   : > { %v6140_v51 = vpop.f32.mrb[46].mxu0  ;;  %v7088_v58 = vsel %vm1330_vm1, %v6986_v49, %v6987_v7  ;;  %v6725_v14 = vadd.f32 1.0, %v10471_v47  ;;  %v6790_v39 = vmul.f32 0.5, %v6724_v52  ;;  %v7119_v63 = vrot.slane %v16886_v27, 1  ;;  %v10177_v52 = vld [vmem:[%s18344_s7 + $0xa8] sm:$0xff]  }
 0x59c   : > { %v6596_v60 = vmul.f32 0.7978846, %v6530_v12  ;;  %v6531_v59 = vadd.f32 %v6465_v42, %v16872_v57  ;;  %v6334_v43 = vmul.f32 %v16903_v34, %v16903_v34  ;;  %v16919_v9 = vadd.f32 %v16487_v23, %v6140_v51  ;;  %v6142_v30 = vpop.f32.mrb[47].mxu0  ;;  %9024 = vmatpush3.bf16.msra.mxu0 %v10177_v52 }
 0x59d   : > { %v7257_v13 = vpack.c.bf16 %v7088_v58, %v16899_v41  ;;  %v6791_v33 = vmul.f32 0.5, %v6725_v14  ;;  %v16923_v5 = vmul.f32 %v6790_v39, %v16767_v17  ;;  %9025 = vmatprep.subr.bf16.mxu0 %v18944_v50 }
 0x59e   : > { %10476 = vtanh.f32 %v6596_v60  ;;  %v6597_v24 = vmul.f32 0.7978846, %v6531_v59  ;;  %v6400_v2 = vmul.f32 %v6334_v43, %v16903_v34  ;;  %v6335_v49 = vmul.f32 %v16919_v9, %v16919_v9 }
 0x59f   : > { %v16931_v3 = vmul.f32 %v6791_v33, %v16781_v53  ;;  %v6988_v6 = vrot.slane %v16923_v5, 7  ;;  %v7120_v17 = vrot.slane %v16923_v5, 1  ;;  %v16962_v43 = vsel %vm1463_vm0, %v7118_v62, %v7119_v63 }
 0x5a0   : > { %7614 = vmatmul.mubr.bf16.gmra.mrb[152].mxu0 %v7254_v48  ;;  %v10473_v0 = vpop.eup %10472  ;;  %10478 = vtanh.f32 %v6597_v24  ;;  %v6466_v35 = vmul.f32 0.044715, %v6400_v2  ;;  %v6401_v41 = vmul.f32 %v6335_v49, %v16919_v9 }
 0x5a1   : > { %7621 = vmatprep.mubr.bf16.mxu0 %v7258_v16  ;;  %v7261_v53 = vpack.c.bf16 %v16931_v3, %v16923_v5  ;;  %v6989_v47 = vrot.slane %v16931_v3, 7  ;;  %v16945_v27 = vsel %vm1330_vm1, %v6987_v7, %v6988_v6  ;;  %v6726_v12 = vadd.f32 1.0, %v10473_v0 }
 0x5a2   : > { %v6145_v48 = vpop.f32.mrb[48].mxu0  ;;  %v10475_v42 = vpop.eup %10474  ;;  %v6532_v15 = vadd.f32 %v6466_v35, %v16903_v34  ;;  %v6467_v51 = vmul.f32 0.044715, %v6401_v41  ;;  %v16955_v14 = vsel %vm1463_vm0, %v7119_v63, %v7120_v17 }
 0x5a3   : > { %v16949_v16 = vadd.f32 %v16487_v23, %v6145_v48  ;;  %v6147_v58 = vpop.f32.mrb[49].mxu0  ;;  %v7086_v7 = vsel %vm1330_vm1, %v6988_v6, %v6989_v47  ;;  %v6727_v60 = vadd.f32 1.0, %v10475_v42  ;;  %v6792_v59 = vmul.f32 0.5, %v6726_v12 }
 0x5a4   : > { %v6148_v39 = vpop.f32.mrb[50].mxu0  ;;  %v6598_v30 = vmul.f32 0.7978846, %v6532_v15  ;;  %v6533_v33 = vadd.f32 %v6467_v51, %v16919_v9  ;;  %v7260_v6 = vpack.c.bf16 %v7086_v7, %v16945_v27  ;;  %v7121_v12 = vrot.slane %v16931_v3, 1 }
 0x5a5   : > { %v6336_v24 = vmul.f32 %v16949_v16, %v16949_v16  ;;  %v16968_v2 = vadd.f32 %v16487_v23, %v6148_v39  ;;  %v6150_v49 = vpop.f32.mrb[51].mxu0  ;;  %v6793_v0 = vmul.f32 0.5, %v6727_v60  ;;  %v16972_v35 = vmul.f32 %v6792_v59, %v16815_v32 }
 0x5a6   : > { %10480 = vtanh.f32 %v6598_v30  ;;  %v6599_v63 = vmul.f32 0.7978846, %v6533_v33 }
 0x5a7   : > { %v6402_v41 = vmul.f32 %v6336_v24, %v16949_v16  ;;  %v6337_v52 = vmul.f32 %v16968_v2, %v16968_v2  ;;  %v16980_v48 = vmul.f32 %v6793_v0, %v16825_v26  ;;  %v6990_v27 = vrot.slane %v16972_v35, 7 }
 0x5a8   : > { %7622 = vmatmul.mubr.bf16.gmra.mrb[156].mxu0 %v7257_v13  ;;  %v7122_v32 = vrot.slane %v16972_v35, 1  ;;  %v10477_v42 = vpop.eup %10476  ;;  %10482 = vtanh.f32 %v6599_v63 }
 0x5a9   : > { %v6468_v15 = vmul.f32 0.044715, %v6402_v41  ;;  %v6403_v51 = vmul.f32 %v6337_v52, %v16968_v2  ;;  %7629 = vmatprep.mubr.bf16.mxu0 %v7261_v53  ;;  %v7264_v39 = vpack.c.bf16 %v16980_v48, %v16972_v35  ;;  %v6991_v13 = vrot.slane %v16980_v48, 7 }
 0x5aa   : > { %v6153_v58 = vpop.f32.mrb[52].mxu0  ;;  %v16991_v26 = vsel %vm1330_vm1, %v6989_v47, %v6990_v27  ;;  %v6728_v7 = vadd.f32 1.0, %v10477_v42  ;;  %v10479_v3 = vpop.eup %10478  ;;  %v16999_v53 = vsel %vm1463_vm0, %v7121_v12, %v7122_v32  ;;  %v17007_v35 = vsel %vm1463_vm0, %v7120_v17, %v7121_v12 }
 0x5ab   : > { %v6534_v60 = vadd.f32 %v6468_v15, %v16949_v16  ;;  %v6469_v59 = vmul.f32 0.044715, %v6403_v51  ;;  %v16995_v30 = vadd.f32 %v16487_v23, %v6153_v58  ;;  %v6155_v33 = vpop.f32.mrb[53].mxu0  ;;  %v7084_v49 = vsel %vm1330_vm1, %v6990_v27, %v6991_v13 }
 0x5ac   : > { %v6156_v24 = vpop.f32.mrb[54].mxu0  ;;  %v6729_v0 = vadd.f32 1.0, %v10479_v3  ;;  %v6794_v47 = vmul.f32 0.5, %v6728_v7  ;;  %v7263_v27 = vpack.c.bf16 %v7084_v49, %v16991_v26  ;;  %v7123_v3 = vrot.slane %v16980_v48, 1 }
 0x5ad   : > { %v6600_v63 = vmul.f32 0.7978846, %v6534_v60  ;;  %v6535_v41 = vadd.f32 %v6469_v59, %v16968_v2  ;;  %v6338_v52 = vmul.f32 %v16995_v30, %v16995_v30  ;;  %v17013_v42 = vadd.f32 %v16487_v23, %v6156_v24  ;;  %v6158_v15 = vpop.f32.mrb[55].mxu0 }
 0x5ae   : > { %v6795_v51 = vmul.f32 0.5, %v6729_v0  ;;  %v17017_v58 = vmul.f32 %v6794_v47, %v16859_v36 }
 0x5af   : > { %10484 = vtanh.f32 %v6600_v63  ;;  %v6601_v17 = vmul.f32 0.7978846, %v6535_v41  ;;  %v6404_v12 = vmul.f32 %v6338_v52, %v16995_v30  ;;  %v6339_v7 = vmul.f32 %v17013_v42, %v17013_v42  ;;  %v17042_v41 = vld [vmem:[%s18347_s10] ss:$0 sm:$0xff] }
 0x5b0   : > { %7630 = vmatmul.mubr.bf16.gmra.mrb[160].mxu0 %v7260_v6  ;;  %v17025_v23 = vmul.f32 %v6795_v51, %v16872_v57  ;;  %v6992_v26 = vrot.slane %v17017_v58, 7  ;;  %v7124_v36 = vrot.slane %v17017_v58, 1  ;;  %v10481_v60 = vpop.eup %10480 }
 0x5b1   : > { %10486 = vtanh.f32 %v6601_v17  ;;  %v6470_v59 = vmul.f32 0.044715, %v6404_v12  ;;  %v6405_v33 = vmul.f32 %v6339_v7, %v17013_v42  ;;  %7637 = vmatprep.mubr.bf16.mxu0 %v7264_v39  ;;  %v6730_v0 = vadd.f32 1.0, %v10481_v60 }
 0x5b2   : > { %v6161_v24 = vpop.f32.mrb[56].mxu0  ;;  %v7267_v49 = vpack.c.bf16 %v17025_v23, %v17017_v58  ;;  %v6993_v6 = vrot.slane %v17025_v23, 7  ;;  %v17036_v57 = vsel %vm1330_vm1, %v6991_v13, %v6992_v26  ;;  %v10483_v48 = vpop.eup %10482  ;;  %v17049_v15 = vsel %vm1463_vm0, %v7123_v3, %v7124_v36 }
 0x5b3   : > { %v6536_v47 = vadd.f32 %v6470_v59, %v16995_v30  ;;  %v6471_v63 = vmul.f32 0.044715, %v6405_v33  ;;  %v17045_v39 = vadd.f32 %v17042_v41, %v6161_v24  ;;  %v6163_v52 = vpop.f32.mrb[57].mxu0  ;;  %v6731_v58 = vadd.f32 1.0, %v10483_v48 }
 0x5b4   : > { %v6164_v13 = vpop.f32.mrb[58].mxu0  ;;  %v7082_v51 = vsel %vm1330_vm1, %v6992_v26, %v6993_v6  ;;  %v6796_v17 = vmul.f32 0.5, %v6730_v0  ;;  %v17055_v12 = vsel %vm1463_vm0, %v7122_v32, %v7123_v3 }
 0x5b5   : > { %v6602_v7 = vmul.f32 0.7978846, %v6536_v47  ;;  %v6537_v60 = vadd.f32 %v6471_v63, %v17013_v42  ;;  %v6340_v59 = vmul.f32 %v17045_v39, %v17045_v39  ;;  %v17061_v33 = vadd.f32 %v17042_v41, %v6164_v13  ;;  %v6166_v24 = vpop.f32.mrb[59].mxu0 }
 0x5b6   : > { %v7266_v52 = vpack.c.bf16 %v7082_v51, %v17036_v57  ;;  %v6797_v5 = vmul.f32 0.5, %v6731_v58  ;;  %v17065_v26 = vmul.f32 %v6796_v17, %v16903_v34  ;;  %v7125_v63 = vrot.slane %v17025_v23, 1 }
 0x5b7   : > { %10488 = vtanh.f32 %v6602_v7  ;;  %v6603_v3 = vmul.f32 0.7978846, %v6537_v60  ;;  %v6406_v0 = vmul.f32 %v6340_v59, %v17045_v39  ;;  %v6341_v48 = vmul.f32 %v17061_v33, %v17061_v33 }
 0x5b8   : > { %7638 = vmatmul.mubr.bf16.gmra.mrb[164].mxu0 %v7263_v27  ;;  %v17073_v47 = vmul.f32 %v6797_v5, %v16919_v9  ;;  %v6994_v57 = vrot.slane %v17065_v26, 7  ;;  %v7126_v34 = vrot.slane %v17065_v26, 1 }
 0x5b9   : > { %v10485_v13 = vpop.eup %10484  ;;  %10490 = vtanh.f32 %v6603_v3  ;;  %v6472_v51 = vmul.f32 0.044715, %v6406_v0  ;;  %v6407_v58 = vmul.f32 %v6341_v48, %v17061_v33  ;;  %7645 = vmatprep.mubr.bf16.mxu0 %v7267_v49 }
 0x5ba   : > { %v6169_v17 = vpop.f32.mrb[60].mxu0  ;;  %v7270_v7 = vpack.c.bf16 %v17073_v47, %v17065_v26  ;;  %v6995_v27 = vrot.slane %v17073_v47, 7  ;;  %v17084_v9 = vsel %vm1330_vm1, %v6993_v6, %v6994_v57  ;;  %v6732_v5 = vadd.f32 1.0, %v10485_v13 }
 0x5bb   : > { %v10487_v23 = vpop.eup %10486  ;;  %v6538_v60 = vadd.f32 %v6472_v51, %v17045_v39  ;;  %v6473_v59 = vmul.f32 0.044715, %v6407_v58  ;;  %v17088_v24 = vadd.f32 %v17042_v41, %v6169_v17  ;;  %v6171_v3 = vpop.f32.mrb[61].mxu0  ;;  %v17094_v49 = vsel %vm1463_vm0, %v7125_v63, %v7126_v34 }
 0x5bc   : > { %v6172_v0 = vpop.f32.mrb[62].mxu0  ;;  %v7080_v6 = vsel %vm1330_vm1, %v6994_v57, %v6995_v27  ;;  %v6733_v48 = vadd.f32 1.0, %v10487_v23  ;;  %v6798_v13 = vmul.f32 0.5, %v6732_v5  ;;  %v17100_v51 = vsel %vm1463_vm0, %v7124_v36, %v7125_v63 }
 0x5bd   : > { %v6604_v58 = vmul.f32 0.7978846, %v6538_v60  ;;  %v6539_v17 = vadd.f32 %v6473_v59, %v17061_v33  ;;  %v6342_v3 = vmul.f32 %v17088_v24, %v17088_v24  ;;  %v17106_v32 = vadd.f32 %v17042_v41, %v6172_v0  ;;  %v6174_v62 = vpop.f32.mrb[63].mxu0 }
 0x5be   : > { %v7269_v18 = vpack.c.bf16 %v7080_v6, %v17084_v9  ;;  %v6799_v21 = vmul.f32 0.5, %v6733_v48  ;;  %v17110_v57 = vmul.f32 %v6798_v13, %v16949_v16  ;;  %v7127_v9 = vrot.slane %v17073_v47, 1  ;;  %v10178_v47 = vld [vmem:[%s18344_s7 + $0xb0] sm:$0xff]  }
 0x5bf   : > { %10492 = vtanh.f32 %v6604_v58  ;;  %v6605_v63 = vmul.f32 0.7978846, %v6539_v17  ;;  %v6408_v5 = vmul.f32 %v6342_v3, %v17088_v24  ;;  %v6343_v23 = vmul.f32 %v17106_v32, %v17106_v32  ;;  %9026 = vmatpush3.bf16.msra.mxu0 %v10178_v47 }
 0x5c0   : > { %7646 = vmatmul.mubr.bf16.gmra.mrb[168].mxu0 %v7266_v52  ;;  %v17118_v60 = vmul.f32 %v6799_v21, %v16968_v2  ;;  %v6996_v62 = vrot.slane %v17110_v57, 7  ;;  %v7128_v16 = vrot.slane %v17110_v57, 1  ;;  %9027 = vmatprep.subr.bf16.mxu0 %v18944_v50 }
 0x5c1   : > { %v10489_v59 = vpop.eup %10488  ;;  %10494 = vtanh.f32 %v6605_v63  ;;  %v6474_v0 = vmul.f32 0.044715, %v6408_v5  ;;  %v6409_v6 = vmul.f32 %v6343_v23, %v17106_v32  ;;  %7653 = vmatprep.mubr.bf16.mxu0 %v7270_v7 }
 0x5c2   : > { %v7273_v13 = vpack.c.bf16 %v17118_v60, %v17110_v57  ;;  %v6997_v52 = vrot.slane %v17118_v60, 7  ;;  %v17129_v21 = vsel %vm1330_vm1, %v6995_v27, %v6996_v62  ;;  %v6734_v2 = vadd.f32 1.0, %v10489_v59 }
 0x5c3   : > { %v6177_v48 = vpop.f32.mrb[64].mxu0  ;;  %v10491_v58 = vpop.eup %10490  ;;  %v6540_v17 = vadd.f32 %v6474_v0, %v17088_v24  ;;  %v6475_v3 = vmul.f32 0.044715, %v6409_v6  ;;  %v17142_v5 = vsel %vm1463_vm0, %v7127_v9, %v7128_v16  ;;  %v17150_v0 = vsel %vm1463_vm0, %v7126_v34, %v7127_v9 }
 0x5c4   : > { %v17136_v7 = vadd.f32 %v17042_v41, %v6177_v48  ;;  %v6179_v63 = vpop.f32.mrb[65].mxu0  ;;  %v7078_v23 = vsel %vm1330_vm1, %v6996_v62, %v6997_v52  ;;  %v6735_v59 = vadd.f32 1.0, %v10491_v58  ;;  %v6800_v36 = vmul.f32 0.5, %v6734_v2 }
 0x5c5   : > { %v6180_v27 = vpop.f32.mrb[66].mxu0  ;;  %v6606_v6 = vmul.f32 0.7978846, %v6540_v17  ;;  %v6541_v48 = vadd.f32 %v6475_v3, %v17106_v32  ;;  %v7272_v62 = vpack.c.bf16 %v7078_v23, %v17129_v21  ;;  %v7129_v17 = vrot.slane %v17118_v60, 1 }
 0x5c6   : > { %v6344_v63 = vmul.f32 %v17136_v7, %v17136_v7  ;;  %v17156_v40 = vadd.f32 %v17042_v41, %v6180_v27  ;;  %v6182_v19 = vpop.f32.mrb[67].mxu0  ;;  %v6801_v2 = vmul.f32 0.5, %v6735_v59  ;;  %v17161_v26 = vmul.f32 %v6800_v36, %v16995_v30 }
 0x5c7   : > { %10496 = vtanh.f32 %v6606_v6  ;;  %v6607_v9 = vmul.f32 0.7978846, %v6541_v48 }
 0x5c8   : > { %v6410_v47 = vmul.f32 %v6344_v63, %v17136_v7  ;;  %v6345_v58 = vmul.f32 %v17156_v40, %v17156_v40  ;;  %7654 = vmatmul.mubr.bf16.gmra.mrb[172].mxu0 %v7269_v18  ;;  %v17169_v19 = vmul.f32 %v6801_v2, %v17013_v42  ;;  %v6998_v21 = vrot.slane %v17161_v26, 7 }
 0x5c9   : > { %v7130_v30 = vrot.slane %v17161_v26, 1  ;;  %v10493_v36 = vpop.eup %10492  ;;  %10498 = vtanh.f32 %v6607_v9  ;;  %7661 = vmatprep.mubr.bf16.mxu0 %v7273_v13 }
 0x5ca   : > { %v6476_v3 = vmul.f32 0.044715, %v6410_v47  ;;  %v6411_v27 = vmul.f32 %v6345_v58, %v17156_v40  ;;  %v7276_v59 = vpack.c.bf16 %v17169_v19, %v17161_v26  ;;  %v6999_v18 = vrot.slane %v17169_v19, 7 }
 0x5cb   : > { %v6185_v23 = vpop.f32.mrb[68].mxu0  ;;  %v17180_v42 = vsel %vm1330_vm1, %v6997_v52, %v6998_v21  ;;  %v6736_v6 = vadd.f32 1.0, %v10493_v36  ;;  %v10495_v60 = vpop.eup %10494  ;;  %v17190_v13 = vsel %vm1463_vm0, %v7129_v17, %v7130_v30 }
 0x5cc   : > { %v6542_v48 = vadd.f32 %v6476_v3, %v17136_v7  ;;  %v6477_v63 = vmul.f32 0.044715, %v6411_v27  ;;  %v17184_v2 = vadd.f32 %v17042_v41, %v6185_v23  ;;  %v6187_v9 = vpop.f32.mrb[69].mxu0  ;;  %v7076_v52 = vsel %vm1330_vm1, %v6998_v21, %v6999_v18 }
 0x5cd   : > { %v6188_v47 = vpop.f32.mrb[70].mxu0  ;;  %v6737_v58 = vadd.f32 1.0, %v10495_v60  ;;  %v6802_v36 = vmul.f32 0.5, %v6736_v6  ;;  %v17198_v3 = vsel %vm1463_vm0, %v7128_v16, %v7129_v17  ;;  %v7275_v21 = vpack.c.bf16 %v7076_v52, %v17180_v42 }
 0x5ce   : > { %v6608_v27 = vmul.f32 0.7978846, %v6542_v48  ;;  %v6543_v23 = vadd.f32 %v6477_v63, %v17156_v40  ;;  %v6346_v9 = vmul.f32 %v17184_v2, %v17184_v2  ;;  %v17204_v34 = vadd.f32 %v17042_v41, %v6188_v47  ;;  %v6190_v29 = vpop.f32.mrb[71].mxu0 }
 0x5cf   : > { %v6803_v60 = vmul.f32 0.5, %v6737_v58  ;;  %v17208_v6 = vmul.f32 %v6802_v36, %v17045_v39  ;;  %v7131_v42 = vrot.slane %v17169_v19, 1  ;;  %v10179_v36 = vld [vmem:[%s18344_s7 + $0xb8] sm:$0xff]  }
 0x5d0   : > { %10500 = vtanh.f32 %v6608_v27  ;;  %v6609_v16 = vmul.f32 0.7978846, %v6543_v23  ;;  %v6412_v17 = vmul.f32 %v6346_v9, %v17184_v2  ;;  %v6347_v48 = vmul.f32 %v17204_v34, %v17204_v34  ;;  %7662 = vmatmul.mubr.bf16.gmra.mrb[176].mxu0 %v7272_v62 }
 0x5d1   : > { %v17216_v63 = vmul.f32 %v6803_v60, %v17061_v33  ;;  %v7000_v29 = vrot.slane %v17208_v6, 7  ;;  %v7132_v39 = vrot.slane %v17208_v6, 1  ;;  %v10497_v47 = vpop.eup %10496  ;;  %7669 = vmatprep.mubr.bf16.mxu0 %v7276_v59  ;;  %9028 = vmatpush3.bf16.msra.mxu0 %v10179_v36 }
 0x5d2   : > { %10502 = vtanh.f32 %v6609_v16  ;;  %v6478_v52 = vmul.f32 0.044715, %v6412_v17  ;;  %v6413_v58 = vmul.f32 %v6347_v48, %v17204_v34  ;;  %v6738_v23 = vadd.f32 1.0, %v10497_v47 }
 0x5d3   : > { %v6193_v62 = vpop.f32.mrb[72].mxu0  ;;  %v7279_v33 = vpack.c.bf16 %v17216_v63, %v17208_v6  ;;  %v7001_v27 = vrot.slane %v17216_v63, 7  ;;  %v17230_v19 = vsel %vm1330_vm1, %v6999_v18, %v7000_v29  ;;  %v10499_v9 = vpop.eup %10498  ;;  %v17240_v48 = vsel %vm1463_vm0, %v7131_v42, %v7132_v39 }
 0x5d4   : > { %v6544_v60 = vadd.f32 %v6478_v52, %v17184_v2  ;;  %v6479_v16 = vmul.f32 0.044715, %v6413_v58  ;;  %v17234_v59 = vadd.f32 %v17042_v41, %v6193_v62  ;;  %v6195_v17 = vpop.f32.mrb[73].mxu0  ;;  %v6739_v47 = vadd.f32 1.0, %v10499_v9 }
 0x5d5   : > { %v6196_v57 = vpop.f32.mrb[74].mxu0  ;;  %v7074_v18 = vsel %vm1330_vm1, %v7000_v29, %v7001_v27  ;;  %v6804_v31 = vmul.f32 0.5, %v6738_v23  ;;  %v17248_v52 = vsel %vm1463_vm0, %v7130_v30, %v7131_v42 }
 0x5d6   : > { %18970 = vst [vmem:[#allocation36_spill] sm:$0xff] %v17248_v52  ;;  %v6610_v58 = vmul.f32 0.7978846, %v6544_v60  ;;  %v6545_v36 = vadd.f32 %v6479_v16, %v17204_v34  ;;  %v6348_v62 = vmul.f32 %v17234_v59, %v17234_v59  ;;  %v17254_v17 = vadd.f32 %v17042_v41, %v6196_v57  ;;  %v6198_v55 = vpop.f32.mrb[75].mxu0 }
 0x5d7   : > { %v7278_v29 = vpack.c.bf16 %v7074_v18, %v17230_v19  ;;  %v6805_v9 = vmul.f32 0.5, %v6739_v47  ;;  %v17258_v23 = vmul.f32 %v6804_v31, %v17088_v24  ;;  %v7133_v19 = vrot.slane %v17216_v63, 1 }
 0x5d8   : > { %10504 = vtanh.f32 %v6610_v58  ;;  %v6611_v30 = vmul.f32 0.7978846, %v6545_v36  ;;  %v6414_v42 = vmul.f32 %v6348_v62, %v17234_v59  ;;  %v6349_v60 = vmul.f32 %v17254_v17, %v17254_v17  ;;  %7670 = vmatmul.mubr.bf16.gmra.mrb[180].mxu0 %v7275_v21 }
 0x5d9   : > { %v17266_v57 = vmul.f32 %v6805_v9, %v17106_v32  ;;  %v7002_v55 = vrot.slane %v17258_v23, 7  ;;  %v7134_v31 = vrot.slane %v17258_v23, 1  ;;  %7677 = vmatprep.mubr.bf16.mxu0 %v7279_v33 }
 0x5da   : > { %v10501_v24 = vpop.eup %10500  ;;  %10506 = vtanh.f32 %v6611_v30  ;;  %v6480_v16 = vmul.f32 0.044715, %v6414_v42  ;;  %v6415_v18 = vmul.f32 %v6349_v60, %v17254_v17 }
 0x5db   : > { %v6201_v47 = vpop.f32.mrb[76].mxu0  ;;  %v7282_v58 = vpack.c.bf16 %v17266_v57, %v17258_v23  ;;  %v7003_v21 = vrot.slane %v17266_v57, 7  ;;  %v17277_v32 = vsel %vm1330_vm1, %v7001_v27, %v7002_v55  ;;  %v6740_v36 = vadd.f32 1.0, %v10501_v24 }
 0x5dc   : > { %v10503_v63 = vpop.eup %10502  ;;  %v6546_v62 = vadd.f32 %v6480_v16, %v17234_v59  ;;  %v6481_v9 = vmul.f32 0.044715, %v6415_v18  ;;  %v17281_v30 = vadd.f32 %v17042_v41, %v6201_v47  ;;  %v6203_v42 = vpop.f32.mrb[77].mxu0  ;;  %v17285_v33 = vsel %vm1463_vm0, %v7133_v19, %v7134_v31 }
 0x5dd   : > { %18971 = vst [vmem:[#allocation40_spill] sm:$0xff] %v17285_v33  ;;  %v6204_v23 = vpop.f32.mrb[78].mxu0  ;;  %v7072_v60 = vsel %vm1330_vm1, %v7002_v55, %v7003_v21  ;;  %v6741_v26 = vadd.f32 1.0, %v10503_v63  ;;  %v6806_v27 = vmul.f32 0.5, %v6740_v36  ;;  %v17293_v24 = vsel %vm1463_vm0, %v7132_v39, %v7133_v19 }
 0x5de   : > { %18972 = vst [vmem:[#allocation35_spill] sm:$0xff] %v17293_v24  ;;  %v6612_v16 = vmul.f32 0.7978846, %v6546_v62  ;;  %v6547_v18 = vadd.f32 %v6481_v9, %v17254_v17  ;;  %v6350_v47 = vmul.f32 %v17281_v30, %v17281_v30  ;;  %v17299_v42 = vadd.f32 %v17042_v41, %v6204_v23  ;;  %v6206_v22 = vpop.f32.mrb[79].mxu0 }
 0x5df   : > { %v7281_v55 = vpack.c.bf16 %v7072_v60, %v17277_v32  ;;  %v6807_v63 = vmul.f32 0.5, %v6741_v26  ;;  %v17303_v36 = vmul.f32 %v6806_v27, %v17136_v7  ;;  %v7135_v26 = vrot.slane %v17266_v57, 1 }
 0x5e0   : > { %10508 = vtanh.f32 %v6612_v16  ;;  %v6613_v39 = vmul.f32 0.7978846, %v6547_v18  ;;  %v6416_v19 = vmul.f32 %v6350_v47, %v17281_v30  ;;  %v6351_v62 = vmul.f32 %v17299_v42, %v17299_v42  ;;  %7678 = vmatmul.mubr.bf16.gmra.mrb[184].mxu0 %v7278_v29 }
 0x5e1   : > { %v17311_v9 = vmul.f32 %v6807_v63, %v17156_v40  ;;  %v7004_v22 = vrot.slane %v17303_v36, 7  ;;  %v7136_v7 = vrot.slane %v17303_v36, 1  ;;  %7685 = vmatprep.mubr.bf16.mxu0 %v7282_v58 }
 0x5e2   : > { %v10505_v32 = vpop.eup %10504  ;;  %10510 = vtanh.f32 %v6613_v39  ;;  %v6482_v23 = vmul.f32 0.044715, %v6416_v19  ;;  %v6417_v60 = vmul.f32 %v6351_v62, %v17299_v42 }
 0x5e3   : > { %v6209_v27 = vpop.f32.mrb[80].mxu0  ;;  %v7285_v16 = vpack.c.bf16 %v17311_v9, %v17303_v36  ;;  %v7005_v29 = vrot.slane %v17311_v9, 7  ;;  %v17322_v40 = vsel %vm1330_vm1, %v7003_v21, %v7004_v22  ;;  %v6742_v18 = vadd.f32 1.0, %v10505_v32 }
 0x5e4   : > { %v10507_v57 = vpop.eup %10506  ;;  %v6548_v47 = vadd.f32 %v6482_v23, %v17281_v30  ;;  %v6483_v63 = vmul.f32 0.044715, %v6417_v60  ;;  %v17326_v39 = vadd.f32 %v17042_v41, %v6209_v27  ;;  %v6211_v19 = vpop.f32.mrb[81].mxu0  ;;  %v17330_v58 = vsel %vm1463_vm0, %v7135_v26, %v7136_v7 }
 0x5e5   : > { %18973 = vst [vmem:[#allocation34_spill] sm:$0xff] %v17330_v58  ;;  %v6212_v36 = vpop.f32.mrb[82].mxu0  ;;  %v7070_v62 = vsel %vm1330_vm1, %v7004_v22, %v7005_v29  ;;  %v6743_v6 = vadd.f32 1.0, %v10507_v57  ;;  %v6808_v21 = vmul.f32 0.5, %v6742_v18  ;;  %v17336_v32 = vsel %vm1463_vm0, %v7134_v31, %v7135_v26 }
 0x5e6   : > { %18974 = vst [vmem:[#allocation41_spill] sm:$0xff] %v17336_v32  ;;  %v6614_v23 = vmul.f32 0.7978846, %v6548_v47  ;;  %v6549_v60 = vadd.f32 %v6483_v63, %v17299_v42  ;;  %v6352_v27 = vmul.f32 %v17326_v39, %v17326_v39  ;;  %v17342_v19 = vadd.f32 %v17042_v41, %v6212_v36  ;;  %v6214_v24 = vpop.f32.mrb[83].mxu0 }
 0x5e7   : > { %v7284_v33 = vpack.c.bf16 %v7070_v62, %v17322_v40  ;;  %v6809_v52 = vmul.f32 0.5, %v6743_v6  ;;  %v17346_v22 = vmul.f32 %v6808_v21, %v17184_v2  ;;  %v7137_v6 = vrot.slane %v17311_v9, 1 }
 0x5e8   : > { %10512 = vtanh.f32 %v6614_v23  ;;  %v6615_v26 = vmul.f32 0.7978846, %v6549_v60  ;;  %v6418_v18 = vmul.f32 %v6352_v27, %v17326_v39  ;;  %v6353_v57 = vmul.f32 %v17342_v19, %v17342_v19  ;;  %7686 = vmatmul.mubr.bf16.gmra.mrb[188].mxu0 %v7281_v55 }
 0x5e9   : > { %v17354_v47 = vmul.f32 %v6809_v52, %v17204_v34  ;;  %v7006_v24 = vrot.slane %v17346_v22, 7  ;;  %v7138_v2 = vrot.slane %v17346_v22, 1  ;;  %7693 = vmatprep.mubr.bf16.mxu0 %v7285_v16 }
 0x5ea   : > { %v10509_v40 = vpop.eup %10508  ;;  %10514 = vtanh.f32 %v6615_v26  ;;  %v6484_v63 = vmul.f32 0.044715, %v6418_v18  ;;  %v6419_v36 = vmul.f32 %v6353_v57, %v17342_v19 }
 0x5eb   : > { %v6217_v62 = vpop.f32.mrb[84].mxu0  ;;  %v7288_v21 = vpack.c.bf16 %v17354_v47, %v17346_v22  ;;  %v7007_v55 = vrot.slane %v17354_v47, 7  ;;  %v17365_v34 = vsel %vm1330_vm1, %v7005_v29, %v7006_v24  ;;  %v6744_v52 = vadd.f32 1.0, %v10509_v40 }
 0x5ec   : > { %v10511_v9 = vpop.eup %10510  ;;  %v6550_v23 = vadd.f32 %v6484_v63, %v17326_v39  ;;  %v6485_v60 = vmul.f32 0.044715, %v6419_v36  ;;  %v17369_v27 = vadd.f32 %v17042_v41, %v6217_v62  ;;  %v6219_v26 = vpop.f32.mrb[85].mxu0  ;;  %v17373_v16 = vsel %vm1463_vm0, %v7137_v6, %v7138_v2 }
 0x5ed   : > { %18975 = vst [vmem:[#allocation37_spill] sm:$0xff] %v17373_v16  ;;  %v6220_v22 = vpop.f32.mrb[86].mxu0  ;;  %v7068_v18 = vsel %vm1330_vm1, %v7006_v24, %v7007_v55  ;;  %v6745_v57 = vadd.f32 1.0, %v10511_v9  ;;  %v6810_v29 = vmul.f32 0.5, %v6744_v52  ;;  %v17379_v40 = vsel %vm1463_vm0, %v7136_v7, %v7137_v6 }
 0x5ee   : > { %18976 = vst [vmem:[#allocation13_spill] sm:$0xff] %v17379_v40  ;;  %v6616_v63 = vmul.f32 0.7978846, %v6550_v23  ;;  %v6551_v36 = vadd.f32 %v6485_v60, %v17342_v19  ;;  %v6354_v62 = vmul.f32 %v17369_v27, %v17369_v27  ;;  %v17385_v26 = vadd.f32 %v17042_v41, %v6220_v22  ;;  %v6222_v31 = vpop.f32.mrb[87].mxu0 }
 0x5ef   : > { %v7287_v32 = vpack.c.bf16 %v7068_v18, %v17365_v34  ;;  %v6811_v58 = vmul.f32 0.5, %v6745_v57  ;;  %v17389_v24 = vmul.f32 %v6810_v29, %v17234_v59  ;;  %v7139_v34 = vrot.slane %v17354_v47, 1 }
 0x5f0   : > { %10516 = vtanh.f32 %v6616_v63  ;;  %v6617_v6 = vmul.f32 0.7978846, %v6551_v36  ;;  %v6420_v52 = vmul.f32 %v6354_v62, %v17369_v27  ;;  %v6355_v9 = vmul.f32 %v17385_v26, %v17385_v26  ;;  %7694 = vmatmul.mubr.bf16.gmra.mrb[192].mxu0 %v7284_v33 }
 0x5f1   : > { %v17397_v23 = vmul.f32 %v6811_v58, %v17254_v17  ;;  %v7008_v31 = vrot.slane %v17389_v24, 7  ;;  %v7140_v59 = vrot.slane %v17389_v24, 1  ;;  %7701 = vmatprep.mubr.bf16.mxu0 %v7288_v21 }
 0x5f2   : > { %v10513_v60 = vpop.eup %10512  ;;  %10518 = vtanh.f32 %v6617_v6  ;;  %v6486_v22 = vmul.f32 0.044715, %v6420_v52  ;;  %v6421_v18 = vmul.f32 %v6355_v9, %v17385_v26 }
 0x5f3   : > { %v6225_v57 = vpop.f32.mrb[88].mxu0  ;;  %v7291_v29 = vpack.c.bf16 %v17397_v23, %v17389_v24  ;;  %v7009_v33 = vrot.slane %v17397_v23, 7  ;;  %v17408_v17 = vsel %vm1330_vm1, %v7007_v55, %v7008_v31  ;;  %v6746_v58 = vadd.f32 1.0, %v10513_v60 }
 0x5f4   : > { %v10515_v47 = vpop.eup %10514  ;;  %v6552_v63 = vadd.f32 %v6486_v22, %v17369_v27  ;;  %v6487_v36 = vmul.f32 0.044715, %v6421_v18  ;;  %v17412_v62 = vadd.f32 %v17042_v41, %v6225_v57  ;;  %v6227_v6 = vpop.f32.mrb[89].mxu0  ;;  %v17416_v21 = vsel %vm1463_vm0, %v7139_v34, %v7140_v59 }
 0x5f5   : > { %18977 = vst [vmem:[#allocation39_spill] sm:$0xff] %v17416_v21  ;;  %v6228_v24 = vpop.f32.mrb[90].mxu0  ;;  %v7066_v52 = vsel %vm1330_vm1, %v7008_v31, %v7009_v33  ;;  %v6747_v9 = vadd.f32 1.0, %v10515_v47  ;;  %v6812_v55 = vmul.f32 0.5, %v6746_v58  ;;  %v17422_v60 = vsel %vm1463_vm0, %v7138_v2, %v7139_v34 }
 0x5f6   : > { %18978 = vst [vmem:[#allocation7_spill] sm:$0xff] %v17422_v60  ;;  %v6618_v22 = vmul.f32 0.7978846, %v6552_v63  ;;  %v6553_v18 = vadd.f32 %v6487_v36, %v17385_v26  ;;  %v6356_v57 = vmul.f32 %v17412_v62, %v17412_v62  ;;  %v17428_v6 = vadd.f32 %v17042_v41, %v6228_v24  ;;  %v6230_v7 = vpop.f32.mrb[91].mxu0 }
 0x5f7   : > { %v7290_v40 = vpack.c.bf16 %v7066_v52, %v17408_v17  ;;  %v6813_v16 = vmul.f32 0.5, %v6747_v9  ;;  %v17432_v31 = vmul.f32 %v6812_v55, %v17281_v30  ;;  %v7141_v17 = vrot.slane %v17397_v23, 1 }
 0x5f8   : > { %10520 = vtanh.f32 %v6618_v22  ;;  %v6619_v34 = vmul.f32 0.7978846, %v6553_v18  ;;  %v6422_v58 = vmul.f32 %v6356_v57, %v17412_v62  ;;  %v6357_v47 = vmul.f32 %v17428_v6, %v17428_v6  ;;  %7702 = vmatmul.mubr.bf16.gmra.mrb[196].mxu0 %v7287_v32 }
 0x5f9   : > { %v17440_v63 = vmul.f32 %v6813_v16, %v17299_v42  ;;  %v7010_v7 = vrot.slane %v17432_v31, 7  ;;  %v7142_v30 = vrot.slane %v17432_v31, 1  ;;  %7709 = vmatprep.mubr.bf16.mxu0 %v7291_v29 }
 0x5fa   : > { %v10517_v36 = vpop.eup %10516  ;;  %10522 = vtanh.f32 %v6619_v34  ;;  %v6488_v24 = vmul.f32 0.044715, %v6422_v58  ;;  %v6423_v52 = vmul.f32 %v6357_v47, %v17428_v6 }
 0x5fb   : > { %v6233_v9 = vpop.f32.mrb[92].mxu0  ;;  %v7294_v55 = vpack.c.bf16 %v17440_v63, %v17432_v31  ;;  %v7011_v32 = vrot.slane %v17440_v63, 7  ;;  %v17451_v42 = vsel %vm1330_vm1, %v7009_v33, %v7010_v7  ;;  %v6748_v16 = vadd.f32 1.0, %v10517_v36 }
 0x5fc   : > { %v10519_v23 = vpop.eup %10518  ;;  %v6554_v22 = vadd.f32 %v6488_v24, %v17412_v62  ;;  %v6489_v18 = vmul.f32 0.044715, %v6423_v52  ;;  %v17455_v57 = vadd.f32 %v17042_v41, %v6233_v9  ;;  %v6235_v34 = vpop.f32.mrb[93].mxu0  ;;  %v17459_v29 = vsel %vm1463_vm0, %v7141_v17, %v7142_v30 }
 0x5fd   : > { %18979 = vst [vmem:[#allocation20_spill] sm:$0xff] %v17459_v29  ;;  %v6236_v31 = vpop.f32.mrb[94].mxu0  ;;  %v7064_v58 = vsel %vm1330_vm1, %v7010_v7, %v7011_v32  ;;  %v6749_v47 = vadd.f32 1.0, %v10519_v23  ;;  %v6814_v33 = vmul.f32 0.5, %v6748_v16  ;;  %v17465_v36 = vsel %vm1463_vm0, %v7140_v59, %v7141_v17 }
 0x5fe   : > { %18980 = vst [vmem:[#allocation21_spill] sm:$0xff] %v17465_v36  ;;  %v6620_v24 = vmul.f32 0.7978846, %v6554_v22  ;;  %v6555_v52 = vadd.f32 %v6489_v18, %v17428_v6  ;;  %v6358_v9 = vmul.f32 %v17455_v57, %v17455_v57  ;;  %v17471_v34 = vadd.f32 %v17042_v41, %v6236_v31  ;;  %v6238_v2 = vpop.f32.mrb[95].mxu0 }
 0x5ff   : > { %v7293_v60 = vpack.c.bf16 %v7064_v58, %v17451_v42  ;;  %v6815_v21 = vmul.f32 0.5, %v6749_v47  ;;  %v17475_v7 = vmul.f32 %v6814_v33, %v17326_v39  ;;  %v7143_v42 = vrot.slane %v17440_v63, 1 }
 0x600   : > { %10524 = vtanh.f32 %v6620_v24  ;;  %v6621_v17 = vmul.f32 0.7978846, %v6555_v52  ;;  %v6424_v16 = vmul.f32 %v6358_v9, %v17455_v57  ;;  %v6359_v23 = vmul.f32 %v17471_v34, %v17471_v34  ;;  %7710 = vmatmul.mubr.bf16.gmra.mrb[200].mxu0 %v7290_v40 }
 0x601   : > { %v17483_v22 = vmul.f32 %v6815_v21, %v17342_v19  ;;  %v7012_v2 = vrot.slane %v17475_v7, 7  ;;  %v7144_v39 = vrot.slane %v17475_v7, 1  ;;  %7717 = vmatprep.mubr.bf16.mxu0 %v7294_v55 }
 0x602   : > { %v10521_v18 = vpop.eup %10520  ;;  %10526 = vtanh.f32 %v6621_v17  ;;  %v6490_v31 = vmul.f32 0.044715, %v6424_v16  ;;  %v6425_v58 = vmul.f32 %v6359_v23, %v17471_v34 }
 0x603   : > { %v6241_v47 = vpop.f32.mrb[96].mxu0  ;;  %v7297_v33 = vpack.c.bf16 %v17483_v22, %v17475_v7  ;;  %v7013_v40 = vrot.slane %v17483_v22, 7  ;;  %v17494_v19 = vsel %vm1330_vm1, %v7011_v32, %v7012_v2  ;;  %v6750_v21 = vadd.f32 1.0, %v10521_v18 }
 0x604   : > { %v10523_v63 = vpop.eup %10522  ;;  %v6556_v24 = vadd.f32 %v6490_v31, %v17455_v57  ;;  %v6491_v52 = vmul.f32 0.044715, %v6425_v58  ;;  %v17498_v9 = vadd.f32 %v17042_v41, %v6241_v47  ;;  %v6243_v17 = vpop.f32.mrb[97].mxu0  ;;  %v17502_v55 = vsel %vm1463_vm0, %v7143_v42, %v7144_v39 }
 0x605   : > { %18981 = vst [vmem:[#allocation44_spill] sm:$0xff] %v17502_v55  ;;  %v6244_v7 = vpop.f32.mrb[98].mxu0  ;;  %v7062_v16 = vsel %vm1330_vm1, %v7012_v2, %v7013_v40  ;;  %v6751_v23 = vadd.f32 1.0, %v10523_v63  ;;  %v6816_v32 = vmul.f32 0.5, %v6750_v21  ;;  %v17508_v18 = vsel %vm1463_vm0, %v7142_v30, %v7143_v42 }
 0x606   : > { %18982 = vst [vmem:[#allocation9_spill] sm:$0xff] %v17508_v18  ;;  %v6622_v31 = vmul.f32 0.7978846, %v6556_v24  ;;  %v6557_v58 = vadd.f32 %v6491_v52, %v17471_v34  ;;  %v6360_v47 = vmul.f32 %v17498_v9, %v17498_v9  ;;  %v17514_v17 = vadd.f32 %v17042_v41, %v6244_v7  ;;  %v6246_v59 = vpop.f32.mrb[99].mxu0 }
 0x607   : > { %v7296_v36 = vpack.c.bf16 %v7062_v16, %v17494_v19  ;;  %v6817_v29 = vmul.f32 0.5, %v6751_v23  ;;  %v17518_v2 = vmul.f32 %v6816_v32, %v17369_v27  ;;  %v7145_v19 = vrot.slane %v17483_v22, 1 }
 0x608   : > { %10528 = vtanh.f32 %v6622_v31  ;;  %v6623_v42 = vmul.f32 0.7978846, %v6557_v58  ;;  %v6426_v21 = vmul.f32 %v6360_v47, %v17498_v9  ;;  %v6361_v63 = vmul.f32 %v17514_v17, %v17514_v17  ;;  %7718 = vmatmul.mubr.bf16.gmra.mrb[204].mxu0 %v7293_v60 }
 0x609   : > { %v17526_v24 = vmul.f32 %v6817_v29, %v17385_v26  ;;  %v7014_v59 = vrot.slane %v17518_v2, 7  ;;  %v7146_v27 = vrot.slane %v17518_v2, 1  ;;  %7725 = vmatprep.mubr.bf16.mxu0 %v7297_v33 }
 0x60a   : > { %v10525_v52 = vpop.eup %10524  ;;  %10530 = vtanh.f32 %v6623_v42  ;;  %v6492_v7 = vmul.f32 0.044715, %v6426_v21  ;;  %v6427_v16 = vmul.f32 %v6361_v63, %v17514_v17 }
 0x60b   : > { %v6249_v23 = vpop.f32.mrb[100].mxu0  ;;  %v7300_v32 = vpack.c.bf16 %v17526_v24, %v17518_v2  ;;  %v7015_v60 = vrot.slane %v17526_v24, 7  ;;  %v17537_v26 = vsel %vm1330_vm1, %v7013_v40, %v7014_v59  ;;  %v6752_v29 = vadd.f32 1.0, %v10525_v52 }
 0x60c   : > { %v10527_v22 = vpop.eup %10526  ;;  %v6558_v31 = vadd.f32 %v6492_v7, %v17498_v9  ;;  %v6493_v58 = vmul.f32 0.044715, %v6427_v16  ;;  %v17541_v47 = vadd.f32 %v17042_v41, %v6249_v23  ;;  %v6251_v42 = vpop.f32.mrb[101].mxu0  ;;  %v17545_v33 = vsel %vm1463_vm0, %v7145_v19, %v7146_v27 }
 0x60d   : > { %18983 = vst [vmem:[#allocation43_spill] sm:$0xff] %v17545_v33  ;;  %v6252_v2 = vpop.f32.mrb[102].mxu0  ;;  %v7060_v21 = vsel %vm1330_vm1, %v7014_v59, %v7015_v60  ;;  %v6753_v63 = vadd.f32 1.0, %v10527_v22  ;;  %v6818_v40 = vmul.f32 0.5, %v6752_v29  ;;  %v17551_v52 = vsel %vm1463_vm0, %v7144_v39, %v7145_v19 }
 0x60e   : > { %18984 = vst [vmem:[#allocation42_spill] sm:$0xff] %v17551_v52  ;;  %v6624_v7 = vmul.f32 0.7978846, %v6558_v31  ;;  %v6559_v16 = vadd.f32 %v6493_v58, %v17514_v17  ;;  %v6362_v23 = vmul.f32 %v17541_v47, %v17541_v47  ;;  %v17557_v42 = vadd.f32 %v17042_v41, %v6252_v2  ;;  %v6254_v30 = vpop.f32.mrb[103].mxu0 }
 0x60f   : > { %v7299_v18 = vpack.c.bf16 %v7060_v21, %v17537_v26  ;;  %v6819_v55 = vmul.f32 0.5, %v6753_v63  ;;  %v17561_v59 = vmul.f32 %v6818_v40, %v17412_v62  ;;  %v7147_v26 = vrot.slane %v17526_v24, 1 }
 0x610   : > { %10532 = vtanh.f32 %v6624_v7  ;;  %v6625_v19 = vmul.f32 0.7978846, %v6559_v16  ;;  %v6428_v29 = vmul.f32 %v6362_v23, %v17541_v47  ;;  %v6363_v22 = vmul.f32 %v17557_v42, %v17557_v42  ;;  %7726 = vmatmul.mubr.bf16.gmra.mrb[208].mxu0 %v7296_v36 }
 0x611   : > { %v17569_v31 = vmul.f32 %v6819_v55, %v17428_v6  ;;  %v7016_v30 = vrot.slane %v17561_v59, 7  ;;  %v7148_v62 = vrot.slane %v17561_v59, 1  ;;  %7733 = vmatprep.mubr.bf16.mxu0 %v7300_v32 }
 0x612   : > { %v10529_v58 = vpop.eup %10528  ;;  %10534 = vtanh.f32 %v6625_v19  ;;  %v6494_v2 = vmul.f32 0.044715, %v6428_v29  ;;  %v6429_v21 = vmul.f32 %v6363_v22, %v17557_v42 }
 0x613   : > { %v6257_v63 = vpop.f32.mrb[104].mxu0  ;;  %v7303_v40 = vpack.c.bf16 %v17569_v31, %v17561_v59  ;;  %v7017_v36 = vrot.slane %v17569_v31, 7  ;;  %v17580_v6 = vsel %vm1330_vm1, %v7015_v60, %v7016_v30  ;;  %v6754_v55 = vadd.f32 1.0, %v10529_v58 }
 0x614   : > { %v10531_v24 = vpop.eup %10530  ;;  %v6560_v7 = vadd.f32 %v6494_v2, %v17541_v47  ;;  %v6495_v16 = vmul.f32 0.044715, %v6429_v21  ;;  %v17584_v23 = vadd.f32 %v17042_v41, %v6257_v63  ;;  %v6259_v19 = vpop.f32.mrb[105].mxu0  ;;  %v17588_v32 = vsel %vm1463_vm0, %v7147_v26, %v7148_v62 }
 0x615   : > { %18985 = vst [vmem:[#allocation18_spill] sm:$0xff] %v17588_v32  ;;  %v6260_v59 = vpop.f32.mrb[106].mxu0  ;;  %v7058_v29 = vsel %vm1330_vm1, %v7016_v30, %v7017_v36  ;;  %v6755_v22 = vadd.f32 1.0, %v10531_v24  ;;  %v6820_v60 = vmul.f32 0.5, %v6754_v55  ;;  %v17594_v58 = vsel %vm1463_vm0, %v7146_v27, %v7147_v26 }
 0x616   : > { %18986 = vst [vmem:[#allocation12_spill] sm:$0xff] %v17594_v58  ;;  %v6626_v2 = vmul.f32 0.7978846, %v6560_v7  ;;  %v6561_v21 = vadd.f32 %v6495_v16, %v17557_v42  ;;  %v6364_v63 = vmul.f32 %v17584_v23, %v17584_v23  ;;  %v17600_v19 = vadd.f32 %v17042_v41, %v6260_v59  ;;  %v6262_v39 = vpop.f32.mrb[107].mxu0 }
 0x617   : > { %v7302_v52 = vpack.c.bf16 %v7058_v29, %v17580_v6  ;;  %v6821_v33 = vmul.f32 0.5, %v6755_v22  ;;  %v17604_v30 = vmul.f32 %v6820_v60, %v17455_v57  ;;  %v7149_v6 = vrot.slane %v17569_v31, 1 }
 0x618   : > { %10536 = vtanh.f32 %v6626_v2  ;;  %v6627_v26 = vmul.f32 0.7978846, %v6561_v21  ;;  %v6430_v55 = vmul.f32 %v6364_v63, %v17584_v23  ;;  %v6365_v24 = vmul.f32 %v17600_v19, %v17600_v19  ;;  %7734 = vmatmul.mubr.bf16.gmra.mrb[212].mxu0 %v7299_v18  ;;  %v17629_v21 = vld [vmem:[%s18347_s10] ss:$0 sm:$0xff] }
 0x619   : > { %v17612_v41 = vmul.f32 %v6821_v33, %v17471_v34  ;;  %v7018_v39 = vrot.slane %v17604_v30, 7  ;;  %v7150_v57 = vrot.slane %v17604_v30, 1  ;;  %7741 = vmatprep.mubr.bf16.mxu0 %v7303_v40 }
 0x61a   : > { %v10533_v7 = vpop.eup %10532  ;;  %10538 = vtanh.f32 %v6627_v26  ;;  %v6496_v16 = vmul.f32 0.044715, %v6430_v55  ;;  %v6431_v59 = vmul.f32 %v6365_v24, %v17600_v19 }
 0x61b   : > { %v6265_v29 = vpop.f32.mrb[108].mxu0  ;;  %v7306_v22 = vpack.c.bf16 %v17612_v41, %v17604_v30  ;;  %v7019_v18 = vrot.slane %v17612_v41, 7  ;;  %v17623_v34 = vsel %vm1330_vm1, %v7017_v36, %v7018_v39  ;;  %v6756_v33 = vadd.f32 1.0, %v10533_v7 }
 0x61c   : > { %v10535_v31 = vpop.eup %10534  ;;  %v6562_v60 = vadd.f32 %v6496_v16, %v17584_v23  ;;  %v6497_v2 = vmul.f32 0.044715, %v6431_v59  ;;  %v17632_v40 = vadd.f32 %v17629_v21, %v6265_v29  ;;  %v6267_v63 = vpop.f32.mrb[109].mxu0  ;;  %v17636_v30 = vsel %vm1463_vm0, %v7149_v6, %v7150_v57 }
 0x61d   : > { %18987 = vst [vmem:[#allocation8_spill] sm:$0xff] %v17636_v30  ;;  %v6268_v36 = vpop.f32.mrb[110].mxu0  ;;  %v7056_v26 = vsel %vm1330_vm1, %v7018_v39, %v7019_v18  ;;  %v6757_v55 = vadd.f32 1.0, %v10535_v31  ;;  %v6822_v24 = vmul.f32 0.5, %v6756_v33  ;;  %v17642_v7 = vsel %vm1463_vm0, %v7148_v62, %v7149_v6 }
 0x61e   : > { %18988 = vst [vmem:[#allocation10_spill] sm:$0xff] %v17642_v7  ;;  %v6628_v16 = vmul.f32 0.7978846, %v6562_v60  ;;  %v6563_v59 = vadd.f32 %v6497_v2, %v17600_v19  ;;  %v6366_v29 = vmul.f32 %v17632_v40, %v17632_v40  ;;  %v17648_v63 = vadd.f32 %v17629_v21, %v6268_v36  ;;  %v6270_v27 = vpop.f32.mrb[111].mxu0 }
 0x61f   : > { %v7305_v58 = vpack.c.bf16 %v7056_v26, %v17623_v34  ;;  %v6823_v32 = vmul.f32 0.5, %v6757_v55  ;;  %v17652_v39 = vmul.f32 %v6822_v24, %v17498_v9  ;;  %v7151_v34 = vrot.slane %v17612_v41, 1 }
 0x620   : > { %10540 = vtanh.f32 %v6628_v16  ;;  %v6629_v6 = vmul.f32 0.7978846, %v6563_v59  ;;  %v6432_v33 = vmul.f32 %v6366_v29, %v17632_v40  ;;  %v6367_v31 = vmul.f32 %v17648_v63, %v17648_v63  ;;  %7742 = vmatmul.mubr.bf16.gmra.mrb[216].mxu0 %v7302_v52 }
 0x621   : > { %v6889_v60 = vmul.f32 %v6823_v32, %v17514_v17  ;;  %v7020_v27 = vrot.slane %v17652_v39, 7  ;;  %v7152_v9 = vrot.slane %v17652_v39, 1  ;;  %7749 = vmatprep.mubr.bf16.mxu0 %v7306_v22 }
 0x622   : > { %v10537_v2 = vpop.eup %10536  ;;  %10542 = vtanh.f32 %v6629_v6  ;;  %v6498_v36 = vmul.f32 0.044715, %v6432_v33  ;;  %v6433_v26 = vmul.f32 %v6367_v31, %v17648_v63 }
 0x623   : > { %v6273_v55 = vpop.f32.mrb[112].mxu0  ;;  %v7309_v24 = vpack.c.bf16 %v6889_v60, %v17652_v39  ;;  %v7021_v16 = vrot.slane %v6889_v60, 7  ;;  %v17667_v52 = vsel %vm1330_vm1, %v7019_v18, %v7020_v27  ;;  %v6758_v17 = vadd.f32 1.0, %v10537_v2 }
 0x624   : > { %v10539_v32 = vpop.eup %10538  ;;  %v6564_v41 = vadd.f32 %v6498_v36, %v17632_v40  ;;  %v6499_v59 = vmul.f32 0.044715, %v6433_v26  ;;  %v17671_v29 = vadd.f32 %v17629_v21, %v6273_v55  ;;  %v6275_v6 = vpop.f32.mrb[113].mxu0  ;;  %v17675_v22 = vsel %vm1463_vm0, %v7151_v34, %v7152_v9 }
 0x625   : > { %18989 = vst [vmem:[#allocation22_spill] sm:$0xff] %v17675_v22  ;;  %v6276_v33 = vpop.f32.mrb[114].mxu0  ;;  %v7054_v39 = vsel %vm1330_vm1, %v7020_v27, %v7021_v16  ;;  %v6759_v31 = vadd.f32 1.0, %v10539_v32  ;;  %v6824_v18 = vmul.f32 0.5, %v6758_v17  ;;  %v17681_v2 = vsel %vm1463_vm0, %v7150_v57, %v7151_v34 }
 0x626   : > { %18990 = vst [vmem:[#allocation11_spill] sm:$0xff] %v17681_v2  ;;  %v6630_v36 = vmul.f32 0.7978846, %v6564_v41  ;;  %v6565_v26 = vadd.f32 %v6499_v59, %v17648_v63  ;;  %v6368_v55 = vmul.f32 %v17671_v29, %v17671_v29  ;;  %v17687_v6 = vadd.f32 %v17629_v21, %v6276_v33  ;;  %v6278_v62 = vpop.f32.mrb[115].mxu0 }
 0x627   : > { %v7308_v7 = vpack.c.bf16 %v7054_v39, %v17667_v52  ;;  %v6825_v30 = vmul.f32 0.5, %v6759_v31  ;;  %v6890_v27 = vmul.f32 %v6824_v18, %v17541_v47  ;;  %v7153_v62 = vrot.slane %v6889_v60, 1 }
 0x628   : > { %10544 = vtanh.f32 %v6630_v36  ;;  %v6631_v57 = vmul.f32 0.7978846, %v6565_v26  ;;  %v6434_v34 = vmul.f32 %v6368_v55, %v17671_v29  ;;  %v6369_v32 = vmul.f32 %v17687_v6, %v17687_v6  ;;  %7750 = vmatmul.mubr.bf16.gmra.mrb[220].mxu0 %v7305_v58 }
 0x629   : > { %v6891_v41 = vmul.f32 %v6825_v30, %v17557_v42  ;;  %v7022_v59 = vrot.slane %v6890_v27, 7  ;;  %v7154_v33 = vrot.slane %v6890_v27, 1  ;;  %7757 = vmatprep.mubr.bf16.mxu0 %v7309_v24 }
 0x62a   : > { %v10541_v52 = vpop.eup %10540  ;;  %10546 = vtanh.f32 %v6631_v57  ;;  %v6500_v39 = vmul.f32 0.044715, %v6434_v34  ;;  %v6435_v47 = vmul.f32 %v6369_v32, %v17687_v6  ;;  %v17709_v57 = vsel %vm1463_vm0, %v7152_v9, %v7153_v62 }
 0x62b   : > { %v7312_v31 = vpack.c.bf16 %v6891_v41, %v6890_v27  ;;  %v7023_v18 = vrot.slane %v6891_v41, 7  ;;  %v17700_v36 = vsel %vm1330_vm1, %v7021_v16, %v7022_v59  ;;  %v6760_v26 = vadd.f32 1.0, %v10541_v52  ;;  %v6281_v30 = vpop.f32.mrb[116].mxu0  ;;  %18992 = vst [vmem:[#allocation23_spill] sm:$0xff] %v17709_v57 }
 0x62c   : > { %v10543_v55 = vpop.eup %10542  ;;  %v6566_v58 = vadd.f32 %v6500_v39, %v17671_v29  ;;  %v6501_v42 = vmul.f32 0.044715, %v6435_v47  ;;  %v17705_v60 = vsel %vm1463_vm0, %v7153_v62, %v7154_v33  ;;  %v17712_v24 = vadd.f32 %v17629_v21, %v6281_v30  ;;  %v6283_v27 = vpop.f32.mrb[117].mxu0 }
 0x62d   : > { %18991 = vst [vmem:[#allocation14_spill] sm:$0xff] %v17705_v60  ;;  %v7052_v16 = vsel %vm1330_vm1, %v7022_v59, %v7023_v18  ;;  %v6761_v34 = vadd.f32 1.0, %v10543_v55  ;;  %v6826_v32 = vmul.f32 0.5, %v6760_v26  ;;  %v6284_v47 = vpop.f32.mrb[118].mxu0  ;;  %v7155_v55 = vrot.slane %v6891_v41, 1 }
 0x62e   : > { %v6632_v52 = vmul.f32 0.7978846, %v6566_v58  ;;  %v6567_v39 = vadd.f32 %v6501_v42, %v17687_v6  ;;  %v7311_v17 = vpack.c.bf16 %v7052_v16, %v17700_v36  ;;  %v6370_v9 = vmul.f32 %v17712_v24, %v17712_v24  ;;  %v6286_v30 = vpop.f32.mrb[119].mxu0 }
 0x62f   : > { %v17723_v62 = vadd.f32 %v17629_v21, %v6284_v47  ;;  %v6827_v27 = vmul.f32 0.5, %v6761_v34  ;;  %v6892_v59 = vmul.f32 %v6826_v32, %v17584_v23  ;;  %v17732_v34 = vsel %vm1463_vm0, %v7154_v33, %v7155_v55 }
 0x630   : > { %10548 = vtanh.f32 %v6632_v52  ;;  %v6633_v26 = vmul.f32 0.7978846, %v6567_v39  ;;  %v6436_v58 = vmul.f32 %v6370_v9, %v17712_v24  ;;  %7758 = vmatmul.mubr.bf16.gmra.mrb[224].mxu0 %v7308_v7  ;;  %18993 = vst [vmem:[#allocation24_spill] sm:$0xff] %v17732_v34 }
 0x631   : > { %v6371_v36 = vmul.f32 %v17723_v62, %v17723_v62  ;;  %v6893_v42 = vmul.f32 %v6827_v27, %v17600_v19  ;;  %v7024_v16 = vrot.slane %v6892_v59, 7  ;;  %7765 = vmatprep.mubr.bf16.mxu0 %v7312_v31  ;;  %v7156_v47 = vrot.slane %v6892_v59, 1 }
 0x632   : > { %v10545_v2 = vpop.eup %10544  ;;  %10550 = vtanh.f32 %v6633_v26  ;;  %v6502_v23 = vmul.f32 0.044715, %v6436_v58 }
 0x633   : > { %v6437_v41 = vmul.f32 %v6371_v36, %v17723_v62  ;;  %v7315_v32 = vpack.c.bf16 %v6893_v42, %v6892_v59  ;;  %v7025_v52 = vrot.slane %v6893_v42, 7  ;;  %v6289_v9 = vpop.f32.mrb[120].mxu0  ;;  %v17737_v7 = vsel %vm1330_vm1, %v7023_v18, %v7024_v16 }
 0x634   : > { %v10547_v39 = vpop.eup %10546  ;;  %v6762_v19 = vadd.f32 1.0, %v10545_v2  ;;  %v17741_v31 = vsel %vm1463_vm0, %v7155_v55, %v7156_v47  ;;  %v7157_v30 = vrot.slane %v6893_v42, 1  ;;  %v6568_v33 = vadd.f32 %v6502_v23, %v17712_v24  ;;  %v6291_v59 = vpop.f32.mrb[121].mxu0 }
 0x635   : > { %18994 = vst [vmem:[#allocation25_spill] sm:$0xff] %v17741_v31  ;;  %v6503_v27 = vmul.f32 0.044715, %v6437_v41  ;;  %v17745_v26 = vadd.f32 %v17629_v21, %v6289_v9  ;;  %v7050_v58 = vsel %vm1330_vm1, %v7024_v16, %v7025_v52  ;;  %v6292_v36 = vpop.f32.mrb[122].mxu0  ;;  %v6763_v57 = vadd.f32 1.0, %v10547_v39 }
 0x636   : > { %v7314_v18 = vpack.c.bf16 %v7050_v58, %v17737_v7  ;;  %v6828_v2 = vmul.f32 0.5, %v6762_v19  ;;  %v6634_v60 = vmul.f32 0.7978846, %v6568_v33  ;;  %v17756_v41 = vadd.f32 %v17629_v21, %v6292_v36  ;;  %v6294_v9 = vpop.f32.mrb[123].mxu0 }
 0x637   : > { %v6569_v42 = vadd.f32 %v6503_v27, %v17723_v62  ;;  %v6372_v23 = vmul.f32 %v17745_v26, %v17745_v26  ;;  %v6829_v59 = vmul.f32 0.5, %v6763_v57  ;;  %v17761_v39 = vsel %vm1463_vm0, %v7156_v47, %v7157_v30 }
 0x638   : > { %v6894_v16 = vmul.f32 %v6828_v2, %v17632_v40  ;;  %18995 = vst [vmem:[#allocation29_spill] sm:$0xff] %v17761_v39  ;;  %10552 = vtanh.f32 %v6634_v60  ;;  %v6373_v33 = vmul.f32 %v17756_v41, %v17756_v41  ;;  %7766 = vmatmul.mubr.bf16.gmra.mrb[228].mxu0 %v7311_v17 }
 0x639   : > { %v6635_v7 = vmul.f32 0.7978846, %v6569_v42  ;;  %v6438_v19 = vmul.f32 %v6372_v23, %v17745_v26  ;;  %7773 = vmatprep.mubr.bf16.mxu0 %v7315_v32  ;;  %v6895_v58 = vmul.f32 %v6829_v59, %v17648_v63 }
 0x63a   : > { %v10549_v27 = vpop.eup %10548  ;;  %v7026_v36 = vrot.slane %v6894_v16, 7  ;;  %v7158_v57 = vrot.slane %v6894_v16, 1  ;;  %v6439_v2 = vmul.f32 %v6373_v33, %v17756_v41 }
 0x63b   : > { %10554 = vtanh.f32 %v6635_v7  ;;  %v6504_v40 = vmul.f32 0.044715, %v6438_v19  ;;  %v6764_v47 = vadd.f32 1.0, %v10549_v27  ;;  %v6297_v60 = vpop.f32.mrb[124].mxu0  ;;  %v7318_v42 = vpack.c.bf16 %v6895_v58, %v6894_v16 }
 0x63c   : > { %v10551_v9 = vpop.eup %10550  ;;  %v7027_v55 = vrot.slane %v6895_v58, 7  ;;  %v7049_v23 = vsel %vm1330_vm1, %v7025_v52, %v7026_v36  ;;  %v17772_v17 = vsel %vm1463_vm0, %v7157_v30, %v7158_v57  ;;  %v6505_v32 = vmul.f32 0.044715, %v6439_v2  ;;  %v6299_v7 = vpop.f32.mrb[125].mxu0 }
 0x63d   : > { %18996 = vst [vmem:[#allocation28_spill] sm:$0xff] %v17772_v17  ;;  %v6570_v63 = vadd.f32 %v6504_v40, %v17745_v26  ;;  %v17776_v59 = vadd.f32 %v17629_v21, %v6297_v60  ;;  %v6765_v19 = vadd.f32 1.0, %v10551_v9  ;;  %v6300_v33 = vpop.f32.mrb[126].mxu0  ;;  %v6830_v27 = vmul.f32 0.5, %v6764_v47 }
 0x63e   : > { %v7048_v16 = vsel %vm1330_vm1, %v7026_v36, %v7027_v55  ;;  %v7159_v34 = vrot.slane %v6895_v58, 1  ;;  %v6571_v30 = vadd.f32 %v6505_v32, %v17756_v41  ;;  %v17786_v2 = vadd.f32 %v17629_v21, %v6300_v33  ;;  %v6302_v60 = vpop.f32.mrb[127].mxu0 }
 0x63f   : > { %v6636_v31 = vmul.f32 0.7978846, %v6570_v63  ;;  %v6374_v40 = vmul.f32 %v17776_v59, %v17776_v59  ;;  %v7317_v9 = vpack.c.bf16 %v7048_v16, %v7049_v23  ;;  %v6831_v7 = vmul.f32 0.5, %v6765_v19 }
 0x640   : > { %v6896_v22 = vmul.f32 %v6830_v27, %v17671_v29  ;;  %v17791_v36 = vsel %vm1463_vm0, %v7158_v57, %v7159_v34  ;;  %v6637_v58 = vmul.f32 0.7978846, %v6571_v30  ;;  %v6375_v63 = vmul.f32 %v17786_v2, %v17786_v2  ;;  %7774 = vmatmul.mubr.bf16.gmra.mrb[232].mxu0 %v7314_v18  ;;  %v6305_v32 = vpop.f32.mrb[8].mxu1 }
 0x641   : > { %10556 = vtanh.f32 %v6636_v31  ;;  %v6440_v47 = vmul.f32 %v6374_v40, %v17776_v59  ;;  %v17797_v33 = vadd.f32 %v17629_v21, %v6305_v32  ;;  %7781 = vmatprep.mubr.bf16.mxu0 %v7318_v42  ;;  %v6307_v23 = vpop.f32.mrb[9].mxu1  ;;  %v6897_v29 = vmul.f32 %v6831_v7, %v17687_v6 }
 0x642   : > { %v7028_v19 = vrot.slane %v6896_v22, 7  ;;  %v7160_v16 = vrot.slane %v6896_v22, 1  ;;  %v10553_v57 = vpop.eup %10552  ;;  %10558 = vtanh.f32 %v6637_v58  ;;  %v6441_v27 = vmul.f32 %v6375_v63, %v17786_v2  ;;  %v6308_v30 = vpop.f32.mrb[10].mxu1 }
 0x643   : > { %v6506_v31 = vmul.f32 0.044715, %v6440_v47  ;;  %v6376_v40 = vmul.f32 %v17797_v33, %v17797_v33  ;;  %v6310_v18 = vpop.f32.mrb[11].mxu1  ;;  %v7321_v60 = vpack.c.bf16 %v6897_v29, %v6896_v22  ;;  %v7029_v52 = vrot.slane %v6897_v29, 7 }
 0x644   : > { %v7047_v21 = vsel %vm1330_vm1, %v7027_v55, %v7028_v19  ;;  %v6507_v7 = vmul.f32 0.044715, %v6441_v27  ;;  %v6766_v32 = vadd.f32 1.0, %v10553_v57  ;;  %v17808_v58 = vsel %vm1463_vm0, %v7159_v34, %v7160_v16 }
 0x645   : > { %v10555_v42 = vpop.eup %10554  ;;  %v6572_v6 = vadd.f32 %v6506_v31, %v17776_v59  ;;  %v6442_v47 = vmul.f32 %v6376_v40, %v17797_v33  ;;  %v7046_v63 = vsel %vm1330_vm1, %v7028_v19, %v7029_v52  ;;  %v7319_v22 = vpack.c.bf16 %v17808_v58, %v17791_v36 }
 0x646   : > { %v6767_v23 = vadd.f32 1.0, %v10555_v42  ;;  %v6573_v55 = vadd.f32 %v6507_v7, %v17786_v2  ;;  %v7320_v18 = vpack.c.bf16 %v7046_v63, %v7047_v21  ;;  %v6832_v31 = vmul.f32 0.5, %v6766_v32 }
 0x647   : > { %v6638_v30 = vmul.f32 0.7978846, %v6572_v6  ;;  %v6508_v27 = vmul.f32 0.044715, %v6442_v47  ;;  %v7161_v39 = vrot.slane %v6897_v29, 1 }
 0x648   : > { %v6833_v57 = vmul.f32 0.5, %v6767_v23  ;;  %v6639_v34 = vmul.f32 0.7978846, %v6573_v55  ;;  %7782 = vmatmul.mubr.bf16.gmra.mrb[236].mxu0 %v7317_v9  ;;  %v6898_v40 = vmul.f32 %v6832_v31, %v17712_v24 }
 0x649   : > { %10560 = vtanh.f32 %v6638_v30  ;;  %v6574_v17 = vadd.f32 %v6508_v27, %v17797_v33  ;;  %7789 = vmatprep.mubr.bf16.mxu0 %v7321_v60  ;;  %v17821_v42 = vsel %vm1463_vm0, %v7160_v16, %v7161_v39 }
 0x64a   : > { %v6899_v19 = vmul.f32 %v6833_v57, %v17723_v62  ;;  %10562 = vtanh.f32 %v6639_v34  ;;  %v7030_v21 = vrot.slane %v6898_v40, 7  ;;  %v7162_v7 = vrot.slane %v6898_v40, 1 }
 0x64b   : > { %v10557_v6 = vpop.eup %10556  ;;  %v6640_v32 = vmul.f32 0.7978846, %v6574_v17 }
 0x64c   : > { %v7324_v29 = vpack.c.bf16 %v6899_v19, %v6898_v40  ;;  %v7031_v47 = vrot.slane %v6899_v19, 7  ;;  %v6768_v63 = vadd.f32 1.0, %v10557_v6  ;;  %v10559_v9 = vpop.eup %10558  ;;  %v7045_v24 = vsel %vm1330_vm1, %v7029_v52, %v7030_v21 }
 0x64d   : > { %v17827_v60 = vsel %vm1463_vm0, %v7161_v39, %v7162_v7  ;;  %v7163_v62 = vrot.slane %v6899_v19, 1  ;;  %10564 = vtanh.f32 %v6640_v32  ;;  %v6769_v23 = vadd.f32 1.0, %v10559_v9 }
 0x64e   : > { %v7044_v16 = vsel %vm1330_vm1, %v7030_v21, %v7031_v47  ;;  %v6834_v30 = vmul.f32 0.5, %v6768_v63  ;;  %v7322_v17 = vpack.c.bf16 %v17827_v60, %v17821_v42 }
 0x64f   : > { %v7323_v55 = vpack.c.bf16 %v7044_v16, %v7045_v24  ;;  %v17835_v31 = vsel %vm1463_vm0, %v7162_v7, %v7163_v62  ;;  %v6835_v52 = vmul.f32 0.5, %v6769_v23 }
 0x650   : > { %v6900_v27 = vmul.f32 %v6834_v30, %v17745_v26  ;;  %7790 = vmatmul.mubr.bf16.gmra.mrb[240].mxu0 %v7320_v18 }
 0x651   : > { %7797 = vmatprep.mubr.bf16.mxu0 %v7324_v29  ;;  %v6901_v39 = vmul.f32 %v6835_v52, %v17756_v41 }
 0x652   : > { %v7032_v57 = vrot.slane %v6900_v27, 7  ;;  %v7164_v34 = vrot.slane %v6900_v27, 1 }
 0x653   : > { %v10561_v40 = vpop.eup %10560  ;;  %v7327_v19 = vpack.c.bf16 %v6901_v39, %v6900_v27  ;;  %v7033_v6 = vrot.slane %v6901_v39, 7  ;;  %v7165_v9 = vrot.slane %v6901_v39, 1 }
 0x654   : > { %v7043_v21 = vsel %vm1330_vm1, %v7031_v47, %v7032_v57  ;;  %v6770_v32 = vadd.f32 1.0, %v10561_v40  ;;  %v10563_v63 = vpop.eup %10562  ;;  %v17843_v7 = vsel %vm1463_vm0, %v7163_v62, %v7164_v34 }
 0x655   : > { %v7042_v26 = vsel %vm1330_vm1, %v7032_v57, %v7033_v6  ;;  %v6771_v18 = vadd.f32 1.0, %v10563_v63  ;;  %v7325_v29 = vpack.c.bf16 %v17843_v7, %v17835_v31  ;;  %v17851_v16 = vsel %vm1463_vm0, %v7164_v34, %v7165_v9 }
 0x656   : > { %v6836_v41 = vmul.f32 0.5, %v6770_v32  ;;  %v7326_v24 = vpack.c.bf16 %v7042_v26, %v7043_v21 }
 0x657   : > { %v10565_v47 = vpop.eup %10564  ;;  %v6837_v23 = vmul.f32 0.5, %v6771_v18 }
 0x658   : > { %v6902_v30 = vmul.f32 %v6836_v41, %v17776_v59  ;;  %7798 = vmatmul.mubr.bf16.gmra.mrb[244].mxu0 %v7323_v55  ;;  %v6772_v62 = vadd.f32 1.0, %v10565_v47 }
 0x659   : > { %7805 = vmatprep.mubr.bf16.mxu0 %v7327_v19  ;;  %v6903_v52 = vmul.f32 %v6837_v23, %v17786_v2 }
 0x65a   : > { %v7034_v27 = vrot.slane %v6902_v30, 7  ;;  %v7166_v39 = vrot.slane %v6902_v30, 1  ;;  %v6838_v57 = vmul.f32 0.5, %v6772_v62  ;;  %v18999_v62 = vpack.c.bf16 %v16771_v61, %v16753_v28 }
 0x65b   : > { %v7330_v40 = vpack.c.bf16 %v6903_v52, %v6902_v30  ;;  %v7035_v32 = vrot.slane %v6903_v52, 7  ;;  %v7167_v55 = vrot.slane %v6903_v52, 1  ;;  %v18998_v30 = vpack.c.bf16 %v16702_v54, %v16712_v45  ;;  %v19027_v52 = vld [vmem:[#allocation44_spill] sm:$0xff] }
 0x65c   : > { %v7041_v21 = vsel %vm1330_vm1, %v7033_v6, %v7034_v27  ;;  %v17859_v34 = vsel %vm1463_vm0, %v7165_v9, %v7166_v39  ;;  %v17862_v63 = vmul.f32 %v6838_v57, %v17797_v33  ;;  %v19002_v54 = vpack.c.bf16 %v16880_v11, %v16866_v10  ;;  %v19010_v10 = vld [vmem:[#allocation36_spill] sm:$0xff]  ;;  %v19030_v57 = vld [vmem:[#allocation43_spill] sm:$0xff] }
 0x65d   : > { %v7328_v59 = vpack.c.bf16 %v17859_v34, %v17851_v16  ;;  %v7040_v2 = vsel %vm1330_vm1, %v7034_v27, %v7035_v32  ;;  %v17872_v6 = vsel %vm1463_vm0, %v7166_v39, %v7167_v55  ;;  %v19003_v45 = vpack.c.bf16 %v16907_v1, %v16913_v25  ;;  %v19012_v1 = vld [vmem:[#allocation40_spill] sm:$0xff]  ;;  %v19013_v25 = vld [vmem:[#allocation35_spill] sm:$0xff]  ;;  %v19028_v27 = vld [vmem:[#allocation9_spill] sm:$0xff] }
 0x65e   : > { %v7329_v19 = vpack.c.bf16 %v7040_v2, %v7041_v21  ;;  %v7036_v26 = vrot.slane %v17862_v63, 7  ;;  %v7168_v18 = vrot.slane %v17862_v63, 1  ;;  %v19004_v28 = vpack.c.bf16 %v16955_v14, %v16962_v43  ;;  %v19015_v43 = vld [vmem:[#allocation34_spill] sm:$0xff] }
 0x65f   : > { %v19005_v61 = vpack.c.bf16 %v16999_v53, %v17007_v35  ;;  %v19011_v11 = vpack.c.bf16 %v17240_v48, %v19010_v10  ;;  %v19014_v14 = vpack.c.bf16 %v19012_v1, %v19013_v25  ;;  %v19016_v53 = vld [vmem:[#allocation41_spill] sm:$0xff]  ;;  %v19029_v39 = vpack.c.bf16 %v19027_v52, %v19028_v27  ;;  %v19033_v21 = vld [vmem:[#allocation18_spill] sm:$0xff] }
 0x660   : > { %7806 = vmatmul.mubr.bf16.gmra.mrb[248].mxu0 %v7326_v24  ;;  %v7038_v33 = vsel %vm1330_vm1, %v7036_v26, %v18969_v20  ;;  %v7039_v9 = vsel %vm1330_vm1, %v7035_v32, %v7036_v26  ;;  %v17883_v41 = vsel %vm1463_vm0, %v7167_v55, %v7168_v18  ;;  %v7333_v24 = vpack.c.bf16 %v18944_v50, %v17862_v63  ;;  %v19034_v55 = vld [vmem:[#allocation12_spill] sm:$0xff]  ;;  %v19037_v26 = vld [vmem:[#allocation10_spill] sm:$0xff] }
 0x661   : > { %7813 = vmatprep.mubr.bf16.mxu0 %v7330_v40  ;;  %v7332_v47 = vpack.c.bf16 %v7038_v33, %v7039_v9  ;;  %v7331_v23 = vpack.c.bf16 %v17883_v41, %v17872_v6  ;;  %v18997_v20 = vpack.c.bf16 %v16645_v46, %v16656_v37  ;;  %v19000_v46 = vpack.c.bf16 %v16797_v4, %v16801_v38  ;;  %v19031_v40 = vld [vmem:[#allocation42_spill] sm:$0xff] }
 0x662   : > { %v19001_v37 = vpack.c.bf16 %v16833_v44, %v16844_v56  ;;  %v19006_v4 = vpack.c.bf16 %v17049_v15, %v17055_v12  ;;  %v19007_v38 = vpack.c.bf16 %v17094_v49, %v17100_v51  ;;  %v19008_v44 = vpack.c.bf16 %v17142_v5, %v17150_v0  ;;  %v19018_v15 = vld [vmem:[#allocation37_spill] sm:$0xff]  ;;  %v19021_v51 = vld [vmem:[#allocation39_spill] sm:$0xff]  ;;  %v19039_v9 = vld [vmem:[#allocation22_spill] sm:$0xff] }
 0x663   : > { %v19009_v56 = vpack.c.bf16 %v17190_v13, %v17198_v3  ;;  %v19017_v35 = vpack.c.bf16 %v19015_v43, %v19016_v53  ;;  %v19019_v12 = vld [vmem:[#allocation13_spill] sm:$0xff]  ;;  %v19022_v5 = vld [vmem:[#allocation7_spill] sm:$0xff]  ;;  %v19024_v13 = vld [vmem:[#allocation20_spill] sm:$0xff]  ;;  %v19032_v32 = vpack.c.bf16 %v19030_v57, %v19031_v40  ;;  %v19035_v2 = vpack.c.bf16 %v19033_v21, %v19034_v55 }
 0x664   : > { %v19020_v49 = vpack.c.bf16 %v19018_v15, %v19019_v12  ;;  %v19023_v0 = vpack.c.bf16 %v19021_v51, %v19022_v5  ;;  %v19025_v3 = vld [vmem:[#allocation21_spill] sm:$0xff]  ;;  %v18032_v10 = vstv %s10730_s14 }
 0x665   : > { %v19026_v48 = vpack.c.bf16 %v19024_v13, %v19025_v3 }
 0x668   : > { %7814 = vmatmul.mubr.bf16.gmra.mrb[252].mxu0 %v7329_v19  ;;  %v19036_v19 = vld [vmem:[#allocation8_spill] sm:$0xff] }
 0x669   : > { %7821 = vmatprep.mubr.bf16.mxu0 %v7333_v24  ;;  %v19038_v33 = vpack.c.bf16 %v19036_v19, %v19037_v26 }
 0x670   : > { %7822 = vmatmul.mubr.bf16.gmra.mrb[0].mxu0 %v7332_v47  ;;  %v19040_v47 = vld [vmem:[#allocation11_spill] sm:$0xff] }
 0x671   : > { %9029 = vmatprep.mubr.msk.bf16.mxu0 %vm10619_vm2, %v18944_v50  ;;  %v19041_v24 = vpack.c.bf16 %v19039_v9, %v19040_v47 }
 0x678   : > { %9030 = vmatmul.mubr.bf16.vlgmr.msra.gmra.mrb[128].mxu0 %v18997_v20  ;;  %v19042_v20 = vld [vmem:[#allocation14_spill] sm:$0xff] }
 0x679   : > { %9033 = vmatprep.mubr.msk.bf16.mxu0 %vm10619_vm2, %v18944_v50 }
 0x680   : > { %9034 = vmatmul.mubr.bf16.gmra.mrb[132].mxu0 %v18998_v30  ;;  %v19043_v30 = vld [vmem:[#allocation23_spill] sm:$0xff] }
 0x681   : > { %9037 = vmatprep.mubr.msk.bf16.mxu0 %vm10619_vm2, %v18944_v50 }
 0x688   : > { %9038 = vmatmul.mubr.bf16.gmra.mrb[136].mxu0 %v18999_v62  ;;  %v19044_v62 = vpack.c.bf16 %v19042_v20, %v19043_v30 }
 0x689   : > { %9041 = vmatprep.mubr.msk.bf16.mxu0 %vm10619_vm2, %v18944_v50 }
 0x690   : > { %9042 = vmatmul.mubr.bf16.gmra.mrb[140].mxu0 %v19000_v46  ;;  %v19045_v46 = vld [vmem:[#allocation25_spill] sm:$0xff] }
 0x691   : > { %9045 = vmatprep.mubr.msk.bf16.mxu0 %vm10619_vm2, %v18944_v50 }
 0x698   : > { %9046 = vmatmul.mubr.bf16.gmra.mrb[144].mxu0 %v19001_v37  ;;  %v19046_v37 = vld [vmem:[#allocation24_spill] sm:$0xff] }
 0x699   : > { %9049 = vmatprep.mubr.msk.bf16.mxu0 %vm10619_vm2, %v18944_v50 }
 0x6a0   : > { %9050 = vmatmul.mubr.bf16.gmra.mrb[148].mxu0 %v19002_v54  ;;  %v19047_v54 = vpack.c.bf16 %v19045_v46, %v19046_v37 }
 0x6a1   : > { %9053 = vmatprep.mubr.msk.bf16.mxu0 %vm10619_vm2, %v18944_v50 }
 0x6a8   : > { %9054 = vmatmul.mubr.bf16.gmra.mrb[152].mxu0 %v19003_v45  ;;  %v19048_v45 = vld [vmem:[#allocation28_spill] sm:$0xff] }
 0x6a9   : > { %9057 = vmatprep.mubr.msk.bf16.mxu0 %vm10619_vm2, %v18944_v50 }
 0x6b0   : > { %9058 = vmatmul.mubr.bf16.gmra.mrb[156].mxu0 %v19004_v28  ;;  %v19049_v28 = vld [vmem:[#allocation29_spill] sm:$0xff] }
 0x6b1   : > { %9061 = vmatprep.mubr.msk.bf16.mxu0 %vm10619_vm2, %v18944_v50 }
 0x6b8   : > { %9062 = vmatmul.mubr.bf16.gmra.mrb[160].mxu0 %v19005_v61  ;;  %v19050_v61 = vpack.c.bf16 %v19048_v45, %v19049_v28 }
 0x6b9   : > { %9065 = vmatprep.mubr.msk.bf16.mxu0 %vm10619_vm2, %v18944_v50 }
 0x6c0   : > { %9066 = vmatmul.mubr.bf16.gmra.mrb[164].mxu0 %v19006_v4 }
 0x6c1   : > { %9069 = vmatprep.mubr.msk.bf16.mxu0 %vm10619_vm2, %v18944_v50 }
 0x6c8   : > { %9070 = vmatmul.mubr.bf16.gmra.mrb[168].mxu0 %v19007_v38  ;;  %v18029_v38 = vld [vmem:[%s18348_s11] ss:$0 sm:$0xff] }
 0x6c9   : > { %9073 = vmatprep.mubr.msk.bf16.mxu0 %vm10619_vm2, %v18944_v50 }
 0x6d0   : > { %9074 = vmatmul.mubr.bf16.gmra.mrb[172].mxu0 %v19008_v44 }
 0x6d1   : > { %9077 = vmatprep.mubr.msk.bf16.mxu0 %vm10619_vm2, %v18944_v50 }
 0x6d8   : > { %9078 = vmatmul.mubr.bf16.gmra.mrb[176].mxu0 %v19009_v56 }
 0x6d9   : > { %9081 = vmatprep.mubr.msk.bf16.mxu0 %vm10619_vm2, %v18944_v50 }
 0x6e0   : > { %9082 = vmatmul.mubr.bf16.gmra.mrb[180].mxu0 %v19011_v11 }
 0x6e1   : > { %9085 = vmatprep.mubr.msk.bf16.mxu0 %vm10619_vm2, %v18944_v50 }
 0x6e8   : > { %9086 = vmatmul.mubr.bf16.gmra.mrb[184].mxu0 %v19014_v14  ;;  %v19051_v14 = vld [vmem:[#allocation5_spill] sm:$0xff] }
 0x6e9   : > { %9089 = vmatprep.mubr.msk.bf16.mxu0 %vm10619_vm2, %v18944_v50 }
 0x6f0   : > { %9090 = vmatmul.mubr.bf16.gmra.mrb[188].mxu0 %v19017_v35 }
 0x6f1   : > { %9093 = vmatprep.mubr.msk.bf16.mxu0 %vm10619_vm2, %v18944_v50 }
 0x6f8   : > { %9094 = vmatmul.mubr.bf16.gmra.mrb[192].mxu0 %v19020_v49 }
 0x6f9   : > { %9097 = vmatprep.mubr.msk.bf16.mxu0 %vm10619_vm2, %v18944_v50 }
 0x700   : > { %9098 = vmatmul.mubr.bf16.gmra.mrb[196].mxu0 %v19023_v0 }
 0x701   : > { %9101 = vmatprep.mubr.msk.bf16.mxu0 %vm10619_vm2, %v18944_v50 }
 0x708   : > { %9102 = vmatmul.mubr.bf16.gmra.mrb[200].mxu0 %v19026_v48 }
 0x709   : > { %9105 = vmatprep.mubr.msk.bf16.mxu0 %vm10619_vm2, %v18944_v50 }
 0x710   : > { %9106 = vmatmul.mubr.bf16.gmra.mrb[204].mxu0 %v19029_v39 }
 0x711   : > { %9109 = vmatprep.mubr.msk.bf16.mxu0 %vm10619_vm2, %v18944_v50 }
 0x718   : > { %9110 = vmatmul.mubr.bf16.gmra.mrb[208].mxu0 %v19032_v32 }
 0x719   : > { %9113 = vmatprep.mubr.msk.bf16.mxu0 %vm10619_vm2, %v18944_v50 }
 0x720   : > { %9114 = vmatmul.mubr.bf16.gmra.mrb[212].mxu0 %v19035_v2 }
 0x721   : > { %9117 = vmatprep.mubr.msk.bf16.mxu0 %vm10619_vm2, %v18944_v50 }
 0x728   : > { %9118 = vmatmul.mubr.bf16.gmra.mrb[216].mxu0 %v19038_v33 }
 0x729   : > { %9121 = vmatprep.mubr.msk.bf16.mxu0 %vm10619_vm2, %v18944_v50 }
 0x730   : > { %9122 = vmatmul.mubr.bf16.gmra.mrb[220].mxu0 %v19041_v24 }
 0x731   : > { %9125 = vmatprep.mubr.msk.bf16.mxu0 %vm10619_vm2, %v18944_v50 }
 0x738   : > { %9126 = vmatmul.mubr.bf16.gmra.mrb[224].mxu0 %v19044_v62  ;;  %v19052_v62 = vld [vmem:[#allocation6_spill] sm:$0xff] }
 0x739   : > { %9129 = vmatprep.mubr.msk.bf16.mxu0 %vm10619_vm2, %v18944_v50  ;;  %v7170_v46 = vsel %vm1463_vm0, %v7168_v18, %v19052_v62 }
 0x740   : > { %9130 = vmatmul.mubr.bf16.gmra.mrb[228].mxu0 %v19047_v54 }
 0x741   : > { %9133 = vmatprep.mubr.msk.bf16.mxu0 %vm10619_vm2, %v18944_v50 }
 0x748   : > { %9134 = vmatmul.mubr.bf16.gmra.mrb[232].mxu0 %v19050_v61 }
 0x749   : > { %9137 = vmatprep.mubr.msk.bf16.mxu0 %vm10619_vm2, %v18944_v50 }
 0x74b   : > { %v7863_v4 = vpop.f32.mrb[128].mxu0 }
 0x74c   : > { %v9031_v44 = vpop.f32.mrb[129].mxu0 }
 0x74d   : > { %v7865_v56 = vpop.f32.mrb[130].mxu0 }
 0x74e   : > { %v9249_v11 = vadd.f32 %v18029_v38, %v7865_v56  ;;  %v9032_v1 = vpop.f32.mrb[131].mxu0 }
 0x750   : > { %v8125_v25 = vmul.f32 %v9249_v11, %v18032_v10  ;;  %9138 = vmatmul.mubr.bf16.gmra.mrb[236].mxu0 %v7319_v22 }
 0x751   : > { %9141 = vmatprep.mubr.msk.bf16.mxu0 %vm10619_vm2, %v18944_v50 }
 0x752   : > { %v8189_v43 = vadd.f32 %v8125_v25, %v19051_v14 }
 0x753   : > { %v7870_v53 = vpop.f32.mrb[132].mxu0 }
 0x754   : > { %8253 = vst [vmem:[%s18044_s16] sm:$0xff] %v8189_v43  ;;  %v9250_v35 = vadd.f32 %v18029_v38, %v7870_v53  ;;  %v9035_v36 = vpop.f32.mrb[133].mxu0 }
 0x755   : > { %v7873_v58 = vpop.f32.mrb[134].mxu0 }
 0x756   : > { %v8126_v22 = vmul.f32 %v9250_v35, %v18032_v10  ;;  %v9251_v15 = vadd.f32 %v18029_v38, %v7873_v58  ;;  %v9036_v12 = vpop.f32.mrb[135].mxu0 }
 0x758   : > { %v8190_v49 = vadd.f32 %v8126_v22, %v19051_v14  ;;  %v8127_v51 = vmul.f32 %v9251_v15, %v18032_v10  ;;  %9142 = vmatmul.mubr.bf16.gmra.mrb[240].mxu0 %v7322_v17 }
 0x759   : > { %9145 = vmatprep.mubr.msk.bf16.mxu0 %vm10619_vm2, %v18944_v50 }
 0x75a   : > { %8254 = vst [vmem:[%s18044_s16 + $0x8] sm:$0xff] %v8190_v49  ;;  %v8191_v5 = vadd.f32 %v8127_v51, %v19051_v14 }
 0x75b   : > { %v7878_v0 = vpop.f32.mrb[136].mxu0 }
 0x75c   : > { %8255 = vst [vmem:[%s18044_s16 + $0x10] sm:$0xff] %v8191_v5  ;;  %v9252_v13 = vadd.f32 %v18029_v38, %v7878_v0  ;;  %v9039_v3 = vpop.f32.mrb[137].mxu0 }
 0x75d   : > { %v7881_v48 = vpop.f32.mrb[138].mxu0 }
 0x75e   : > { %v8128_v52 = vmul.f32 %v9252_v13, %v18032_v10  ;;  %v9253_v27 = vadd.f32 %v18029_v38, %v7881_v48  ;;  %v9040_v42 = vpop.f32.mrb[139].mxu0 }
 0x760   : > { %v8192_v60 = vadd.f32 %v8128_v52, %v19051_v14  ;;  %v8129_v17 = vmul.f32 %v9253_v27, %v18032_v10  ;;  %9146 = vmatmul.mubr.bf16.gmra.mrb[244].mxu0 %v7325_v29 }
 0x761   : > { %9149 = vmatprep.mubr.msk.bf16.mxu0 %vm10619_vm2, %v18944_v50 }
 0x762   : > { %8256 = vst [vmem:[%s18044_s16 + $0x18] sm:$0xff] %v8192_v60  ;;  %v8193_v39 = vadd.f32 %v8129_v17, %v19051_v14 }
 0x763   : > { %v7886_v57 = vpop.f32.mrb[140].mxu0 }
 0x764   : > { %8257 = vst [vmem:[%s18044_s16 + $0x20] sm:$0xff] %v8193_v39  ;;  %v9254_v40 = vadd.f32 %v18029_v38, %v7886_v57  ;;  %v9043_v32 = vpop.f32.mrb[141].mxu0 }
 0x765   : > { %v7889_v21 = vpop.f32.mrb[142].mxu0 }
 0x766   : > { %v8130_v55 = vmul.f32 %v9254_v40, %v18032_v10  ;;  %v9255_v2 = vadd.f32 %v18029_v38, %v7889_v21  ;;  %v9044_v31 = vpop.f32.mrb[143].mxu0 }
 0x768   : > { %v8194_v7 = vadd.f32 %v8130_v55, %v19051_v14  ;;  %v8131_v29 = vmul.f32 %v9255_v2, %v18032_v10  ;;  %9150 = vmatmul.mubr.bf16.gmra.mrb[248].mxu0 %v7328_v59 }
 0x769   : > { %9153 = vmatprep.mubr.msk.bf16.mxu0 %vm10619_vm2, %v18944_v50 }
 0x76a   : > { %8258 = vst [vmem:[%s18044_s16 + $0x28] sm:$0xff] %v8194_v7  ;;  %v8195_v19 = vadd.f32 %v8131_v29, %v19051_v14 }
 0x76b   : > { %v7894_v26 = vpop.f32.mrb[144].mxu0 }
 0x76c   : > { %8259 = vst [vmem:[%s18044_s16 + $0x30] sm:$0xff] %v8195_v19  ;;  %v9256_v33 = vadd.f32 %v18029_v38, %v7894_v26  ;;  %v9047_v9 = vpop.f32.mrb[145].mxu0 }
 0x76d   : > { %v7897_v47 = vpop.f32.mrb[146].mxu0 }
 0x76e   : > { %v8132_v24 = vmul.f32 %v9256_v33, %v18032_v10  ;;  %v9257_v20 = vadd.f32 %v18029_v38, %v7897_v47  ;;  %v9048_v16 = vpop.f32.mrb[147].mxu0 }
 0x770   : > { %v8196_v34 = vadd.f32 %v8132_v24, %v19051_v14  ;;  %v8133_v59 = vmul.f32 %v9257_v20, %v18032_v10  ;;  %9154 = vmatmul.mubr.bf16.gmra.mrb[252].mxu0 %v7331_v23  ;;  %v7334_v23 = vpack.c.bf16 %v19052_v62, %v7170_v46 }
 0x771   : > { %9157 = vmatprep.mubr.msk.bf16.mxu0 %vm10619_vm2, %v18944_v50 }
 0x772   : > { %8260 = vst [vmem:[%s18044_s16 + $0x38] sm:$0xff] %v8196_v34  ;;  %v8197_v30 = vadd.f32 %v8133_v59, %v19051_v14 }
 0x773   : > { %v7902_v37 = vpop.f32.mrb[148].mxu0 }
 0x774   : > { %8261 = vst [vmem:[%s18044_s16 + $0x40] sm:$0xff] %v8197_v30  ;;  %v9258_v54 = vadd.f32 %v18029_v38, %v7902_v37  ;;  %v9051_v6 = vpop.f32.mrb[149].mxu0 }
 0x775   : > { %v7905_v41 = vpop.f32.mrb[150].mxu0 }
 0x776   : > { %v8134_v50 = vmul.f32 %v9258_v54, %v18032_v10  ;;  %v9259_v45 = vadd.f32 %v18029_v38, %v7905_v41  ;;  %v9052_v28 = vpop.f32.mrb[151].mxu0 }
 0x778   : > { %v8198_v63 = vadd.f32 %v8134_v50, %v19051_v14  ;;  %v8135_v8 = vmul.f32 %v9259_v45, %v18032_v10  ;;  %9158 = vmatmul.mubr.bf16.gmra.mrb[0].mxu0 %v7334_v23 }
 0x77a   : > { %8262 = vst [vmem:[%s18044_s16 + $0x48] sm:$0xff] %v8198_v63  ;;  %v8199_v18 = vadd.f32 %v8135_v8, %v19051_v14 }
 0x77b   : > { %v7910_v61 = vpop.f32.mrb[152].mxu0 }
 0x77c   : > { %8263 = vst [vmem:[%s18044_s16 + $0x50] sm:$0xff] %v8199_v18  ;;  %v9260_v4 = vadd.f32 %v18029_v38, %v7910_v61  ;;  %v9055_v44 = vpop.f32.mrb[153].mxu0 }
 0x77d   : > { %v7913_v56 = vpop.f32.mrb[154].mxu0 }
 0x77e   : > { %v8136_v11 = vmul.f32 %v9260_v4, %v18032_v10  ;;  %v9261_v1 = vadd.f32 %v18029_v38, %v7913_v56  ;;  %v9056_v25 = vpop.f32.mrb[155].mxu0 }
 0x780   : > { %v8200_v43 = vadd.f32 %v8136_v11, %v19051_v14  ;;  %v8137_v53 = vmul.f32 %v9261_v1, %v18032_v10 }
 0x782   : > { %8264 = vst [vmem:[%s18044_s16 + $0x58] sm:$0xff] %v8200_v43  ;;  %v8201_v35 = vadd.f32 %v8137_v53, %v19051_v14 }
 0x783   : > { %v7918_v36 = vpop.f32.mrb[156].mxu0 }
 0x784   : > { %8265 = vst [vmem:[%s18044_s16 + $0x60] sm:$0xff] %v8201_v35  ;;  %v9262_v58 = vadd.f32 %v18029_v38, %v7918_v36  ;;  %v9059_v22 = vpop.f32.mrb[157].mxu0 }
 0x785   : > { %v7921_v15 = vpop.f32.mrb[158].mxu0 }
 0x786   : > { %v8138_v12 = vmul.f32 %v9262_v58, %v18032_v10  ;;  %v9263_v49 = vadd.f32 %v18029_v38, %v7921_v15  ;;  %v9060_v51 = vpop.f32.mrb[159].mxu0 }
 0x788   : > { %v8202_v5 = vadd.f32 %v8138_v12, %v19051_v14  ;;  %v8139_v0 = vmul.f32 %v9263_v49, %v18032_v10 }
 0x78a   : > { %8266 = vst [vmem:[%s18044_s16 + $0x68] sm:$0xff] %v8202_v5  ;;  %v8203_v13 = vadd.f32 %v8139_v0, %v19051_v14 }
 0x78b   : > { %v7926_v3 = vpop.f32.mrb[160].mxu0 }
 0x78c   : > { %8267 = vst [vmem:[%s18044_s16 + $0x70] sm:$0xff] %v8203_v13  ;;  %v9264_v48 = vadd.f32 %v18029_v38, %v7926_v3  ;;  %v9063_v52 = vpop.f32.mrb[161].mxu0 }
 0x78d   : > { %v7929_v27 = vpop.f32.mrb[162].mxu0 }
 0x78e   : > { %v8140_v42 = vmul.f32 %v9264_v48, %v18032_v10  ;;  %v9265_v60 = vadd.f32 %v18029_v38, %v7929_v27  ;;  %v9064_v17 = vpop.f32.mrb[163].mxu0 }
 0x790   : > { %v8204_v39 = vadd.f32 %v8140_v42, %v19051_v14  ;;  %v8141_v57 = vmul.f32 %v9265_v60, %v18032_v10 }
 0x792   : > { %8268 = vst [vmem:[%s18044_s16 + $0x78] sm:$0xff] %v8204_v39  ;;  %v8205_v40 = vadd.f32 %v8141_v57, %v19051_v14 }
 0x793   : > { %v7934_v32 = vpop.f32.mrb[164].mxu0 }
 0x794   : > { %8269 = vst [vmem:[%s18044_s16 + $0x80] sm:$0xff] %v8205_v40  ;;  %v9266_v21 = vadd.f32 %v18029_v38, %v7934_v32  ;;  %v9067_v55 = vpop.f32.mrb[165].mxu0 }
 0x795   : > { %v7937_v2 = vpop.f32.mrb[166].mxu0 }
 0x796   : > { %v8142_v31 = vmul.f32 %v9266_v21, %v18032_v10  ;;  %v9267_v7 = vadd.f32 %v18029_v38, %v7937_v2  ;;  %v9068_v29 = vpop.f32.mrb[167].mxu0 }
 0x798   : > { %v8206_v19 = vadd.f32 %v8142_v31, %v19051_v14  ;;  %v8143_v26 = vmul.f32 %v9267_v7, %v18032_v10 }
 0x79a   : > { %8270 = vst [vmem:[%s18044_s16 + $0x88] sm:$0xff] %v8206_v19  ;;  %v8207_v33 = vadd.f32 %v8143_v26, %v19051_v14 }
 0x79b   : > { %v7942_v9 = vpop.f32.mrb[168].mxu0 }
 0x79c   : > { %8271 = vst [vmem:[%s18044_s16 + $0x90] sm:$0xff] %v8207_v33  ;;  %v9268_v47 = vadd.f32 %v18029_v38, %v7942_v9  ;;  %v9071_v24 = vpop.f32.mrb[169].mxu0 }
 0x79d   : > { %v7945_v20 = vpop.f32.mrb[170].mxu0 }
 0x79e   : > { %v8144_v16 = vmul.f32 %v9268_v47, %v18032_v10  ;;  %v9269_v34 = vadd.f32 %v18029_v38, %v7945_v20  ;;  %v9072_v59 = vpop.f32.mrb[171].mxu0 }
 0x7a0   : > { %v8208_v30 = vadd.f32 %v8144_v16, %v19051_v14  ;;  %v8145_v62 = vmul.f32 %v9269_v34, %v18032_v10 }
 0x7a2   : > { %8272 = vst [vmem:[%s18044_s16 + $0x98] sm:$0xff] %v8208_v30  ;;  %v8209_v46 = vadd.f32 %v8145_v62, %v19051_v14 }
 0x7a3   : > { %v7950_v37 = vpop.f32.mrb[172].mxu0 }
 0x7a4   : > { %8273 = vst [vmem:[%s18044_s16 + $0xa0] sm:$0xff] %v8209_v46  ;;  %v9270_v54 = vadd.f32 %v18029_v38, %v7950_v37  ;;  %v9075_v6 = vpop.f32.mrb[173].mxu0 }
 0x7a5   : > { %v7953_v41 = vpop.f32.mrb[174].mxu0 }
 0x7a6   : > { %v8146_v23 = vmul.f32 %v9270_v54, %v18032_v10  ;;  %v9271_v50 = vadd.f32 %v18029_v38, %v7953_v41  ;;  %v9076_v45 = vpop.f32.mrb[175].mxu0 }
 0x7a8   : > { %v8210_v28 = vadd.f32 %v8146_v23, %v19051_v14  ;;  %v8147_v63 = vmul.f32 %v9271_v50, %v18032_v10 }
 0x7aa   : > { %8274 = vst [vmem:[%s18044_s16 + $0xa8] sm:$0xff] %v8210_v28  ;;  %v8211_v8 = vadd.f32 %v8147_v63, %v19051_v14 }
 0x7ab   : > { %v7958_v18 = vpop.f32.mrb[176].mxu0 }
 0x7ac   : > { %8275 = vst [vmem:[%s18044_s16 + $0xb0] sm:$0xff] %v8211_v8  ;;  %v9272_v61 = vadd.f32 %v18029_v38, %v7958_v18  ;;  %v9079_v4 = vpop.f32.mrb[177].mxu0 }
 0x7ad   : > { %v7961_v44 = vpop.f32.mrb[178].mxu0 }
 0x7ae   : > { %v8148_v56 = vmul.f32 %v9272_v61, %v18032_v10  ;;  %v9273_v11 = vadd.f32 %v18029_v38, %v7961_v44  ;;  %v9080_v1 = vpop.f32.mrb[179].mxu0 }
 0x7b0   : > { %v8212_v25 = vadd.f32 %v8148_v56, %v19051_v14  ;;  %v8149_v43 = vmul.f32 %v9273_v11, %v18032_v10 }
 0x7b2   : > { %8276 = vst [vmem:[%s18044_s16 + $0xb8] sm:$0xff] %v8212_v25  ;;  %v8213_v53 = vadd.f32 %v8149_v43, %v19051_v14 }
 0x7b3   : > { %v7966_v35 = vpop.f32.mrb[180].mxu0 }
 0x7b4   : > { %8277 = vst [vmem:[%s18044_s16 + $0xc0] sm:$0xff] %v8213_v53  ;;  %v9274_v36 = vadd.f32 %v18029_v38, %v7966_v35  ;;  %v9083_v58 = vpop.f32.mrb[181].mxu0 }
 0x7b5   : > { %v7969_v22 = vpop.f32.mrb[182].mxu0 }
 0x7b6   : > { %v8150_v15 = vmul.f32 %v9274_v36, %v18032_v10  ;;  %v9275_v12 = vadd.f32 %v18029_v38, %v7969_v22  ;;  %v9084_v49 = vpop.f32.mrb[183].mxu0 }
 0x7b8   : > { %v8214_v51 = vadd.f32 %v8150_v15, %v19051_v14  ;;  %v8151_v5 = vmul.f32 %v9275_v12, %v18032_v10 }
 0x7ba   : > { %8278 = vst [vmem:[%s18044_s16 + $0xc8] sm:$0xff] %v8214_v51  ;;  %v8215_v0 = vadd.f32 %v8151_v5, %v19051_v14 }
 0x7bb   : > { %v7974_v13 = vpop.f32.mrb[184].mxu0 }
 0x7bc   : > { %8279 = vst [vmem:[%s18044_s16 + $0xd0] sm:$0xff] %v8215_v0  ;;  %v9276_v3 = vadd.f32 %v18029_v38, %v7974_v13  ;;  %v9087_v48 = vpop.f32.mrb[185].mxu0 }
 0x7bd   : > { %v7977_v52 = vpop.f32.mrb[186].mxu0 }
 0x7be   : > { %v8152_v27 = vmul.f32 %v9276_v3, %v18032_v10  ;;  %v9277_v42 = vadd.f32 %v18029_v38, %v7977_v52  ;;  %v9088_v60 = vpop.f32.mrb[187].mxu0 }
 0x7c0   : > { %v8216_v17 = vadd.f32 %v8152_v27, %v19051_v14  ;;  %v8153_v39 = vmul.f32 %v9277_v42, %v18032_v10 }
 0x7c2   : > { %8280 = vst [vmem:[%s18044_s16 + $0xd8] sm:$0xff] %v8216_v17  ;;  %v8217_v57 = vadd.f32 %v8153_v39, %v19051_v14 }
 0x7c3   : > { %v7982_v40 = vpop.f32.mrb[188].mxu0 }
 0x7c4   : > { %8281 = vst [vmem:[%s18044_s16 + $0xe0] sm:$0xff] %v8217_v57  ;;  %v9278_v32 = vadd.f32 %v18029_v38, %v7982_v40  ;;  %v9091_v21 = vpop.f32.mrb[189].mxu0 }
 0x7c5   : > { %v7985_v55 = vpop.f32.mrb[190].mxu0 }
 0x7c6   : > { %v8154_v2 = vmul.f32 %v9278_v32, %v18032_v10  ;;  %v9279_v31 = vadd.f32 %v18029_v38, %v7985_v55  ;;  %v9092_v7 = vpop.f32.mrb[191].mxu0 }
 0x7c8   : > { %v8218_v29 = vadd.f32 %v8154_v2, %v19051_v14  ;;  %v8155_v19 = vmul.f32 %v9279_v31, %v18032_v10 }
 0x7ca   : > { %8282 = vst [vmem:[%s18044_s16 + $0xe8] sm:$0xff] %v8218_v29  ;;  %v8219_v26 = vadd.f32 %v8155_v19, %v19051_v14 }
 0x7cb   : > { %v7990_v33 = vpop.f32.mrb[192].mxu0 }
 0x7cc   : > { %8283 = vst [vmem:[%s18044_s16 + $0xf0] sm:$0xff] %v8219_v26  ;;  %v9280_v9 = vadd.f32 %v18029_v38, %v7990_v33  ;;  %v9095_v47 = vpop.f32.mrb[193].mxu0 }
 0x7cd   : > { %v7993_v24 = vpop.f32.mrb[194].mxu0 }
 0x7ce   : > { %v8156_v20 = vmul.f32 %v9280_v9, %v18032_v10  ;;  %v9281_v16 = vadd.f32 %v18029_v38, %v7993_v24  ;;  %v9096_v34 = vpop.f32.mrb[195].mxu0 }
 0x7d0   : > { %v8220_v59 = vadd.f32 %v8156_v20, %v19051_v14  ;;  %v8157_v30 = vmul.f32 %v9281_v16, %v18032_v10 }
 0x7d2   : > { %8284 = vst [vmem:[%s18044_s16 + $0xf8] sm:$0xff] %v8220_v59  ;;  %v8221_v62 = vadd.f32 %v8157_v30, %v19051_v14 }
 0x7d3   : > { %v7998_v46 = vpop.f32.mrb[196].mxu0 }
 0x7d4   : > { %8285 = vst [vmem:[%s18044_s16 + $0x100] sm:$0xff] %v8221_v62  ;;  %v9282_v37 = vadd.f32 %v18029_v38, %v7998_v46  ;;  %v9099_v54 = vpop.f32.mrb[197].mxu0 }
 0x7d5   : > { %v8001_v6 = vpop.f32.mrb[198].mxu0 }
 0x7d6   : > { %v8158_v41 = vmul.f32 %v9282_v37, %v18032_v10  ;;  %v9283_v23 = vadd.f32 %v18029_v38, %v8001_v6  ;;  %v9100_v50 = vpop.f32.mrb[199].mxu0 }
 0x7d8   : > { %v8222_v45 = vadd.f32 %v8158_v41, %v19051_v14  ;;  %v8159_v28 = vmul.f32 %v9283_v23, %v18032_v10 }
 0x7da   : > { %8286 = vst [vmem:[%s18044_s16 + $0x108] sm:$0xff] %v8222_v45  ;;  %v8223_v63 = vadd.f32 %v8159_v28, %v19051_v14 }
 0x7db   : > { %v8006_v8 = vpop.f32.mrb[200].mxu0 }
 0x7dc   : > { %8287 = vst [vmem:[%s18044_s16 + $0x110] sm:$0xff] %v8223_v63  ;;  %v9284_v18 = vadd.f32 %v18029_v38, %v8006_v8  ;;  %v9103_v61 = vpop.f32.mrb[201].mxu0 }
 0x7dd   : > { %v8009_v4 = vpop.f32.mrb[202].mxu0 }
 0x7de   : > { %v8160_v44 = vmul.f32 %v9284_v18, %v18032_v10  ;;  %v9285_v56 = vadd.f32 %v18029_v38, %v8009_v4  ;;  %v9104_v11 = vpop.f32.mrb[203].mxu0 }
 0x7e0   : > { %v8224_v1 = vadd.f32 %v8160_v44, %v19051_v14  ;;  %v8161_v25 = vmul.f32 %v9285_v56, %v18032_v10 }
 0x7e2   : > { %8288 = vst [vmem:[%s18044_s16 + $0x118] sm:$0xff] %v8224_v1  ;;  %v8225_v43 = vadd.f32 %v8161_v25, %v19051_v14 }
 0x7e3   : > { %v8014_v53 = vpop.f32.mrb[204].mxu0 }
 0x7e4   : > { %8289 = vst [vmem:[%s18044_s16 + $0x120] sm:$0xff] %v8225_v43  ;;  %v9286_v35 = vadd.f32 %v18029_v38, %v8014_v53  ;;  %v9107_v36 = vpop.f32.mrb[205].mxu0 }
 0x7e5   : > { %v8017_v58 = vpop.f32.mrb[206].mxu0 }
 0x7e6   : > { %v8162_v22 = vmul.f32 %v9286_v35, %v18032_v10  ;;  %v9287_v15 = vadd.f32 %v18029_v38, %v8017_v58  ;;  %v9108_v12 = vpop.f32.mrb[207].mxu0 }
 0x7e8   : > { %v8226_v49 = vadd.f32 %v8162_v22, %v19051_v14  ;;  %v8163_v51 = vmul.f32 %v9287_v15, %v18032_v10 }
 0x7ea   : > { %8290 = vst [vmem:[%s18044_s16 + $0x128] sm:$0xff] %v8226_v49  ;;  %v8227_v5 = vadd.f32 %v8163_v51, %v19051_v14 }
 0x7eb   : > { %v8022_v0 = vpop.f32.mrb[208].mxu0 }
 0x7ec   : > { %8291 = vst [vmem:[%s18044_s16 + $0x130] sm:$0xff] %v8227_v5  ;;  %v9288_v13 = vadd.f32 %v18029_v38, %v8022_v0  ;;  %v9111_v3 = vpop.f32.mrb[209].mxu0 }
 0x7ed   : > { %v8025_v48 = vpop.f32.mrb[210].mxu0 }
 0x7ee   : > { %v8164_v52 = vmul.f32 %v9288_v13, %v18032_v10  ;;  %v9289_v27 = vadd.f32 %v18029_v38, %v8025_v48  ;;  %v9112_v42 = vpop.f32.mrb[211].mxu0 }
 0x7f0   : > { %v8228_v60 = vadd.f32 %v8164_v52, %v19051_v14  ;;  %v8165_v17 = vmul.f32 %v9289_v27, %v18032_v10 }
 0x7f2   : > { %8292 = vst [vmem:[%s18044_s16 + $0x138] sm:$0xff] %v8228_v60  ;;  %v8229_v39 = vadd.f32 %v8165_v17, %v19051_v14 }
 0x7f3   : > { %v8030_v57 = vpop.f32.mrb[212].mxu0 }
 0x7f4   : > { %8293 = vst [vmem:[%s18044_s16 + $0x140] sm:$0xff] %v8229_v39  ;;  %v9290_v40 = vadd.f32 %v18029_v38, %v8030_v57  ;;  %v9115_v32 = vpop.f32.mrb[213].mxu0 }
 0x7f5   : > { %v8033_v21 = vpop.f32.mrb[214].mxu0 }
 0x7f6   : > { %v8166_v55 = vmul.f32 %v9290_v40, %v18032_v10  ;;  %v9291_v2 = vadd.f32 %v18029_v38, %v8033_v21  ;;  %v9116_v31 = vpop.f32.mrb[215].mxu0 }
 0x7f8   : > { %v8230_v7 = vadd.f32 %v8166_v55, %v19051_v14  ;;  %v8167_v29 = vmul.f32 %v9291_v2, %v18032_v10 }
 0x7fa   : > { %8294 = vst [vmem:[%s18044_s16 + $0x148] sm:$0xff] %v8230_v7  ;;  %v8231_v19 = vadd.f32 %v8167_v29, %v19051_v14 }
 0x7fb   : > { %v8038_v26 = vpop.f32.mrb[216].mxu0 }
 0x7fc   : > { %8295 = vst [vmem:[%s18044_s16 + $0x150] sm:$0xff] %v8231_v19  ;;  %v9292_v33 = vadd.f32 %v18029_v38, %v8038_v26  ;;  %v9119_v9 = vpop.f32.mrb[217].mxu0 }
 0x7fd   : > { %v8041_v47 = vpop.f32.mrb[218].mxu0 }
 0x7fe   : > { %v8168_v24 = vmul.f32 %v9292_v33, %v18032_v10  ;;  %v9293_v20 = vadd.f32 %v18029_v38, %v8041_v47  ;;  %v9120_v16 = vpop.f32.mrb[219].mxu0 }
 0x800   : > { %v8232_v34 = vadd.f32 %v8168_v24, %v19051_v14  ;;  %v8169_v59 = vmul.f32 %v9293_v20, %v18032_v10 }
 0x802   : > { %8296 = vst [vmem:[%s18044_s16 + $0x158] sm:$0xff] %v8232_v34  ;;  %v8233_v30 = vadd.f32 %v8169_v59, %v19051_v14 }
 0x803   : > { %v8046_v62 = vpop.f32.mrb[220].mxu0 }
 0x804   : > { %8297 = vst [vmem:[%s18044_s16 + $0x160] sm:$0xff] %v8233_v30  ;;  %v9294_v46 = vadd.f32 %v18029_v38, %v8046_v62  ;;  %v9123_v37 = vpop.f32.mrb[221].mxu0 }
 0x805   : > { %v8049_v54 = vpop.f32.mrb[222].mxu0 }
 0x806   : > { %v8170_v6 = vmul.f32 %v9294_v46, %v18032_v10  ;;  %v9295_v41 = vadd.f32 %v18029_v38, %v8049_v54  ;;  %v9124_v23 = vpop.f32.mrb[223].mxu0 }
 0x808   : > { %v8234_v50 = vadd.f32 %v8170_v6, %v19051_v14  ;;  %v8171_v45 = vmul.f32 %v9295_v41, %v18032_v10 }
 0x80a   : > { %8298 = vst [vmem:[%s18044_s16 + $0x168] sm:$0xff] %v8234_v50  ;;  %v8235_v28 = vadd.f32 %v8171_v45, %v19051_v14 }
 0x80b   : > { %v8054_v63 = vpop.f32.mrb[224].mxu0 }
 0x80c   : > { %8299 = vst [vmem:[%s18044_s16 + $0x170] sm:$0xff] %v8235_v28  ;;  %v9296_v8 = vadd.f32 %v18029_v38, %v8054_v63  ;;  %v9127_v18 = vpop.f32.mrb[225].mxu0 }
 0x80d   : > { %v8057_v61 = vpop.f32.mrb[226].mxu0 }
 0x80e   : > { %v8172_v4 = vmul.f32 %v9296_v8, %v18032_v10  ;;  %v9297_v44 = vadd.f32 %v18029_v38, %v8057_v61  ;;  %v9128_v56 = vpop.f32.mrb[227].mxu0 }
 0x810   : > { %v8236_v11 = vadd.f32 %v8172_v4, %v19051_v14  ;;  %v8173_v1 = vmul.f32 %v9297_v44, %v18032_v10 }
 0x812   : > { %8300 = vst [vmem:[%s18044_s16 + $0x178] sm:$0xff] %v8236_v11  ;;  %v8237_v25 = vadd.f32 %v8173_v1, %v19051_v14 }
 0x813   : > { %v8062_v43 = vpop.f32.mrb[228].mxu0 }
 0x814   : > { %8301 = vst [vmem:[%s18044_s16 + $0x180] sm:$0xff] %v8237_v25  ;;  %v9298_v53 = vadd.f32 %v18029_v38, %v8062_v43  ;;  %v9131_v35 = vpop.f32.mrb[229].mxu0 }
 0x815   : > { %v8065_v36 = vpop.f32.mrb[230].mxu0 }
 0x816   : > { %v8174_v58 = vmul.f32 %v9298_v53, %v18032_v10  ;;  %v9299_v22 = vadd.f32 %v18029_v38, %v8065_v36  ;;  %v9132_v15 = vpop.f32.mrb[231].mxu0 }
 0x818   : > { %v8238_v12 = vadd.f32 %v8174_v58, %v19051_v14  ;;  %v8175_v49 = vmul.f32 %v9299_v22, %v18032_v10 }
 0x81a   : > { %8302 = vst [vmem:[%s18044_s16 + $0x188] sm:$0xff] %v8238_v12  ;;  %v8239_v51 = vadd.f32 %v8175_v49, %v19051_v14 }
 0x81b   : > { %v8070_v5 = vpop.f32.mrb[232].mxu0 }
 0x81c   : > { %8303 = vst [vmem:[%s18044_s16 + $0x190] sm:$0xff] %v8239_v51  ;;  %v9300_v0 = vadd.f32 %v18029_v38, %v8070_v5  ;;  %v9135_v13 = vpop.f32.mrb[233].mxu0 }
 0x81d   : > { %v8073_v3 = vpop.f32.mrb[234].mxu0 }
 0x81e   : > { %v8176_v48 = vmul.f32 %v9300_v0, %v18032_v10  ;;  %v9301_v52 = vadd.f32 %v18029_v38, %v8073_v3  ;;  %v9136_v27 = vpop.f32.mrb[235].mxu0 }
 0x820   : > { %v8240_v42 = vadd.f32 %v8176_v48, %v19051_v14  ;;  %v8177_v60 = vmul.f32 %v9301_v52, %v18032_v10 }
 0x822   : > { %8304 = vst [vmem:[%s18044_s16 + $0x198] sm:$0xff] %v8240_v42  ;;  %v8241_v17 = vadd.f32 %v8177_v60, %v19051_v14 }
 0x823   : > { %v8078_v39 = vpop.f32.mrb[236].mxu0 }
 0x824   : > { %8305 = vst [vmem:[%s18044_s16 + $0x1a0] sm:$0xff] %v8241_v17  ;;  %v9302_v57 = vadd.f32 %v18029_v38, %v8078_v39  ;;  %v9139_v40 = vpop.f32.mrb[237].mxu0 }
 0x825   : > { %v8081_v32 = vpop.f32.mrb[238].mxu0 }
 0x826   : > { %v8178_v21 = vmul.f32 %v9302_v57, %v18032_v10  ;;  %v9303_v55 = vadd.f32 %v18029_v38, %v8081_v32  ;;  %v9140_v2 = vpop.f32.mrb[239].mxu0 }
 0x828   : > { %v8242_v31 = vadd.f32 %v8178_v21, %v19051_v14  ;;  %v8179_v7 = vmul.f32 %v9303_v55, %v18032_v10 }
 0x82a   : > { %8306 = vst [vmem:[%s18044_s16 + $0x1a8] sm:$0xff] %v8242_v31  ;;  %v8243_v29 = vadd.f32 %v8179_v7, %v19051_v14 }
 0x82b   : > { %v8086_v19 = vpop.f32.mrb[240].mxu0 }
 0x82c   : > { %8307 = vst [vmem:[%s18044_s16 + $0x1b0] sm:$0xff] %v8243_v29  ;;  %v9304_v26 = vadd.f32 %v18029_v38, %v8086_v19  ;;  %v9143_v33 = vpop.f32.mrb[241].mxu0 }
 0x82d   : > { %v8089_v9 = vpop.f32.mrb[242].mxu0 }
 0x82e   : > { %v8180_v47 = vmul.f32 %v9304_v26, %v18032_v10  ;;  %v9305_v24 = vadd.f32 %v18029_v38, %v8089_v9  ;;  %v9144_v20 = vpop.f32.mrb[243].mxu0 }
 0x830   : > { %v8244_v16 = vadd.f32 %v8180_v47, %v19051_v14  ;;  %v8181_v34 = vmul.f32 %v9305_v24, %v18032_v10 }
 0x832   : > { %8308 = vst [vmem:[%s18044_s16 + $0x1b8] sm:$0xff] %v8244_v16  ;;  %v8245_v59 = vadd.f32 %v8181_v34, %v19051_v14 }
 0x833   : > { %v8094_v30 = vpop.f32.mrb[244].mxu0 }
 0x834   : > { %8309 = vst [vmem:[%s18044_s16 + $0x1c0] sm:$0xff] %v8245_v59  ;;  %v9306_v62 = vadd.f32 %v18029_v38, %v8094_v30  ;;  %v9147_v46 = vpop.f32.mrb[245].mxu0 }
 0x835   : > { %v8097_v37 = vpop.f32.mrb[246].mxu0 }
 0x836   : > { %v8182_v54 = vmul.f32 %v9306_v62, %v18032_v10  ;;  %v9307_v6 = vadd.f32 %v18029_v38, %v8097_v37  ;;  %v9148_v41 = vpop.f32.mrb[247].mxu0 }
 0x838   : > { %v8246_v23 = vadd.f32 %v8182_v54, %v19051_v14  ;;  %v8183_v50 = vmul.f32 %v9307_v6, %v18032_v10 }
 0x83a   : > { %8310 = vst [vmem:[%s18044_s16 + $0x1c8] sm:$0xff] %v8246_v23  ;;  %v8247_v45 = vadd.f32 %v8183_v50, %v19051_v14 }
 0x83b   : > { %v8102_v28 = vpop.f32.mrb[248].mxu0 }
 0x83c   : > { %8311 = vst [vmem:[%s18044_s16 + $0x1d0] sm:$0xff] %v8247_v45  ;;  %v9308_v63 = vadd.f32 %v18029_v38, %v8102_v28  ;;  %v9151_v8 = vpop.f32.mrb[249].mxu0 }
 0x83d   : > { %v8105_v18 = vpop.f32.mrb[250].mxu0 }
 0x83e   : > { %v8184_v61 = vmul.f32 %v9308_v63, %v18032_v10  ;;  %v9309_v4 = vadd.f32 %v18029_v38, %v8105_v18  ;;  %v9152_v44 = vpop.f32.mrb[251].mxu0 }
 0x840   : > { %v8248_v56 = vadd.f32 %v8184_v61, %v19051_v14  ;;  %v8185_v11 = vmul.f32 %v9309_v4, %v18032_v10 }
 0x842   : > { %8312 = vst [vmem:[%s18044_s16 + $0x1d8] sm:$0xff] %v8248_v56  ;;  %v8249_v1 = vadd.f32 %v8185_v11, %v19051_v14 }
 0x843   : > { %v8110_v25 = vpop.f32.mrb[252].mxu0 }
 0x844   : > { %8313 = vst [vmem:[%s18044_s16 + $0x1e0] sm:$0xff] %v8249_v1  ;;  %v9310_v43 = vadd.f32 %v18029_v38, %v8110_v25  ;;  %v9155_v53 = vpop.f32.mrb[253].mxu0 }
 0x845   : > { %v8113_v35 = vpop.f32.mrb[254].mxu0 }
 0x846   : > { %v8186_v36 = vmul.f32 %v9310_v43, %v18032_v10  ;;  %v9311_v58 = vadd.f32 %v18029_v38, %v8113_v35  ;;  %v9156_v22 = vpop.f32.mrb[255].mxu0 }
 0x848   : > { %v8250_v15 = vadd.f32 %v8186_v36, %v19051_v14  ;;  %v8187_v12 = vmul.f32 %v9311_v58, %v18032_v10 }
 0x84a   : > { %8314 = vst [vmem:[%s18044_s16 + $0x1e8] sm:$0xff] %v8250_v15  ;;  %v8251_v49 = vadd.f32 %v8187_v12, %v19051_v14 }
 0x84b   : > { %v8118_v51 = vpop.f32.mrb[0].mxu0 }
 0x84c   : > { %8315 = vst [vmem:[%s18044_s16 + $0x1f0] sm:$0xff] %v8251_v49  ;;  %v9312_v5 = vadd.f32 %v18029_v38, %v8118_v51  ;;  %v9159_v0 = vpop.f32.mrb[1].mxu0 }
 0x84d   : > { %v8121_v13 = vpop.f32.mrb[2].mxu0 }
 0x84e   : > { %v8188_v3 = vmul.f32 %v9312_v5, %v18032_v10  ;;  %v9160_v48 = vpop.f32.mrb[3].mxu0 }
 0x850   : > { %v8252_v52 = vadd.f32 %v8188_v3, %v19051_v14 }
 0x852   : > { %8316 = vst [vmem:[%s18044_s16 + $0x1f8] sm:$0xff] %v8252_v52 }
 0x853 PF: > { %s23_s21 = sadd.s32 1, %s10613_s21   ;;  %s19053_s19 = smov %s10609_s20 }
 0x854   : > { %p20_p2 = scmp.ge.s32.totalorder %s23_s21, 4   ;;  %s19054_s20 = smov %s19056_s23 }
 0x856   :  { %22 = sbr.rel (!%p20_p2) target bundleno = 2 (0x2), region = 109 }
 0x85d   :  { %8347 = vsyncpa [#allocation3], 1 }
 0x85e   :  { %8349 = vsyncpa [#allocation3 + $0x1], 1 }

</bundles_post_ra>
